<compile_context>
chip_gen: v6e
topology: v6e:2x2x1
jax: 0.10.0
libtpu: 0.0.40
codegen_flags: <defaults>
</compile_context>

<pallas_src>
from functools import partial

import jax
import jax.numpy as jnp
from jax import lax
from jax.experimental import pallas as pl
from jax.experimental.pallas import tpu as pltpu


CPAD = 128          # lane-dense channel padding
_BN_EPS = 1e-5
_NEG_SLOPE = 0.01   # PyTorch LeakyReLU default


# ----------------------------------------------------------------------------
# Fused encoder kernel (one batch element per grid step)
# ----------------------------------------------------------------------------
def _encoder_kernel(x_ref, w_ref, b_ref,
                    o1_ref, o2_ref, o3_ref, o4_ref, o5_ref,
                    pad_ref, *, neg_slope):
    C = x_ref.shape[-1]          # 128
    PADL = 8                     # 8-aligned sublane offset of the interior (W axis)

    def conv_bn_lrelu(x, layer):
        h, w = x.shape[0], x.shape[1]
        # ZeroPad2d(1) in VMEM scratch: zero the buffer, drop the activation at
        # an aligned offset; the 1-wide zero border comes from the zeroed buffer.
        pad_ref[...] = jnp.zeros_like(pad_ref)
        pad_ref[1:h + 1, PADL:PADL + w, :] = x
        # im2col: 9 shifted (h, w, C) views -> (h*w, 9*C), one MXU matmul.
        taps = [
            pad_ref[di:di + h, PADL - 1 + dj:PADL - 1 + dj + w, :].reshape(h * w, C)
            for di in range(3) for dj in range(3)
        ]
        patch = jnp.concatenate(taps, axis=-1).astype(jnp.bfloat16)
        acc = jnp.dot(patch, w_ref[layer], preferred_element_type=jnp.float32)
        y = acc + b_ref[layer]                    # folded conv-bias + BN shift (f32)
        y = jnp.maximum(y, neg_slope * y)         # LeakyReLU, f32 epilogue
        return y.reshape(h, w, C)

    def maxpool2(x):
        h, w = x.shape[0], x.shape[1]
        xr = x.reshape(h // 2, 2, w // 2, 2, C)
        return jnp.maximum(
            jnp.maximum(xr[:, 0, :, 0, :], xr[:, 0, :, 1, :]),
            jnp.maximum(xr[:, 1, :, 0, :], xr[:, 1, :, 1, :]),
        )

    x = x_ref[0]                                  # (H, W, C) for this batch element
    layer = 0
    for blk, o_ref in enumerate((o1_ref, o2_ref, o3_ref, o4_ref, o5_ref)):
        if blk > 0:                               # blocks 2..5 pool first
            x = maxpool2(x)
        x = conv_bn_lrelu(x, layer); layer += 1
        x = conv_bn_lrelu(x, layer); layer += 1
        o_ref[...] = x[None].astype(o_ref.dtype)  # lane-dense (…,128) store


# ----------------------------------------------------------------------------
# Wrapper
# ----------------------------------------------------------------------------
def unet_encoder_forward(params, x_nchw):
    w_stack, b_stack = params["w"], params["b"]
    block_channels = params["block_channels"]
    n, cin, h, w = x_nchw.shape
    n_layers = w_stack.shape[0]

    # One boundary transpose + channel pad (lane-dense layout for the kernel).
    x = jnp.transpose(x_nchw, (0, 2, 3, 1))
    x = jnp.pad(x, ((0, 0), (0, 0), (0, 0), (0, CPAD - cin)))

    out_shapes, out_specs = [], []
    hh = h
    for blk in range(5):
        if blk > 0:
            hh //= 2
        out_shapes.append(jax.ShapeDtypeStruct((n, hh, hh, CPAD), jnp.float32))
        out_specs.append(pl.BlockSpec((1, hh, hh, CPAD), lambda i: (i, 0, 0, 0)))

    kernel = partial(_encoder_kernel, neg_slope=_NEG_SLOPE)
    outs = pl.pallas_call(
        kernel,
        out_shape=tuple(out_shapes),
        grid=(n,),
        in_specs=[
            pl.BlockSpec((1, h, w, CPAD), lambda i: (i, 0, 0, 0)),
            pl.BlockSpec((n_layers, 9 * CPAD, CPAD), lambda i: (0, 0, 0)),
            pl.BlockSpec((n_layers, 1, CPAD), lambda i: (0, 0, 0)),
        ],
        out_specs=tuple(out_specs),
        scratch_shapes=[pltpu.VMEM((h + 2, w + 16, CPAD), jnp.float32)],
        compiler_params=pltpu.CompilerParams(
            dimension_semantics=("parallel",),
            vmem_limit_bytes=32 * 1024 * 1024,
        ),
    )(x, w_stack, b_stack)

    # Back to PyTorch-style NCHW, dropping the channel padding (boundary only).
    return tuple(
        jnp.transpose(o[..., :c], (0, 3, 1, 2))
        for o, c in zip(outs, block_channels)
    )


# ----------------------------------------------------------------------------
# Deterministic parameter construction (Conv2d + eval-mode BatchNorm2d folded)
# ----------------------------------------------------------------------------
def _make_conv_bn_params(key, cin, cout):
    kw, kb, kg, kbeta, km, kv = jax.random.split(key, 6)
    w = jax.random.normal(kw, (cout, cin, 3, 3), jnp.float32) / jnp.sqrt(9.0 * cin)
    conv_b = 0.05 * jax.random.normal(kb, (cout,), jnp.float32)
    gamma = 1.0 + 0.1 * jax.random.normal(kg, (cout,), jnp.float32)
    beta = 0.1 * jax.random.normal(kbeta, (cout,), jnp.float32)
    r_mean = 0.1 * jax.random.normal(km, (cout,), jnp.float32)
    r_var = jax.random.uniform(kv, (cout,), jnp.float32, 0.5, 1.5)

    scale = gamma / jnp.sqrt(r_var + _BN_EPS)        # BN (eval) scale
    bias = beta + (conv_b - r_mean) * scale          # BN shift incl. conv bias
    w_folded = w * scale[:, None, None, None]        # fold BN scale into weights

    # Tap-major (3,3,cin,cout), zero-padded to the lane-dense (9,128,128) slab.
    w_t = jnp.transpose(w_folded, (2, 3, 1, 0)).reshape(9, cin, cout)
    w_pad = jnp.zeros((9, CPAD, CPAD), jnp.float32).at[:, :cin, :cout].set(w_t)
    b_pad = jnp.zeros((CPAD,), jnp.float32).at[:cout].set(bias)

    raw = dict(w=w, b=conv_b, gamma=gamma, beta=beta, mean=r_mean, var=r_var)
    return w_pad.reshape(9 * CPAD, CPAD), b_pad, raw


def build_unet_encoder_params(key, in_channels, num_features):
    f = list(num_features)
    layer_io = [
        (in_channels, f[0]), (f[0], f[0]),
        (f[0], f[1]), (f[1], f[1]),
        (f[1], f[2]), (f[2], f[2]),
        (f[2], f[3]), (f[3], f[3]),
        (f[3], f[4]), (f[4], f[4]),
    ]
    ws, bs, raws = [], [], []
    for cin, cout in layer_io:
        key, sub = jax.random.split(key)
        w_pad, b_pad, raw = _make_conv_bn_params(sub, cin, cout)
        ws.append(w_pad); bs.append(b_pad); raws.append(raw)
    return {
        "w": jnp.stack(ws).astype(jnp.bfloat16),      # (10, 9*128, 128) bf16
        "b": jnp.stack(bs)[:, None, :],               # (10, 1, 128) f32
        "block_channels": (f[0], f[1], f[2], f[3], f[4]),
        "raw": raws,                                  # for the pure-JAX reference
    }


# ----------------------------------------------------------------------------
# Pure-JAX (XLA) reference of the same eval-mode forward pass
# ----------------------------------------------------------------------------
def unet_encoder_reference(params, x_nchw):
    raw = params["raw"]
    x = x_nchw
    outs = []
    li = 0
    for blk in range(5):
        if blk > 0:
            n, c, h, w = x.shape
            x = x.reshape(n, c, h // 2, 2, w // 2, 2).max(axis=(3, 5))
        for _ in range(2):
            p = raw[li]; li += 1
            y = lax.conv_general_dilated(
                x, p["w"], window_strides=(1, 1), padding=((1, 1), (1, 1)),
                dimension_numbers=("NCHW", "OIHW", "NCHW"),
                precision=lax.Precision.HIGHEST)
            y = y + p["b"][None, :, None, None]
            y = (y - p["mean"][None, :, None, None]) * (
                p["gamma"] / jnp.sqrt(p["var"] + _BN_EPS))[None, :, None, None] \
                + p["beta"][None, :, None, None]
            x = jnp.maximum(y, _NEG_SLOPE * y)
        outs.append(x)
    return tuple(outs)


# ----------------------------------------------------------------------------
if __name__ == "__main__":
    batch, in_ch, spatial = 2, 4, 16
    num_features = [8, 16, 16, 32, 32]

    key = jax.random.PRNGKey(0)
    x = jax.random.normal(key, (batch, in_ch, spatial, spatial), jnp.float32)
    params = build_unet_encoder_params(jax.random.PRNGKey(42), in_ch, num_features)

    fwd = jax.jit(lambda inp: unet_encoder_forward(params, inp))
    outs = jax.block_until_ready(fwd(x))

    refs = unet_encoder_reference(params, x)
    for i, (o, r) in enumerate(zip(outs, refs)):
        expect = (batch, num_features[i], spatial // (2 ** i), spatial // (2 ** i))
        assert o.shape == expect, (o.shape, expect)
        assert bool(jnp.all(jnp.isfinite(o)))
        err = float(jnp.max(jnp.abs(o - r)))
        scale = float(jnp.max(jnp.abs(r)))
        # bf16 MXU inputs with f32 accumulation vs f32 reference: loose tolerance.
        assert err <= 0.1 + 0.1 * scale, (i, err, scale)

    print("KERNEL_OK")
</pallas_src>

<mosaic_0001>
module attributes {stable_mosaic.version = 11 : i64} {
  func.func @_encoder_kernel(%arg0: i32, %arg1: memref<1x16x16x128xf32, #tpu.memory_space<vmem>>, %arg2: memref<10x1152x128xbf16, #tpu.memory_space<vmem>>, %arg3: memref<10x1x128xf32, #tpu.memory_space<vmem>>, %arg4: memref<1x16x16x128xf32, #tpu.memory_space<vmem>>, %arg5: memref<1x8x8x128xf32, #tpu.memory_space<vmem>>, %arg6: memref<1x4x4x128xf32, #tpu.memory_space<vmem>>, %arg7: memref<1x2x2x128xf32, #tpu.memory_space<vmem>>, %arg8: memref<1x1x1x128xf32, #tpu.memory_space<vmem>>, %arg9: memref<18x32x128xf32, #tpu.memory_space<vmem>>) attributes {dimension_semantics = [#tpu.dimension_semantics<parallel>], iteration_bounds = array<i64: 2>, scalar_prefetch = 0 : i64, scratch_operands = 1 : i64, tpu.core_type = #tpu.core_type<tc>, window_params = [{transform_indices = @transform_0, window_bounds = array<i64: 1, 16, 16, 128>}, {pipeline_mode = #tpu.pipeline_mode<synchronous>, transform_indices = @transform_1, window_bounds = array<i64: 10, 1152, 128>}, {pipeline_mode = #tpu.pipeline_mode<synchronous>, transform_indices = @transform_2, window_bounds = array<i64: 10, 1, 128>}, {transform_indices = @transform_3, window_bounds = array<i64: 1, 16, 16, 128>}, {transform_indices = @transform_4, window_bounds = array<i64: 1, 8, 8, 128>}, {transform_indices = @transform_5, window_bounds = array<i64: 1, 4, 4, 128>}, {transform_indices = @transform_6, window_bounds = array<i64: 1, 2, 2, 128>}, {transform_indices = @transform_7, window_bounds = array<i64: 1, 1, 1, 128>}]} {
    %c0 = arith.constant 0 : index
    %c0_0 = arith.constant 0 : index
    %c0_1 = arith.constant 0 : index
    %c0_2 = arith.constant 0 : index
    %0 = vector.load %arg1[%c0, %c0_0, %c0_1, %c0_2] : memref<1x16x16x128xf32, #tpu.memory_space<vmem>>, vector<1x16x16x128xf32>
    %1 = vector.shape_cast %0 : vector<1x16x16x128xf32> to vector<16x16x128xf32>
    %cst = arith.constant 0.000000e+00 : f32
    %2 = vector.broadcast %cst : f32 to vector<18x32x128xf32>
    %c0_3 = arith.constant 0 : index
    %c0_4 = arith.constant 0 : index
    %c0_5 = arith.constant 0 : index
    %3 = vector.load %arg9[%c0_3, %c0_4, %c0_5] : memref<18x32x128xf32, #tpu.memory_space<vmem>>, vector<18x32x128xf32>
    tpu.vector_store %arg9[%c0_3, %c0_4, %c0_5], %2 {strides = array<i32>} : memref<18x32x128xf32, #tpu.memory_space<vmem>>, vector<18x32x128xf32>,
    %c1 = arith.constant 1 : index
    %c8 = arith.constant 8 : index
    %c0_6 = arith.constant 0 : index
    %4 = vector.load %arg9[%c1, %c8, %c0_6] : memref<18x32x128xf32, #tpu.memory_space<vmem>>, vector<16x16x128xf32>
    tpu.vector_store %arg9[%c1, %c8, %c0_6], %1 {strides = array<i32>} : memref<18x32x128xf32, #tpu.memory_space<vmem>>, vector<16x16x128xf32>,
    %c0_7 = arith.constant 0 : index
    %c7 = arith.constant 7 : index
    %c0_8 = arith.constant 0 : index
    %5 = vector.load %arg9[%c0_7, %c7, %c0_8] : memref<18x32x128xf32, #tpu.memory_space<vmem>>, vector<16x16x128xf32>
    %6 = vector.shape_cast %5 : vector<16x16x128xf32> to vector<256x128xf32>
    %c0_9 = arith.constant 0 : index
    %c8_10 = arith.constant 8 : index
    %c0_11 = arith.constant 0 : index
    %7 = vector.load %arg9[%c0_9, %c8_10, %c0_11] : memref<18x32x128xf32, #tpu.memory_space<vmem>>, vector<16x16x128xf32>
    %8 = vector.shape_cast %7 : vector<16x16x128xf32> to vector<256x128xf32>
    %c0_12 = arith.constant 0 : index
    %c9 = arith.constant 9 : index
    %c0_13 = arith.constant 0 : index
    %9 = vector.load %arg9[%c0_12, %c9, %c0_13] : memref<18x32x128xf32, #tpu.memory_space<vmem>>, vector<16x16x128xf32>
    %10 = vector.shape_cast %9 : vector<16x16x128xf32> to vector<256x128xf32>
    %c1_14 = arith.constant 1 : index
    %c7_15 = arith.constant 7 : index
    %c0_16 = arith.constant 0 : index
    %11 = vector.load %arg9[%c1_14, %c7_15, %c0_16] : memref<18x32x128xf32, #tpu.memory_space<vmem>>, vector<16x16x128xf32>
    %12 = vector.shape_cast %11 : vector<16x16x128xf32> to vector<256x128xf32>
    %c1_17 = arith.constant 1 : index
    %c8_18 = arith.constant 8 : index
    %c0_19 = arith.constant 0 : index
    %13 = vector.load %arg9[%c1_17, %c8_18, %c0_19] : memref<18x32x128xf32, #tpu.memory_space<vmem>>, vector<16x16x128xf32>
    %14 = vector.shape_cast %13 : vector<16x16x128xf32> to vector<256x128xf32>
    %c1_20 = arith.constant 1 : index
    %c9_21 = arith.constant 9 : index
    %c0_22 = arith.constant 0 : index
    %15 = vector.load %arg9[%c1_20, %c9_21, %c0_22] : memref<18x32x128xf32, #tpu.memory_space<vmem>>, vector<16x16x128xf32>
    %16 = vector.shape_cast %15 : vector<16x16x128xf32> to vector<256x128xf32>
    %c2 = arith.constant 2 : index
    %c7_23 = arith.constant 7 : index
    %c0_24 = arith.constant 0 : index
    %17 = vector.load %arg9[%c2, %c7_23, %c0_24] : memref<18x32x128xf32, #tpu.memory_space<vmem>>, vector<16x16x128xf32>
    %18 = vector.shape_cast %17 : vector<16x16x128xf32> to vector<256x128xf32>
    %c2_25 = arith.constant 2 : index
    %c8_26 = arith.constant 8 : index
    %c0_27 = arith.constant 0 : index
    %19 = vector.load %arg9[%c2_25, %c8_26, %c0_27] : memref<18x32x128xf32, #tpu.memory_space<vmem>>, vector<16x16x128xf32>
    %20 = vector.shape_cast %19 : vector<16x16x128xf32> to vector<256x128xf32>
    %c2_28 = arith.constant 2 : index
    %c9_29 = arith.constant 9 : index
    %c0_30 = arith.constant 0 : index
    %21 = vector.load %arg9[%c2_28, %c9_29, %c0_30] : memref<18x32x128xf32, #tpu.memory_space<vmem>>, vector<16x16x128xf32>
    %22 = vector.shape_cast %21 : vector<16x16x128xf32> to vector<256x128xf32>
    %23 = tpu.concatenate %6, %8, %10, %12, %14, %16, %18, %20, %22 in 1 : vector<256x128xf32>, vector<256x128xf32>, vector<256x128xf32>, vector<256x128xf32>, vector<256x128xf32>, vector<256x128xf32>, vector<256x128xf32>, vector<256x128xf32>, vector<256x128xf32> -> vector<256x1152xf32>
    %24 = arith.truncf %23 : vector<256x1152xf32> to vector<256x1152xbf16>
    %c0_31 = arith.constant 0 : index
    %c0_32 = arith.constant 0 : index
    %c0_33 = arith.constant 0 : index
    %25 = vector.load %arg2[%c0_31, %c0_32, %c0_33] : memref<10x1152x128xbf16, #tpu.memory_space<vmem>>, vector<1x1152x128xbf16>
    %26 = vector.shape_cast %25 : vector<1x1152x128xbf16> to vector<1152x128xbf16>
    %cst_34 = arith.constant dense<0.000000e+00> : vector<256x128xf32>
    %27 = tpu.matmul %24, %26, %cst_34 {dimension_numbers = #tpu.dot_dimension_numbers<[1], [0], [0], [1], [0, 0, 1, 1], [], []>} : vector<256x1152xbf16>, vector<1152x128xbf16>, vector<256x128xf32> -> vector<256x128xf32>
    %c0_35 = arith.constant 0 : index
    %c0_36 = arith.constant 0 : index
    %c0_37 = arith.constant 0 : index
    %28 = vector.load %arg3[%c0_35, %c0_36, %c0_37] : memref<10x1x128xf32, #tpu.memory_space<vmem>>, vector<1x1x128xf32>
    %29 = vector.shape_cast %28 : vector<1x1x128xf32> to vector<1x128xf32>
    %30 = vector.broadcast %29 : vector<1x128xf32> to vector<256x128xf32>
    %31 = arith.addf %27, %30 : vector<256x128xf32>
    %cst_38 = arith.constant 0.00999999977 : f32
    %32 = vector.broadcast %cst_38 : f32 to vector<256x128xf32>
    %33 = arith.mulf %32, %31 : vector<256x128xf32>
    %34 = arith.maximumf %31, %33 : vector<256x128xf32>
    %35 = vector.shape_cast %34 : vector<256x128xf32> to vector<16x16x128xf32>
    %cst_39 = arith.constant 0.000000e+00 : f32
    %36 = vector.broadcast %cst_39 : f32 to vector<18x32x128xf32>
    %c0_40 = arith.constant 0 : index
    %c0_41 = arith.constant 0 : index
    %c0_42 = arith.constant 0 : index
    %37 = vector.load %arg9[%c0_40, %c0_41, %c0_42] : memref<18x32x128xf32, #tpu.memory_space<vmem>>, vector<18x32x128xf32>
    tpu.vector_store %arg9[%c0_40, %c0_41, %c0_42], %36 {strides = array<i32>} : memref<18x32x128xf32, #tpu.memory_space<vmem>>, vector<18x32x128xf32>,
    %c1_43 = arith.constant 1 : index
    %c8_44 = arith.constant 8 : index
    %c0_45 = arith.constant 0 : index
    %38 = vector.load %arg9[%c1_43, %c8_44, %c0_45] : memref<18x32x128xf32, #tpu.memory_space<vmem>>, vector<16x16x128xf32>
    tpu.vector_store %arg9[%c1_43, %c8_44, %c0_45], %35 {strides = array<i32>} : memref<18x32x128xf32, #tpu.memory_space<vmem>>, vector<16x16x128xf32>,
    %c0_46 = arith.constant 0 : index
    %c7_47 = arith.constant 7 : index
    %c0_48 = arith.constant 0 : index
    %39 = vector.load %arg9[%c0_46, %c7_47, %c0_48] : memref<18x32x128xf32, #tpu.memory_space<vmem>>, vector<16x16x128xf32>
    %40 = vector.shape_cast %39 : vector<16x16x128xf32> to vector<256x128xf32>
    %c0_49 = arith.constant 0 : index
    %c8_50 = arith.constant 8 : index
    %c0_51 = arith.constant 0 : index
    %41 = vector.load %arg9[%c0_49, %c8_50, %c0_51] : memref<18x32x128xf32, #tpu.memory_space<vmem>>, vector<16x16x128xf32>
    %42 = vector.shape_cast %41 : vector<16x16x128xf32> to vector<256x128xf32>
    %c0_52 = arith.constant 0 : index
    %c9_53 = arith.constant 9 : index
    %c0_54 = arith.constant 0 : index
    %43 = vector.load %arg9[%c0_52, %c9_53, %c0_54] : memref<18x32x128xf32, #tpu.memory_space<vmem>>, vector<16x16x128xf32>
    %44 = vector.shape_cast %43 : vector<16x16x128xf32> to vector<256x128xf32>
    %c1_55 = arith.constant 1 : index
    %c7_56 = arith.constant 7 : index
    %c0_57 = arith.constant 0 : index
    %45 = vector.load %arg9[%c1_55, %c7_56, %c0_57] : memref<18x32x128xf32, #tpu.memory_space<vmem>>, vector<16x16x128xf32>
    %46 = vector.shape_cast %45 : vector<16x16x128xf32> to vector<256x128xf32>
    %c1_58 = arith.constant 1 : index
    %c8_59 = arith.constant 8 : index
    %c0_60 = arith.constant 0 : index
    %47 = vector.load %arg9[%c1_58, %c8_59, %c0_60] : memref<18x32x128xf32, #tpu.memory_space<vmem>>, vector<16x16x128xf32>
    %48 = vector.shape_cast %47 : vector<16x16x128xf32> to vector<256x128xf32>
    %c1_61 = arith.constant 1 : index
    %c9_62 = arith.constant 9 : index
    %c0_63 = arith.constant 0 : index
    %49 = vector.load %arg9[%c1_61, %c9_62, %c0_63] : memref<18x32x128xf32, #tpu.memory_space<vmem>>, vector<16x16x128xf32>
    %50 = vector.shape_cast %49 : vector<16x16x128xf32> to vector<256x128xf32>
    %c2_64 = arith.constant 2 : index
    %c7_65 = arith.constant 7 : index
    %c0_66 = arith.constant 0 : index
    %51 = vector.load %arg9[%c2_64, %c7_65, %c0_66] : memref<18x32x128xf32, #tpu.memory_space<vmem>>, vector<16x16x128xf32>
    %52 = vector.shape_cast %51 : vector<16x16x128xf32> to vector<256x128xf32>
    %c2_67 = arith.constant 2 : index
    %c8_68 = arith.constant 8 : index
    %c0_69 = arith.constant 0 : index
    %53 = vector.load %arg9[%c2_67, %c8_68, %c0_69] : memref<18x32x128xf32, #tpu.memory_space<vmem>>, vector<16x16x128xf32>
    %54 = vector.shape_cast %53 : vector<16x16x128xf32> to vector<256x128xf32>
    %c2_70 = arith.constant 2 : index
    %c9_71 = arith.constant 9 : index
    %c0_72 = arith.constant 0 : index
    %55 = vector.load %arg9[%c2_70, %c9_71, %c0_72] : memref<18x32x128xf32, #tpu.memory_space<vmem>>, vector<16x16x128xf32>
    %56 = vector.shape_cast %55 : vector<16x16x128xf32> to vector<256x128xf32>
    %57 = tpu.concatenate %40, %42, %44, %46, %48, %50, %52, %54, %56 in 1 : vector<256x128xf32>, vector<256x128xf32>, vector<256x128xf32>, vector<256x128xf32>, vector<256x128xf32>, vector<256x128xf32>, vector<256x128xf32>, vector<256x128xf32>, vector<256x128xf32> -> vector<256x1152xf32>
    %58 = arith.truncf %57 : vector<256x1152xf32> to vector<256x1152xbf16>
    %c1_73 = arith.constant 1 : index
    %c0_74 = arith.constant 0 : index
    %c0_75 = arith.constant 0 : index
    %59 = vector.load %arg2[%c1_73, %c0_74, %c0_75] : memref<10x1152x128xbf16, #tpu.memory_space<vmem>>, vector<1x1152x128xbf16>
    %60 = vector.shape_cast %59 : vector<1x1152x128xbf16> to vector<1152x128xbf16>
    %cst_76 = arith.constant dense<0.000000e+00> : vector<256x128xf32>
    %61 = tpu.matmul %58, %60, %cst_76 {dimension_numbers = #tpu.dot_dimension_numbers<[1], [0], [0], [1], [0, 0, 1, 1], [], []>} : vector<256x1152xbf16>, vector<1152x128xbf16>, vector<256x128xf32> -> vector<256x128xf32>
    %c1_77 = arith.constant 1 : index
    %c0_78 = arith.constant 0 : index
    %c0_79 = arith.constant 0 : index
    %62 = vector.load %arg3[%c1_77, %c0_78, %c0_79] : memref<10x1x128xf32, #tpu.memory_space<vmem>>, vector<1x1x128xf32>
    %63 = vector.shape_cast %62 : vector<1x1x128xf32> to vector<1x128xf32>
    %64 = vector.broadcast %63 : vector<1x128xf32> to vector<256x128xf32>
    %65 = arith.addf %61, %64 : vector<256x128xf32>
    %cst_80 = arith.constant 0.00999999977 : f32
    %66 = vector.broadcast %cst_80 : f32 to vector<256x128xf32>
    %67 = arith.mulf %66, %65 : vector<256x128xf32>
    %68 = arith.maximumf %65, %67 : vector<256x128xf32>
    %69 = vector.shape_cast %68 : vector<256x128xf32> to vector<16x16x128xf32>
    %70 = vector.shape_cast %69 : vector<16x16x128xf32> to vector<1x16x16x128xf32>
    %c0_81 = arith.constant 0 : index
    %c0_82 = arith.constant 0 : index
    %c0_83 = arith.constant 0 : index
    %c0_84 = arith.constant 0 : index
    %71 = vector.load %arg4[%c0_81, %c0_82, %c0_83, %c0_84] : memref<1x16x16x128xf32, #tpu.memory_space<vmem>>, vector<1x16x16x128xf32>
    tpu.vector_store %arg4[%c0_81, %c0_82, %c0_83, %c0_84], %70 {strides = array<i32>} : memref<1x16x16x128xf32, #tpu.memory_space<vmem>>, vector<1x16x16x128xf32>,
    %72 = vector.shape_cast %69 : vector<16x16x128xf32> to vector<8x2x8x2x128xf32>
    %73 = vector.extract_strided_slice %72 {offsets = [0, 0, 0, 0, 0], sizes = [8, 1, 8, 1, 128], strides = [1, 1, 1, 1, 1]} : vector<8x2x8x2x128xf32> to vector<8x1x8x1x128xf32>
    %74 = vector.shape_cast %73 : vector<8x1x8x1x128xf32> to vector<8x8x128xf32>
    %75 = vector.extract_strided_slice %72 {offsets = [0, 0, 0, 1, 0], sizes = [8, 1, 8, 1, 128], strides = [1, 1, 1, 1, 1]} : vector<8x2x8x2x128xf32> to vector<8x1x8x1x128xf32>
    %76 = vector.shape_cast %75 : vector<8x1x8x1x128xf32> to vector<8x8x128xf32>
    %77 = arith.maximumf %74, %76 : vector<8x8x128xf32>
    %78 = vector.extract_strided_slice %72 {offsets = [0, 1, 0, 0, 0], sizes = [8, 1, 8, 1, 128], strides = [1, 1, 1, 1, 1]} : vector<8x2x8x2x128xf32> to vector<8x1x8x1x128xf32>
    %79 = vector.shape_cast %78 : vector<8x1x8x1x128xf32> to vector<8x8x128xf32>
    %80 = vector.extract_strided_slice %72 {offsets = [0, 1, 0, 1, 0], sizes = [8, 1, 8, 1, 128], strides = [1, 1, 1, 1, 1]} : vector<8x2x8x2x128xf32> to vector<8x1x8x1x128xf32>
    %81 = vector.shape_cast %80 : vector<8x1x8x1x128xf32> to vector<8x8x128xf32>
    %82 = arith.maximumf %79, %81 : vector<8x8x128xf32>
    %83 = arith.maximumf %77, %82 : vector<8x8x128xf32>
    %cst_85 = arith.constant 0.000000e+00 : f32
    %84 = vector.broadcast %cst_85 : f32 to vector<18x32x128xf32>
    %c0_86 = arith.constant 0 : index
    %c0_87 = arith.constant 0 : index
    %c0_88 = arith.constant 0 : index
    %85 = vector.load %arg9[%c0_86, %c0_87, %c0_88] : memref<18x32x128xf32, #tpu.memory_space<vmem>>, vector<18x32x128xf32>
    tpu.vector_store %arg9[%c0_86, %c0_87, %c0_88], %84 {strides = array<i32>} : memref<18x32x128xf32, #tpu.memory_space<vmem>>, vector<18x32x128xf32>,
    %c1_89 = arith.constant 1 : index
    %c8_90 = arith.constant 8 : index
    %c0_91 = arith.constant 0 : index
    %86 = vector.load %arg9[%c1_89, %c8_90, %c0_91] : memref<18x32x128xf32, #tpu.memory_space<vmem>>, vector<8x8x128xf32>
    tpu.vector_store %arg9[%c1_89, %c8_90, %c0_91], %83 {strides = array<i32>} : memref<18x32x128xf32, #tpu.memory_space<vmem>>, vector<8x8x128xf32>,
    %c0_92 = arith.constant 0 : index
    %c7_93 = arith.constant 7 : index
    %c0_94 = arith.constant 0 : index
    %87 = vector.load %arg9[%c0_92, %c7_93, %c0_94] : memref<18x32x128xf32, #tpu.memory_space<vmem>>, vector<8x8x128xf32>
    %88 = vector.shape_cast %87 : vector<8x8x128xf32> to vector<64x128xf32>
    %c0_95 = arith.constant 0 : index
    %c8_96 = arith.constant 8 : index
    %c0_97 = arith.constant 0 : index
    %89 = vector.load %arg9[%c0_95, %c8_96, %c0_97] : memref<18x32x128xf32, #tpu.memory_space<vmem>>, vector<8x8x128xf32>
    %90 = vector.shape_cast %89 : vector<8x8x128xf32> to vector<64x128xf32>
    %c0_98 = arith.constant 0 : index
    %c9_99 = arith.constant 9 : index
    %c0_100 = arith.constant 0 : index
    %91 = vector.load %arg9[%c0_98, %c9_99, %c0_100] : memref<18x32x128xf32, #tpu.memory_space<vmem>>, vector<8x8x128xf32>
    %92 = vector.shape_cast %91 : vector<8x8x128xf32> to vector<64x128xf32>
    %c1_101 = arith.constant 1 : index
    %c7_102 = arith.constant 7 : index
    %c0_103 = arith.constant 0 : index
    %93 = vector.load %arg9[%c1_101, %c7_102, %c0_103] : memref<18x32x128xf32, #tpu.memory_space<vmem>>, vector<8x8x128xf32>
    %94 = vector.shape_cast %93 : vector<8x8x128xf32> to vector<64x128xf32>
    %c1_104 = arith.constant 1 : index
    %c8_105 = arith.constant 8 : index
    %c0_106 = arith.constant 0 : index
    %95 = vector.load %arg9[%c1_104, %c8_105, %c0_106] : memref<18x32x128xf32, #tpu.memory_space<vmem>>, vector<8x8x128xf32>
    %96 = vector.shape_cast %95 : vector<8x8x128xf32> to vector<64x128xf32>
    %c1_107 = arith.constant 1 : index
    %c9_108 = arith.constant 9 : index
    %c0_109 = arith.constant 0 : index
    %97 = vector.load %arg9[%c1_107, %c9_108, %c0_109] : memref<18x32x128xf32, #tpu.memory_space<vmem>>, vector<8x8x128xf32>
    %98 = vector.shape_cast %97 : vector<8x8x128xf32> to vector<64x128xf32>
    %c2_110 = arith.constant 2 : index
    %c7_111 = arith.constant 7 : index
    %c0_112 = arith.constant 0 : index
    %99 = vector.load %arg9[%c2_110, %c7_111, %c0_112] : memref<18x32x128xf32, #tpu.memory_space<vmem>>, vector<8x8x128xf32>
    %100 = vector.shape_cast %99 : vector<8x8x128xf32> to vector<64x128xf32>
    %c2_113 = arith.constant 2 : index
    %c8_114 = arith.constant 8 : index
    %c0_115 = arith.constant 0 : index
    %101 = vector.load %arg9[%c2_113, %c8_114, %c0_115] : memref<18x32x128xf32, #tpu.memory_space<vmem>>, vector<8x8x128xf32>
    %102 = vector.shape_cast %101 : vector<8x8x128xf32> to vector<64x128xf32>
    %c2_116 = arith.constant 2 : index
    %c9_117 = arith.constant 9 : index
    %c0_118 = arith.constant 0 : index
    %103 = vector.load %arg9[%c2_116, %c9_117, %c0_118] : memref<18x32x128xf32, #tpu.memory_space<vmem>>, vector<8x8x128xf32>
    %104 = vector.shape_cast %103 : vector<8x8x128xf32> to vector<64x128xf32>
    %105 = tpu.concatenate %88, %90, %92, %94, %96, %98, %100, %102, %104 in 1 : vector<64x128xf32>, vector<64x128xf32>, vector<64x128xf32>, vector<64x128xf32>, vector<64x128xf32>, vector<64x128xf32>, vector<64x128xf32>, vector<64x128xf32>, vector<64x128xf32> -> vector<64x1152xf32>
    %106 = arith.truncf %105 : vector<64x1152xf32> to vector<64x1152xbf16>
    %c2_119 = arith.constant 2 : index
    %c0_120 = arith.constant 0 : index
    %c0_121 = arith.constant 0 : index
    %107 = vector.load %arg2[%c2_119, %c0_120, %c0_121] : memref<10x1152x128xbf16, #tpu.memory_space<vmem>>, vector<1x1152x128xbf16>
    %108 = vector.shape_cast %107 : vector<1x1152x128xbf16> to vector<1152x128xbf16>
    %cst_122 = arith.constant dense<0.000000e+00> : vector<64x128xf32>
    %109 = tpu.matmul %106, %108, %cst_122 {dimension_numbers = #tpu.dot_dimension_numbers<[1], [0], [0], [1], [0, 0, 1, 1], [], []>} : vector<64x1152xbf16>, vector<1152x128xbf16>, vector<64x128xf32> -> vector<64x128xf32>
    %c2_123 = arith.constant 2 : index
    %c0_124 = arith.constant 0 : index
    %c0_125 = arith.constant 0 : index
    %110 = vector.load %arg3[%c2_123, %c0_124, %c0_125] : memref<10x1x128xf32, #tpu.memory_space<vmem>>, vector<1x1x128xf32>
    %111 = vector.shape_cast %110 : vector<1x1x128xf32> to vector<1x128xf32>
    %112 = vector.broadcast %111 : vector<1x128xf32> to vector<64x128xf32>
    %113 = arith.addf %109, %112 : vector<64x128xf32>
    %cst_126 = arith.constant 0.00999999977 : f32
    %114 = vector.broadcast %cst_126 : f32 to vector<64x128xf32>
    %115 = arith.mulf %114, %113 : vector<64x128xf32>
    %116 = arith.maximumf %113, %115 : vector<64x128xf32>
    %117 = vector.shape_cast %116 : vector<64x128xf32> to vector<8x8x128xf32>
    %cst_127 = arith.constant 0.000000e+00 : f32
    %118 = vector.broadcast %cst_127 : f32 to vector<18x32x128xf32>
    %c0_128 = arith.constant 0 : index
    %c0_129 = arith.constant 0 : index
    %c0_130 = arith.constant 0 : index
    %119 = vector.load %arg9[%c0_128, %c0_129, %c0_130] : memref<18x32x128xf32, #tpu.memory_space<vmem>>, vector<18x32x128xf32>
    tpu.vector_store %arg9[%c0_128, %c0_129, %c0_130], %118 {strides = array<i32>} : memref<18x32x128xf32, #tpu.memory_space<vmem>>, vector<18x32x128xf32>,
    %c1_131 = arith.constant 1 : index
    %c8_132 = arith.constant 8 : index
    %c0_133 = arith.constant 0 : index
    %120 = vector.load %arg9[%c1_131, %c8_132, %c0_133] : memref<18x32x128xf32, #tpu.memory_space<vmem>>, vector<8x8x128xf32>
    tpu.vector_store %arg9[%c1_131, %c8_132, %c0_133], %117 {strides = array<i32>} : memref<18x32x128xf32, #tpu.memory_space<vmem>>, vector<8x8x128xf32>,
    %c0_134 = arith.constant 0 : index
    %c7_135 = arith.constant 7 : index
    %c0_136 = arith.constant 0 : index
    %121 = vector.load %arg9[%c0_134, %c7_135, %c0_136] : memref<18x32x128xf32, #tpu.memory_space<vmem>>, vector<8x8x128xf32>
    %122 = vector.shape_cast %121 : vector<8x8x128xf32> to vector<64x128xf32>
    %c0_137 = arith.constant 0 : index
    %c8_138 = arith.constant 8 : index
    %c0_139 = arith.constant 0 : index
    %123 = vector.load %arg9[%c0_137, %c8_138, %c0_139] : memref<18x32x128xf32, #tpu.memory_space<vmem>>, vector<8x8x128xf32>
    %124 = vector.shape_cast %123 : vector<8x8x128xf32> to vector<64x128xf32>
    %c0_140 = arith.constant 0 : index
    %c9_141 = arith.constant 9 : index
    %c0_142 = arith.constant 0 : index
    %125 = vector.load %arg9[%c0_140, %c9_141, %c0_142] : memref<18x32x128xf32, #tpu.memory_space<vmem>>, vector<8x8x128xf32>
    %126 = vector.shape_cast %125 : vector<8x8x128xf32> to vector<64x128xf32>
    %c1_143 = arith.constant 1 : index
    %c7_144 = arith.constant 7 : index
    %c0_145 = arith.constant 0 : index
    %127 = vector.load %arg9[%c1_143, %c7_144, %c0_145] : memref<18x32x128xf32, #tpu.memory_space<vmem>>, vector<8x8x128xf32>
    %128 = vector.shape_cast %127 : vector<8x8x128xf32> to vector<64x128xf32>
    %c1_146 = arith.constant 1 : index
    %c8_147 = arith.constant 8 : index
    %c0_148 = arith.constant 0 : index
    %129 = vector.load %arg9[%c1_146, %c8_147, %c0_148] : memref<18x32x128xf32, #tpu.memory_space<vmem>>, vector<8x8x128xf32>
    %130 = vector.shape_cast %129 : vector<8x8x128xf32> to vector<64x128xf32>
    %c1_149 = arith.constant 1 : index
    %c9_150 = arith.constant 9 : index
    %c0_151 = arith.constant 0 : index
    %131 = vector.load %arg9[%c1_149, %c9_150, %c0_151] : memref<18x32x128xf32, #tpu.memory_space<vmem>>, vector<8x8x128xf32>
    %132 = vector.shape_cast %131 : vector<8x8x128xf32> to vector<64x128xf32>
    %c2_152 = arith.constant 2 : index
    %c7_153 = arith.constant 7 : index
    %c0_154 = arith.constant 0 : index
    %133 = vector.load %arg9[%c2_152, %c7_153, %c0_154] : memref<18x32x128xf32, #tpu.memory_space<vmem>>, vector<8x8x128xf32>
    %134 = vector.shape_cast %133 : vector<8x8x128xf32> to vector<64x128xf32>
    %c2_155 = arith.constant 2 : index
    %c8_156 = arith.constant 8 : index
    %c0_157 = arith.constant 0 : index
    %135 = vector.load %arg9[%c2_155, %c8_156, %c0_157] : memref<18x32x128xf32, #tpu.memory_space<vmem>>, vector<8x8x128xf32>
    %136 = vector.shape_cast %135 : vector<8x8x128xf32> to vector<64x128xf32>
    %c2_158 = arith.constant 2 : index
    %c9_159 = arith.constant 9 : index
    %c0_160 = arith.constant 0 : index
    %137 = vector.load %arg9[%c2_158, %c9_159, %c0_160] : memref<18x32x128xf32, #tpu.memory_space<vmem>>, vector<8x8x128xf32>
    %138 = vector.shape_cast %137 : vector<8x8x128xf32> to vector<64x128xf32>
    %139 = tpu.concatenate %122, %124, %126, %128, %130, %132, %134, %136, %138 in 1 : vector<64x128xf32>, vector<64x128xf32>, vector<64x128xf32>, vector<64x128xf32>, vector<64x128xf32>, vector<64x128xf32>, vector<64x128xf32>, vector<64x128xf32>, vector<64x128xf32> -> vector<64x1152xf32>
    %140 = arith.truncf %139 : vector<64x1152xf32> to vector<64x1152xbf16>
    %c3 = arith.constant 3 : index
    %c0_161 = arith.constant 0 : index
    %c0_162 = arith.constant 0 : index
    %141 = vector.load %arg2[%c3, %c0_161, %c0_162] : memref<10x1152x128xbf16, #tpu.memory_space<vmem>>, vector<1x1152x128xbf16>
    %142 = vector.shape_cast %141 : vector<1x1152x128xbf16> to vector<1152x128xbf16>
    %cst_163 = arith.constant dense<0.000000e+00> : vector<64x128xf32>
    %143 = tpu.matmul %140, %142, %cst_163 {dimension_numbers = #tpu.dot_dimension_numbers<[1], [0], [0], [1], [0, 0, 1, 1], [], []>} : vector<64x1152xbf16>, vector<1152x128xbf16>, vector<64x128xf32> -> vector<64x128xf32>
    %c3_164 = arith.constant 3 : index
    %c0_165 = arith.constant 0 : index
    %c0_166 = arith.constant 0 : index
    %144 = vector.load %arg3[%c3_164, %c0_165, %c0_166] : memref<10x1x128xf32, #tpu.memory_space<vmem>>, vector<1x1x128xf32>
    %145 = vector.shape_cast %144 : vector<1x1x128xf32> to vector<1x128xf32>
    %146 = vector.broadcast %145 : vector<1x128xf32> to vector<64x128xf32>
    %147 = arith.addf %143, %146 : vector<64x128xf32>
    %cst_167 = arith.constant 0.00999999977 : f32
    %148 = vector.broadcast %cst_167 : f32 to vector<64x128xf32>
    %149 = arith.mulf %148, %147 : vector<64x128xf32>
    %150 = arith.maximumf %147, %149 : vector<64x128xf32>
    %151 = vector.shape_cast %150 : vector<64x128xf32> to vector<8x8x128xf32>
    %152 = vector.shape_cast %151 : vector<8x8x128xf32> to vector<1x8x8x128xf32>
    %c0_168 = arith.constant 0 : index
    %c0_169 = arith.constant 0 : index
    %c0_170 = arith.constant 0 : index
    %c0_171 = arith.constant 0 : index
    %153 = vector.load %arg5[%c0_168, %c0_169, %c0_170, %c0_171] : memref<1x8x8x128xf32, #tpu.memory_space<vmem>>, vector<1x8x8x128xf32>
    tpu.vector_store %arg5[%c0_168, %c0_169, %c0_170, %c0_171], %152 {strides = array<i32>} : memref<1x8x8x128xf32, #tpu.memory_space<vmem>>, vector<1x8x8x128xf32>,
    %154 = vector.shape_cast %151 : vector<8x8x128xf32> to vector<4x2x4x2x128xf32>
    %155 = vector.extract_strided_slice %154 {offsets = [0, 0, 0, 0, 0], sizes = [4, 1, 4, 1, 128], strides = [1, 1, 1, 1, 1]} : vector<4x2x4x2x128xf32> to vector<4x1x4x1x128xf32>
    %156 = vector.shape_cast %155 : vector<4x1x4x1x128xf32> to vector<4x4x128xf32>
    %157 = vector.extract_strided_slice %154 {offsets = [0, 0, 0, 1, 0], sizes = [4, 1, 4, 1, 128], strides = [1, 1, 1, 1, 1]} : vector<4x2x4x2x128xf32> to vector<4x1x4x1x128xf32>
    %158 = vector.shape_cast %157 : vector<4x1x4x1x128xf32> to vector<4x4x128xf32>
    %159 = arith.maximumf %156, %158 : vector<4x4x128xf32>
    %160 = vector.extract_strided_slice %154 {offsets = [0, 1, 0, 0, 0], sizes = [4, 1, 4, 1, 128], strides = [1, 1, 1, 1, 1]} : vector<4x2x4x2x128xf32> to vector<4x1x4x1x128xf32>
    %161 = vector.shape_cast %160 : vector<4x1x4x1x128xf32> to vector<4x4x128xf32>
    %162 = vector.extract_strided_slice %154 {offsets = [0, 1, 0, 1, 0], sizes = [4, 1, 4, 1, 128], strides = [1, 1, 1, 1, 1]} : vector<4x2x4x2x128xf32> to vector<4x1x4x1x128xf32>
    %163 = vector.shape_cast %162 : vector<4x1x4x1x128xf32> to vector<4x4x128xf32>
    %164 = arith.maximumf %161, %163 : vector<4x4x128xf32>
    %165 = arith.maximumf %159, %164 : vector<4x4x128xf32>
    %cst_172 = arith.constant 0.000000e+00 : f32
    %166 = vector.broadcast %cst_172 : f32 to vector<18x32x128xf32>
    %c0_173 = arith.constant 0 : index
    %c0_174 = arith.constant 0 : index
    %c0_175 = arith.constant 0 : index
    %167 = vector.load %arg9[%c0_173, %c0_174, %c0_175] : memref<18x32x128xf32, #tpu.memory_space<vmem>>, vector<18x32x128xf32>
    tpu.vector_store %arg9[%c0_173, %c0_174, %c0_175], %166 {strides = array<i32>} : memref<18x32x128xf32, #tpu.memory_space<vmem>>, vector<18x32x128xf32>,
    %c1_176 = arith.constant 1 : index
    %c8_177 = arith.constant 8 : index
    %c0_178 = arith.constant 0 : index
    %168 = vector.load %arg9[%c1_176, %c8_177, %c0_178] : memref<18x32x128xf32, #tpu.memory_space<vmem>>, vector<4x4x128xf32>
    tpu.vector_store %arg9[%c1_176, %c8_177, %c0_178], %165 {strides = array<i32>} : memref<18x32x128xf32, #tpu.memory_space<vmem>>, vector<4x4x128xf32>,
    %c0_179 = arith.constant 0 : index
    %c7_180 = arith.constant 7 : index
    %c0_181 = arith.constant 0 : index
    %169 = vector.load %arg9[%c0_179, %c7_180, %c0_181] : memref<18x32x128xf32, #tpu.memory_space<vmem>>, vector<4x4x128xf32>
    %170 = vector.shape_cast %169 : vector<4x4x128xf32> to vector<16x128xf32>
    %c0_182 = arith.constant 0 : index
    %c8_183 = arith.constant 8 : index
    %c0_184 = arith.constant 0 : index
    %171 = vector.load %arg9[%c0_182, %c8_183, %c0_184] : memref<18x32x128xf32, #tpu.memory_space<vmem>>, vector<4x4x128xf32>
    %172 = vector.shape_cast %171 : vector<4x4x128xf32> to vector<16x128xf32>
    %c0_185 = arith.constant 0 : index
    %c9_186 = arith.constant 9 : index
    %c0_187 = arith.constant 0 : index
    %173 = vector.load %arg9[%c0_185, %c9_186, %c0_187] : memref<18x32x128xf32, #tpu.memory_space<vmem>>, vector<4x4x128xf32>
    %174 = vector.shape_cast %173 : vector<4x4x128xf32> to vector<16x128xf32>
    %c1_188 = arith.constant 1 : index
    %c7_189 = arith.constant 7 : index
    %c0_190 = arith.constant 0 : index
    %175 = vector.load %arg9[%c1_188, %c7_189, %c0_190] : memref<18x32x128xf32, #tpu.memory_space<vmem>>, vector<4x4x128xf32>
    %176 = vector.shape_cast %175 : vector<4x4x128xf32> to vector<16x128xf32>
    %c1_191 = arith.constant 1 : index
    %c8_192 = arith.constant 8 : index
    %c0_193 = arith.constant 0 : index
    %177 = vector.load %arg9[%c1_191, %c8_192, %c0_193] : memref<18x32x128xf32, #tpu.memory_space<vmem>>, vector<4x4x128xf32>
    %178 = vector.shape_cast %177 : vector<4x4x128xf32> to vector<16x128xf32>
    %c1_194 = arith.constant 1 : index
    %c9_195 = arith.constant 9 : index
    %c0_196 = arith.constant 0 : index
    %179 = vector.load %arg9[%c1_194, %c9_195, %c0_196] : memref<18x32x128xf32, #tpu.memory_space<vmem>>, vector<4x4x128xf32>
    %180 = vector.shape_cast %179 : vector<4x4x128xf32> to vector<16x128xf32>
    %c2_197 = arith.constant 2 : index
    %c7_198 = arith.constant 7 : index
    %c0_199 = arith.constant 0 : index
    %181 = vector.load %arg9[%c2_197, %c7_198, %c0_199] : memref<18x32x128xf32, #tpu.memory_space<vmem>>, vector<4x4x128xf32>
    %182 = vector.shape_cast %181 : vector<4x4x128xf32> to vector<16x128xf32>
    %c2_200 = arith.constant 2 : index
    %c8_201 = arith.constant 8 : index
    %c0_202 = arith.constant 0 : index
    %183 = vector.load %arg9[%c2_200, %c8_201, %c0_202] : memref<18x32x128xf32, #tpu.memory_space<vmem>>, vector<4x4x128xf32>
    %184 = vector.shape_cast %183 : vector<4x4x128xf32> to vector<16x128xf32>
    %c2_203 = arith.constant 2 : index
    %c9_204 = arith.constant 9 : index
    %c0_205 = arith.constant 0 : index
    %185 = vector.load %arg9[%c2_203, %c9_204, %c0_205] : memref<18x32x128xf32, #tpu.memory_space<vmem>>, vector<4x4x128xf32>
    %186 = vector.shape_cast %185 : vector<4x4x128xf32> to vector<16x128xf32>
    %187 = tpu.concatenate %170, %172, %174, %176, %178, %180, %182, %184, %186 in 1 : vector<16x128xf32>, vector<16x128xf32>, vector<16x128xf32>, vector<16x128xf32>, vector<16x128xf32>, vector<16x128xf32>, vector<16x128xf32>, vector<16x128xf32>, vector<16x128xf32> -> vector<16x1152xf32>
    %188 = arith.truncf %187 : vector<16x1152xf32> to vector<16x1152xbf16>
    %c4 = arith.constant 4 : index
    %c0_206 = arith.constant 0 : index
    %c0_207 = arith.constant 0 : index
    %189 = vector.load %arg2[%c4, %c0_206, %c0_207] : memref<10x1152x128xbf16, #tpu.memory_space<vmem>>, vector<1x1152x128xbf16>
    %190 = vector.shape_cast %189 : vector<1x1152x128xbf16> to vector<1152x128xbf16>
    %cst_208 = arith.constant dense<0.000000e+00> : vector<16x128xf32>
    %191 = tpu.matmul %188, %190, %cst_208 {dimension_numbers = #tpu.dot_dimension_numbers<[1], [0], [0], [1], [0, 0, 1, 1], [], []>} : vector<16x1152xbf16>, vector<1152x128xbf16>, vector<16x128xf32> -> vector<16x128xf32>
    %c4_209 = arith.constant 4 : index
    %c0_210 = arith.constant 0 : index
    %c0_211 = arith.constant 0 : index
    %192 = vector.load %arg3[%c4_209, %c0_210, %c0_211] : memref<10x1x128xf32, #tpu.memory_space<vmem>>, vector<1x1x128xf32>
    %193 = vector.shape_cast %192 : vector<1x1x128xf32> to vector<1x128xf32>
    %194 = vector.broadcast %193 : vector<1x128xf32> to vector<16x128xf32>
    %195 = arith.addf %191, %194 : vector<16x128xf32>
    %cst_212 = arith.constant 0.00999999977 : f32
    %196 = vector.broadcast %cst_212 : f32 to vector<16x128xf32>
    %197 = arith.mulf %196, %195 : vector<16x128xf32>
    %198 = arith.maximumf %195, %197 : vector<16x128xf32>
    %199 = vector.shape_cast %198 : vector<16x128xf32> to vector<4x4x128xf32>
    %cst_213 = arith.constant 0.000000e+00 : f32
    %200 = vector.broadcast %cst_213 : f32 to vector<18x32x128xf32>
    %c0_214 = arith.constant 0 : index
    %c0_215 = arith.constant 0 : index
    %c0_216 = arith.constant 0 : index
    %201 = vector.load %arg9[%c0_214, %c0_215, %c0_216] : memref<18x32x128xf32, #tpu.memory_space<vmem>>, vector<18x32x128xf32>
    tpu.vector_store %arg9[%c0_214, %c0_215, %c0_216], %200 {strides = array<i32>} : memref<18x32x128xf32, #tpu.memory_space<vmem>>, vector<18x32x128xf32>,
    %c1_217 = arith.constant 1 : index
    %c8_218 = arith.constant 8 : index
    %c0_219 = arith.constant 0 : index
    %202 = vector.load %arg9[%c1_217, %c8_218, %c0_219] : memref<18x32x128xf32, #tpu.memory_space<vmem>>, vector<4x4x128xf32>
    tpu.vector_store %arg9[%c1_217, %c8_218, %c0_219], %199 {strides = array<i32>} : memref<18x32x128xf32, #tpu.memory_space<vmem>>, vector<4x4x128xf32>,
    %c0_220 = arith.constant 0 : index
    %c7_221 = arith.constant 7 : index
    %c0_222 = arith.constant 0 : index
    %203 = vector.load %arg9[%c0_220, %c7_221, %c0_222] : memref<18x32x128xf32, #tpu.memory_space<vmem>>, vector<4x4x128xf32>
    %204 = vector.shape_cast %203 : vector<4x4x128xf32> to vector<16x128xf32>
    %c0_223 = arith.constant 0 : index
    %c8_224 = arith.constant 8 : index
    %c0_225 = arith.constant 0 : index
    %205 = vector.load %arg9[%c0_223, %c8_224, %c0_225] : memref<18x32x128xf32, #tpu.memory_space<vmem>>, vector<4x4x128xf32>
    %206 = vector.shape_cast %205 : vector<4x4x128xf32> to vector<16x128xf32>
    %c0_226 = arith.constant 0 : index
    %c9_227 = arith.constant 9 : index
    %c0_228 = arith.constant 0 : index
    %207 = vector.load %arg9[%c0_226, %c9_227, %c0_228] : memref<18x32x128xf32, #tpu.memory_space<vmem>>, vector<4x4x128xf32>
    %208 = vector.shape_cast %207 : vector<4x4x128xf32> to vector<16x128xf32>
    %c1_229 = arith.constant 1 : index
    %c7_230 = arith.constant 7 : index
    %c0_231 = arith.constant 0 : index
    %209 = vector.load %arg9[%c1_229, %c7_230, %c0_231] : memref<18x32x128xf32, #tpu.memory_space<vmem>>, vector<4x4x128xf32>
    %210 = vector.shape_cast %209 : vector<4x4x128xf32> to vector<16x128xf32>
    %c1_232 = arith.constant 1 : index
    %c8_233 = arith.constant 8 : index
    %c0_234 = arith.constant 0 : index
    %211 = vector.load %arg9[%c1_232, %c8_233, %c0_234] : memref<18x32x128xf32, #tpu.memory_space<vmem>>, vector<4x4x128xf32>
    %212 = vector.shape_cast %211 : vector<4x4x128xf32> to vector<16x128xf32>
    %c1_235 = arith.constant 1 : index
    %c9_236 = arith.constant 9 : index
    %c0_237 = arith.constant 0 : index
    %213 = vector.load %arg9[%c1_235, %c9_236, %c0_237] : memref<18x32x128xf32, #tpu.memory_space<vmem>>, vector<4x4x128xf32>
    %214 = vector.shape_cast %213 : vector<4x4x128xf32> to vector<16x128xf32>
    %c2_238 = arith.constant 2 : index
    %c7_239 = arith.constant 7 : index
    %c0_240 = arith.constant 0 : index
    %215 = vector.load %arg9[%c2_238, %c7_239, %c0_240] : memref<18x32x128xf32, #tpu.memory_space<vmem>>, vector<4x4x128xf32>
    %216 = vector.shape_cast %215 : vector<4x4x128xf32> to vector<16x128xf32>
    %c2_241 = arith.constant 2 : index
    %c8_242 = arith.constant 8 : index
    %c0_243 = arith.constant 0 : index
    %217 = vector.load %arg9[%c2_241, %c8_242, %c0_243] : memref<18x32x128xf32, #tpu.memory_space<vmem>>, vector<4x4x128xf32>
    %218 = vector.shape_cast %217 : vector<4x4x128xf32> to vector<16x128xf32>
    %c2_244 = arith.constant 2 : index
    %c9_245 = arith.constant 9 : index
    %c0_246 = arith.constant 0 : index
    %219 = vector.load %arg9[%c2_244, %c9_245, %c0_246] : memref<18x32x128xf32, #tpu.memory_space<vmem>>, vector<4x4x128xf32>
    %220 = vector.shape_cast %219 : vector<4x4x128xf32> to vector<16x128xf32>
    %221 = tpu.concatenate %204, %206, %208, %210, %212, %214, %216, %218, %220 in 1 : vector<16x128xf32>, vector<16x128xf32>, vector<16x128xf32>, vector<16x128xf32>, vector<16x128xf32>, vector<16x128xf32>, vector<16x128xf32>, vector<16x128xf32>, vector<16x128xf32> -> vector<16x1152xf32>
    %222 = arith.truncf %221 : vector<16x1152xf32> to vector<16x1152xbf16>
    %c5 = arith.constant 5 : index
    %c0_247 = arith.constant 0 : index
    %c0_248 = arith.constant 0 : index
    %223 = vector.load %arg2[%c5, %c0_247, %c0_248] : memref<10x1152x128xbf16, #tpu.memory_space<vmem>>, vector<1x1152x128xbf16>
    %224 = vector.shape_cast %223 : vector<1x1152x128xbf16> to vector<1152x128xbf16>
    %cst_249 = arith.constant dense<0.000000e+00> : vector<16x128xf32>
    %225 = tpu.matmul %222, %224, %cst_249 {dimension_numbers = #tpu.dot_dimension_numbers<[1], [0], [0], [1], [0, 0, 1, 1], [], []>} : vector<16x1152xbf16>, vector<1152x128xbf16>, vector<16x128xf32> -> vector<16x128xf32>
    %c5_250 = arith.constant 5 : index
    %c0_251 = arith.constant 0 : index
    %c0_252 = arith.constant 0 : index
    %226 = vector.load %arg3[%c5_250, %c0_251, %c0_252] : memref<10x1x128xf32, #tpu.memory_space<vmem>>, vector<1x1x128xf32>
    %227 = vector.shape_cast %226 : vector<1x1x128xf32> to vector<1x128xf32>
    %228 = vector.broadcast %227 : vector<1x128xf32> to vector<16x128xf32>
    %229 = arith.addf %225, %228 : vector<16x128xf32>
    %cst_253 = arith.constant 0.00999999977 : f32
    %230 = vector.broadcast %cst_253 : f32 to vector<16x128xf32>
    %231 = arith.mulf %230, %229 : vector<16x128xf32>
    %232 = arith.maximumf %229, %231 : vector<16x128xf32>
    %233 = vector.shape_cast %232 : vector<16x128xf32> to vector<4x4x128xf32>
    %234 = vector.shape_cast %233 : vector<4x4x128xf32> to vector<1x4x4x128xf32>
    %c0_254 = arith.constant 0 : index
    %c0_255 = arith.constant 0 : index
    %c0_256 = arith.constant 0 : index
    %c0_257 = arith.constant 0 : index
    %235 = vector.load %arg6[%c0_254, %c0_255, %c0_256, %c0_257] : memref<1x4x4x128xf32, #tpu.memory_space<vmem>>, vector<1x4x4x128xf32>
    tpu.vector_store %arg6[%c0_254, %c0_255, %c0_256, %c0_257], %234 {strides = array<i32>} : memref<1x4x4x128xf32, #tpu.memory_space<vmem>>, vector<1x4x4x128xf32>,
    %236 = vector.shape_cast %233 : vector<4x4x128xf32> to vector<2x2x2x2x128xf32>
    %237 = vector.extract_strided_slice %236 {offsets = [0, 0, 0, 0, 0], sizes = [2, 1, 2, 1, 128], strides = [1, 1, 1, 1, 1]} : vector<2x2x2x2x128xf32> to vector<2x1x2x1x128xf32>
    %238 = vector.shape_cast %237 : vector<2x1x2x1x128xf32> to vector<2x2x128xf32>
    %239 = vector.extract_strided_slice %236 {offsets = [0, 0, 0, 1, 0], sizes = [2, 1, 2, 1, 128], strides = [1, 1, 1, 1, 1]} : vector<2x2x2x2x128xf32> to vector<2x1x2x1x128xf32>
    %240 = vector.shape_cast %239 : vector<2x1x2x1x128xf32> to vector<2x2x128xf32>
    %241 = arith.maximumf %238, %240 : vector<2x2x128xf32>
    %242 = vector.extract_strided_slice %236 {offsets = [0, 1, 0, 0, 0], sizes = [2, 1, 2, 1, 128], strides = [1, 1, 1, 1, 1]} : vector<2x2x2x2x128xf32> to vector<2x1x2x1x128xf32>
    %243 = vector.shape_cast %242 : vector<2x1x2x1x128xf32> to vector<2x2x128xf32>
    %244 = vector.extract_strided_slice %236 {offsets = [0, 1, 0, 1, 0], sizes = [2, 1, 2, 1, 128], strides = [1, 1, 1, 1, 1]} : vector<2x2x2x2x128xf32> to vector<2x1x2x1x128xf32>
    %245 = vector.shape_cast %244 : vector<2x1x2x1x128xf32> to vector<2x2x128xf32>
    %246 = arith.maximumf %243, %245 : vector<2x2x128xf32>
    %247 = arith.maximumf %241, %246 : vector<2x2x128xf32>
    %cst_258 = arith.constant 0.000000e+00 : f32
    %248 = vector.broadcast %cst_258 : f32 to vector<18x32x128xf32>
    %c0_259 = arith.constant 0 : index
    %c0_260 = arith.constant 0 : index
    %c0_261 = arith.constant 0 : index
    %249 = vector.load %arg9[%c0_259, %c0_260, %c0_261] : memref<18x32x128xf32, #tpu.memory_space<vmem>>, vector<18x32x128xf32>
    tpu.vector_store %arg9[%c0_259, %c0_260, %c0_261], %248 {strides = array<i32>} : memref<18x32x128xf32, #tpu.memory_space<vmem>>, vector<18x32x128xf32>,
    %c1_262 = arith.constant 1 : index
    %c8_263 = arith.constant 8 : index
    %c0_264 = arith.constant 0 : index
    %250 = vector.load %arg9[%c1_262, %c8_263, %c0_264] : memref<18x32x128xf32, #tpu.memory_space<vmem>>, vector<2x2x128xf32>
    tpu.vector_store %arg9[%c1_262, %c8_263, %c0_264], %247 {strides = array<i32>} : memref<18x32x128xf32, #tpu.memory_space<vmem>>, vector<2x2x128xf32>,
    %c0_265 = arith.constant 0 : index
    %c7_266 = arith.constant 7 : index
    %c0_267 = arith.constant 0 : index
    %251 = vector.load %arg9[%c0_265, %c7_266, %c0_267] : memref<18x32x128xf32, #tpu.memory_space<vmem>>, vector<2x2x128xf32>
    %252 = vector.shape_cast %251 : vector<2x2x128xf32> to vector<4x128xf32>
    %c0_268 = arith.constant 0 : index
    %c8_269 = arith.constant 8 : index
    %c0_270 = arith.constant 0 : index
    %253 = vector.load %arg9[%c0_268, %c8_269, %c0_270] : memref<18x32x128xf32, #tpu.memory_space<vmem>>, vector<2x2x128xf32>
    %254 = vector.shape_cast %253 : vector<2x2x128xf32> to vector<4x128xf32>
    %c0_271 = arith.constant 0 : index
    %c9_272 = arith.constant 9 : index
    %c0_273 = arith.constant 0 : index
    %255 = vector.load %arg9[%c0_271, %c9_272, %c0_273] : memref<18x32x128xf32, #tpu.memory_space<vmem>>, vector<2x2x128xf32>
    %256 = vector.shape_cast %255 : vector<2x2x128xf32> to vector<4x128xf32>
    %c1_274 = arith.constant 1 : index
    %c7_275 = arith.constant 7 : index
    %c0_276 = arith.constant 0 : index
    %257 = vector.load %arg9[%c1_274, %c7_275, %c0_276] : memref<18x32x128xf32, #tpu.memory_space<vmem>>, vector<2x2x128xf32>
    %258 = vector.shape_cast %257 : vector<2x2x128xf32> to vector<4x128xf32>
    %c1_277 = arith.constant 1 : index
    %c8_278 = arith.constant 8 : index
    %c0_279 = arith.constant 0 : index
    %259 = vector.load %arg9[%c1_277, %c8_278, %c0_279] : memref<18x32x128xf32, #tpu.memory_space<vmem>>, vector<2x2x128xf32>
    %260 = vector.shape_cast %259 : vector<2x2x128xf32> to vector<4x128xf32>
    %c1_280 = arith.constant 1 : index
    %c9_281 = arith.constant 9 : index
    %c0_282 = arith.constant 0 : index
    %261 = vector.load %arg9[%c1_280, %c9_281, %c0_282] : memref<18x32x128xf32, #tpu.memory_space<vmem>>, vector<2x2x128xf32>
    %262 = vector.shape_cast %261 : vector<2x2x128xf32> to vector<4x128xf32>
    %c2_283 = arith.constant 2 : index
    %c7_284 = arith.constant 7 : index
    %c0_285 = arith.constant 0 : index
    %263 = vector.load %arg9[%c2_283, %c7_284, %c0_285] : memref<18x32x128xf32, #tpu.memory_space<vmem>>, vector<2x2x128xf32>
    %264 = vector.shape_cast %263 : vector<2x2x128xf32> to vector<4x128xf32>
    %c2_286 = arith.constant 2 : index
    %c8_287 = arith.constant 8 : index
    %c0_288 = arith.constant 0 : index
    %265 = vector.load %arg9[%c2_286, %c8_287, %c0_288] : memref<18x32x128xf32, #tpu.memory_space<vmem>>, vector<2x2x128xf32>
    %266 = vector.shape_cast %265 : vector<2x2x128xf32> to vector<4x128xf32>
    %c2_289 = arith.constant 2 : index
    %c9_290 = arith.constant 9 : index
    %c0_291 = arith.constant 0 : index
    %267 = vector.load %arg9[%c2_289, %c9_290, %c0_291] : memref<18x32x128xf32, #tpu.memory_space<vmem>>, vector<2x2x128xf32>
    %268 = vector.shape_cast %267 : vector<2x2x128xf32> to vector<4x128xf32>
    %269 = tpu.concatenate %252, %254, %256, %258, %260, %262, %264, %266, %268 in 1 : vector<4x128xf32>, vector<4x128xf32>, vector<4x128xf32>, vector<4x128xf32>, vector<4x128xf32>, vector<4x128xf32>, vector<4x128xf32>, vector<4x128xf32>, vector<4x128xf32> -> vector<4x1152xf32>
    %270 = arith.truncf %269 : vector<4x1152xf32> to vector<4x1152xbf16>
    %c6 = arith.constant 6 : index
    %c0_292 = arith.constant 0 : index
    %c0_293 = arith.constant 0 : index
    %271 = vector.load %arg2[%c6, %c0_292, %c0_293] : memref<10x1152x128xbf16, #tpu.memory_space<vmem>>, vector<1x1152x128xbf16>
    %272 = vector.shape_cast %271 : vector<1x1152x128xbf16> to vector<1152x128xbf16>
    %cst_294 = arith.constant dense<0.000000e+00> : vector<4x128xf32>
    %273 = tpu.matmul %270, %272, %cst_294 {dimension_numbers = #tpu.dot_dimension_numbers<[1], [0], [0], [1], [0, 0, 1, 1], [], []>} : vector<4x1152xbf16>, vector<1152x128xbf16>, vector<4x128xf32> -> vector<4x128xf32>
    %c6_295 = arith.constant 6 : index
    %c0_296 = arith.constant 0 : index
    %c0_297 = arith.constant 0 : index
    %274 = vector.load %arg3[%c6_295, %c0_296, %c0_297] : memref<10x1x128xf32, #tpu.memory_space<vmem>>, vector<1x1x128xf32>
    %275 = vector.shape_cast %274 : vector<1x1x128xf32> to vector<1x128xf32>
    %276 = vector.broadcast %275 : vector<1x128xf32> to vector<4x128xf32>
    %277 = arith.addf %273, %276 : vector<4x128xf32>
    %cst_298 = arith.constant 0.00999999977 : f32
    %278 = vector.broadcast %cst_298 : f32 to vector<4x128xf32>
    %279 = arith.mulf %278, %277 : vector<4x128xf32>
    %280 = arith.maximumf %277, %279 : vector<4x128xf32>
    %281 = vector.shape_cast %280 : vector<4x128xf32> to vector<2x2x128xf32>
    %cst_299 = arith.constant 0.000000e+00 : f32
    %282 = vector.broadcast %cst_299 : f32 to vector<18x32x128xf32>
    %c0_300 = arith.constant 0 : index
    %c0_301 = arith.constant 0 : index
    %c0_302 = arith.constant 0 : index
    %283 = vector.load %arg9[%c0_300, %c0_301, %c0_302] : memref<18x32x128xf32, #tpu.memory_space<vmem>>, vector<18x32x128xf32>
    tpu.vector_store %arg9[%c0_300, %c0_301, %c0_302], %282 {strides = array<i32>} : memref<18x32x128xf32, #tpu.memory_space<vmem>>, vector<18x32x128xf32>,
    %c1_303 = arith.constant 1 : index
    %c8_304 = arith.constant 8 : index
    %c0_305 = arith.constant 0 : index
    %284 = vector.load %arg9[%c1_303, %c8_304, %c0_305] : memref<18x32x128xf32, #tpu.memory_space<vmem>>, vector<2x2x128xf32>
    tpu.vector_store %arg9[%c1_303, %c8_304, %c0_305], %281 {strides = array<i32>} : memref<18x32x128xf32, #tpu.memory_space<vmem>>, vector<2x2x128xf32>,
    %c0_306 = arith.constant 0 : index
    %c7_307 = arith.constant 7 : index
    %c0_308 = arith.constant 0 : index
    %285 = vector.load %arg9[%c0_306, %c7_307, %c0_308] : memref<18x32x128xf32, #tpu.memory_space<vmem>>, vector<2x2x128xf32>
    %286 = vector.shape_cast %285 : vector<2x2x128xf32> to vector<4x128xf32>
    %c0_309 = arith.constant 0 : index
    %c8_310 = arith.constant 8 : index
    %c0_311 = arith.constant 0 : index
    %287 = vector.load %arg9[%c0_309, %c8_310, %c0_311] : memref<18x32x128xf32, #tpu.memory_space<vmem>>, vector<2x2x128xf32>
    %288 = vector.shape_cast %287 : vector<2x2x128xf32> to vector<4x128xf32>
    %c0_312 = arith.constant 0 : index
    %c9_313 = arith.constant 9 : index
    %c0_314 = arith.constant 0 : index
    %289 = vector.load %arg9[%c0_312, %c9_313, %c0_314] : memref<18x32x128xf32, #tpu.memory_space<vmem>>, vector<2x2x128xf32>
    %290 = vector.shape_cast %289 : vector<2x2x128xf32> to vector<4x128xf32>
    %c1_315 = arith.constant 1 : index
    %c7_316 = arith.constant 7 : index
    %c0_317 = arith.constant 0 : index
    %291 = vector.load %arg9[%c1_315, %c7_316, %c0_317] : memref<18x32x128xf32, #tpu.memory_space<vmem>>, vector<2x2x128xf32>
    %292 = vector.shape_cast %291 : vector<2x2x128xf32> to vector<4x128xf32>
    %c1_318 = arith.constant 1 : index
    %c8_319 = arith.constant 8 : index
    %c0_320 = arith.constant 0 : index
    %293 = vector.load %arg9[%c1_318, %c8_319, %c0_320] : memref<18x32x128xf32, #tpu.memory_space<vmem>>, vector<2x2x128xf32>
    %294 = vector.shape_cast %293 : vector<2x2x128xf32> to vector<4x128xf32>
    %c1_321 = arith.constant 1 : index
    %c9_322 = arith.constant 9 : index
    %c0_323 = arith.constant 0 : index
    %295 = vector.load %arg9[%c1_321, %c9_322, %c0_323] : memref<18x32x128xf32, #tpu.memory_space<vmem>>, vector<2x2x128xf32>
    %296 = vector.shape_cast %295 : vector<2x2x128xf32> to vector<4x128xf32>
    %c2_324 = arith.constant 2 : index
    %c7_325 = arith.constant 7 : index
    %c0_326 = arith.constant 0 : index
    %297 = vector.load %arg9[%c2_324, %c7_325, %c0_326] : memref<18x32x128xf32, #tpu.memory_space<vmem>>, vector<2x2x128xf32>
    %298 = vector.shape_cast %297 : vector<2x2x128xf32> to vector<4x128xf32>
    %c2_327 = arith.constant 2 : index
    %c8_328 = arith.constant 8 : index
    %c0_329 = arith.constant 0 : index
    %299 = vector.load %arg9[%c2_327, %c8_328, %c0_329] : memref<18x32x128xf32, #tpu.memory_space<vmem>>, vector<2x2x128xf32>
    %300 = vector.shape_cast %299 : vector<2x2x128xf32> to vector<4x128xf32>
    %c2_330 = arith.constant 2 : index
    %c9_331 = arith.constant 9 : index
    %c0_332 = arith.constant 0 : index
    %301 = vector.load %arg9[%c2_330, %c9_331, %c0_332] : memref<18x32x128xf32, #tpu.memory_space<vmem>>, vector<2x2x128xf32>
    %302 = vector.shape_cast %301 : vector<2x2x128xf32> to vector<4x128xf32>
    %303 = tpu.concatenate %286, %288, %290, %292, %294, %296, %298, %300, %302 in 1 : vector<4x128xf32>, vector<4x128xf32>, vector<4x128xf32>, vector<4x128xf32>, vector<4x128xf32>, vector<4x128xf32>, vector<4x128xf32>, vector<4x128xf32>, vector<4x128xf32> -> vector<4x1152xf32>
    %304 = arith.truncf %303 : vector<4x1152xf32> to vector<4x1152xbf16>
    %c7_333 = arith.constant 7 : index
    %c0_334 = arith.constant 0 : index
    %c0_335 = arith.constant 0 : index
    %305 = vector.load %arg2[%c7_333, %c0_334, %c0_335] : memref<10x1152x128xbf16, #tpu.memory_space<vmem>>, vector<1x1152x128xbf16>
    %306 = vector.shape_cast %305 : vector<1x1152x128xbf16> to vector<1152x128xbf16>
    %cst_336 = arith.constant dense<0.000000e+00> : vector<4x128xf32>
    %307 = tpu.matmul %304, %306, %cst_336 {dimension_numbers = #tpu.dot_dimension_numbers<[1], [0], [0], [1], [0, 0, 1, 1], [], []>} : vector<4x1152xbf16>, vector<1152x128xbf16>, vector<4x128xf32> -> vector<4x128xf32>
    %c7_337 = arith.constant 7 : index
    %c0_338 = arith.constant 0 : index
    %c0_339 = arith.constant 0 : index
    %308 = vector.load %arg3[%c7_337, %c0_338, %c0_339] : memref<10x1x128xf32, #tpu.memory_space<vmem>>, vector<1x1x128xf32>
    %309 = vector.shape_cast %308 : vector<1x1x128xf32> to vector<1x128xf32>
    %310 = vector.broadcast %309 : vector<1x128xf32> to vector<4x128xf32>
    %311 = arith.addf %307, %310 : vector<4x128xf32>
    %cst_340 = arith.constant 0.00999999977 : f32
    %312 = vector.broadcast %cst_340 : f32 to vector<4x128xf32>
    %313 = arith.mulf %312, %311 : vector<4x128xf32>
    %314 = arith.maximumf %311, %313 : vector<4x128xf32>
    %315 = vector.shape_cast %314 : vector<4x128xf32> to vector<2x2x128xf32>
    %316 = vector.shape_cast %315 : vector<2x2x128xf32> to vector<1x2x2x128xf32>
    %c0_341 = arith.constant 0 : index
    %c0_342 = arith.constant 0 : index
    %c0_343 = arith.constant 0 : index
    %c0_344 = arith.constant 0 : index
    %317 = vector.load %arg7[%c0_341, %c0_342, %c0_343, %c0_344] : memref<1x2x2x128xf32, #tpu.memory_space<vmem>>, vector<1x2x2x128xf32>
    tpu.vector_store %arg7[%c0_341, %c0_342, %c0_343, %c0_344], %316 {strides = array<i32>} : memref<1x2x2x128xf32, #tpu.memory_space<vmem>>, vector<1x2x2x128xf32>,
    %318 = vector.shape_cast %315 : vector<2x2x128xf32> to vector<1x2x1x2x128xf32>
    %319 = vector.extract_strided_slice %318 {offsets = [0, 0, 0, 0, 0], sizes = [1, 1, 1, 1, 128], strides = [1, 1, 1, 1, 1]} : vector<1x2x1x2x128xf32> to vector<1x1x1x1x128xf32>
    %320 = vector.shape_cast %319 : vector<1x1x1x1x128xf32> to vector<1x1x128xf32>
    %321 = vector.extract_strided_slice %318 {offsets = [0, 0, 0, 1, 0], sizes = [1, 1, 1, 1, 128], strides = [1, 1, 1, 1, 1]} : vector<1x2x1x2x128xf32> to vector<1x1x1x1x128xf32>
    %322 = vector.shape_cast %321 : vector<1x1x1x1x128xf32> to vector<1x1x128xf32>
    %323 = arith.maximumf %320, %322 : vector<1x1x128xf32>
    %324 = vector.extract_strided_slice %318 {offsets = [0, 1, 0, 0, 0], sizes = [1, 1, 1, 1, 128], strides = [1, 1, 1, 1, 1]} : vector<1x2x1x2x128xf32> to vector<1x1x1x1x128xf32>
    %325 = vector.shape_cast %324 : vector<1x1x1x1x128xf32> to vector<1x1x128xf32>
    %326 = vector.extract_strided_slice %318 {offsets = [0, 1, 0, 1, 0], sizes = [1, 1, 1, 1, 128], strides = [1, 1, 1, 1, 1]} : vector<1x2x1x2x128xf32> to vector<1x1x1x1x128xf32>
    %327 = vector.shape_cast %326 : vector<1x1x1x1x128xf32> to vector<1x1x128xf32>
    %328 = arith.maximumf %325, %327 : vector<1x1x128xf32>
    %329 = arith.maximumf %323, %328 : vector<1x1x128xf32>
    %cst_345 = arith.constant 0.000000e+00 : f32
    %330 = vector.broadcast %cst_345 : f32 to vector<18x32x128xf32>
    %c0_346 = arith.constant 0 : index
    %c0_347 = arith.constant 0 : index
    %c0_348 = arith.constant 0 : index
    %331 = vector.load %arg9[%c0_346, %c0_347, %c0_348] : memref<18x32x128xf32, #tpu.memory_space<vmem>>, vector<18x32x128xf32>
    tpu.vector_store %arg9[%c0_346, %c0_347, %c0_348], %330 {strides = array<i32>} : memref<18x32x128xf32, #tpu.memory_space<vmem>>, vector<18x32x128xf32>,
    %c1_349 = arith.constant 1 : index
    %c8_350 = arith.constant 8 : index
    %c0_351 = arith.constant 0 : index
    %332 = vector.load %arg9[%c1_349, %c8_350, %c0_351] : memref<18x32x128xf32, #tpu.memory_space<vmem>>, vector<1x1x128xf32>
    tpu.vector_store %arg9[%c1_349, %c8_350, %c0_351], %329 {strides = array<i32>} : memref<18x32x128xf32, #tpu.memory_space<vmem>>, vector<1x1x128xf32>,
    %c0_352 = arith.constant 0 : index
    %c7_353 = arith.constant 7 : index
    %c0_354 = arith.constant 0 : index
    %333 = vector.load %arg9[%c0_352, %c7_353, %c0_354] : memref<18x32x128xf32, #tpu.memory_space<vmem>>, vector<1x1x128xf32>
    %334 = vector.shape_cast %333 : vector<1x1x128xf32> to vector<1x128xf32>
    %c0_355 = arith.constant 0 : index
    %c8_356 = arith.constant 8 : index
    %c0_357 = arith.constant 0 : index
    %335 = vector.load %arg9[%c0_355, %c8_356, %c0_357] : memref<18x32x128xf32, #tpu.memory_space<vmem>>, vector<1x1x128xf32>
    %336 = vector.shape_cast %335 : vector<1x1x128xf32> to vector<1x128xf32>
    %c0_358 = arith.constant 0 : index
    %c9_359 = arith.constant 9 : index
    %c0_360 = arith.constant 0 : index
    %337 = vector.load %arg9[%c0_358, %c9_359, %c0_360] : memref<18x32x128xf32, #tpu.memory_space<vmem>>, vector<1x1x128xf32>
    %338 = vector.shape_cast %337 : vector<1x1x128xf32> to vector<1x128xf32>
    %c1_361 = arith.constant 1 : index
    %c7_362 = arith.constant 7 : index
    %c0_363 = arith.constant 0 : index
    %339 = vector.load %arg9[%c1_361, %c7_362, %c0_363] : memref<18x32x128xf32, #tpu.memory_space<vmem>>, vector<1x1x128xf32>
    %340 = vector.shape_cast %339 : vector<1x1x128xf32> to vector<1x128xf32>
    %c1_364 = arith.constant 1 : index
    %c8_365 = arith.constant 8 : index
    %c0_366 = arith.constant 0 : index
    %341 = vector.load %arg9[%c1_364, %c8_365, %c0_366] : memref<18x32x128xf32, #tpu.memory_space<vmem>>, vector<1x1x128xf32>
    %342 = vector.shape_cast %341 : vector<1x1x128xf32> to vector<1x128xf32>
    %c1_367 = arith.constant 1 : index
    %c9_368 = arith.constant 9 : index
    %c0_369 = arith.constant 0 : index
    %343 = vector.load %arg9[%c1_367, %c9_368, %c0_369] : memref<18x32x128xf32, #tpu.memory_space<vmem>>, vector<1x1x128xf32>
    %344 = vector.shape_cast %343 : vector<1x1x128xf32> to vector<1x128xf32>
    %c2_370 = arith.constant 2 : index
    %c7_371 = arith.constant 7 : index
    %c0_372 = arith.constant 0 : index
    %345 = vector.load %arg9[%c2_370, %c7_371, %c0_372] : memref<18x32x128xf32, #tpu.memory_space<vmem>>, vector<1x1x128xf32>
    %346 = vector.shape_cast %345 : vector<1x1x128xf32> to vector<1x128xf32>
    %c2_373 = arith.constant 2 : index
    %c8_374 = arith.constant 8 : index
    %c0_375 = arith.constant 0 : index
    %347 = vector.load %arg9[%c2_373, %c8_374, %c0_375] : memref<18x32x128xf32, #tpu.memory_space<vmem>>, vector<1x1x128xf32>
    %348 = vector.shape_cast %347 : vector<1x1x128xf32> to vector<1x128xf32>
    %c2_376 = arith.constant 2 : index
    %c9_377 = arith.constant 9 : index
    %c0_378 = arith.constant 0 : index
    %349 = vector.load %arg9[%c2_376, %c9_377, %c0_378] : memref<18x32x128xf32, #tpu.memory_space<vmem>>, vector<1x1x128xf32>
    %350 = vector.shape_cast %349 : vector<1x1x128xf32> to vector<1x128xf32>
    %351 = tpu.concatenate %334, %336, %338, %340, %342, %344, %346, %348, %350 in 1 : vector<1x128xf32>, vector<1x128xf32>, vector<1x128xf32>, vector<1x128xf32>, vector<1x128xf32>, vector<1x128xf32>, vector<1x128xf32>, vector<1x128xf32>, vector<1x128xf32> -> vector<1x1152xf32>
    %352 = arith.truncf %351 : vector<1x1152xf32> to vector<1x1152xbf16>
    %c8_379 = arith.constant 8 : index
    %c0_380 = arith.constant 0 : index
    %c0_381 = arith.constant 0 : index
    %353 = vector.load %arg2[%c8_379, %c0_380, %c0_381] : memref<10x1152x128xbf16, #tpu.memory_space<vmem>>, vector<1x1152x128xbf16>
    %354 = vector.shape_cast %353 : vector<1x1152x128xbf16> to vector<1152x128xbf16>
    %cst_382 = arith.constant dense<0.000000e+00> : vector<1x128xf32>
    %355 = tpu.matmul %352, %354, %cst_382 {dimension_numbers = #tpu.dot_dimension_numbers<[1], [0], [0], [1], [0, 0, 1, 1], [], []>} : vector<1x1152xbf16>, vector<1152x128xbf16>, vector<1x128xf32> -> vector<1x128xf32>
    %c8_383 = arith.constant 8 : index
    %c0_384 = arith.constant 0 : index
    %c0_385 = arith.constant 0 : index
    %356 = vector.load %arg3[%c8_383, %c0_384, %c0_385] : memref<10x1x128xf32, #tpu.memory_space<vmem>>, vector<1x1x128xf32>
    %357 = vector.shape_cast %356 : vector<1x1x128xf32> to vector<1x128xf32>
    %358 = arith.addf %355, %357 : vector<1x128xf32>
    %cst_386 = arith.constant 0.00999999977 : f32
    %359 = vector.broadcast %cst_386 : f32 to vector<1x128xf32>
    %360 = arith.mulf %359, %358 : vector<1x128xf32>
    %361 = arith.maximumf %358, %360 : vector<1x128xf32>
    %362 = vector.shape_cast %361 : vector<1x128xf32> to vector<1x1x128xf32>
    %cst_387 = arith.constant 0.000000e+00 : f32
    %363 = vector.broadcast %cst_387 : f32 to vector<18x32x128xf32>
    %c0_388 = arith.constant 0 : index
    %c0_389 = arith.constant 0 : index
    %c0_390 = arith.constant 0 : index
    %364 = vector.load %arg9[%c0_388, %c0_389, %c0_390] : memref<18x32x128xf32, #tpu.memory_space<vmem>>, vector<18x32x128xf32>
    tpu.vector_store %arg9[%c0_388, %c0_389, %c0_390], %363 {strides = array<i32>} : memref<18x32x128xf32, #tpu.memory_space<vmem>>, vector<18x32x128xf32>,
    %c1_391 = arith.constant 1 : index
    %c8_392 = arith.constant 8 : index
    %c0_393 = arith.constant 0 : index
    %365 = vector.load %arg9[%c1_391, %c8_392, %c0_393] : memref<18x32x128xf32, #tpu.memory_space<vmem>>, vector<1x1x128xf32>
    tpu.vector_store %arg9[%c1_391, %c8_392, %c0_393], %362 {strides = array<i32>} : memref<18x32x128xf32, #tpu.memory_space<vmem>>, vector<1x1x128xf32>,
    %c0_394 = arith.constant 0 : index
    %c7_395 = arith.constant 7 : index
    %c0_396 = arith.constant 0 : index
    %366 = vector.load %arg9[%c0_394, %c7_395, %c0_396] : memref<18x32x128xf32, #tpu.memory_space<vmem>>, vector<1x1x128xf32>
    %367 = vector.shape_cast %366 : vector<1x1x128xf32> to vector<1x128xf32>
    %c0_397 = arith.constant 0 : index
    %c8_398 = arith.constant 8 : index
    %c0_399 = arith.constant 0 : index
    %368 = vector.load %arg9[%c0_397, %c8_398, %c0_399] : memref<18x32x128xf32, #tpu.memory_space<vmem>>, vector<1x1x128xf32>
    %369 = vector.shape_cast %368 : vector<1x1x128xf32> to vector<1x128xf32>
    %c0_400 = arith.constant 0 : index
    %c9_401 = arith.constant 9 : index
    %c0_402 = arith.constant 0 : index
    %370 = vector.load %arg9[%c0_400, %c9_401, %c0_402] : memref<18x32x128xf32, #tpu.memory_space<vmem>>, vector<1x1x128xf32>
    %371 = vector.shape_cast %370 : vector<1x1x128xf32> to vector<1x128xf32>
    %c1_403 = arith.constant 1 : index
    %c7_404 = arith.constant 7 : index
    %c0_405 = arith.constant 0 : index
    %372 = vector.load %arg9[%c1_403, %c7_404, %c0_405] : memref<18x32x128xf32, #tpu.memory_space<vmem>>, vector<1x1x128xf32>
    %373 = vector.shape_cast %372 : vector<1x1x128xf32> to vector<1x128xf32>
    %c1_406 = arith.constant 1 : index
    %c8_407 = arith.constant 8 : index
    %c0_408 = arith.constant 0 : index
    %374 = vector.load %arg9[%c1_406, %c8_407, %c0_408] : memref<18x32x128xf32, #tpu.memory_space<vmem>>, vector<1x1x128xf32>
    %375 = vector.shape_cast %374 : vector<1x1x128xf32> to vector<1x128xf32>
    %c1_409 = arith.constant 1 : index
    %c9_410 = arith.constant 9 : index
    %c0_411 = arith.constant 0 : index
    %376 = vector.load %arg9[%c1_409, %c9_410, %c0_411] : memref<18x32x128xf32, #tpu.memory_space<vmem>>, vector<1x1x128xf32>
    %377 = vector.shape_cast %376 : vector<1x1x128xf32> to vector<1x128xf32>
    %c2_412 = arith.constant 2 : index
    %c7_413 = arith.constant 7 : index
    %c0_414 = arith.constant 0 : index
    %378 = vector.load %arg9[%c2_412, %c7_413, %c0_414] : memref<18x32x128xf32, #tpu.memory_space<vmem>>, vector<1x1x128xf32>
    %379 = vector.shape_cast %378 : vector<1x1x128xf32> to vector<1x128xf32>
    %c2_415 = arith.constant 2 : index
    %c8_416 = arith.constant 8 : index
    %c0_417 = arith.constant 0 : index
    %380 = vector.load %arg9[%c2_415, %c8_416, %c0_417] : memref<18x32x128xf32, #tpu.memory_space<vmem>>, vector<1x1x128xf32>
    %381 = vector.shape_cast %380 : vector<1x1x128xf32> to vector<1x128xf32>
    %c2_418 = arith.constant 2 : index
    %c9_419 = arith.constant 9 : index
    %c0_420 = arith.constant 0 : index
    %382 = vector.load %arg9[%c2_418, %c9_419, %c0_420] : memref<18x32x128xf32, #tpu.memory_space<vmem>>, vector<1x1x128xf32>
    %383 = vector.shape_cast %382 : vector<1x1x128xf32> to vector<1x128xf32>
    %384 = tpu.concatenate %367, %369, %371, %373, %375, %377, %379, %381, %383 in 1 : vector<1x128xf32>, vector<1x128xf32>, vector<1x128xf32>, vector<1x128xf32>, vector<1x128xf32>, vector<1x128xf32>, vector<1x128xf32>, vector<1x128xf32>, vector<1x128xf32> -> vector<1x1152xf32>
    %385 = arith.truncf %384 : vector<1x1152xf32> to vector<1x1152xbf16>
    %c9_421 = arith.constant 9 : index
    %c0_422 = arith.constant 0 : index
    %c0_423 = arith.constant 0 : index
    %386 = vector.load %arg2[%c9_421, %c0_422, %c0_423] : memref<10x1152x128xbf16, #tpu.memory_space<vmem>>, vector<1x1152x128xbf16>
    %387 = vector.shape_cast %386 : vector<1x1152x128xbf16> to vector<1152x128xbf16>
    %cst_424 = arith.constant dense<0.000000e+00> : vector<1x128xf32>
    %388 = tpu.matmul %385, %387, %cst_424 {dimension_numbers = #tpu.dot_dimension_numbers<[1], [0], [0], [1], [0, 0, 1, 1], [], []>} : vector<1x1152xbf16>, vector<1152x128xbf16>, vector<1x128xf32> -> vector<1x128xf32>
    %c9_425 = arith.constant 9 : index
    %c0_426 = arith.constant 0 : index
    %c0_427 = arith.constant 0 : index
    %389 = vector.load %arg3[%c9_425, %c0_426, %c0_427] : memref<10x1x128xf32, #tpu.memory_space<vmem>>, vector<1x1x128xf32>
    %390 = vector.shape_cast %389 : vector<1x1x128xf32> to vector<1x128xf32>
    %391 = arith.addf %388, %390 : vector<1x128xf32>
    %cst_428 = arith.constant 0.00999999977 : f32
    %392 = vector.broadcast %cst_428 : f32 to vector<1x128xf32>
    %393 = arith.mulf %392, %391 : vector<1x128xf32>
    %394 = arith.maximumf %391, %393 : vector<1x128xf32>
    %395 = vector.shape_cast %394 : vector<1x128xf32> to vector<1x1x128xf32>
    %396 = vector.shape_cast %395 : vector<1x1x128xf32> to vector<1x1x1x128xf32>
    %c0_429 = arith.constant 0 : index
    %c0_430 = arith.constant 0 : index
    %c0_431 = arith.constant 0 : index
    %c0_432 = arith.constant 0 : index
    %397 = vector.load %arg8[%c0_429, %c0_430, %c0_431, %c0_432] : memref<1x1x1x128xf32, #tpu.memory_space<vmem>>, vector<1x1x1x128xf32>
    tpu.vector_store %arg8[%c0_429, %c0_430, %c0_431, %c0_432], %396 {strides = array<i32>} : memref<1x1x1x128xf32, #tpu.memory_space<vmem>>, vector<1x1x1x128xf32>,
    return
  }
  func.func @transform_0(%arg0: i32) -> (i32, i32, i32, i32) {
    %c0_i32 = arith.constant 0 : i32
    %c0_i32_0 = arith.constant 0 : i32
    %c0_i32_1 = arith.constant 0 : i32
    %c0_i32_2 = arith.constant 0 : i32
    return %arg0, %c0_i32, %c0_i32_0, %c0_i32_1 : i32, i32, i32, i32
  }
  func.func @transform_1(%arg0: i32) -> (i32, i32, i32) {
    %c0_i32 = arith.constant 0 : i32
    %c0_i32_0 = arith.constant 0 : i32
    %c0_i32_1 = arith.constant 0 : i32
    %c0_i32_2 = arith.constant 0 : i32
    return %c0_i32, %c0_i32_0, %c0_i32_1 : i32, i32, i32
  }
  func.func @transform_2(%arg0: i32) -> (i32, i32, i32) {
    %c0_i32 = arith.constant 0 : i32
    %c0_i32_0 = arith.constant 0 : i32
    %c0_i32_1 = arith.constant 0 : i32
    %c0_i32_2 = arith.constant 0 : i32
    return %c0_i32, %c0_i32_0, %c0_i32_1 : i32, i32, i32
  }
  func.func @transform_3(%arg0: i32) -> (i32, i32, i32, i32) {
    %c0_i32 = arith.constant 0 : i32
    %c0_i32_0 = arith.constant 0 : i32
    %c0_i32_1 = arith.constant 0 : i32
    %c0_i32_2 = arith.constant 0 : i32
    return %arg0, %c0_i32, %c0_i32_0, %c0_i32_1 : i32, i32, i32, i32
  }
  func.func @transform_4(%arg0: i32) -> (i32, i32, i32, i32) {
    %c0_i32 = arith.constant 0 : i32
    %c0_i32_0 = arith.constant 0 : i32
    %c0_i32_1 = arith.constant 0 : i32
    %c0_i32_2 = arith.constant 0 : i32
    return %arg0, %c0_i32, %c0_i32_0, %c0_i32_1 : i32, i32, i32, i32
  }
  func.func @transform_5(%arg0: i32) -> (i32, i32, i32, i32) {
    %c0_i32 = arith.constant 0 : i32
    %c0_i32_0 = arith.constant 0 : i32
    %c0_i32_1 = arith.constant 0 : i32
    %c0_i32_2 = arith.constant 0 : i32
    return %arg0, %c0_i32, %c0_i32_0, %c0_i32_1 : i32, i32, i32, i32
  }
  func.func @transform_6(%arg0: i32) -> (i32, i32, i32, i32) {
    %c0_i32 = arith.constant 0 : i32
    %c0_i32_0 = arith.constant 0 : i32
    %c0_i32_1 = arith.constant 0 : i32
    %c0_i32_2 = arith.constant 0 : i32
    return %arg0, %c0_i32, %c0_i32_0, %c0_i32_1 : i32, i32, i32, i32
  }
  func.func @transform_7(%arg0: i32) -> (i32, i32, i32, i32) {
    %c0_i32 = arith.constant 0 : i32
    %c0_i32_0 = arith.constant 0 : i32
    %c0_i32_1 = arith.constant 0 : i32
    %c0_i32_2 = arith.constant 0 : i32
    return %arg0, %c0_i32, %c0_i32_0, %c0_i32_1 : i32, i32, i32, i32
  }
}

</mosaic_0001>

<bundles_post_ra>
// kernel: _lambda_.1
= control target key start
LH: loop header
LB: loop body
LE: loop exit
PB: predicated region body
PF: predicated region fallthrough
CT: control target
= control target key end

     0   :  { %13 = vsyncpa [#allocation4], 0  ;;  %s21966_s0 = inlined_call_operand.vmem [shape: f32[2,16,16,128], index: 0, kind: input, shape index: {}]   ;;  %s21967_s1 = inlined_call_operand.hbm [shape: bf16[10,1152,128], index: 1, kind: input, shape index: {}]   ;;  %s21968_s2 = inlined_call_operand.hbm [shape: f32[10,1,128], index: 2, kind: input, shape index: {}]   ;;  %s21969_s3 = inlined_call_operand.vmem [shape: f32[2,16,16,128], index: 3, kind: output, shape index: {0}]   ;;  %s21970_s4 = inlined_call_operand.vmem [shape: f32[2,8,8,128], index: 4, kind: output, shape index: {1}]   ;;  %s21971_s5 = inlined_call_operand.vmem [shape: f32[2,4,4,128], index: 5, kind: output, shape index: {2}]   ;;  %s21972_s6 = inlined_call_operand.vmem [shape: f32[2,2,2,128], index: 6, kind: output, shape index: {3}]   ;;  %s21973_s7 = inlined_call_operand.vmem [shape: f32[2,1,1,128], index: 7, kind: output, shape index: {4}]  }
   0x1   :  { %14 = vsyncpa [#allocation6], 0  ;;  %s18722_s24 = smov 0  }
   0x2 LB: > { %s18672_s25 = smov [#allocation3]   ;;  %s18728_s27 = sadd.s32 4294967295, %s18670_s24   ;;  %s18670_s24 = sphi %s18722_s24, %s20_s24  }
   0x3   : > { %s235_s26 = sshll.u32 %s18672_s25, 4  ;;  %p14765_p0 = scmp.ge.s32.totalorder %s18670_s24, 1  ;;  %s236_s26 = int_to_ptr.vmem [resolvable:$true] %s235_s26 }
   0x4   : > { %p223_p1 = scmp.lt.s32.totalorder %s18670_s24, 3  ;;  %p17836_p3 = scmp.eq.s32.totalorder %s18728_s27, 0 }
   0x5   : > { %s18673_s29 = smov [#allocation5]   ;;  %s18615_s9 = scalar_lea.vmem %s236_s26, 92160 }
   0x6   : > { %p18732_p2 = pnand %p14765_p0, %p223_p1  ;;  %s248_s30 = sshll.u32 %s18673_s29, 4  ;;  %s249_s30 = int_to_ptr.vmem [resolvable:$true] %s248_s30 }
   0x7   : > { %p18616_p7 = scmp.ne.s32.totalorder %s236_s26, %s18615_s9  ;;  %p18623_p10 = scmp.lt.s32.totalorder %s236_s26, %s236_s26 }
   0x8   : > { %p17829_p4 = pneg %p18732_p2  ;;  %p18624_p11 = scmp.lt.s32.totalorder %s18615_s9, %s18615_s9 }
   0xa   : > { %p18741_p5 = pnand %p17836_p3, %p17829_p4  ;;  %p18625_p12 = por %p18624_p11, %p18623_p10 }
   0xc   : > { %p18606_p6 = pneg %p18741_p5 }
   0xe   : > { %p18618_p8 = pnand %p18616_p7, %p18606_p6 }
  0x10   : > { %p18619_p9 = pneg %p18618_p8 }
  0x12   : > { %p18626_p13 = pnand %p18625_p12, %p18619_p9 }
  0x14   : > { %18629 = shalt.err (!%p18626_p13)
}
  0x15   : > { %s18674_s10 = smov 64   ;;  %s18675_s11 = smov 4  }
  0x16   : > { %17832 = dma.hbm_to_vmem [thread:$0]  (!%p18741_p5), %s21967_s1, 92160, %s236_s26, [#allocation4], %s18674_s10, %s18674_s10, %s18675_s11  }
  0x17   : > { %s18641_s14 = scalar_lea.vmem %s249_s30, 160  ;;  %p18649_p7 = scmp.lt.s32.totalorder %s249_s30, %s249_s30 }
  0x18   : > { %p18642_p0 = scmp.ne.s32.totalorder %s249_s30, %s18641_s14  ;;  %p18650_p8 = scmp.lt.s32.totalorder %s18641_s14, %s18641_s14 }
  0x1a   : > { %p18644_p1 = pnand %p18642_p0, %p18606_p6  ;;  %p18651_p10 = por %p18650_p8, %p18649_p7 }
  0x1c   : > { %p18645_p4 = pneg %p18644_p1 }
  0x1e   : > { %p18652_p9 = pnand %p18651_p10, %p18645_p4 }
  0x20   : > { %18655 = shalt.err (!%p18652_p9)
}
  0x21   : > { %s18676_s15 = smov 16   ;;  %s18677_s16 = smov 1  }
  0x22   : > { %17835 = dma.hbm_to_vmem [thread:$0]  (!%p18741_p5), %s21968_s2, 160, %s249_s30, [#allocation6], %s18676_s15, %s18676_s15, %s18677_s16  }
  0x23   : > { %272 = sbr.rel (%p18732_p2) target bundleno = 3375 (0xd2f), region = 32 }
  0x28   : > { %18661 = dma.done.wait (%p17836_p3), [#allocation4], 92160  }
  0x29   : > { %18663 = vsyncadd (%p17836_p3), [#allocation4], 4294875136 }
  0x2a   : > { %18665 = dma.done.wait (%p17836_p3), [#allocation6], 160  }
  0x2b   : > { %18667 = vsyncadd (%p17836_p3), [#allocation6], 4294967136  ;;  %v21976_v0 = vmov 0.0   ;;  %v18679_v1 = vmov 0.0|0.0   ;;  %v17857_v2 = vld [vmem:[#allocation3 + $0x78] sm:$0xff]   ;;  %v17861_v6 = vld [vmem:[#allocation3 + $0x70] sm:$0xff]  }
  0x2c   : > { %387 = vst [vmem:[#allocation2] sm:$0xff] %v21976_v0  ;;  %388 = vst [vmem:[#allocation2 + $0x8] sm:$0xff] %v21976_v0  ;;  %1540 = vmatprep.mubr.bf16.mxu0 %v18679_v1  ;;  %v17858_v3 = vld [vmem:[#allocation3 + $0x38] sm:$0xff]   ;;  %15687 = vmatprep.subr.bf16.mxu0 %v17857_v2  ;;  %v17862_v7 = vld [vmem:[#allocation3 + $0x30] sm:$0xff]   ;;  %p326_p2 = scmp.lt.s32.totalorder %s18728_s27, 1  ;;  %vm6071_vm0 = vcmask 1041409  }
  0x2d   : > { %389 = vst [vmem:[#allocation2 + $0x10] sm:$0xff] %v21976_v0  ;;  %390 = vst [vmem:[#allocation2 + $0x18] sm:$0xff] %v21976_v0  ;;  %v17859_v4 = vld [vmem:[#allocation3 + $0xf8] sm:$0xff]   ;;  %15688 = vmatpush3.bf16.msra.mxu0 %v17858_v3  ;;  %v17863_v8 = vld [vmem:[#allocation3 + $0xf0] sm:$0xff]   ;;  %vm6073_vm1 = vcmask 1042434   ;;  %vm6075_vm2 = vcmask 1043459  }
  0x2e   : > { %391 = vst [vmem:[#allocation2 + $0x20] sm:$0xff] %v21976_v0  ;;  %394 = vst [vmem:[#allocation2 + $0x38] sm:$0xff] %v21976_v0  ;;  %v17860_v5 = vld [vmem:[#allocation3 + $0xb8] sm:$0xff]   ;;  %15799 = vmatprep.subr.bf16.mxu1 %v17859_v4  ;;  %15689 = vmatprep.subr.bf16.mxu0 %v17861_v6  ;;  %v17864_v9 = vld [vmem:[#allocation3 + $0xb0] sm:$0xff]   ;;  %s22258_s27 = smov (!%p326_p2, %s18728_s27), 1  ;;  %vm6077_vm3 = vcmask 1044484  }
  0x2f   : > { %395 = vst [vmem:[#allocation2 + $0x40] sm:$0xff] %v21976_v0  ;;  %398 = vst [vmem:[#allocation2 + $0x58] sm:$0xff] %v21976_v0  ;;  %15800 = vmatpush3.bf16.msra.mxu1 %v17860_v5  ;;  %v17865_v10 = vld [vmem:[#allocation3 + $0x68] sm:$0xff]   ;;  %v17869_v14 = vld [vmem:[#allocation3 + $0x60] sm:$0xff]   ;;  %s15682_s19 = sshll.u32 %s22258_s27, 8  ;;  %vm6079_vm4 = vcmask 1045509  }
  0x30   : > { %399 = vst [vmem:[#allocation2 + $0x60] sm:$0xff] %v21976_v0  ;;  %402 = vst [vmem:[#allocation2 + $0x78] sm:$0xff] %v21976_v0  ;;  %15801 = vmatprep.subr.bf16.mxu1 %v17863_v8  ;;  %v17866_v11 = vld [vmem:[#allocation3 + $0x28] sm:$0xff]   ;;  %v17870_v15 = vld [vmem:[#allocation3 + $0x20] sm:$0xff]   ;;  %s18825_s22 = scalar_lea.vmem %s21966_s0, %s15682_s19  ;;  %s20753_s26 = scalar_lea.vmem %s21969_s3, %s15682_s19  ;;  %vm6081_vm5 = vcmask 1046534   ;;  %vm6083_vm6 = vcmask 1047559  }
  0x31   : > { %403 = vst [vmem:[#allocation2 + $0x80] sm:$0xff] %v21976_v0  ;;  %406 = vst [vmem:[#allocation2 + $0x98] sm:$0xff] %v21976_v0  ;;  %15690 = vmatpush3.bf16.msra.mxu0 %v17862_v7  ;;  %v17867_v12 = vld [vmem:[#allocation3 + $0xe8] sm:$0xff]   ;;  %v17871_v16 = vld [vmem:[#allocation3 + $0xe0] sm:$0xff]   ;;  %s15684_s28 = sshll.u32 %s22258_s27, 6  ;;  %vm18681_vm7 = vmmov 0   ;;  %s353_s19 = scalar_lea.vmem %s21973_s7, %s22258_s27 }
  0x32   : > { %407 = vst [vmem:[#allocation2 + $0xa0] sm:$0xff] %v21976_v0  ;;  %410 = vst [vmem:[#allocation2 + $0xb8] sm:$0xff] %v21976_v0  ;;  %15691 = vmatprep.subr.bf16.mxu0 %v17865_v10  ;;  %v17868_v13 = vld [vmem:[#allocation3 + $0xa8] sm:$0xff]   ;;  %v17872_v17 = vld [vmem:[#allocation3 + $0xa0] sm:$0xff]   ;;  %s21548_s8 = scalar_lea.vmem %s21970_s4, %s15684_s28  ;;  %s15685_s9 = sshll.u32 %s22258_s27, 4 }
  0x33   : > { %411 = vst [vmem:[#allocation2 + $0xc0] sm:$0xff] %v21976_v0  ;;  %414 = vst [vmem:[#allocation2 + $0xd8] sm:$0xff] %v21976_v0  ;;  %15802 = vmatpush3.bf16.msra.mxu1 %v17864_v9  ;;  %v17873_v18 = vld [vmem:[#allocation3 + $0x58] sm:$0xff]   ;;  %v17877_v22 = vld [vmem:[#allocation3 + $0x50] sm:$0xff]   ;;  %s345_s12 = scalar_lea.vmem %s21971_s5, %s15685_s9  ;;  %s15686_s13 = sshll.u32 %s22258_s27, 2 }
  0x34   : > { %415 = vst [vmem:[#allocation2 + $0xe0] sm:$0xff] %v21976_v0  ;;  %418 = vst [vmem:[#allocation2 + $0xf8] sm:$0xff] %v21976_v0  ;;  %15803 = vmatprep.subr.bf16.mxu1 %v17867_v12  ;;  %v17874_v19 = vld [vmem:[#allocation3 + $0x18] sm:$0xff]   ;;  %v17878_v23 = vld [vmem:[#allocation3 + $0x10] sm:$0xff]   ;;  %s350_s16 = scalar_lea.vmem %s21972_s6, %s15686_s13 }
  0x35   : > { %419 = vst [vmem:[#allocation2 + $0x100] sm:$0xff] %v21976_v0  ;;  %422 = vst [vmem:[#allocation2 + $0x118] sm:$0xff] %v21976_v0  ;;  %15692 = vmatpush3.bf16.msra.mxu0 %v17866_v11  ;;  %v17875_v20 = vld [vmem:[#allocation3 + $0xd8] sm:$0xff]   ;;  %v17879_v24 = vld [vmem:[#allocation3 + $0xd0] sm:$0xff]  }
  0x36   : > { %423 = vst [vmem:[#allocation2 + $0x120] sm:$0xff] %v21976_v0  ;;  %426 = vst [vmem:[#allocation2 + $0x138] sm:$0xff] %v21976_v0  ;;  %15693 = vmatprep.subr.bf16.mxu0 %v17869_v14  ;;  %v17876_v21 = vld [vmem:[#allocation3 + $0x98] sm:$0xff]   ;;  %v17880_v25 = vld [vmem:[#allocation3 + $0x90] sm:$0xff]  }
  0x37   : > { %427 = vst [vmem:[#allocation2 + $0x140] sm:$0xff] %v21976_v0  ;;  %430 = vst [vmem:[#allocation2 + $0x158] sm:$0xff] %v21976_v0  ;;  %15804 = vmatpush3.bf16.msra.mxu1 %v17868_v13  ;;  %v17881_v26 = vld [vmem:[#allocation3 + $0x48] sm:$0xff]   ;;  %v17885_v30 = vld [vmem:[#allocation3 + $0x40] sm:$0xff]  }
  0x38   : > { %431 = vst [vmem:[#allocation2 + $0x160] sm:$0xff] %v21976_v0  ;;  %434 = vst [vmem:[#allocation2 + $0x178] sm:$0xff] %v21976_v0  ;;  %15805 = vmatprep.subr.bf16.mxu1 %v17871_v16  ;;  %v17882_v27 = vld [vmem:[#allocation3 + $0x8] sm:$0xff]   ;;  %v17886_v31 = vld [vmem:[#allocation3] sm:$0xff]  }
  0x39   : > { %435 = vst [vmem:[#allocation2 + $0x180] sm:$0xff] %v21976_v0  ;;  %438 = vst [vmem:[#allocation2 + $0x198] sm:$0xff] %v21976_v0  ;;  %15694 = vmatpush3.bf16.msra.mxu0 %v17870_v15  ;;  %v17883_v28 = vld [vmem:[#allocation3 + $0xc8] sm:$0xff]   ;;  %v17887_v32 = vld [vmem:[#allocation3 + $0xc0] sm:$0xff]  }
  0x3a   : > { %439 = vst [vmem:[#allocation2 + $0x1a0] sm:$0xff] %v21976_v0  ;;  %442 = vst [vmem:[#allocation2 + $0x1b8] sm:$0xff] %v21976_v0  ;;  %15695 = vmatprep.subr.bf16.mxu0 %v17873_v18  ;;  %v17884_v29 = vld [vmem:[#allocation3 + $0x88] sm:$0xff]   ;;  %v18827_v36 = vld [vmem:[#allocation2 + $0x11] sm:$0xff] }
  0x3b   : > { %443 = vst [vmem:[#allocation2 + $0x1c0] sm:$0xff] %v21976_v0  ;;  %446 = vst [vmem:[#allocation2 + $0x1d8] sm:$0xff] %v21976_v0  ;;  %15806 = vmatpush3.bf16.msra.mxu1 %v17872_v17  ;;  %v492_v33 = vld [vmem:[#allocation2 + $0x7] sm:$0xff]  ;;  %v493_v34 = vld [vmem:[#allocation2 + $0xf] sm:$0xff] }
  0x3c   : > { %447 = vst [vmem:[#allocation2 + $0x1e0] sm:$0xff] %v21976_v0  ;;  %450 = vst [vmem:[#allocation2 + $0x1f8] sm:$0xff] %v21976_v0  ;;  %15807 = vmatprep.subr.bf16.mxu1 %v17875_v20  ;;  %v18818_v35 = vld [vmem:[#allocation2 + $0x9] sm:$0xff]  ;;  %v781_v37 = vpack.c.bf16 %v493_v34, %v492_v33  ;;  %v17888_v38 = vld [vmem:[#allocation3 + $0x80] sm:$0xff]  }
  0x3d   : > { %451 = vst [vmem:[#allocation2 + $0x200] sm:$0xff] %v21976_v0  ;;  %454 = vst [vmem:[#allocation2 + $0x218] sm:$0xff] %v21976_v0  ;;  %15696 = vmatpush3.bf16.msra.mxu0 %v17874_v19  ;;  %v17889_v39 = vld [vmem:[#allocation3 + $0x178] sm:$0xff]   ;;  %v355_v40 = vld [vmem:[%s18825_s22] sm:$0xff]  ;;  %v783_v58 = vpack.c.bf16 %v18827_v36, %v18818_v35 }
  0x3e   : > { %455 = vst [vmem:[#allocation2 + $0x220] sm:$0xff] %v21976_v0  ;;  %456 = vst [vmem:[#allocation2 + $0x228] sm:$0xff] %v21976_v0  ;;  %15697 = vmatprep.subr.bf16.mxu0 %v17877_v22  ;;  %v356_v41 = vld [vmem:[%s18825_s22 + $0x8] sm:$0xff]  ;;  %v17890_v42 = vld [vmem:[#allocation3 + $0x138] sm:$0xff]  }
  0x3f   : > { %457 = vst [vmem:[#allocation2 + $0x230] sm:$0xff] %v21976_v0  ;;  %458 = vst [vmem:[#allocation2 + $0x238] sm:$0xff] %v21976_v0  ;;  %15808 = vmatpush3.bf16.msra.mxu1 %v17876_v21  ;;  %v18835_v43 = vpack.c.bf16 %v356_v41, %v355_v40  ;;  %v357_v44 = vld [vmem:[%s18825_s22 + $0x10] sm:$0xff]  ;;  %v358_v45 = vld [vmem:[%s18825_s22 + $0x18] sm:$0xff] }
  0x40   : > { %15809 = vmatprep.subr.bf16.mxu1 %v17879_v24  ;;  %2377 = vst [vmem:[#allocation2] sm:$0xff] %v21976_v0  ;;  %2378 = vst [vmem:[#allocation2 + $0x8] sm:$0xff] %v21976_v0  ;;  %v17891_v46 = vld [vmem:[#allocation3 + $0x170] sm:$0xff]   ;;  %v359_v47 = vld [vmem:[%s18825_s22 + $0x20] sm:$0xff]  ;;  %v18863_v59 = vpack.c.bf16 %v358_v45, %v357_v44 }
  0x41   : > { %15698 = vmatpush3.bf16.msra.mxu0 %v17878_v23  ;;  %2379 = vst [vmem:[#allocation2 + $0x10] sm:$0xff] %v21976_v0  ;;  %2380 = vst [vmem:[#allocation2 + $0x18] sm:$0xff] %v21976_v0  ;;  %v360_v48 = vld [vmem:[%s18825_s22 + $0x28] sm:$0xff]  ;;  %v17892_v50 = vld [vmem:[#allocation3 + $0x130] sm:$0xff]  }
  0x42   : > { %15699 = vmatprep.subr.bf16.mxu0 %v17881_v26  ;;  %460 = vst [vmem:[#allocation2 + $0x28] sm:$0xff] %v355_v40  ;;  %461 = vst [vmem:[#allocation2 + $0x30] sm:$0xff] %v356_v41  ;;  %v18845_v51 = vld [vmem:[%s18825_s22 + $0x30] sm:$0xff]  ;;  %v18857_v55 = vld [vmem:[%s18825_s22 + $0x38] sm:$0xff]  ;;  %v18901_v16 = vpack.c.bf16 %v360_v48, %v359_v47 }
  0x43   : > { %15810 = vmatpush3.bf16.msra.mxu1 %v17880_v25  ;;  %462 = vst [vmem:[#allocation2 + $0x48] sm:$0xff] %v357_v44  ;;  %463 = vst [vmem:[#allocation2 + $0x50] sm:$0xff] %v358_v45  ;;  %v17893_v62 = vld [vmem:[#allocation3 + $0x168] sm:$0xff]   ;;  %v18868_v63 = vld [vmem:[%s18825_s22 + $0x40] sm:$0xff]  ;;  %v18949_v34 = vpack.c.bf16 %v18857_v55, %v18845_v51 }
  0x44   : > { %15811 = vmatprep.subr.bf16.mxu1 %v17883_v28  ;;  %464 = vst [vmem:[#allocation2 + $0x68] sm:$0xff] %v359_v47  ;;  %465 = vst [vmem:[#allocation2 + $0x70] sm:$0xff] %v360_v48  ;;  %v18877_v6 = vld [vmem:[%s18825_s22 + $0x48] sm:$0xff]  ;;  %v18889_v12 = vld [vmem:[%s18825_s22 + $0x50] sm:$0xff] }
  0x45   : > { %15700 = vmatpush3.bf16.msra.mxu0 %v17882_v27  ;;  %466 = vst [vmem:[#allocation2 + $0x88] sm:$0xff] %v18845_v51  ;;  %467 = vst [vmem:[#allocation2 + $0x90] sm:$0xff] %v18857_v55  ;;  %v17894_v11 = vld [vmem:[#allocation3 + $0x128] sm:$0xff]   ;;  %v18892_v13 = vld [vmem:[%s18825_s22 + $0x58] sm:$0xff] }
  0x46   : > { %15701 = vmatprep.subr.bf16.mxu0 %v17885_v30  ;;  %468 = vst [vmem:[#allocation2 + $0xa8] sm:$0xff] %v18868_v63  ;;  %469 = vst [vmem:[#allocation2 + $0xb0] sm:$0xff] %v18877_v6  ;;  %v17895_v17 = vld [vmem:[#allocation3 + $0x160] sm:$0xff]   ;;  %v18912_v21 = vld [vmem:[%s18825_s22 + $0x68] sm:$0xff] }
  0x47   : > { %15812 = vmatpush3.bf16.msra.mxu1 %v17884_v29  ;;  %v18842_v49 = vld [vmem:[#allocation2 + $0x7] sm:$0xff]  ;;  %470 = vst [vmem:[#allocation2 + $0xc8] sm:$0xff] %v18889_v12  ;;  %471 = vst [vmem:[#allocation2 + $0xd0] sm:$0xff] %v18892_v13  ;;  %v18923_v25 = vld [vmem:[%s18825_s22 + $0x70] sm:$0xff] }
  0x48   : > { %15813 = vmatprep.subr.bf16.mxu1 %v17887_v32  ;;  %22005 = vst [vmem:[#allocation9_spill] sm:$0xff] %v18842_v49  ;;  %v18847_v52 = vld [vmem:[#allocation2 + $0xf] sm:$0xff]  ;;  %5679 = vst [vmem:[#allocation2] sm:$0xff] %v21976_v0  ;;  %v18909_v20 = vld [vmem:[%s18825_s22 + $0x60] sm:$0xff] }
  0x49   : > { %15702 = vmatpush3.bf16.msra.mxu0 %v17886_v31  ;;  %22006 = vst [vmem:[#allocation10_spill] sm:$0xff] %v18847_v52  ;;  %v18849_v53 = vld [vmem:[#allocation2 + $0x9] sm:$0xff]  ;;  %v18851_v54 = vld [vmem:[#allocation2 + $0x11] sm:$0xff]  ;;  %472 = vst [vmem:[#allocation2 + $0xe8] sm:$0xff] %v18909_v20 }
  0x4a   : > { %15911 = vmatprep.subr.bf16.mxu0 %v17889_v39  ;;  %22007 = vst [vmem:[#allocation11_spill] sm:$0xff] %v18849_v53  ;;  %22008 = vst [vmem:[#allocation12_spill] sm:$0xff] %v18851_v54  ;;  %v494_v56 = vld [vmem:[#allocation2 + $0x27] sm:$0xff]  ;;  %v589_v57 = vld [vmem:[#allocation2 + $0x2f] sm:$0xff] }
  0x4b   : > { %15814 = vmatpush3.bf16.msra.mxu1 %v17888_v38  ;;  %13692 = vst [vmem:[#allocation2 + $0x18] sm:$0xff] %v21976_v0  ;;  %5680 = vst [vmem:[#allocation2 + $0x8] sm:$0xff] %v21976_v0  ;;  %v784_v60 = vpack.c.bf16 %v589_v57, %v494_v56  ;;  %v559_v61 = vld [vmem:[#allocation2 + $0x31] sm:$0xff]  ;;  %v590_v1 = vld [vmem:[#allocation2 + $0x47] sm:$0xff]  ;;  %v18997_v57 = vpack.c.bf16 %v18877_v6, %v18868_v63 }
  0x4c   : > { %1541 = vmatmul.mubr.bf16.vlgmr.msra.gmra.mxu0 %v781_v37  ;;  %5681 = vst [vmem:[#allocation2 + $0x10] sm:$0xff] %v21976_v0  ;;  %2381 = vst [vmem:[#allocation2 + $0x20] sm:$0xff] %v21976_v0  ;;  %v591_v2 = vld [vmem:[#allocation2 + $0x4f] sm:$0xff]  ;;  %v592_v4 = vld [vmem:[#allocation2 + $0x67] sm:$0xff] }
  0x4d   : > { %15912 = vmatpush3.bf16.msra.mxu0 %v17890_v42  ;;  %1548 = vmatprep.mubr.bf16.mxu0 %v18835_v43  ;;  %2384 = vst [vmem:[#allocation2 + $0x38] sm:$0xff] %v21976_v0  ;;  %v18872_v3 = vpack.c.bf16 %v591_v2, %v590_v1  ;;  %v18874_v5 = vld [vmem:[#allocation2 + $0x51] sm:$0xff]  ;;  %2385 = vst [vmem:[#allocation2 + $0x40] sm:$0xff] %v21976_v0  ;;  %v558_v7 = vld [vmem:[#allocation2 + $0x29] sm:$0xff] }
  0x4e   : > { %15913 = vmatprep.subr.bf16.mxu0 %v17891_v46  ;;  %1701 = vmatprep.mubr.bf16.mxu1 %v784_v60  ;;  %22009 = vst [vmem:[#allocation13_spill] sm:$0xff] %v18874_v5  ;;  %v593_v8 = vld [vmem:[#allocation2 + $0x6f] sm:$0xff]  ;;  %2388 = vst [vmem:[#allocation2 + $0x58] sm:$0xff] %v21976_v0  ;;  %v594_v10 = vld [vmem:[#allocation2 + $0x87] sm:$0xff]  ;;  %v18899_v15 = vpack.c.bf16 %v559_v61, %v558_v7 }
  0x4f   : > { %1702 = vmatmul.mubr.bf16.vlgmr.msra.gmra.mxu1 %v783_v58  ;;  %v18881_v9 = vld [vmem:[#allocation2 + $0x71] sm:$0xff]  ;;  %2389 = vst [vmem:[#allocation2 + $0x60] sm:$0xff] %v21976_v0  ;;  %2393 = vst [vmem:[#allocation2 + $0x80] sm:$0xff] %v21976_v0  ;;  %v18904_v18 = vpack.c.bf16 %v593_v8, %v592_v4  ;;  %v18906_v19 = vld [vmem:[#allocation2 + $0xa7] sm:$0xff] }
  0x50   : > { %22010 = vst [vmem:[#allocation14_spill] sm:$0xff] %v18881_v9  ;;  %1709 = vmatprep.mubr.bf16.mxu1 %v18872_v3  ;;  %2392 = vst [vmem:[#allocation2 + $0x78] sm:$0xff] %v21976_v0  ;;  %v18895_v14 = vld [vmem:[#allocation2 + $0x91] sm:$0xff]  ;;  %v17896_v22 = vld [vmem:[#allocation3 + $0x120] sm:$0xff]  }
  0x51   : > { %15914 = vmatpush3.bf16.msra.mxu0 %v17892_v50  ;;  %22011 = vst [vmem:[#allocation15_spill] sm:$0xff] %v18895_v14  ;;  %2396 = vst [vmem:[#allocation2 + $0x98] sm:$0xff] %v21976_v0  ;;  %v749_v23 = vld [vmem:[#allocation2 + $0x49] sm:$0xff]  ;;  %v18918_v24 = vld [vmem:[#allocation2 + $0xb1] sm:$0xff] }
  0x52   : > { %15915 = vmatprep.subr.bf16.mxu0 %v17893_v62  ;;  %473 = vst [vmem:[#allocation2 + $0xf0] sm:$0xff] %v18912_v21  ;;  %2397 = vst [vmem:[#allocation2 + $0xa0] sm:$0xff] %v21976_v0  ;;  %v18926_v26 = vld [vmem:[%s18825_s22 + $0x78] sm:$0xff]  ;;  %v18933_v28 = vld [vmem:[%s18825_s22 + $0x80] sm:$0xff]  ;;  %v18945_v33 = vpack.c.bf16 %v18874_v5, %v749_v23  ;;  %v19040_v23 = vpack.c.bf16 %v18892_v13, %v18889_v12 }
  0x53   : > { %22012 = vst [vmem:[#allocation16_spill] sm:$0xff] %v18918_v24  ;;  %2400 = vst [vmem:[#allocation2 + $0xb8] sm:$0xff] %v21976_v0  ;;  %v17897_v27 = vld [vmem:[#allocation3 + $0x158] sm:$0xff]   ;;  %v595_v29 = vld [vmem:[#allocation2 + $0x8f] sm:$0xff]  ;;  %v19102_v49 = vpack.c.bf16 %v18926_v26, %v18923_v25 }
  0x54   : > { %1549 = vmatmul.mubr.bf16.gmra.mxu0 %v784_v60  ;;  %474 = vst [vmem:[#allocation2 + $0x108] sm:$0xff] %v18923_v25  ;;  %475 = vst [vmem:[#allocation2 + $0x110] sm:$0xff] %v18926_v26  ;;  %v18935_v30 = vld [vmem:[#allocation2 + $0xc7] sm:$0xff]  ;;  %v18938_v31 = vld [vmem:[#allocation2 + $0xd1] sm:$0xff]  ;;  %v18956_v37 = vpack.c.bf16 %v595_v29, %v594_v10 }
  0x55   : > { %1556 = vmatprep.mubr.bf16.mxu0 %v18863_v59  ;;  %15916 = vmatpush3.bf16.msra.mxu0 %v17894_v11  ;;  %476 = vst [vmem:[#allocation2 + $0x128] sm:$0xff] %v18933_v28  ;;  %22013 = vst [vmem:[#allocation17_spill] sm:$0xff] %v18938_v31  ;;  %v18941_v32 = vld [vmem:[%s18825_s22 + $0x88] sm:$0xff]  ;;  %v17898_v35 = vld [vmem:[#allocation3 + $0x118] sm:$0xff]  }
  0x56   : > { %15917 = vmatprep.subr.bf16.mxu0 %v17895_v17  ;;  %2401 = vst [vmem:[#allocation2 + $0xc0] sm:$0xff] %v21976_v0  ;;  %477 = vst [vmem:[#allocation2 + $0x130] sm:$0xff] %v18941_v32  ;;  %v18953_v36 = vld [vmem:[%s18825_s22 + $0x90] sm:$0xff]  ;;  %v18958_v38 = vld [vmem:[#allocation2 + $0xe7] sm:$0xff] }
  0x57   : > { %1710 = vmatmul.mubr.bf16.gmra.mxu1 %v18899_v15  ;;  %2404 = vst [vmem:[#allocation2 + $0xd8] sm:$0xff] %v21976_v0  ;;  %478 = vst [vmem:[#allocation2 + $0x148] sm:$0xff] %v18953_v36  ;;  %v18964_v40 = vld [vmem:[%s18825_s22 + $0x98] sm:$0xff]  ;;  %v17899_v41 = vld [vmem:[#allocation3 + $0x150] sm:$0xff]  }
  0x58   : > { %1717 = vmatprep.mubr.bf16.mxu1 %v18904_v18  ;;  %2405 = vst [vmem:[#allocation2 + $0xe0] sm:$0xff] %v21976_v0  ;;  %479 = vst [vmem:[#allocation2 + $0x150] sm:$0xff] %v18964_v40  ;;  %v18970_v42 = vld [vmem:[%s18825_s22 + $0xa0] sm:$0xff]  ;;  %v751_v44 = vld [vmem:[#allocation2 + $0x69] sm:$0xff] }
  0x59   : > { %15918 = vmatpush3.bf16.msra.mxu0 %v17896_v22  ;;  %v18961_v39 = vld [vmem:[#allocation2 + $0xf1] sm:$0xff]  ;;  %480 = vst [vmem:[#allocation2 + $0x168] sm:$0xff] %v18970_v42  ;;  %v18984_v50 = vld [vmem:[%s18825_s22 + $0xa8] sm:$0xff]  ;;  %v18993_v56 = vpack.c.bf16 %v18881_v9, %v751_v44  ;;  %v19020_v4 = vld [vmem:[%s18825_s22 + $0xc0] sm:$0xff] }
  0x5a   : > { %15919 = vmatprep.subr.bf16.mxu0 %v17897_v27  ;;  %2408 = vst [vmem:[#allocation2 + $0xf8] sm:$0xff] %v21976_v0  ;;  %v597_v45 = vld [vmem:[#allocation2 + $0xaf] sm:$0xff]  ;;  %481 = vst [vmem:[#allocation2 + $0x170] sm:$0xff] %v18984_v50  ;;  %v19005_v61 = vld [vmem:[%s18825_s22 + $0xb8] sm:$0xff] }
  0x5b   : > { %v18975_v46 = vld [vmem:[#allocation2 + $0x107] sm:$0xff]  ;;  %v18981_v48 = vld [vmem:[#allocation2 + $0x111] sm:$0xff]  ;;  %v19009_v62 = vpack.c.bf16 %v597_v45, %v18906_v19  ;;  %483 = vst [vmem:[#allocation2 + $0x190] sm:$0xff] %v19005_v61  ;;  %484 = vst [vmem:[#allocation2 + $0x1a8] sm:$0xff] %v19020_v4 }
  0x5c   : > { %1557 = vmatmul.mubr.bf16.gmra.mxu0 %v18872_v3  ;;  %v18979_v47 = vld [vmem:[#allocation2 + $0x127] sm:$0xff]  ;;  %2409 = vst [vmem:[#allocation2 + $0x100] sm:$0xff] %v21976_v0  ;;  %v17900_v51 = vld [vmem:[#allocation3 + $0x110] sm:$0xff]   ;;  %2412 = vst [vmem:[#allocation2 + $0x118] sm:$0xff] %v21976_v0 }
  0x5d   : > { %1564 = vmatprep.mubr.bf16.mxu0 %v18901_v16  ;;  %15920 = vmatpush3.bf16.msra.mxu0 %v17898_v35  ;;  %2413 = vst [vmem:[#allocation2 + $0x120] sm:$0xff] %v21976_v0  ;;  %v18990_v55 = vld [vmem:[#allocation2 + $0x131] sm:$0xff]  ;;  %v17901_v1 = vld [vmem:[#allocation3 + $0x148] sm:$0xff]   ;;  %v17910_v54 = vld [vmem:[#allocation3 + $0x1a0] sm:$0xff]  }
  0x5e   : > { %15921 = vmatprep.subr.bf16.mxu0 %v17899_v41  ;;  %v18999_v58 = vld [vmem:[#allocation2 + $0x147] sm:$0xff]  ;;  %v19002_v60 = vld [vmem:[%s18825_s22 + $0xb0] sm:$0xff]  ;;  %2416 = vst [vmem:[#allocation2 + $0x138] sm:$0xff] %v21976_v0  ;;  %v17903_v17 = vld [vmem:[#allocation3 + $0x1f8] sm:$0xff]  }
  0x5f   : > { %1718 = vmatmul.mubr.bf16.gmra.mxu1 %v18945_v33  ;;  %482 = vst [vmem:[#allocation2 + $0x188] sm:$0xff] %v19002_v60  ;;  %2417 = vst [vmem:[#allocation2 + $0x140] sm:$0xff] %v21976_v0  ;;  %v19014_v63 = vld [vmem:[#allocation2 + $0x151] sm:$0xff]  ;;  %v19023_v6 = vld [vmem:[%s18825_s22 + $0xc8] sm:$0xff]  ;;  %16023 = vmatprep.subr.bf16.mxu1 %v17903_v17  ;;  %v19074_v17 = vpack.c.bf16 %v18912_v21, %v18909_v20 }
  0x60   : > { %1725 = vmatprep.mubr.bf16.mxu1 %v18956_v37  ;;  %v19017_v2 = vld [vmem:[#allocation2 + $0x167] sm:$0xff]  ;;  %2420 = vst [vmem:[#allocation2 + $0x158] sm:$0xff] %v21976_v0  ;;  %485 = vst [vmem:[#allocation2 + $0x1b0] sm:$0xff] %v19023_v6  ;;  %v599_v10 = vld [vmem:[#allocation2 + $0xcf] sm:$0xff] }
  0x61   : > { %15922 = vmatpush3.bf16.msra.mxu0 %v17900_v51  ;;  %v17902_v7 = vld [vmem:[#allocation3 + $0x108] sm:$0xff]   ;;  %2421 = vst [vmem:[#allocation2 + $0x160] sm:$0xff] %v21976_v0  ;;  %v19032_v11 = vld [vmem:[#allocation2 + $0x171] sm:$0xff]  ;;  %v19045_v29 = vpack.c.bf16 %v599_v10, %v18935_v30  ;;  %v17911_v53 = vld [vmem:[#allocation3 + $0x140] sm:$0xff]  }
  0x62   : > { %15923 = vmatprep.subr.bf16.mxu0 %v17901_v1  ;;  %v564_v8 = vld [vmem:[#allocation2 + $0x89] sm:$0xff]  ;;  %2424 = vst [vmem:[#allocation2 + $0x178] sm:$0xff] %v21976_v0  ;;  %v17904_v19 = vld [vmem:[#allocation3 + $0x1b8] sm:$0xff]   ;;  %v17912_v20 = vld [vmem:[#allocation3 + $0x100] sm:$0xff]  }
  0x63   : > { %v19036_v22 = vpack.c.bf16 %v18895_v14, %v564_v8  ;;  %v19047_v35 = vld [vmem:[#allocation2 + $0x191] sm:$0xff]  ;;  %16024 = vmatpush3.bf16.msra.mxu1 %v17904_v19  ;;  %v566_v12 = vld [vmem:[#allocation2 + $0xa9] sm:$0xff]  ;;  %v17909_v19 = vld [vmem:[#allocation3 + $0x1e0] sm:$0xff]   ;;  %22015 = vst [vmem:[#allocation19_spill] sm:$0xff] %v19102_v49 }
  0x64   : > { %1565 = vmatmul.mubr.bf16.gmra.mxu0 %v18904_v18  ;;  %v17905_v41 = vld [vmem:[#allocation3 + $0x1f0] sm:$0xff]   ;;  %2428 = vst [vmem:[#allocation2 + $0x198] sm:$0xff] %v21976_v0  ;;  %v19052_v13 = vld [vmem:[#allocation2 + $0x1a7] sm:$0xff]  ;;  %v19060_v51 = vld [vmem:[%s18825_s22 + $0xd8] sm:$0xff]  ;;  %v19070_v10 = vpack.c.bf16 %v18918_v24, %v566_v12 }
  0x65   : > { %1572 = vmatprep.mubr.bf16.mxu0 %v18949_v34  ;;  %15924 = vmatpush3.bf16.msra.mxu0 %v17902_v7  ;;  %v17906_v44 = vld [vmem:[#allocation3 + $0x1b0] sm:$0xff]   ;;  %2429 = vst [vmem:[#allocation2 + $0x1a0] sm:$0xff] %v21976_v0  ;;  %487 = vst [vmem:[#allocation2 + $0x1d0] sm:$0xff] %v19060_v51  ;;  %v17907_v7 = vld [vmem:[#allocation3 + $0x1e8] sm:$0xff]  }
  0x66   : > { %v19042_v27 = vld [vmem:[#allocation2 + $0x187] sm:$0xff]  ;;  %v601_v30 = vld [vmem:[#allocation2 + $0xef] sm:$0xff]  ;;  %16025 = vmatprep.subr.bf16.mxu1 %v17905_v41  ;;  %15925 = vmatprep.subr.bf16.mxu0 %v17911_v53  ;;  %v19132_v9 = vld [vmem:[#allocation3 + $0x238] sm:$0xff]  }
  0x67   : > { %1726 = vmatmul.mubr.bf16.gmra.mxu1 %v18993_v56  ;;  %2425 = vst [vmem:[#allocation2 + $0x180] sm:$0xff] %v21976_v0  ;;  %v19057_v45 = vld [vmem:[%s18825_s22 + $0xd0] sm:$0xff]  ;;  %v17908_v8 = vld [vmem:[#allocation3 + $0x1a8] sm:$0xff]   ;;  %v19077_v41 = vpack.c.bf16 %v601_v30, %v18958_v38 }
  0x68   : > { %1733 = vmatprep.mubr.bf16.mxu1 %v19009_v62  ;;  %486 = vst [vmem:[#allocation2 + $0x1c8] sm:$0xff] %v19057_v45  ;;  %v19066_v1 = vld [vmem:[#allocation2 + $0x1b1] sm:$0xff]  ;;  %16026 = vmatpush3.bf16.msra.mxu1 %v17906_v44  ;;  %v19080_v44 = vld [vmem:[%s18825_s22 + $0xe0] sm:$0xff]  ;;  %v19083_v52 = vld [vmem:[%s18825_s22 + $0xe8] sm:$0xff] }
  0x69   : > { %2432 = vst [vmem:[#allocation2 + $0x1b8] sm:$0xff] %v21976_v0  ;;  %16027 = vmatprep.subr.bf16.mxu1 %v17907_v7  ;;  %22014 = vst [vmem:[#allocation18_spill] sm:$0xff] %v19077_v41  ;;  %v568_v21 = vld [vmem:[#allocation2 + $0xc9] sm:$0xff]  ;;  %15926 = vmatpush3.bf16.msra.mxu0 %v17912_v20  ;;  %v17913_v7 = vld [vmem:[#allocation3 + $0x1d8] sm:$0xff]  }
  0x6a   : > { %488 = vst [vmem:[#allocation2 + $0x1e8] sm:$0xff] %v19080_v44  ;;  %489 = vst [vmem:[#allocation2 + $0x1f0] sm:$0xff] %v19083_v52  ;;  %v603_v38 = vld [vmem:[#allocation2 + $0x10f] sm:$0xff]  ;;  %17557 = vmatprep.subr.bf16.mxu0 %v19132_v9 }
  0x6b   : > { %v17915_v24 = vld [vmem:[#allocation3 + $0x1d0] sm:$0xff]   ;;  %v19105_v53 = vpack.c.bf16 %v603_v38, %v18975_v46  ;;  %v22016_v46 = vmov 0.0  }
  0x6c   : > { %1573 = vmatmul.mubr.bf16.gmra.mxu0 %v18956_v37  ;;  %16028 = vmatpush3.bf16.msra.mxu1 %v17908_v8  ;;  %v19093_v30 = vld [vmem:[#allocation2 + $0x1d1] sm:$0xff]  ;;  %v570_v25 = vld [vmem:[#allocation2 + $0xe9] sm:$0xff] }
  0x6d   : > { %1580 = vmatprep.mubr.bf16.mxu0 %v18997_v57  ;;  %16029 = vmatprep.subr.bf16.mxu1 %v17909_v19  ;;  %2436 = vst [vmem:[#allocation2 + $0x1d8] sm:$0xff] %v21976_v0  ;;  %v17914_v8 = vld [vmem:[#allocation3 + $0x198] sm:$0xff]   ;;  %v19098_v19 = vpack.c.bf16 %v18938_v31, %v568_v21  ;;  %v19108_v14 = vld [vmem:[%s18825_s22 + $0xf0] sm:$0xff]  ;;  %v17917_v21 = vld [vmem:[#allocation3 + $0x1c8] sm:$0xff]   ;;  %v19130_v31 = vpack.c.bf16 %v18941_v32, %v18933_v28 }
  0x6e   : > { %490 = vst [vmem:[#allocation2 + $0x208] sm:$0xff] %v19108_v14  ;;  %v605_v38 = vld [vmem:[#allocation2 + $0x12f] sm:$0xff] }
  0x6f   : > { %1734 = vmatmul.mubr.bf16.gmra.mxu1 %v19036_v22  ;;  %v19090_v12 = vld [vmem:[#allocation2 + $0x1c7] sm:$0xff]  ;;  %v19135_v5 = vpack.c.bf16 %v605_v38, %v18979_v47  ;;  %v607_v28 = vld [vmem:[#allocation2 + $0x14f] sm:$0xff]  ;;  %v19150_v47 = vpack.c.bf16 %v18964_v40, %v18953_v36  ;;  %v19164_v36 = vpack.c.bf16 %v18984_v50, %v18970_v42  ;;  %v19178_v42 = vpack.c.bf16 %v19005_v61, %v19002_v60 }
  0x70   : > { %1741 = vmatprep.mubr.bf16.mxu1 %v19045_v29  ;;  %2433 = vst [vmem:[#allocation2 + $0x1c0] sm:$0xff] %v21976_v0  ;;  %16030 = vmatpush3.bf16.msra.mxu1 %v17910_v54  ;;  %v19111_v54 = vld [vmem:[%s18825_s22 + $0xf8] sm:$0xff]  ;;  %v17916_v0 = vld [vmem:[#allocation3 + $0x190] sm:$0xff]   ;;  %v19192_v60 = vpack.c.bf16 %v19023_v6, %v19020_v4  ;;  %v19206_v4 = vpack.c.bf16 %v19060_v51, %v19057_v45 }
  0x71   : > { %16031 = vmatprep.subr.bf16.mxu1 %v17913_v7  ;;  %v19113_v20 = vld [vmem:[#allocation2 + $0x1e7] sm:$0xff]  ;;  %491 = vst [vmem:[#allocation2 + $0x210] sm:$0xff] %v19111_v54  ;;  %v19118_v26 = vld [vmem:[#allocation2 + $0x1f1] sm:$0xff]  ;;  %v19220_v45 = vpack.c.bf16 %v19083_v52, %v19080_v44  ;;  %v19237_v52 = vpack.c.bf16 %v19111_v54, %v19108_v14 }
  0x72   : > { %2437 = vst [vmem:[#allocation2 + $0x1e0] sm:$0xff] %v22016_v46  ;;  %2440 = vst [vmem:[#allocation2 + $0x1f8] sm:$0xff] %v22016_v46  ;;  %v17918_v7 = vld [vmem:[#allocation3 + $0x188] sm:$0xff]  }
  0x73   : > { %v611_v38 = vld [vmem:[#allocation2 + $0x18f] sm:$0xff] }
  0x74   : > { %1581 = vmatmul.mubr.bf16.gmra.mxu0 %v19009_v62  ;;  %16032 = vmatpush3.bf16.msra.mxu1 %v17914_v8  ;;  %v17919_v8 = vld [vmem:[#allocation3 + $0x1c0] sm:$0xff]   ;;  %v19181_v50 = vpack.c.bf16 %v611_v38, %v19042_v27  ;;  %v580_v27 = vld [vmem:[#allocation2 + $0x189] sm:$0xff] }
  0x75   : > { %1588 = vmatprep.mubr.bf16.mxu0 %v19040_v23  ;;  %16033 = vmatprep.subr.bf16.mxu1 %v17915_v24  ;;  %v19126_v24 = vpack.c.bf16 %v18961_v39, %v570_v25  ;;  %v19153_v25 = vpack.c.bf16 %v607_v28, %v18999_v58  ;;  %v576_v58 = vld [vmem:[#allocation2 + $0x149] sm:$0xff] }
  0x76   : > { %v615_v28 = vld [vmem:[#allocation2 + $0x1cf] sm:$0xff] }
  0x77   : > { %1742 = vmatmul.mubr.bf16.gmra.mxu1 %v19070_v10  ;;  %v19209_v6 = vpack.c.bf16 %v615_v28, %v19090_v12  ;;  %v584_v12 = vld [vmem:[#allocation2 + $0x1c9] sm:$0xff] }
  0x78   : > { %1749 = vmatprep.mubr.bf16.mxu1 %v19077_v41  ;;  %16034 = vmatpush3.bf16.msra.mxu1 %v17916_v0  ;;  %v572_v0 = vld [vmem:[#allocation2 + $0x109] sm:$0xff] }
  0x79   : > { %16035 = vmatprep.subr.bf16.mxu1 %v17917_v21  ;;  %v19146_v32 = vpack.c.bf16 %v18981_v48, %v572_v0  ;;  %v609_v21 = vld [vmem:[#allocation2 + $0x16f] sm:$0xff] }
  0x7a   : > { %v19167_v40 = vpack.c.bf16 %v609_v21, %v19017_v2  ;;  %v578_v2 = vld [vmem:[#allocation2 + $0x169] sm:$0xff] }
  0x7b   : > { %v19188_v0 = vpack.c.bf16 %v19032_v11, %v578_v2  ;;  %v617_v21 = vld [vmem:[#allocation2 + $0x1ef] sm:$0xff]  ;;  %v19230_v2 = vpack.c.bf16 %v19093_v30, %v584_v12 }
  0x7c   : > { %1589 = vmatmul.mubr.bf16.gmra.mxu0 %v19045_v29  ;;  %16036 = vmatpush3.bf16.msra.mxu1 %v17918_v7  ;;  %v19174_v7 = vpack.c.bf16 %v19014_v63, %v576_v58  ;;  %v19223_v51 = vpack.c.bf16 %v617_v21, %v19113_v20  ;;  %v619_v38 = vld [vmem:[#allocation2 + $0x20f] sm:$0xff] }
  0x7d   : > { %1596 = vmatprep.mubr.bf16.mxu0 %v19074_v17  ;;  %16037 = vmatprep.subr.bf16.mxu1 %v17919_v8  ;;  %v613_v8 = vld [vmem:[#allocation2 + $0x1af] sm:$0xff] }
  0x7e   : > { %v19195_v61 = vpack.c.bf16 %v613_v8, %v19052_v13  ;;  %v582_v13 = vld [vmem:[#allocation2 + $0x1a9] sm:$0xff]  ;;  %v19243_v20 = vld [vmem:[#allocation2 + $0x211] sm:$0xff] }
  0x7f   : > { %1750 = vmatmul.mubr.bf16.gmra.mxu1 %v19098_v19  ;;  %v19216_v58 = vpack.c.bf16 %v19066_v1, %v582_v13  ;;  %v586_v44 = vld [vmem:[#allocation2 + $0x1e9] sm:$0xff]  ;;  %v19261_v12 = vld [vmem:[#allocation2 + $0x231] sm:$0xff] }
  0x80   : > { %1757 = vmatprep.mubr.bf16.mxu1 %v19105_v53  ;;  %v17922_v28 = vld [vmem:[#allocation3 + $0x230] sm:$0xff]   ;;  %v19248_v13 = vld [vmem:[#allocation2 + $0x227] sm:$0xff] }
  0x81   : > { %v19250_v14 = vld [vmem:[#allocation2 + $0x22f] sm:$0xff] }
  0x82   : > { %v922_v54 = vpack.c.bf16 %v19250_v14, %v19248_v13  ;;  %v19259_v21 = vld [vmem:[#allocation2 + $0x229] sm:$0xff] }
  0x84   : > { %1597 = vmatmul.mubr.bf16.gmra.mxu0 %v19077_v41  ;;  %v17920_v41 = vld [vmem:[#allocation3 + $0x180] sm:$0xff]  }
  0x85   : > { %1604 = vmatprep.mubr.bf16.mxu0 %v19102_v49  ;;  %v19137_v49 = vld [vmem:[#allocation2 + $0x207] sm:$0xff]  ;;  %16038 = vmatpush3.bf16.msra.mxu1 %v17920_v41 }
  0x86   : > { %2441 = vst [vmem:[#allocation2 + $0x200] sm:$0xff] %v22016_v46  ;;  %v574_v46 = vld [vmem:[#allocation2 + $0x129] sm:$0xff]  ;;  %v19233_v8 = vpack.c.bf16 %v619_v38, %v19137_v49  ;;  %v19246_v49 = vpack.c.bf16 %v19118_v26, %v586_v44  ;;  %v17924_v38 = vld [vmem:[#allocation3 + $0x220] sm:$0xff]  }
  0x87   : > { %1758 = vmatmul.mubr.bf16.gmra.mxu1 %v19126_v24  ;;  %v19160_v41 = vpack.c.bf16 %v18990_v55, %v574_v46  ;;  %v19202_v46 = vpack.c.bf16 %v19047_v35, %v580_v27  ;;  %v18577_v27 = vld [vmem:[#allocation2 + $0x220] sm:$0xff] }
  0x88   : > { %1765 = vmatprep.mubr.bf16.mxu1 %v19135_v5  ;;  %2444 = vst [vmem:[#allocation2 + $0x218] sm:$0xff] %v18577_v27  ;;  %2445 = vst [vmem:[#allocation2 + $0x220] sm:$0xff] %v18577_v27 }
  0x89   : > { %2446 = vst [vmem:[#allocation2 + $0x228] sm:$0xff] %v18577_v27  ;;  %2447 = vst [vmem:[#allocation2 + $0x230] sm:$0xff] %v18577_v27 }
  0x8a   : > { %2448 = vst [vmem:[#allocation2 + $0x238] sm:$0xff] %v18577_v27 }
  0x8c   : > { %1605 = vmatmul.mubr.bf16.gmra.mxu0 %v19105_v53 }
  0x8d   : > { %1612 = vmatprep.mubr.bf16.mxu0 %v19130_v31 }
  0x8f   : > { %1766 = vmatmul.mubr.bf16.gmra.mxu1 %v19146_v32 }
  0x90   : > { %1773 = vmatprep.mubr.bf16.mxu1 %v19153_v25  ;;  %v19271_v44 = vld [vmem:[#allocation2 + $0x229] sm:$0xff] }
  0x91   : > { %22019 = vst [vmem:[#allocation22_spill] sm:$0xff] %v19271_v44 }
  0x94   : > { %1613 = vmatmul.mubr.bf16.gmra.mxu0 %v19135_v5 }
  0x95   : > { %1620 = vmatprep.mubr.bf16.mxu0 %v19150_v47 }
  0x97   : > { %1774 = vmatmul.mubr.bf16.gmra.mxu1 %v19160_v41 }
  0x98   : > { %1781 = vmatprep.mubr.bf16.mxu1 %v19167_v40 }
  0x9c   : > { %1621 = vmatmul.mubr.bf16.gmra.mxu0 %v19153_v25 }
  0x9d   : > { %1628 = vmatprep.mubr.bf16.mxu0 %v19164_v36 }
  0x9f   : > { %1782 = vmatmul.mubr.bf16.gmra.mxu1 %v19174_v7 }
  0xa0   : > { %1789 = vmatprep.mubr.bf16.mxu1 %v19181_v50 }
  0xa4   : > { %1629 = vmatmul.mubr.bf16.gmra.mxu0 %v19167_v40 }
  0xa5   : > { %1636 = vmatprep.mubr.bf16.mxu0 %v19178_v42 }
  0xa7   : > { %1790 = vmatmul.mubr.bf16.gmra.mxu1 %v19188_v0 }
  0xa8   : > { %1797 = vmatprep.mubr.bf16.mxu1 %v19195_v61 }
  0xac   : > { %1637 = vmatmul.mubr.bf16.gmra.mxu0 %v19181_v50 }
  0xad   : > { %1644 = vmatprep.mubr.bf16.mxu0 %v19192_v60 }
  0xaf   : > { %1798 = vmatmul.mubr.bf16.gmra.mxu1 %v19202_v46 }
  0xb0   : > { %1805 = vmatprep.mubr.bf16.mxu1 %v19209_v6 }
  0xb4   : > { %1645 = vmatmul.mubr.bf16.gmra.mxu0 %v19195_v61 }
  0xb5   : > { %1652 = vmatprep.mubr.bf16.mxu0 %v19206_v4 }
  0xb7   : > { %1806 = vmatmul.mubr.bf16.gmra.mxu1 %v19216_v58 }
  0xb8   : > { %1813 = vmatprep.mubr.bf16.mxu1 %v19223_v51 }
  0xbc   : > { %1653 = vmatmul.mubr.bf16.gmra.mxu0 %v19209_v6 }
  0xbd   : > { %1660 = vmatprep.mubr.bf16.mxu0 %v19220_v45 }
  0xbf   : > { %1814 = vmatmul.mubr.bf16.gmra.mxu1 %v19230_v2 }
  0xc0   : > { %1821 = vmatprep.mubr.bf16.mxu1 %v19233_v8 }
  0xc4   : > { %1661 = vmatmul.mubr.bf16.gmra.mxu0 %v19223_v51 }
  0xc5   : > { %1862 = vmatprep.mubr.bf16.mxu0 %v18899_v15  ;;  %v17923_v15 = vld [vmem:[#allocation3 + $0x228] sm:$0xff]  }
  0xc7   : > { %1822 = vmatmul.mubr.bf16.gmra.mxu1 %v19246_v49 }
  0xc8   : > { %2023 = vmatprep.mubr.bf16.mxu1 %v18863_v59 }
  0xcc   : > { %1863 = vmatmul.mubr.bf16.vlgmr.msra.gmra.mxu0 %v18835_v43  ;;  %v17925_v43 = vld [vmem:[#allocation3 + $0x218] sm:$0xff]  }
  0xcd   : > { %17558 = vmatpush3.bf16.msra.mxu0 %v19132_v9  ;;  %1870 = vmatprep.mubr.bf16.mxu0 %v18945_v33  ;;  %v19267_v9 = vld [vmem:[#allocation2 + $0x227] sm:$0xff]  ;;  %v19269_v33 = vld [vmem:[#allocation2 + $0x22f] sm:$0xff] }
  0xce   : > { %17559 = vmatprep.subr.bf16.mxu0 %v17922_v28  ;;  %22017 = vst [vmem:[#allocation20_spill] sm:$0xff] %v19267_v9  ;;  %22018 = vst [vmem:[#allocation21_spill] sm:$0xff] %v19269_v33  ;;  %v17966_v33 = vld [vmem:[#allocation3 + $0x368] sm:$0xff]  }
  0xcf   : > { %2024 = vmatmul.mubr.bf16.vlgmr.msra.gmra.mxu1 %v18872_v3  ;;  %13757 = vst [vmem:[#allocation2 + $0x220] sm:$0xff] %v18577_v27  ;;  %13758 = vst [vmem:[#allocation2 + $0x228] sm:$0xff] %v18577_v27  ;;  %v17927_v3 = vld [vmem:[#allocation3 + $0x208] sm:$0xff]  }
  0xd0   : > { %2031 = vmatprep.mubr.bf16.mxu1 %v18901_v16 }
  0xd1   : > { %17560 = vmatpush3.bf16.msra.mxu0 %v17922_v28  ;;  %v19273_v28 = vld [vmem:[#allocation2 + $0x231] sm:$0xff] }
  0xd2   : > { %17561 = vmatprep.subr.bf16.mxu0 %v17923_v15  ;;  %22020 = vst [vmem:[#allocation23_spill] sm:$0xff] %v19273_v28  ;;  %13760 = vst [vmem:[#allocation2 + $0x238] sm:$0xff] %v18577_v27 }
  0xd3   : > { %13759 = vst [vmem:[#allocation2 + $0x230] sm:$0xff] %v18577_v27 }
  0xd4   : > { %1871 = vmatmul.mubr.bf16.gmra.mxu0 %v18863_v59  ;;  %v17926_v59 = vld [vmem:[#allocation3 + $0x210] sm:$0xff]  }
  0xd5   : > { %1878 = vmatprep.mubr.bf16.mxu0 %v18993_v56  ;;  %17562 = vmatpush3.bf16.msra.mxu0 %v17923_v15  ;;  %v17928_v56 = vld [vmem:[#allocation3 + $0x200] sm:$0xff]  }
  0xd6   : > { %17563 = vmatprep.subr.bf16.mxu0 %v17924_v38 }
  0xd7   : > { %2032 = vmatmul.mubr.bf16.gmra.mxu1 %v18904_v18  ;;  %v22022_v18 = vld [vmem:[#allocation19_spill] sm:$0xff] }
  0xd8   : > { %2039 = vmatprep.mubr.bf16.mxu1 %v18949_v34 }
  0xd9   : > { %17564 = vmatpush3.bf16.msra.mxu0 %v17924_v38 }
  0xda   : > { %17565 = vmatprep.subr.bf16.mxu0 %v17925_v43 }
  0xdc   : > { %1879 = vmatmul.mubr.bf16.gmra.mxu0 %v18901_v16  ;;  %v22021_v16 = vld [vmem:[#allocation18_spill] sm:$0xff] }
  0xdd   : > { %1886 = vmatprep.mubr.bf16.mxu0 %v19036_v22  ;;  %17566 = vmatpush3.bf16.msra.mxu0 %v17925_v43 }
  0xde   : > { %17567 = vmatprep.subr.bf16.mxu0 %v17926_v59 }
  0xdf   : > { %2040 = vmatmul.mubr.bf16.gmra.mxu1 %v18956_v37  ;;  %v924_v37 = vpack.c.bf16 %v19261_v12, %v19259_v21 }
  0xe0   : > { %2047 = vmatprep.mubr.bf16.mxu1 %v18997_v57 }
  0xe1   : > { %17568 = vmatpush3.bf16.msra.mxu0 %v17926_v59 }
  0xe2   : > { %17569 = vmatprep.subr.bf16.mxu0 %v17927_v3 }
  0xe4   : > { %1887 = vmatmul.mubr.bf16.gmra.mxu0 %v18949_v34 }
  0xe5   : > { %1894 = vmatprep.mubr.bf16.mxu0 %v19070_v10  ;;  %17570 = vmatpush3.bf16.msra.mxu0 %v17927_v3  ;;  %v19305_v10 = vld [vmem:[#allocation5] ss:$0 sm:$0xff] }
  0xe6   : > { %17571 = vmatprep.subr.bf16.mxu0 %v17928_v56 }
  0xe7   : > { %2048 = vmatmul.mubr.bf16.gmra.mxu1 %v19009_v62 }
  0xe8   : > { %2055 = vmatprep.mubr.bf16.mxu1 %v19040_v23 }
  0xe9   : > { %17572 = vmatpush3.bf16.msra.mxu0 %v17928_v56 }
  0xec   : > { %1895 = vmatmul.mubr.bf16.gmra.mxu0 %v18997_v57 }
  0xed   : > { %1902 = vmatprep.mubr.bf16.mxu0 %v19098_v19 }
  0xef   : > { %2056 = vmatmul.mubr.bf16.gmra.mxu1 %v19045_v29 }
  0xf0   : > { %2063 = vmatprep.mubr.bf16.mxu1 %v19074_v17 }
  0xf4   : > { %1903 = vmatmul.mubr.bf16.gmra.mxu0 %v19040_v23 }
  0xf5   : > { %1910 = vmatprep.mubr.bf16.mxu0 %v19126_v24 }
  0xf7   : > { %2064 = vmatmul.mubr.bf16.gmra.mxu1 %v22021_v16 }
  0xf8   : > { %2071 = vmatprep.mubr.bf16.mxu1 %v22022_v18 }
  0xfc   : > { %1911 = vmatmul.mubr.bf16.gmra.mxu0 %v19074_v17 }
  0xfd   : > { %1918 = vmatprep.mubr.bf16.mxu0 %v19146_v32 }
  0xff   : > { %2072 = vmatmul.mubr.bf16.gmra.mxu1 %v19105_v53 }
 0x100   : > { %2079 = vmatprep.mubr.bf16.mxu1 %v19130_v31 }
 0x104   : > { %1919 = vmatmul.mubr.bf16.gmra.mxu0 %v22022_v18 }
 0x105   : > { %1926 = vmatprep.mubr.bf16.mxu0 %v19160_v41 }
 0x107   : > { %2080 = vmatmul.mubr.bf16.gmra.mxu1 %v19135_v5 }
 0x108   : > { %2087 = vmatprep.mubr.bf16.mxu1 %v19150_v47 }
 0x10c   : > { %v15703_v34 = vpop.f32.mrf.mxu0  ;;  %1927 = vmatmul.mubr.bf16.gmra.mxu0 %v19130_v31 }
 0x10d   : > { %1934 = vmatprep.mubr.bf16.mxu0 %v19174_v7 }
 0x10e   : > { %v15704_v57 = vpop.f32.mrf.mxu0 }
 0x10f   : > { %v15705_v62 = vadd.f32 %v15704_v57, %v15703_v34  ;;  %v15815_v19 = vpop.f32.mrf.mxu1  ;;  %2088 = vmatmul.mubr.bf16.gmra.mxu1 %v19153_v25 }
 0x110   : > { %v15706_v22 = vpop.f32.mrf.mxu0  ;;  %2095 = vmatprep.mubr.bf16.mxu1 %v19164_v36 }
 0x111   : > { %v1543_v31 = vadd.f32 %v15705_v62, %v19305_v10  ;;  %v15816_v53 = vpop.f32.mrf.mxu1 }
 0x112   : > { %v15707_v23 = vpop.f32.mrf.mxu0  ;;  %v15817_v32 = vadd.f32 %v15816_v53, %v15815_v19 }
 0x113   : > { %v15708_v29 = vadd.f32 %v15707_v23, %v15706_v22  ;;  %v15818_v7 = vpop.f32.mrf.mxu1 }
 0x114   : > { %v15709_v17 = vpop.f32.mrf.mxu0  ;;  %1935 = vmatmul.mubr.bf16.gmra.mxu0 %v19150_v47  ;;  %v19312_v27 = vadd.f32 %v15817_v32, %v1543_v31  ;;  %v17929_v31 = vld [vmem:[#allocation3 + $0x2b8] sm:$0xff]  }
 0x115   : > { %1942 = vmatprep.mubr.bf16.mxu0 %v19188_v0  ;;  %v1546_v15 = vadd.f32 %v15708_v29, %v19305_v10  ;;  %v15819_v38 = vpop.f32.mrf.mxu1  ;;  %16159 = vmatprep.subr.bf16.mxu1 %v17929_v31 }
 0x116   : > { %v15710_v5 = vpop.f32.mrf.mxu0  ;;  %v15820_v25 = vadd.f32 %v15819_v38, %v15818_v7 }
 0x117   : > { %v15711_v24 = vadd.f32 %v15710_v5, %v15709_v17  ;;  %v15821_v0 = vpop.f32.mrf.mxu1  ;;  %2096 = vmatmul.mubr.bf16.gmra.mxu1 %v19167_v40  ;;  %v17930_v5 = vld [vmem:[#allocation3 + $0x278] sm:$0xff]  }
 0x118   : > { %v15712_v41 = vpop.f32.mrf.mxu0  ;;  %v19318_v3 = vadd.f32 %v15820_v25, %v1546_v15  ;;  %2103 = vmatprep.mubr.bf16.mxu1 %v19178_v42  ;;  %16160 = vmatpush3.bf16.msra.mxu1 %v17930_v5  ;;  %v682_v5 = vld [vmem:[#allocation2 + $0x209] sm:$0xff] }
 0x119   : > { %v1551_v56 = vadd.f32 %v15711_v24, %v19305_v10  ;;  %v15822_v18 = vpop.f32.mrf.mxu1 }
 0x11a   : > { %v15713_v47 = vpop.f32.mrf.mxu0  ;;  %v15823_v57 = vadd.f32 %v15822_v18, %v15821_v0 }
 0x11b   : > { %v15714_v43 = vadd.f32 %v15713_v47, %v15712_v41  ;;  %v15824_v22 = vpop.f32.mrf.mxu1 }
 0x11c   : > { %v15715_v59 = vpop.f32.mrf.mxu0  ;;  %1943 = vmatmul.mubr.bf16.gmra.mxu0 %v19164_v36  ;;  %v19322_v23 = vadd.f32 %v15823_v57, %v1551_v56 }
 0x11d   : > { %1950 = vmatprep.mubr.bf16.mxu0 %v19202_v46  ;;  %v1554_v36 = vadd.f32 %v15714_v43, %v19305_v10  ;;  %v15825_v40 = vpop.f32.mrf.mxu1 }
 0x11e   : > { %v15716_v16 = vpop.f32.mrf.mxu0  ;;  %v15826_v46 = vadd.f32 %v15825_v40, %v15824_v22 }
 0x11f   : > { %v15717_v34 = vadd.f32 %v15716_v16, %v15715_v59  ;;  %v15827_v53 = vpop.f32.mrf.mxu1  ;;  %2104 = vmatmul.mubr.bf16.gmra.mxu1 %v19181_v50 }
 0x120   : > { %v15718_v62 = vpop.f32.mrf.mxu0  ;;  %v19328_v24 = vadd.f32 %v15826_v46, %v1554_v36  ;;  %2111 = vmatprep.mubr.bf16.mxu1 %v19192_v60 }
 0x121   : > { %v1559_v32 = vadd.f32 %v15717_v34, %v19305_v10  ;;  %v15828_v7 = vpop.f32.mrf.mxu1 }
 0x122   : > { %v15719_v29 = vpop.f32.mrf.mxu0  ;;  %v15829_v47 = vadd.f32 %v15828_v7, %v15827_v53  ;;  %v17931_v53 = vld [vmem:[#allocation3 + $0x2b0] sm:$0xff]  }
 0x123   : > { %v15720_v17 = vadd.f32 %v15719_v29, %v15718_v62  ;;  %v15830_v38 = vpop.f32.mrf.mxu1  ;;  %16161 = vmatprep.subr.bf16.mxu1 %v17931_v53 }
 0x124   : > { %v15721_v19 = vpop.f32.mrf.mxu0  ;;  %1951 = vmatmul.mubr.bf16.gmra.mxu0 %v19178_v42  ;;  %v19332_v43 = vadd.f32 %v15829_v47, %v1559_v32  ;;  %v17932_v32 = vld [vmem:[#allocation3 + $0x270] sm:$0xff]  }
 0x125   : > { %1958 = vmatprep.mubr.bf16.mxu0 %v19216_v58  ;;  %v1562_v50 = vadd.f32 %v15720_v17, %v19305_v10  ;;  %v15831_v58 = vpop.f32.mrf.mxu1  ;;  %16162 = vmatpush3.bf16.msra.mxu1 %v17932_v32 }
 0x126   : > { %v15722_v41 = vpop.f32.mrf.mxu0  ;;  %v15832_v0 = vadd.f32 %v15831_v58, %v15830_v38  ;;  %v19353_v58 = vpack.c.bf16 %v19243_v20, %v682_v5  ;;  %v18579_v5 = vld [vmem:[#allocation2] sm:$0xff] }
 0x127   : > { %v15723_v15 = vadd.f32 %v15722_v41, %v15721_v19  ;;  %v15833_v16 = vpop.f32.mrf.mxu1  ;;  %2112 = vmatmul.mubr.bf16.gmra.mxu1 %v19195_v61  ;;  %v19369_v53 = vpack.c.bf16 %v18579_v5, %v18579_v5 }
 0x128   : > { %v15724_v42 = vpop.f32.mrf.mxu0  ;;  %v19338_v18 = vadd.f32 %v15832_v0, %v1562_v50  ;;  %2119 = vmatprep.mubr.bf16.mxu1 %v19206_v4 }
 0x129   : > { %v1567_v34 = vadd.f32 %v15723_v15, %v19305_v10  ;;  %v15834_v62 = vpop.f32.mrf.mxu1 }
 0x12a   : > { %v15725_v25 = vpop.f32.mrf.mxu0  ;;  %v15835_v36 = vadd.f32 %v15834_v62, %v15833_v16 }
 0x12b   : > { %v15726_v59 = vadd.f32 %v15725_v25, %v15724_v42  ;;  %v15836_v40 = vpop.f32.mrf.mxu1 }
 0x12c   : > { %v15727_v56 = vpop.f32.mrf.mxu0  ;;  %1959 = vmatmul.mubr.bf16.gmra.mxu0 %v19192_v60  ;;  %v19342_v17 = vadd.f32 %v15835_v36, %v1567_v34 }
 0x12d   : > { %1966 = vmatprep.mubr.bf16.mxu0 %v19230_v2  ;;  %v1570_v60 = vadd.f32 %v15726_v59, %v19305_v10  ;;  %v15837_v61 = vpop.f32.mrf.mxu1 }
 0x12e   : > { %v15728_v57 = vpop.f32.mrf.mxu0  ;;  %v15838_v2 = vadd.f32 %v15837_v61, %v15836_v40  ;;  %v18578_v61 = vld [vmem:[#allocation2 + $0x49] sm:$0xff] }
 0x12f   : > { %v15729_v22 = vadd.f32 %v15728_v57, %v15727_v56  ;;  %v15839_v41 = vpop.f32.mrf.mxu1  ;;  %2120 = vmatmul.mubr.bf16.gmra.mxu1 %v19209_v6 }
 0x130   : > { %v15730_v29 = vpop.f32.mrf.mxu0  ;;  %v19348_v7 = vadd.f32 %v15838_v2, %v1570_v60  ;;  %2127 = vmatprep.mubr.bf16.mxu1 %v19220_v45 }
 0x131   : > { %v1575_v15 = vadd.f32 %v15729_v22, %v19305_v10  ;;  %v15840_v42 = vpop.f32.mrf.mxu1 }
 0x132   : > { %v15731_v46 = vpop.f32.mrf.mxu0 }
 0x133   : > { %v15732_v19 = vadd.f32 %v15731_v46, %v15730_v29  ;;  %v15842_v25 = vpop.f32.mrf.mxu1 }
 0x134   : > { %v15733_v31 = vpop.f32.mrf.mxu0  ;;  %1967 = vmatmul.mubr.bf16.gmra.mxu0 %v19206_v4  ;;  %v15841_v4 = vadd.f32 %v15840_v42, %v15839_v41  ;;  %v17933_v42 = vld [vmem:[#allocation3 + $0x2a8] sm:$0xff]  }
 0x135   : > { %1974 = vmatprep.mubr.bf16.mxu0 %v19246_v49  ;;  %v1578_v49 = vadd.f32 %v15732_v19, %v19305_v10  ;;  %v15843_v0 = vpop.f32.mrf.mxu1  ;;  %v22023_v19 = vld [vmem:[#allocation13_spill] sm:$0xff]  ;;  %16163 = vmatprep.subr.bf16.mxu1 %v17933_v42 }
 0x136   : > { %v15734_v47 = vpop.f32.mrf.mxu0  ;;  %v19355_v6 = vadd.f32 %v15841_v4, %v1575_v15  ;;  %v15844_v16 = vadd.f32 %v15843_v0, %v15842_v25 }
 0x137   : > { %v15735_v38 = vadd.f32 %v15734_v47, %v15733_v31  ;;  %v15845_v57 = vpop.f32.mrf.mxu1  ;;  %2128 = vmatmul.mubr.bf16.gmra.mxu1 %v19223_v51 }
 0x138   : > { %v15736_v50 = vpop.f32.mrf.mxu0  ;;  %v19361_v62 = vadd.f32 %v15844_v16, %v1578_v49  ;;  %2135 = vmatprep.mubr.bf16.mxu1 %v19237_v52 }
 0x139   : > { %v1583_v20 = vadd.f32 %v15735_v38, %v19305_v10  ;;  %v15846_v36 = vpop.f32.mrf.mxu1  ;;  %v17934_v38 = vld [vmem:[#allocation3 + $0x268] sm:$0xff]  }
 0x13a   : > { %v15737_v59 = vpop.f32.mrf.mxu0  ;;  %v15847_v40 = vadd.f32 %v15846_v36, %v15845_v57  ;;  %16164 = vmatpush3.bf16.msra.mxu1 %v17934_v38  ;;  %v18582_v38 = vld [vmem:[#allocation2 + $0xa9] sm:$0xff] }
 0x13b   : > { %v15738_v56 = vadd.f32 %v15737_v59, %v15736_v50  ;;  %v15848_v46 = vpop.f32.mrf.mxu1 }
 0x13c   : > { %v15739_v34 = vpop.f32.mrf.mxu0  ;;  %1975 = vmatmul.mubr.bf16.gmra.mxu0 %v19220_v45  ;;  %v789_v45 = vpack.c.bf16 %v22023_v19, %v18578_v61  ;;  %v19366_v2 = vadd.f32 %v15847_v40, %v1583_v20 }
 0x13d   : > { %1982 = vmatprep.mubr.bf16.mxu0 %v19353_v58  ;;  %v1586_v51 = vadd.f32 %v15738_v56, %v19305_v10  ;;  %v15849_v32 = vpop.f32.mrf.mxu1 }
 0x13e   : > { %v15740_v22 = vpop.f32.mrf.mxu0  ;;  %v15850_v15 = vadd.f32 %v15849_v32, %v15848_v46 }
 0x13f   : > { %v15741_v29 = vadd.f32 %v15740_v22, %v15739_v34  ;;  %v15851_v4 = vpop.f32.mrf.mxu1  ;;  %2136 = vmatmul.mubr.bf16.gmra.mxu1 %v19233_v8  ;;  %v22024_v34 = vld [vmem:[#allocation14_spill] sm:$0xff]  ;;  %v18581_v22 = vld [vmem:[#allocation2 + $0x89] sm:$0xff]  ;;  %v22025_v8 = vld [vmem:[#allocation15_spill] sm:$0xff] }
 0x140   : > { %v15742_v60 = vpop.f32.mrf.mxu0  ;;  %v19373_v50 = vadd.f32 %v15850_v15, %v1586_v51  ;;  %2143 = vmatprep.mubr.bf16.mxu1 %v19369_v53  ;;  %v807_v36 = vpack.c.bf16 %v22025_v8, %v18581_v22  ;;  %v17936_v22 = vld [vmem:[#allocation3 + $0x260] sm:$0xff]  }
 0x141   : > { %v1591_v25 = vadd.f32 %v15741_v29, %v19305_v10  ;;  %v15852_v59 = vpop.f32.mrf.mxu1 }
 0x142   : > { %v15743_v31 = vpop.f32.mrf.mxu0  ;;  %v15853_v56 = vadd.f32 %v15852_v59, %v15851_v4  ;;  %v22026_v4 = vld [vmem:[#allocation16_spill] sm:$0xff] }
 0x143   : > { %v15744_v41 = vadd.f32 %v15743_v31, %v15742_v60  ;;  %v15854_v20 = vpop.f32.mrf.mxu1  ;;  %v18583_v59 = vld [vmem:[#allocation2 + $0xc9] sm:$0xff] }
 0x144   : > { %v15745_v47 = vpop.f32.mrf.mxu0  ;;  %1983 = vmatmul.mubr.bf16.gmra.mxu0 %v19237_v52  ;;  %v18580_v52 = vld [vmem:[#allocation2 + $0x69] sm:$0xff]  ;;  %v19379_v40 = vadd.f32 %v15853_v56, %v1591_v25  ;;  %v816_v25 = vpack.c.bf16 %v22026_v4, %v18582_v38 }
 0x145   : > { %17573 = vmatprep.mubr.bf16.mxu0 %v789_v45  ;;  %v798_v57 = vpack.c.bf16 %v22024_v34, %v18580_v52  ;;  %v1594_v29 = vadd.f32 %v15744_v41, %v19305_v10  ;;  %v15855_v46 = vpop.f32.mrf.mxu1  ;;  %v22027_v56 = vld [vmem:[#allocation17_spill] sm:$0xff] }
 0x146   : > { %v15746_v49 = vpop.f32.mrf.mxu0  ;;  %v15856_v19 = vadd.f32 %v15855_v46, %v15854_v20  ;;  %v17935_v20 = vld [vmem:[#allocation3 + $0x2a0] sm:$0xff]  }
 0x147   : > { %v15747_v0 = vadd.f32 %v15746_v49, %v15745_v47  ;;  %v15857_v51 = vpop.f32.mrf.mxu1  ;;  %2144 = vmatmul.mubr.bf16.gmra.mxu1 %v922_v54  ;;  %16165 = vmatprep.subr.bf16.mxu1 %v17935_v20 }
 0x148   : > { %v15748_v16 = vpop.f32.mrf.mxu0  ;;  %v19385_v31 = vadd.f32 %v15856_v19, %v1594_v29  ;;  %16166 = vmatpush3.bf16.msra.mxu1 %v17936_v22  ;;  %v18587_v22 = vld [vmem:[#allocation2 + $0x149] sm:$0xff]  ;;  %3530 = vmatprep.mubr.bf16.mxu1 %v19369_v53 }
 0x149   : > { %v1599_v5 = vadd.f32 %v15747_v0, %v19305_v10  ;;  %v15858_v15 = vpop.f32.mrf.mxu1  ;;  %v17956_v53 = vld [vmem:[#allocation3 + $0x2d0] sm:$0xff]  }
 0x14a   : > { %v15749_v60 = vpop.f32.mrf.mxu0  ;;  %v15859_v41 = vadd.f32 %v15858_v15, %v15857_v51  ;;  %v18584_v51 = vld [vmem:[#allocation2 + $0xe9] sm:$0xff] }
 0x14b   : > { %v15750_v61 = vadd.f32 %v15749_v60, %v15748_v16  ;;  %v15860_v49 = vpop.f32.mrf.mxu1  ;;  %v825_v16 = vpack.c.bf16 %v22027_v56, %v18583_v59  ;;  %v18585_v15 = vld [vmem:[#allocation2 + $0x109] sm:$0xff] }
 0x14c   : > { %v15751_v45 = vpop.f32.mrf.mxu0  ;;  %17574 = vmatmul.mubr.bf16.vlgmr.msra.gmra.mxu0 %v798_v57  ;;  %v19390_v52 = vadd.f32 %v15859_v41, %v1599_v5  ;;  %v834_v5 = vpack.c.bf16 %v18961_v39, %v18584_v51  ;;  %v843_v41 = vpack.c.bf16 %v18981_v48, %v18585_v15 }
 0x14d   : > { %17577 = vmatprep.mubr.bf16.mxu0 %v807_v36  ;;  %v1602_v13 = vadd.f32 %v15750_v61, %v19305_v10  ;;  %v15861_v54 = vpop.f32.mrf.mxu1 }
 0x14e   : > { %v15752_v32 = vpop.f32.mrf.mxu0  ;;  %v15862_v0 = vadd.f32 %v15861_v54, %v15860_v49 }
 0x14f   : > { %v15753_v47 = vadd.f32 %v15752_v32, %v15751_v45  ;;  %v15863_v8 = vpop.f32.mrf.mxu1 }
 0x150   : > { %v15754_v42 = vpop.f32.mrf.mxu0  ;;  %v19393_v36 = vadd.f32 %v15862_v0, %v1602_v13 }
 0x151   : > { %v1607_v29 = vadd.f32 %v15753_v47, %v19305_v10  ;;  %v15864_v46 = vpop.f32.mrf.mxu1 }
 0x152   : > { %v15755_v14 = vpop.f32.mrf.mxu0  ;;  %v15865_v61 = vadd.f32 %v15864_v46, %v15863_v8  ;;  %v861_v8 = vpack.c.bf16 %v19014_v63, %v18587_v22 }
 0x153   : > { %v15756_v34 = vadd.f32 %v15755_v14, %v15754_v42  ;;  %v15866_v32 = vpop.f32.mrf.mxu1 }
 0x154   : > { %v15757_v57 = vpop.f32.mrf.mxu0  ;;  %17578 = vmatmul.mubr.bf16.gmra.mxu0 %v816_v25  ;;  %v19398_v42 = vadd.f32 %v15865_v61, %v1607_v29 }
 0x155   : > { %17581 = vmatprep.mubr.bf16.mxu0 %v825_v16  ;;  %v1610_v38 = vadd.f32 %v15756_v34, %v19305_v10  ;;  %v15867_v47 = vpop.f32.mrf.mxu1 }
 0x156   : > { %v15758_v60 = vpop.f32.mrf.mxu0  ;;  %v15868_v49 = vadd.f32 %v15867_v47, %v15866_v32  ;;  %v17938_v32 = vld [vmem:[#allocation3 + $0x258] sm:$0xff]  }
 0x157   : > { %v15759_v19 = vadd.f32 %v15758_v60, %v15757_v57  ;;  %v15869_v56 = vpop.f32.mrf.mxu1  ;;  %v18586_v57 = vld [vmem:[#allocation2 + $0x129] sm:$0xff] }
 0x158   : > { %v15760_v45 = vpop.f32.mrf.mxu0  ;;  %v19401_v16 = vadd.f32 %v15868_v49, %v1610_v38  ;;  %v852_v34 = vpack.c.bf16 %v18990_v55, %v18586_v57  ;;  %v18588_v49 = vld [vmem:[#allocation2 + $0x169] sm:$0xff] }
 0x159   : > { %v1615_v39 = vadd.f32 %v15759_v19, %v19305_v10  ;;  %v15870_v14 = vpop.f32.mrf.mxu1 }
 0x15a   : > { %v15761_v4 = vpop.f32.mrf.mxu0  ;;  %v15871_v48 = vadd.f32 %v15870_v14, %v15869_v56 }
 0x15b   : > { %v15762_v25 = vadd.f32 %v15761_v4, %v15760_v45  ;;  %v15872_v20 = vpop.f32.mrf.mxu1 }
 0x15c   : > { %v15763_v59 = vpop.f32.mrf.mxu0  ;;  %17582 = vmatmul.mubr.bf16.gmra.mxu0 %v834_v5  ;;  %v19406_v29 = vadd.f32 %v15871_v48, %v1615_v39  ;;  %v17937_v5 = vld [vmem:[#allocation3 + $0x298] sm:$0xff]   ;;  %v18589_v39 = vld [vmem:[#allocation2 + $0x189] sm:$0xff] }
 0x15d   : > { %17585 = vmatprep.mubr.bf16.mxu0 %v843_v41  ;;  %v1618_v60 = vadd.f32 %v15762_v25, %v19305_v10  ;;  %v15873_v61 = vpop.f32.mrf.mxu1  ;;  %16167 = vmatprep.subr.bf16.mxu1 %v17937_v5 }
 0x15e   : > { %v15764_v13 = vpop.f32.mrf.mxu0  ;;  %v15874_v19 = vadd.f32 %v15873_v61, %v15872_v20  ;;  %16168 = vmatpush3.bf16.msra.mxu1 %v17938_v32  ;;  %v18592_v32 = vld [vmem:[#allocation2 + $0x1c9] sm:$0xff] }
 0x15f   : > { %v15765_v54 = vadd.f32 %v15764_v13, %v15763_v59  ;;  %v15875_v15 = vpop.f32.mrf.mxu1  ;;  %v870_v59 = vpack.c.bf16 %v19032_v11, %v18588_v49  ;;  %v879_v13 = vpack.c.bf16 %v19047_v35, %v18589_v39  ;;  %v17939_v49 = vld [vmem:[#allocation3 + $0x290] sm:$0xff]  }
 0x160   : > { %v15766_v0 = vpop.f32.mrf.mxu0  ;;  %v19409_v41 = vadd.f32 %v15874_v19, %v1618_v60  ;;  %v19419_v60 = vld [vmem:[#allocation5] ss:$0 sm:$0xff]  ;;  %16169 = vmatprep.subr.bf16.mxu1 %v17939_v49 }
 0x161   : > { %v1623_v55 = vadd.f32 %v15765_v54, %v19305_v10  ;;  %v15876_v63 = vpop.f32.mrf.mxu1 }
 0x162   : > { %v15767_v46 = vpop.f32.mrf.mxu0  ;;  %v15877_v47 = vadd.f32 %v15876_v63, %v15875_v15  ;;  %v897_v15 = vpack.c.bf16 %v19093_v30, %v18592_v32 }
 0x163   : > { %v15768_v45 = vadd.f32 %v15767_v46, %v15766_v0  ;;  %v15878_v56 = vpop.f32.mrf.mxu1 }
 0x164   : > { %v15769_v51 = vpop.f32.mrf.mxu0  ;;  %17586 = vmatmul.mubr.bf16.gmra.mxu0 %v852_v34  ;;  %v19414_v14 = vadd.f32 %v15877_v47, %v1623_v55 }
 0x165   : > { %17589 = vmatprep.mubr.bf16.mxu0 %v861_v8  ;;  %v1626_v48 = vadd.f32 %v15768_v45, %v19305_v10  ;;  %v15879_v54 = vpop.f32.mrf.mxu1  ;;  %v18591_v10 = vld [vmem:[#allocation2 + $0x1a9] sm:$0xff] }
 0x166   : > { %v15770_v38 = vpop.f32.mrf.mxu0  ;;  %v15880_v34 = vadd.f32 %v15879_v54, %v15878_v56  ;;  %v888_v45 = vpack.c.bf16 %v19066_v1, %v18591_v10 }
 0x167   : > { %v15771_v4 = vadd.f32 %v15770_v38, %v15769_v51  ;;  %v15881_v22 = vpop.f32.mrf.mxu1 }
 0x168   : > { %v15772_v25 = vpop.f32.mrf.mxu0  ;;  %v19417_v8 = vadd.f32 %v15880_v34, %v1626_v48  ;;  %v18593_v34 = vld [vmem:[#allocation2 + $0x1e9] sm:$0xff] }
 0x169   : > { %v1631_v11 = vadd.f32 %v19419_v60, %v15771_v4  ;;  %v15882_v35 = vpop.f32.mrf.mxu1 }
 0x16a   : > { %v15773_v0 = vpop.f32.mrf.mxu0  ;;  %v15883_v19 = vadd.f32 %v15882_v35, %v15881_v22 }
 0x16b   : > { %v15774_v57 = vadd.f32 %v15773_v0, %v15772_v25  ;;  %v15884_v5 = vpop.f32.mrf.mxu1 }
 0x16c   : > { %v15775_v20 = vpop.f32.mrf.mxu0  ;;  %17590 = vmatmul.mubr.bf16.gmra.mxu0 %v870_v59  ;;  %v19424_v55 = vadd.f32 %v15883_v19, %v1631_v11  ;;  %v17940_v59 = vld [vmem:[#allocation3 + $0x250] sm:$0xff]  }
 0x16d   : > { %17593 = vmatprep.mubr.bf16.mxu0 %v879_v13  ;;  %v1634_v38 = vadd.f32 %v19419_v60, %v15774_v57  ;;  %v15885_v47 = vpop.f32.mrf.mxu1  ;;  %16170 = vmatpush3.bf16.msra.mxu1 %v17940_v59 }
 0x16e   : > { %v15776_v46 = vpop.f32.mrf.mxu0  ;;  %v15886_v25 = vadd.f32 %v15885_v47, %v15884_v5 }
 0x16f   : > { %v15777_v61 = vadd.f32 %v15776_v46, %v15775_v20  ;;  %v15887_v56 = vpop.f32.mrf.mxu1  ;;  %v906_v20 = vpack.c.bf16 %v19118_v26, %v18593_v34 }
 0x170   : > { %v15778_v51 = vpop.f32.mrf.mxu0  ;;  %v19427_v39 = vadd.f32 %v15886_v25, %v1634_v38 }
 0x171   : > { %v1639_v1 = vadd.f32 %v19419_v60, %v15777_v61  ;;  %v15888_v30 = vpop.f32.mrf.mxu1 }
 0x172   : > { %v15779_v63 = vpop.f32.mrf.mxu0  ;;  %v15889_v54 = vadd.f32 %v15888_v30, %v15887_v56 }
 0x173   : > { %v15780_v13 = vadd.f32 %v15779_v63, %v15778_v51  ;;  %v15890_v22 = vpop.f32.mrf.mxu1 }
 0x174   : > { %v15781_v4 = vpop.f32.mrf.mxu0  ;;  %17594 = vmatmul.mubr.bf16.gmra.mxu0 %v888_v45  ;;  %v19431_v11 = vadd.f32 %v15889_v54, %v1639_v1 }
 0x175   : > { %17597 = vmatprep.mubr.bf16.mxu0 %v897_v15  ;;  %v1642_v46 = vadd.f32 %v19419_v60, %v15780_v13  ;;  %v15891_v19 = vpop.f32.mrf.mxu1 }
 0x176   : > { %v15782_v48 = vpop.f32.mrf.mxu0  ;;  %v15892_v10 = vadd.f32 %v15891_v19, %v15890_v22 }
 0x177   : > { %v15783_v0 = vadd.f32 %v15782_v48, %v15781_v4  ;;  %v15893_v51 = vpop.f32.mrf.mxu1  ;;  %v17942_v48 = vld [vmem:[#allocation3 + $0x248] sm:$0xff]  }
 0x178   : > { %v15784_v57 = vpop.f32.mrf.mxu0  ;;  %v19435_v45 = vadd.f32 %v15892_v10, %v1642_v46  ;;  %v17943_v10 = vld [vmem:[#allocation3 + $0x338] sm:$0xff]  }
 0x179   : > { %v1647_v5 = vadd.f32 %v19419_v60, %v15783_v0  ;;  %v15894_v26 = vpop.f32.mrf.mxu1  ;;  %16271 = vmatprep.subr.bf16.mxu0 %v17943_v10  ;;  %v17947_v10 = vld [vmem:[#allocation3 + $0x280] sm:$0xff]  }
 0x17a   : > { %v15785_v35 = vpop.f32.mrf.mxu0  ;;  %v15895_v63 = vadd.f32 %v15894_v26, %v15893_v51  ;;  %v17945_v26 = vld [vmem:[#allocation3 + $0x330] sm:$0xff]  }
 0x17b   : > { %v15786_v32 = vadd.f32 %v15785_v35, %v15784_v57  ;;  %v15896_v25 = vpop.f32.mrf.mxu1 }
 0x17c   : > { %v15787_v61 = vpop.f32.mrf.mxu0  ;;  %17598 = vmatmul.mubr.bf16.gmra.mxu0 %v906_v20  ;;  %v19438_v4 = vadd.f32 %v15895_v63, %v1647_v5 }
 0x17d   : > { %17601 = vmatprep.mubr.bf16.mxu0 %v19353_v58  ;;  %v1650_v49 = vadd.f32 %v19419_v60, %v15786_v32  ;;  %v15897_v56 = vpop.f32.mrf.mxu1  ;;  %v17941_v58 = vld [vmem:[#allocation3 + $0x288] sm:$0xff]  }
 0x17e   : > { %v15788_v15 = vpop.f32.mrf.mxu0  ;;  %v15898_v1 = vadd.f32 %v15897_v56, %v15896_v25  ;;  %16171 = vmatprep.subr.bf16.mxu1 %v17941_v58 }
 0x17f   : > { %v15789_v38 = vadd.f32 %v15788_v15, %v15787_v61  ;;  %v15899_v30 = vpop.f32.mrf.mxu1  ;;  %16172 = vmatpush3.bf16.msra.mxu1 %v17942_v48 }
 0x180   : > { %v15790_v47 = vpop.f32.mrf.mxu0  ;;  %v19444_v0 = vadd.f32 %v15898_v1, %v1650_v49  ;;  %v17946_v49 = vld [vmem:[#allocation3 + $0x2f0] sm:$0xff]   ;;  %16173 = vmatprep.subr.bf16.mxu1 %v17947_v10 }
 0x181   : > { %v1655_v54 = vadd.f32 %v19419_v60, %v15789_v38  ;;  %v15900_v20 = vpop.f32.mrf.mxu1 }
 0x182   : > { %v15791_v59 = vpop.f32.mrf.mxu0  ;;  %v15901_v46 = vadd.f32 %v15900_v20, %v15899_v30  ;;  %v17948_v30 = vld [vmem:[#allocation3 + $0x328] sm:$0xff]  }
 0x183   : > { %v15792_v57 = vadd.f32 %v15791_v59, %v15790_v47  ;;  %v15902_v19 = vpop.f32.mrf.mxu1  ;;  %v17950_v20 = vld [vmem:[#allocation3 + $0x2e8] sm:$0xff]  }
 0x184   : > { %v15793_v13 = vpop.f32.mrf.mxu0  ;;  %17602 = vmatmul.mubr.bf16.gmra.mxu0 %v924_v37  ;;  %v19447_v61 = vadd.f32 %v15901_v46, %v1655_v54  ;;  %v17944_v37 = vld [vmem:[#allocation3 + $0x2f8] sm:$0xff]  }
 0x185   : > { %v1658_v21 = vadd.f32 %v19419_v60, %v15792_v57  ;;  %v15903_v51 = vpop.f32.mrf.mxu1  ;;  %16272 = vmatpush3.bf16.msra.mxu0 %v17944_v37 }
 0x186   : > { %v15794_v34 = vpop.f32.mrf.mxu0  ;;  %v15904_v5 = vadd.f32 %v15903_v51, %v15902_v19  ;;  %16273 = vmatprep.subr.bf16.mxu0 %v17945_v26  ;;  %v17951_v51 = vld [vmem:[#allocation3 + $0x320] sm:$0xff]  }
 0x187   : > { %v15795_v22 = vadd.f32 %v15794_v34, %v15793_v13  ;;  %v15905_v15 = vpop.f32.mrf.mxu1 }
 0x188   : > { %v15796_v35 = vpop.f32.mrf.mxu0  ;;  %v19450_v38 = vadd.f32 %v15904_v5, %v1658_v21  ;;  %v17949_v21 = vld [vmem:[#allocation3 + $0x240] sm:$0xff]  }
 0x189   : > { %v1663_v63 = vadd.f32 %v19419_v60, %v15795_v22  ;;  %v15906_v59 = vpop.f32.mrf.mxu1  ;;  %16274 = vmatpush3.bf16.msra.mxu0 %v17946_v49  ;;  %16174 = vmatpush3.bf16.msra.mxu1 %v17949_v21  ;;  %v17953_v49 = vld [vmem:[#allocation3 + $0x318] sm:$0xff]   ;;  %v18594_v21 = vld [vmem:[#allocation2] sm:$0xff] }
 0x18a   : > { %v15797_v12 = vpop.f32.mrf.mxu0  ;;  %v15907_v1 = vadd.f32 %v15906_v59, %v15905_v15  ;;  %16275 = vmatprep.subr.bf16.mxu0 %v17948_v30 }
 0x18b   : > { %v15798_v47 = vadd.f32 %v15797_v12, %v15796_v35  ;;  %v15908_v58 = vpop.f32.mrf.mxu1 }
 0x18c   : > { %v15927_v32 = vpop.f32.mrf.mxu0  ;;  %v19454_v54 = vadd.f32 %v15907_v1, %v1663_v63  ;;  %v22030_v1 = vld [vmem:[#allocation9_spill] sm:$0xff] }
 0x18d   : > { %v1666_v57 = vadd.f32 %v19419_v60, %v15798_v47  ;;  %v15909_v22 = vpop.f32.mrf.mxu1  ;;  %16276 = vmatpush3.bf16.msra.mxu0 %v17950_v20 }
 0x18e   : > { %v15928_v25 = vpop.f32.mrf.mxu0  ;;  %22028 = vst [vmem:[#allocation18_spill] sm:$0xff] %v19454_v54  ;;  %v15910_v35 = vadd.f32 %v15909_v22, %v15908_v58  ;;  %16277 = vmatprep.subr.bf16.mxu0 %v17951_v51 }
 0x18f   : > { %v15929_v56 = vadd.f32 %v15928_v25, %v15927_v32  ;;  %v16039_v12 = vpop.f32.mrf.mxu1  ;;  %v17952_v32 = vld [vmem:[#allocation3 + $0x2e0] sm:$0xff]  }
 0x190   : > { %v15930_v13 = vpop.f32.mrf.mxu0 }
 0x191   : > { %v1865_v48 = vadd.f32 %v15929_v56, %v19312_v27  ;;  %v19458_v27 = vadd.f32 %v15910_v35, %v1666_v57  ;;  %v16040_v60 = vpop.f32.mrf.mxu1  ;;  %16278 = vmatpush3.bf16.msra.mxu0 %v17952_v32  ;;  %v17954_v56 = vld [vmem:[#allocation3 + $0x2d8] sm:$0xff]   ;;  %v17955_v35 = vld [vmem:[#allocation3 + $0x310] sm:$0xff]  }
 0x192   : > { %v15931_v34 = vpop.f32.mrf.mxu0  ;;  %v16041_v26 = vadd.f32 %v16040_v60, %v16039_v12  ;;  %16279 = vmatprep.subr.bf16.mxu0 %v17953_v49  ;;  %v17957_v60 = vld [vmem:[#allocation3 + $0x308] sm:$0xff]   ;;  %v17960_v49 = vld [vmem:[#allocation3 + $0x378] sm:$0xff]  }
 0x193   : > { %v15932_v46 = vadd.f32 %v15931_v34, %v15930_v13  ;;  %22029 = vst [vmem:[#allocation19_spill] sm:$0xff] %v19458_v27  ;;  %v16042_v47 = vpop.f32.mrf.mxu1  ;;  %v22031_v13 = vld [vmem:[#allocation10_spill] sm:$0xff] }
 0x194   : > { %v15933_v19 = vpop.f32.mrf.mxu0  ;;  %v2769_v58 = vpack.c.bf16 %v22031_v13, %v22030_v1  ;;  %v17961_v13 = vld [vmem:[#allocation3 + $0x300] sm:$0xff]  }
 0x195   : > { %v1868_v37 = vadd.f32 %v15932_v46, %v19318_v3  ;;  %v19463_v3 = vadd.f32 %v16041_v26, %v1865_v48  ;;  %v16043_v30 = vpop.f32.mrf.mxu1  ;;  %16280 = vmatpush3.bf16.msra.mxu0 %v17954_v56  ;;  %v19473_v48 = vld [vmem:[#allocation2 + $0x7] sm:$0xff] }
 0x196   : > { %v15934_v5 = vpop.f32.mrf.mxu0  ;;  %v16044_v34 = vadd.f32 %v16043_v30, %v16042_v47  ;;  %3531 = vmatmul.mubr.bf16.vlgmr.msra.gmra.mxu1 %v2769_v58  ;;  %22032 = vst [vmem:[#allocation13_spill] sm:$0xff] %v19473_v48  ;;  %v19475_v46 = vld [vmem:[#allocation2 + $0x9] sm:$0xff]  ;;  %7184 = vst [vmem:[#allocation2] sm:$0xff] %v18594_v21  ;;  %16281 = vmatprep.subr.bf16.mxu0 %v17955_v35  ;;  %v17958_v47 = vld [vmem:[#allocation3 + $0x3b8] sm:$0xff]  }
 0x197   : > { %v15935_v15 = vadd.f32 %v15934_v5, %v15933_v19  ;;  %v19468_v22 = vpop.f32.mrf.mxu1  ;;  %22033 = vst [vmem:[#allocation14_spill] sm:$0xff] %v19475_v46  ;;  %7186 = vst [vmem:[#allocation2 + $0x10] sm:$0xff] %v18594_v21  ;;  %16383 = vmatprep.subr.bf16.mxu1 %v17958_v47  ;;  %v17962_v58 = vld [vmem:[#allocation3 + $0x2c0] sm:$0xff]  }
 0x198   : > { %v15936_v63 = vpop.f32.mrf.mxu0  ;;  %v19477_v10 = vadd.f32 %v16044_v34, %v1868_v37  ;;  %7185 = vst [vmem:[#allocation2 + $0x8] sm:$0xff] %v18594_v21  ;;  %v17959_v37 = vld [vmem:[#allocation3 + $0x2c8] sm:$0xff]   ;;  %16384 = vmatpush3.bf16.msra.mxu1 %v17960_v49 }
 0x199   : > { %v19461_v25 = vadd.f32 %v15935_v15, %v19322_v23  ;;  %v19479_v12 = vpop.f32.mrf.mxu1  ;;  %16282 = vmatpush3.bf16.msra.mxu0 %v17956_v53 }
 0x19a   : > { %v15937_v59 = vpop.f32.mrf.mxu0  ;;  %16283 = vmatprep.subr.bf16.mxu0 %v17957_v60 }
 0x19b   : > { %v15938_v57 = vadd.f32 %v15937_v59, %v15936_v63 }
 0x19c   : > { %v15939_v20 = vpop.f32.mrf.mxu0 }
 0x19d   : > { %v19471_v23 = vadd.f32 %v15938_v57, %v19328_v24  ;;  %v19481_v24 = vpop.f32.mrf.mxu1  ;;  %16284 = vmatpush3.bf16.msra.mxu0 %v17959_v37 }
 0x19e   : > { %v15940_v19 = vpop.f32.mrf.mxu0  ;;  %16285 = vmatprep.subr.bf16.mxu0 %v17961_v13 }
 0x19f   : > { %v15941_v51 = vadd.f32 %v15940_v19, %v15939_v20  ;;  %v19486_v26 = vpop.f32.mrf.mxu1 }
 0x1a0   : > { %v15942_v5 = vpop.f32.mrf.mxu0 }
 0x1a1   : > { %v19484_v32 = vadd.f32 %v15941_v51, %v19332_v43  ;;  %v19488_v56 = vpop.f32.mrf.mxu1  ;;  %16286 = vmatpush3.bf16.msra.mxu0 %v17962_v58  ;;  %v17964_v58 = vld [vmem:[#allocation3 + $0x370] sm:$0xff]  }
 0x1a2   : > { %v15943_v15 = vpop.f32.mrf.mxu0 }
 0x1a3   : > { %v15944_v63 = vadd.f32 %v15943_v15, %v15942_v5  ;;  %v19493_v30 = vpop.f32.mrf.mxu1 }
 0x1a4   : > { %v15945_v59 = vpop.f32.mrf.mxu0 }
 0x1a5   : > { %v19491_v1 = vadd.f32 %v15944_v63, %v19338_v18  ;;  %v19495_v20 = vpop.f32.mrf.mxu1 }
 0x1a6   : > { %v15946_v43 = vpop.f32.mrf.mxu0 }
 0x1a7   : > { %v15947_v57 = vadd.f32 %v15946_v43, %v15945_v59  ;;  %v19500_v21 = vpop.f32.mrf.mxu1  ;;  %v17963_v43 = vld [vmem:[#allocation3 + $0x3b0] sm:$0xff]  }
 0x1a8   : > { %v15948_v34 = vpop.f32.mrf.mxu0  ;;  %16385 = vmatprep.subr.bf16.mxu1 %v17963_v43 }
 0x1a9   : > { %v19498_v35 = vadd.f32 %v15947_v57, %v19342_v17  ;;  %v19502_v51 = vpop.f32.mrf.mxu1  ;;  %16386 = vmatpush3.bf16.msra.mxu1 %v17964_v58 }
 0x1aa   : > { %v15949_v19 = vpop.f32.mrf.mxu0 }
 0x1ab   : > { %v15950_v18 = vadd.f32 %v15949_v19, %v15948_v34  ;;  %v19507_v15 = vpop.f32.mrf.mxu1 }
 0x1ac   : > { %v15951_v53 = vpop.f32.mrf.mxu0 }
 0x1ad   : > { %v19505_v5 = vadd.f32 %v15950_v18, %v19348_v7  ;;  %v19509_v47 = vpop.f32.mrf.mxu1 }
 0x1ae   : > { %v15952_v60 = vpop.f32.mrf.mxu0 }
 0x1af   : > { %v15953_v37 = vadd.f32 %v15952_v60, %v15951_v53  ;;  %v19514_v59 = vpop.f32.mrf.mxu1 }
 0x1b0   : > { %v15954_v63 = vpop.f32.mrf.mxu0 }
 0x1b1   : > { %v19512_v17 = vadd.f32 %v15953_v37, %v19355_v6  ;;  %v19516_v34 = vpop.f32.mrf.mxu1 }
 0x1b2   : > { %v15955_v49 = vpop.f32.mrf.mxu0 }
 0x1b3   : > { %v15956_v13 = vadd.f32 %v15955_v49, %v15954_v63  ;;  %v19521_v18 = vpop.f32.mrf.mxu1 }
 0x1b4   : > { %v15957_v57 = vpop.f32.mrf.mxu0 }
 0x1b5   : > { %v19519_v7 = vadd.f32 %v15956_v13, %v19361_v62  ;;  %v19523_v60 = vpop.f32.mrf.mxu1 }
 0x1b6   : > { %v15958_v19 = vpop.f32.mrf.mxu0 }
 0x1b7   : > { %22034 = vst [vmem:[#allocation15_spill] sm:$0xff] %v19519_v7  ;;  %v15959_v53 = vadd.f32 %v15958_v19, %v15957_v57  ;;  %v19528_v49 = vpop.f32.mrf.mxu1 }
 0x1b8   : > { %v15960_v6 = vpop.f32.mrf.mxu0 }
 0x1b9   : > { %v19526_v37 = vadd.f32 %v15959_v53, %v19366_v2  ;;  %v19530_v28 = vpop.f32.mrf.mxu1 }
 0x1ba   : > { %v15961_v63 = vpop.f32.mrf.mxu0 }
 0x1bb   : > { %v15962_v46 = vadd.f32 %v15961_v63, %v15960_v6  ;;  %v19535_v43 = vpop.f32.mrf.mxu1  ;;  %v17965_v63 = vld [vmem:[#allocation3 + $0x3a8] sm:$0xff]  }
 0x1bc   : > { %v15963_v48 = vpop.f32.mrf.mxu0  ;;  %16387 = vmatprep.subr.bf16.mxu1 %v17965_v63 }
 0x1bd   : > { %v19533_v62 = vadd.f32 %v15962_v46, %v19373_v50  ;;  %v19537_v19 = vpop.f32.mrf.mxu1  ;;  %16388 = vmatpush3.bf16.msra.mxu1 %v17966_v33 }
 0x1be   : > { %v15964_v13 = vpop.f32.mrf.mxu0 }
 0x1bf   : > { %v15965_v58 = vadd.f32 %v15964_v13, %v15963_v48  ;;  %v19542_v44 = vpop.f32.mrf.mxu1 }
 0x1c0   : > { %v15966_v57 = vpop.f32.mrf.mxu0 }
 0x1c1   : > { %v19540_v2 = vadd.f32 %v15965_v58, %v19379_v40  ;;  %v19544_v27 = vpop.f32.mrf.mxu1 }
 0x1c2   : > { %v15967_v53 = vpop.f32.mrf.mxu0  ;;  %22036 = vst [vmem:[#allocation17_spill] sm:$0xff] %v19544_v27 }
 0x1c3   : > { %22035 = vst [vmem:[#allocation16_spill] sm:$0xff] %v19540_v2  ;;  %v15968_v6 = vadd.f32 %v15967_v53, %v15966_v57  ;;  %v19549_v46 = vpop.f32.mrf.mxu1 }
 0x1c4   : > { %v15969_v9 = vpop.f32.mrf.mxu0 }
 0x1c5   : > { %v19547_v50 = vadd.f32 %v15968_v6, %v19385_v31  ;;  %v19551_v58 = vpop.f32.mrf.mxu1 }
 0x1c6   : > { %v15970_v48 = vpop.f32.mrf.mxu0  ;;  %22038 = vst [vmem:[#allocation10_spill] sm:$0xff] %v19551_v58  ;;  %v17968_v58 = vld [vmem:[#allocation3 + $0x360] sm:$0xff]  }
 0x1c7   : > { %22037 = vst [vmem:[#allocation9_spill] sm:$0xff] %v19547_v50  ;;  %v15971_v13 = vadd.f32 %v15970_v48, %v15969_v9  ;;  %v19556_v53 = vpop.f32.mrf.mxu1 }
 0x1c8   : > { %v15972_v40 = vpop.f32.mrf.mxu0  ;;  %22040 = vst [vmem:[#allocation25_spill] sm:$0xff] %v19556_v53 }
 0x1c9   : > { %v19554_v54 = vadd.f32 %v15971_v13, %v19390_v52  ;;  %v19558_v27 = vpop.f32.mrf.mxu1 }
 0x1ca   : > { %v15973_v57 = vpop.f32.mrf.mxu0 }
 0x1cb   : > { %22039 = vst [vmem:[#allocation24_spill] sm:$0xff] %v19554_v54  ;;  %v15974_v2 = vadd.f32 %v15973_v57, %v15972_v40  ;;  %v19563_v6 = vpop.f32.mrf.mxu1 }
 0x1cc   : > { %v15975_v7 = vpop.f32.mrf.mxu0 }
 0x1cd   : > { %v19561_v31 = vadd.f32 %v15974_v2, %v19393_v36  ;;  %v19565_v48 = vpop.f32.mrf.mxu1 }
 0x1ce   : > { %v15976_v33 = vpop.f32.mrf.mxu0  ;;  %22042 = vst [vmem:[#allocation27_spill] sm:$0xff] %v19565_v48 }
 0x1cf   : > { %22041 = vst [vmem:[#allocation26_spill] sm:$0xff] %v19561_v31  ;;  %v15977_v9 = vadd.f32 %v15976_v33, %v15975_v7  ;;  %v19570_v50 = vpop.f32.mrf.mxu1  ;;  %v17967_v33 = vld [vmem:[#allocation3 + $0x3a0] sm:$0xff]  }
 0x1d0   : > { %v15978_v63 = vpop.f32.mrf.mxu0  ;;  %16389 = vmatprep.subr.bf16.mxu1 %v17967_v33 }
 0x1d1   : > { %v19568_v52 = vadd.f32 %v15977_v9, %v19398_v42  ;;  %v19572_v53 = vpop.f32.mrf.mxu1  ;;  %16390 = vmatpush3.bf16.msra.mxu1 %v17968_v58 }
 0x1d2   : > { %v15979_v13 = vpop.f32.mrf.mxu0 }
 0x1d3   : > { %22043 = vst [vmem:[#allocation28_spill] sm:$0xff] %v19568_v52  ;;  %v15980_v40 = vadd.f32 %v15979_v13, %v15978_v63  ;;  %v19577_v31 = vpop.f32.mrf.mxu1  ;;  %v17971_v52 = vld [vmem:[#allocation3 + $0x438] sm:$0xff]  }
 0x1d4   : > { %v15981_v57 = vpop.f32.mrf.mxu0  ;;  %22045 = vst [vmem:[#allocation30_spill] sm:$0xff] %v19577_v31  ;;  %16495 = vmatprep.subr.bf16.mxu0 %v17971_v52 }
 0x1d5   : > { %v19575_v36 = vadd.f32 %v15980_v40, %v19401_v16  ;;  %v19579_v48 = vpop.f32.mrf.mxu1  ;;  %v17969_v40 = vld [vmem:[#allocation3 + $0x398] sm:$0xff]  }
 0x1d6   : > { %v15982_v2 = vpop.f32.mrf.mxu0  ;;  %22046 = vst [vmem:[#allocation31_spill] sm:$0xff] %v19579_v48  ;;  %16391 = vmatprep.subr.bf16.mxu1 %v17969_v40 }
 0x1d7   : > { %22044 = vst [vmem:[#allocation29_spill] sm:$0xff] %v19575_v36  ;;  %v15983_v7 = vadd.f32 %v15982_v2, %v15981_v57  ;;  %v19584_v63 = vpop.f32.mrf.mxu1  ;;  %v17970_v2 = vld [vmem:[#allocation3 + $0x358] sm:$0xff]  }
 0x1d8   : > { %v15984_v54 = vpop.f32.mrf.mxu0  ;;  %22048 = vst [vmem:[#allocation33_spill] sm:$0xff] %v19584_v63  ;;  %16392 = vmatpush3.bf16.msra.mxu1 %v17970_v2 }
 0x1d9   : > { %v19582_v42 = vadd.f32 %v15983_v7, %v19406_v29  ;;  %v19586_v36 = vpop.f32.mrf.mxu1 }
 0x1da   : > { %v15985_v9 = vpop.f32.mrf.mxu0 }
 0x1db   : > { %22047 = vst [vmem:[#allocation32_spill] sm:$0xff] %v19582_v42  ;;  %v15986_v13 = vadd.f32 %v15985_v9, %v15984_v54  ;;  %v19591_v48 = vpop.f32.mrf.mxu1 }
 0x1dc   : > { %v15987_v16 = vpop.f32.mrf.mxu0 }
 0x1dd   : > { %v19589_v57 = vadd.f32 %v15986_v13, %v19409_v41  ;;  %v19593_v7 = vpop.f32.mrf.mxu1 }
 0x1de   : > { %v15988_v31 = vpop.f32.mrf.mxu0 }
 0x1df   : > { %22049 = vst [vmem:[#allocation34_spill] sm:$0xff] %v19589_v57  ;;  %v15989_v29 = vadd.f32 %v15988_v31, %v15987_v16  ;;  %v19598_v9 = vpop.f32.mrf.mxu1 }
 0x1e0   : > { %v15990_v58 = vpop.f32.mrf.mxu0 }
 0x1e1   : > { %v19596_v54 = vadd.f32 %v15989_v29, %v19414_v14  ;;  %v19600_v57 = vpop.f32.mrf.mxu1 }
 0x1e2   : > { %v15991_v33 = vpop.f32.mrf.mxu0  ;;  %22051 = vst [vmem:[#allocation36_spill] sm:$0xff] %v19600_v57  ;;  %v17974_v57 = vld [vmem:[#allocation3 + $0x350] sm:$0xff]  }
 0x1e3   : > { %22050 = vst [vmem:[#allocation35_spill] sm:$0xff] %v19596_v54  ;;  %v15992_v41 = vadd.f32 %v15991_v33, %v15990_v58  ;;  %v19605_v31 = vpop.f32.mrf.mxu1  ;;  %v17973_v58 = vld [vmem:[#allocation3 + $0x390] sm:$0xff]  }
 0x1e4   : > { %v15993_v13 = vpop.f32.mrf.mxu0  ;;  %16393 = vmatprep.subr.bf16.mxu1 %v17973_v58 }
 0x1e5   : > { %v19603_v40 = vadd.f32 %v15992_v41, %v19417_v8  ;;  %v19610_v29 = vpop.f32.mrf.mxu1  ;;  %16394 = vmatpush3.bf16.msra.mxu1 %v17974_v57 }
 0x1e6   : > { %v15994_v63 = vpop.f32.mrf.mxu0  ;;  %22053 = vst [vmem:[#allocation38_spill] sm:$0xff] %v19610_v29 }
 0x1e7   : > { %22052 = vst [vmem:[#allocation37_spill] sm:$0xff] %v19603_v40  ;;  %v15995_v52 = vadd.f32 %v15994_v63, %v15993_v13  ;;  %v19615_v41 = vpop.f32.mrf.mxu1 }
 0x1e8   : > { %v15996_v16 = vpop.f32.mrf.mxu0 }
 0x1e9   : > { %v19608_v2 = vadd.f32 %v15995_v52, %v19424_v55  ;;  %v19620_v52 = vpop.f32.mrf.mxu1 }
 0x1ea   : > { %v15997_v14 = vpop.f32.mrf.mxu0 }
 0x1eb   : > { %v15998_v54 = vadd.f32 %v15997_v14, %v15996_v16 }
 0x1ec   : > { %v15999_v42 = vpop.f32.mrf.mxu0 }
 0x1ed   : > { %v19613_v33 = vadd.f32 %v15998_v54, %v19427_v39  ;;  %v19625_v54 = vpop.f32.mrf.mxu1 }
 0x1ee   : > { %v16000_v8 = vpop.f32.mrf.mxu0 }
 0x1ef   : > { %22054 = vst [vmem:[#allocation39_spill] sm:$0xff] %v19613_v33  ;;  %v16001_v40 = vadd.f32 %v16000_v8, %v15999_v42  ;;  %v19630_v8 = vpop.f32.mrf.mxu1 }
 0x1f0   : > { %v16002_v63 = vpop.f32.mrf.mxu0 }
 0x1f1   : > { %v19618_v55 = vadd.f32 %v16001_v40, %v19431_v11 }
 0x1f2   : > { %v16003_v13 = vpop.f32.mrf.mxu0 }
 0x1f3   : > { %22055 = vst [vmem:[#allocation40_spill] sm:$0xff] %v19618_v55  ;;  %v16004_v16 = vadd.f32 %v16003_v13, %v16002_v63  ;;  %v17977_v55 = vld [vmem:[#allocation3 + $0x388] sm:$0xff]  }
 0x1f4   : > { %v16005_v14 = vpop.f32.mrf.mxu0  ;;  %v17978_v13 = vld [vmem:[#allocation3 + $0x348] sm:$0xff]   ;;  %16395 = vmatprep.subr.bf16.mxu1 %v17977_v55  ;;  %v16047_v55 = vadd.f32 %v19479_v12, %v19468_v22  ;;  %v16059_v22 = vadd.f32 %v19507_v15, %v19502_v51 }
 0x1f5   : > { %v19623_v29 = vadd.f32 %v16004_v16, %v19435_v45  ;;  %v19635_v16 = vpop.f32.mrf.mxu1  ;;  %16396 = vmatpush3.bf16.msra.mxu1 %v17978_v13 }
 0x1f6   : > { %v16006_v39 = vpop.f32.mrf.mxu0 }
 0x1f7   : > { %22056 = vst [vmem:[#allocation41_spill] sm:$0xff] %v19623_v29  ;;  %v16007_v58 = vadd.f32 %v16006_v39, %v16005_v14 }
 0x1f8   : > { %v16008_v33 = vpop.f32.mrf.mxu0 }
 0x1f9   : > { %v19628_v42 = vadd.f32 %v16007_v58, %v19438_v4  ;;  %v19640_v58 = vpop.f32.mrf.mxu1 }
 0x1fa   : > { %v16009_v57 = vpop.f32.mrf.mxu0 }
 0x1fb   : > { %v16010_v11 = vadd.f32 %v16009_v57, %v16008_v33 }
 0x1fc   : > { %v16011_v40 = vpop.f32.mrf.mxu0 }
 0x1fd   : > { %v19633_v63 = vadd.f32 %v16010_v11, %v19444_v0 }
 0x1fe   : > { %v16012_v45 = vpop.f32.mrf.mxu0 }
 0x1ff   : > { %22057 = vst [vmem:[#allocation42_spill] sm:$0xff] %v19633_v63  ;;  %v16013_v29 = vadd.f32 %v16012_v45, %v16011_v40  ;;  %v19651_v40 = vpop.f32.mrf.mxu1 }
 0x200   : > { %v16014_v14 = vpop.f32.mrf.mxu0 }
 0x201   : > { %v19638_v4 = vadd.f32 %v16013_v29, %v19447_v61  ;;  %v16050_v29 = vadd.f32 %v19486_v26, %v19481_v24  ;;  %v19659_v45 = vpop.f32.mrf.mxu1 }
 0x202   : > { %v16015_v39 = vpop.f32.mrf.mxu0 }
 0x203   : > { %22058 = vst [vmem:[#allocation43_spill] sm:$0xff] %v19638_v4  ;;  %v16016_v33 = vadd.f32 %v16015_v39, %v16014_v14  ;;  %v2034_v14 = vadd.f32 %v16047_v55, %v19461_v25  ;;  %v17981_v39 = vld [vmem:[#allocation3 + $0x380] sm:$0xff]   ;;  %v19664_v12 = vpop.f32.mrf.mxu1  ;;  %v2037_v24 = vadd.f32 %v16050_v29, %v19471_v23  ;;  %v16053_v25 = vadd.f32 %v19493_v30, %v19488_v56 }
 0x204   : > { %v19642_v57 = vpop.f32.mrf.mxu0  ;;  %16397 = vmatprep.subr.bf16.mxu1 %v17981_v39  ;;  %v16062_v39 = vadd.f32 %v19514_v59, %v19509_v47  ;;  %v16056_v56 = vadd.f32 %v19500_v21, %v19495_v20 }
 0x205   : > { %v19645_v0 = vadd.f32 %v16016_v33, %v19450_v38  ;;  %v19674_v15 = vpop.f32.mrf.mxu1  ;;  %v2042_v59 = vadd.f32 %v16053_v25, %v19484_v32 }
 0x206   : > { %v19647_v11 = vpop.f32.mrf.mxu0  ;;  %v2045_v25 = vadd.f32 %v16056_v56, %v19491_v1 }
 0x207   : > { %22059 = vst [vmem:[#allocation44_spill] sm:$0xff] %v19645_v0  ;;  %v17982_v0 = vld [vmem:[#allocation3 + $0x340] sm:$0xff]  }
 0x208   : > { %v19653_v13 = vpop.f32.mrf.mxu0  ;;  %16398 = vmatpush3.bf16.msra.mxu1 %v17982_v0  ;;  %v2050_v0 = vadd.f32 %v16059_v22, %v19498_v35 }
 0x20a   : > { %v19655_v61 = vpop.f32.mrf.mxu0 }
 0x20b   : > { %22060 = vst [vmem:[#allocation45_spill] sm:$0xff] %v19655_v61 }
 0x20c   : > { %v17575_v38 = vpop.f32.mrf.mxu0 }
 0x20d   : > { %v2195_v33 = vadd.f32 %v17575_v38, %v2034_v14 }
 0x20e   : > { %v2186_v4 = vpop.f32.mrf.mxu0 }
 0x20f   : > { %v2315_v63 = vmul.f32 0.01, %v2195_v33  ;;  %v2187_v61 = vadd.f32 %v2186_v4, %v19463_v3 }
 0x210   : > { %v17576_v26 = vpop.f32.mrf.mxu0 }
 0x211   : > { %v19670_v55 = vmax.f32 %v2195_v33, %v2315_v63  ;;  %v2313_v14 = vmul.f32 0.01, %v2187_v61  ;;  %v2198_v38 = vadd.f32 %v17576_v26, %v2037_v24  ;;  %v16071_v33 = vadd.f32 %v19535_v43, %v19530_v28 }
 0x212   : > { %v2189_v51 = vpop.f32.mrf.mxu0  ;;  %v2053_v24 = vadd.f32 %v16062_v39, %v19505_v5  ;;  %v16065_v26 = vadd.f32 %v19521_v18, %v19516_v34 }
 0x213   : > { %2451 = vst [vmem:[#allocation2 + $0x48] sm:$0xff] %v19670_v55  ;;  %v2345_v3 = vmax.f32 %v2187_v61, %v2313_v14  ;;  %v2316_v4 = vmul.f32 0.01, %v2198_v38  ;;  %v2190_v23 = vadd.f32 %v2189_v51, %v19477_v10  ;;  %v19687_v10 = vpop.f32.mrf.mxu1  ;;  %v2066_v39 = vadd.f32 %v16071_v33, %v19526_v37 }
 0x214   : > { %v17579_v30 = vpop.f32.mrf.mxu0  ;;  %v16068_v37 = vadd.f32 %v19528_v49, %v19523_v60 }
 0x215   : > { %2449 = vst [vmem:[#allocation2 + $0x28] sm:$0xff] %v2345_v3  ;;  %v19681_v63 = vmax.f32 %v2198_v38, %v2316_v4  ;;  %v2314_v29 = vmul.f32 0.01, %v2190_v23  ;;  %v2211_v47 = vadd.f32 %v17579_v30, %v2050_v0  ;;  %v16074_v4 = vadd.f32 %v19542_v44, %v19537_v19  ;;  %v19707_v0 = vld [vmem:[#allocation2 + $0x18] sm:$0xff] }
 0x216   : > { %v2202_v61 = vpop.f32.mrf.mxu0 }
 0x217   : > { %2452 = vst [vmem:[#allocation2 + $0x50] sm:$0xff] %v19681_v63  ;;  %v2346_v35 = vmax.f32 %v2190_v23, %v2314_v29  ;;  %v2319_v20 = vmul.f32 0.01, %v2211_v47  ;;  %v2203_v21 = vadd.f32 %v2202_v61, %v2042_v59  ;;  %v2788_v22 = vpack.c.bf16 %v19681_v63, %v19670_v55  ;;  %v19702_v23 = vpop.f32.mrf.mxu1 }
 0x218   : > { %v17580_v32 = vpop.f32.mrf.mxu0  ;;  %v2058_v29 = vadd.f32 %v16065_v26, %v19512_v17  ;;  %v16083_v59 = vadd.f32 %v19563_v6, %v19558_v27  ;;  %v2069_v17 = vadd.f32 %v16074_v4, %v19533_v62  ;;  %v22062_v6 = vld [vmem:[#allocation17_spill] sm:$0xff]  ;;  %v17972_v4 = vld [vmem:[#allocation3 + $0x3f8] sm:$0xff]  }
 0x219   : > { %2450 = vst [vmem:[#allocation2 + $0x30] sm:$0xff] %v2346_v35  ;;  %v19695_v28 = vmax.f32 %v2211_v47, %v2319_v20  ;;  %v2317_v5 = vmul.f32 0.01, %v2203_v21  ;;  %v2214_v43 = vadd.f32 %v17580_v32, %v2053_v24  ;;  %v2779_v14 = vpack.c.bf16 %v2346_v35, %v2345_v3  ;;  %v17990_v47 = vld [vmem:[#allocation3 + $0x478] sm:$0xff]   ;;  %v19721_v60 = vpop.f32.mrf.mxu1 }
 0x21a   : > { %v2205_v38 = vpop.f32.mrf.mxu0  ;;  %v19698_v51 = vld [vmem:[#allocation2 + $0x47] sm:$0xff]  ;;  %17605 = vmatprep.subr.bf16.mxu1 %v17990_v47  ;;  %v16077_v26 = vadd.f32 %v19549_v46, %v22062_v6  ;;  %v22068_v47 = vld [vmem:[#allocation27_spill] sm:$0xff] }
 0x21b   : > { %2455 = vst [vmem:[#allocation2 + $0x88] sm:$0xff] %v19695_v28  ;;  %v19705_v34 = vmax.f32 %v2203_v21, %v2317_v5  ;;  %v2320_v1 = vmul.f32 0.01, %v2214_v43  ;;  %v2206_v18 = vadd.f32 %v2205_v38, %v2045_v25  ;;  %3538 = vmatprep.mubr.bf16.mxu1 %v2779_v14  ;;  %5687 = vst [vmem:[#allocation2 + $0x40] sm:$0xff] %v19707_v0  ;;  %v22063_v25 = vld [vmem:[#allocation15_spill] sm:$0xff] }
 0x21c   : > { %v17583_v3 = vpop.f32.mrf.mxu0  ;;  %v2483_v56 = vld [vmem:[#allocation2 + $0x27] sm:$0xff]  ;;  %v2061_v5 = vadd.f32 %v16068_v37, %v22063_v25  ;;  %v22064_v38 = vld [vmem:[#allocation11_spill] sm:$0xff] }
 0x21d   : > { %2453 = vst [vmem:[#allocation2 + $0x68] sm:$0xff] %v19705_v34  ;;  %v19713_v44 = vmax.f32 %v2214_v43, %v2320_v1  ;;  %v2318_v19 = vmul.f32 0.01, %v2206_v18  ;;  %v2227_v30 = vadd.f32 %v17583_v3, %v2066_v39  ;;  %5683 = vst [vmem:[#allocation2 + $0x20] sm:$0xff] %v19707_v0  ;;  %v22065_v39 = vld [vmem:[#allocation12_spill] sm:$0xff] }
 0x21e   : > { %v2218_v33 = vpop.f32.mrf.mxu0  ;;  %v2486_v61 = vld [vmem:[#allocation2 + $0x4f] sm:$0xff]  ;;  %v2771_v1 = vpack.c.bf16 %v22065_v39, %v22064_v38  ;;  %v22069_v25 = vld [vmem:[#allocation24_spill] sm:$0xff] }
 0x21f   : > { %v19719_v24 = vld [vmem:[#allocation2 + $0x51] sm:$0xff]  ;;  %2456 = vst [vmem:[#allocation2 + $0x90] sm:$0xff] %v19713_v44  ;;  %v19724_v49 = vmax.f32 %v2206_v18, %v2318_v19  ;;  %v2323_v35 = vmul.f32 0.01, %v2227_v30  ;;  %v2219_v20 = vadd.f32 %v2218_v33, %v2058_v29  ;;  %v19727_v21 = vld [vmem:[#allocation2 + $0x49] sm:$0xff]  ;;  %v16086_v33 = vadd.f32 %v19570_v50, %v22068_v47 }
 0x220   : > { %13700 = vst [vmem:[#allocation2 + $0x58] sm:$0xff] %v19707_v0  ;;  %v19730_v27 = vld [vmem:[#allocation2 + $0x50] sm:$0xff]  ;;  %v17584_v32 = vpop.f32.mrf.mxu0  ;;  %v2082_v38 = vadd.f32 %v16083_v59, %v22069_v25  ;;  %v19764_v50 = vpack.c.bf16 %v2486_v61, %v19698_v51  ;;  %v22074_v61 = vld [vmem:[#allocation16_spill] sm:$0xff] }
 0x221   : > { %22061 = vst [vmem:[#allocation46_spill] sm:$0xff] %v19730_v27  ;;  %v2484_v43 = vld [vmem:[#allocation2 + $0x2f] sm:$0xff]  ;;  %5689 = vst [vmem:[#allocation2 + $0x50] sm:$0xff] %v19707_v0  ;;  %v19743_v18 = vmax.f32 %v2227_v30, %v2323_v35  ;;  %v2321_v46 = vmul.f32 0.01, %v2219_v20  ;;  %v2230_v3 = vadd.f32 %v17584_v32, %v2069_v17  ;;  %v19758_v17 = vpop.f32.mrf.mxu1 }
 0x222   : > { %v19735_v14 = vld [vmem:[#allocation2 + $0x31] sm:$0xff]  ;;  %2454 = vst [vmem:[#allocation2 + $0x70] sm:$0xff] %v19724_v49  ;;  %v19745_v19 = vld [vmem:[#allocation2 + $0x29] sm:$0xff]  ;;  %v2772_v37 = vpack.c.bf16 %v2484_v43, %v2483_v56  ;;  %v2221_v6 = vpop.f32.mrf.mxu0  ;;  %22070 = vst [vmem:[#allocation11_spill] sm:$0xff] %v19764_v50 }
 0x223   : > { %22066 = vst [vmem:[#allocation17_spill] sm:$0xff] %v19743_v18  ;;  %13696 = vst [vmem:[#allocation2 + $0x38] sm:$0xff] %v19707_v0  ;;  %v19748_v29 = vld [vmem:[#allocation2 + $0x30] sm:$0xff]  ;;  %v19755_v30 = vld [vmem:[#allocation2 + $0x87] sm:$0xff]  ;;  %v19761_v56 = vmax.f32 %v2219_v20, %v2321_v46  ;;  %v2324_v32 = vmul.f32 0.01, %v2230_v3  ;;  %v2222_v43 = vadd.f32 %v2221_v6, %v2061_v5  ;;  %v2074_v6 = vadd.f32 %v16077_v26, %v22074_v61 }
 0x224   : > { %22067 = vst [vmem:[#allocation15_spill] sm:$0xff] %v19748_v29  ;;  %v17975_v35 = vld [vmem:[#allocation3 + $0x430] sm:$0xff]   ;;  %5685 = vst [vmem:[#allocation2 + $0x30] sm:$0xff] %v19707_v0  ;;  %3691 = vmatprep.mubr.bf16.mxu0 %v2772_v37  ;;  %3539 = vmatmul.mubr.bf16.gmra.mxu1 %v2772_v37  ;;  %v17587_v62 = vpop.f32.mrf.mxu0  ;;  %v2487_v20 = vld [vmem:[#allocation2 + $0x67] sm:$0xff] }
 0x225   : > { %2459 = vst [vmem:[#allocation2 + $0xc8] sm:$0xff] %v19743_v18  ;;  %5695 = vst [vmem:[#allocation2 + $0x80] sm:$0xff] %v19707_v0  ;;  %v22071_v59 = vld [vmem:[#allocation10_spill] sm:$0xff]  ;;  %v22072_v47 = vld [vmem:[#allocation25_spill] sm:$0xff]  ;;  %3692 = vmatmul.mubr.bf16.vlgmr.msra.gmra.mxu0 %v2771_v1  ;;  %3546 = vmatprep.mubr.bf16.mxu1 %v2788_v22  ;;  %v19773_v5 = vmax.f32 %v2230_v3, %v2324_v32  ;;  %v2322_v37 = vmul.f32 0.01, %v2222_v43  ;;  %v2243_v51 = vadd.f32 %v17587_v62, %v2082_v38  ;;  %v19784_v32 = vpop.f32.mrf.mxu1 }
 0x226   : > { %v16080_v25 = vadd.f32 %v22072_v47, %v22071_v59  ;;  %v17976_v46 = vld [vmem:[#allocation3 + $0x3f0] sm:$0xff]   ;;  %2457 = vst [vmem:[#allocation2 + $0xa8] sm:$0xff] %v19761_v56  ;;  %3699 = vmatprep.mubr.bf16.mxu0 %v19764_v50  ;;  %5691 = vst [vmem:[#allocation2 + $0x60] sm:$0xff] %v19707_v0  ;;  %16496 = vmatpush3.bf16.msra.mxu0 %v17972_v4  ;;  %v16095_v1 = vadd.f32 %v19591_v48, %v19586_v36  ;;  %v2234_v55 = vpop.f32.mrf.mxu0  ;;  %v17979_v3 = vld [vmem:[#allocation3 + $0x428] sm:$0xff]  }
 0x227   : > { %22073 = vst [vmem:[#allocation12_spill] sm:$0xff] %v19773_v5  ;;  %v19780_v63 = vld [vmem:[#allocation2 + $0x8f] sm:$0xff]  ;;  %16497 = vmatprep.subr.bf16.mxu0 %v17975_v35  ;;  %2460 = vst [vmem:[#allocation2 + $0xd0] sm:$0xff] %v19773_v5  ;;  %v19787_v62 = vmax.f32 %v2222_v43, %v2322_v37  ;;  %v2327_v26 = vmul.f32 0.01, %v2243_v51  ;;  %v2235_v38 = vadd.f32 %v2234_v55, %v2074_v6  ;;  %v22081_v18 = vld [vmem:[#allocation32_spill] sm:$0xff] }
 0x228   : > { %v19782_v22 = vld [vmem:[#allocation2 + $0x91] sm:$0xff]  ;;  %v19790_v47 = vld [vmem:[#allocation2 + $0x89] sm:$0xff]  ;;  %v17588_v36 = vpop.f32.mrf.mxu0  ;;  %v2098_v5 = vadd.f32 %v16095_v1, %v22081_v18 }
 0x229   : > { %v22075_v59 = vld [vmem:[#allocation26_spill] sm:$0xff]  ;;  %13708 = vst [vmem:[#allocation2 + $0x98] sm:$0xff] %v19707_v0  ;;  %v22077_v61 = vld [vmem:[#allocation9_spill] sm:$0xff]  ;;  %2458 = vst [vmem:[#allocation2 + $0xb0] sm:$0xff] %v19787_v62  ;;  %v19804_v55 = vmax.f32 %v2243_v51, %v2327_v26 }
 0x22a   : > { %v2085_v4 = vadd.f32 %v16086_v33, %v22075_v59  ;;  %v19793_v48 = vld [vmem:[#allocation2 + $0x90] sm:$0xff]  ;;  %v2077_v35 = vadd.f32 %v16080_v25, %v22077_v61  ;;  %v17980_v37 = vld [vmem:[#allocation3 + $0x3e8] sm:$0xff]   ;;  %v2325_v59 = vmul.f32 0.01, %v2235_v38  ;;  %16498 = vmatpush3.bf16.msra.mxu0 %v17976_v46  ;;  %v16098_v61 = vadd.f32 %v19598_v9, %v19593_v7  ;;  %v2237_v43 = vpop.f32.mrf.mxu0  ;;  %v19823_v46 = vpop.f32.mrf.mxu1 }
 0x22b   : > { %22076 = vst [vmem:[#allocation27_spill] sm:$0xff] %v19793_v48  ;;  %v2488_v39 = vld [vmem:[#allocation2 + $0x6f] sm:$0xff]  ;;  %5697 = vst [vmem:[#allocation2 + $0x90] sm:$0xff] %v19707_v0  ;;  %16499 = vmatprep.subr.bf16.mxu0 %v17979_v3 }
 0x22c   : > { %v19796_v27 = vld [vmem:[#allocation2 + $0x71] sm:$0xff]  ;;  %22079 = vst [vmem:[#allocation24_spill] sm:$0xff] %v19804_v55  ;;  %v2246_v48 = vadd.f32 %v17588_v36, %v2085_v4  ;;  %v19806_v29 = vld [vmem:[#allocation2 + $0x69] sm:$0xff]  ;;  %v17983_v4 = vld [vmem:[#allocation3 + $0x420] sm:$0xff]   ;;  %v19826_v7 = vmax.f32 %v2235_v38, %v2325_v59  ;;  %v2238_v18 = vadd.f32 %v2237_v43, %v2077_v35  ;;  %3547 = vmatmul.mubr.bf16.gmra.mxu1 %v19764_v50  ;;  %v17591_v36 = vpop.f32.mrf.mxu0 }
 0x22d   : > { %v22078_v33 = vld [vmem:[#allocation30_spill] sm:$0xff]  ;;  %13704 = vst [vmem:[#allocation2 + $0x78] sm:$0xff] %v19707_v0  ;;  %v19820_v26 = vld [vmem:[#allocation2 + $0xc7] sm:$0xff]  ;;  %2463 = vst [vmem:[#allocation2 + $0x108] sm:$0xff] %v19804_v55 }
 0x22e   : > { %v16089_v6 = vadd.f32 %v22078_v33, %v19572_v53  ;;  %v19809_v25 = vld [vmem:[#allocation2 + $0x70] sm:$0xff]  ;;  %v19816_v53 = vpack.c.bf16 %v19735_v14, %v19745_v19  ;;  %v2328_v9 = vmul.f32 0.01, %v2246_v48  ;;  %v19829_v14 = vpack.c.bf16 %v2488_v39, %v2487_v20  ;;  %5703 = vst [vmem:[#allocation2 + $0xc0] sm:$0xff] %v19707_v0  ;;  %v22084_v19 = vld [vmem:[#allocation31_spill] sm:$0xff]  ;;  %v19838_v38 = vld [vmem:[#allocation2 + $0xa7] sm:$0xff]  ;;  %16500 = vmatpush3.bf16.msra.mxu0 %v17980_v37 }
 0x22f   : > { %22080 = vst [vmem:[#allocation10_spill] sm:$0xff] %v19809_v25  ;;  %5693 = vst [vmem:[#allocation2 + $0x70] sm:$0xff] %v19707_v0  ;;  %v22085_v1 = vld [vmem:[#allocation33_spill] sm:$0xff]  ;;  %v22086_v33 = vpack.c.bf16 %v19724_v49, %v19705_v34  ;;  %v17984_v59 = vld [vmem:[#allocation3 + $0x3e0] sm:$0xff]   ;;  %v2326_v39 = vmul.f32 0.01, %v2238_v18  ;;  %v2259_v20 = vadd.f32 %v17591_v36, %v2098_v5  ;;  %v16107_v34 = vadd.f32 %v19625_v54, %v19620_v52  ;;  %v2250_v49 = vpop.f32.mrf.mxu0 }
 0x230   : > { %22082 = vst [vmem:[#allocation25_spill] sm:$0xff] %v19816_v53  ;;  %22083 = vst [vmem:[#allocation16_spill] sm:$0xff] %v19829_v14  ;;  %v16092_v3 = vadd.f32 %v22085_v1, %v22084_v19  ;;  %3700 = vmatmul.mubr.bf16.gmra.mxu0 %v19816_v53  ;;  %v19841_v35 = vmax.f32 %v2246_v48, %v2328_v9  ;;  %v22088_v43 = vld [vmem:[#allocation28_spill] sm:$0xff]  ;;  %v19848_v1 = vld [vmem:[#allocation2 + $0xcf] sm:$0xff]  ;;  %16501 = vmatprep.subr.bf16.mxu0 %v17983_v4  ;;  %v19852_v9 = vpop.f32.mrf.mxu1 }
 0x231   : > { %3554 = vmatprep.mubr.bf16.mxu1 %v22086_v33  ;;  %2461 = vst [vmem:[#allocation2 + $0xe8] sm:$0xff] %v19826_v7  ;;  %3707 = vmatprep.mubr.bf16.mxu0 %v19829_v14  ;;  %v2090_v19 = vadd.f32 %v16089_v6, %v22088_v43  ;;  %5699 = vst [vmem:[#allocation2 + $0xa0] sm:$0xff] %v19707_v0  ;;  %v19850_v33 = vld [vmem:[#allocation2 + $0xd1] sm:$0xff]  ;;  %v19855_v5 = vmax.f32 %v2238_v18, %v2326_v39  ;;  %v2331_v6 = vmul.f32 0.01, %v2259_v20  ;;  %v19858_v51 = vld [vmem:[#allocation2 + $0xc9] sm:$0xff]  ;;  %v17592_v54 = vpop.f32.mrf.mxu0 }
 0x232   : > { %22087 = vst [vmem:[#allocation26_spill] sm:$0xff] %v19841_v35  ;;  %v17985_v48 = vld [vmem:[#allocation3 + $0x418] sm:$0xff]   ;;  %2464 = vst [vmem:[#allocation2 + $0x110] sm:$0xff] %v19841_v35  ;;  %v19861_v52 = vld [vmem:[#allocation2 + $0xd0] sm:$0xff]  ;;  %16502 = vmatpush3.bf16.msra.mxu0 %v17984_v59  ;;  %v16110_v18 = vadd.f32 %v19635_v16, %v19630_v8  ;;  %v2114_v35 = vadd.f32 %v16107_v34, %v19608_v2  ;;  %v19893_v59 = vpop.f32.mrf.mxu1 }
 0x233   : > { %v2251_v36 = vadd.f32 %v2250_v49, %v2090_v19  ;;  %v22089_v43 = vld [vmem:[#allocation34_spill] sm:$0xff]  ;;  %13716 = vst [vmem:[#allocation2 + $0xd8] sm:$0xff] %v19707_v0  ;;  %22090 = vst [vmem:[#allocation9_spill] sm:$0xff] %v19861_v52  ;;  %v22091_v50 = vld [vmem:[#allocation29_spill] sm:$0xff]  ;;  %v19874_v49 = vmax.f32 %v2259_v20, %v2331_v6  ;;  %v2253_v55 = vpop.f32.mrf.mxu0  ;;  %16503 = vmatprep.subr.bf16.mxu0 %v17985_v48 }
 0x234   : > { %v2101_v37 = vadd.f32 %v16098_v61, %v22089_v43  ;;  %v2093_v4 = vadd.f32 %v16092_v3, %v22091_v50  ;;  %v19864_v25 = vld [vmem:[#allocation2 + $0xaf] sm:$0xff]  ;;  %v17986_v39 = vld [vmem:[#allocation3 + $0x3d8] sm:$0xff]   ;;  %5705 = vst [vmem:[#allocation2 + $0xd0] sm:$0xff] %v19707_v0  ;;  %v22092_v61 = vld [vmem:[#allocation36_spill] sm:$0xff]  ;;  %3555 = vmatmul.mubr.bf16.gmra.mxu1 %v19829_v14 }
 0x235   : > { %v19866_v53 = vld [vmem:[#allocation2 + $0xb1] sm:$0xff]  ;;  %v16101_v19 = vadd.f32 %v19605_v31, %v22092_v61  ;;  %2462 = vst [vmem:[#allocation2 + $0xf0] sm:$0xff] %v19855_v5  ;;  %v2329_v43 = vmul.f32 0.01, %v2251_v36  ;;  %v19876_v50 = vld [vmem:[#allocation2 + $0xa9] sm:$0xff]  ;;  %v19886_v31 = vpack.c.bf16 %v19719_v24, %v19727_v21  ;;  %2467 = vst [vmem:[#allocation2 + $0x148] sm:$0xff] %v19874_v49  ;;  %v19901_v24 = vpack.c.bf16 %v19780_v63, %v19755_v30  ;;  %v17595_v48 = vpop.f32.mrf.mxu0 }
 0x236   : > { %v2262_v52 = vadd.f32 %v17592_v54, %v2101_v37  ;;  %13712 = vst [vmem:[#allocation2 + $0xb8] sm:$0xff] %v19707_v0  ;;  %v19879_v3 = vld [vmem:[#allocation2 + $0xb0] sm:$0xff]  ;;  %v19890_v6 = vld [vmem:[#allocation2 + $0x107] sm:$0xff]  ;;  %v2254_v16 = vadd.f32 %v2253_v55, %v2093_v4  ;;  %v2275_v63 = vadd.f32 %v17595_v48, %v2114_v35  ;;  %v22097_v61 = vld [vmem:[#allocation35_spill] sm:$0xff]  ;;  %16504 = vmatpush3.bf16.msra.mxu0 %v17986_v39 }
 0x237   : > { %22093 = vst [vmem:[#allocation30_spill] sm:$0xff] %v19879_v3  ;;  %v17987_v37 = vld [vmem:[#allocation3 + $0x410] sm:$0xff]   ;;  %5701 = vst [vmem:[#allocation2 + $0xb0] sm:$0xff] %v19707_v0  ;;  %v19896_v8 = vmax.f32 %v2251_v36, %v2329_v43  ;;  %v22096_v36 = vpack.c.bf16 %v19713_v44, %v19695_v28  ;;  %v16119_v28 = vadd.f32 %v19687_v10, %v19674_v15  ;;  %v2266_v44 = vpop.f32.mrf.mxu0 }
 0x238   : > { %v2332_v2 = vmul.f32 0.01, %v2262_v52  ;;  %22094 = vst [vmem:[#allocation32_spill] sm:$0xff] %v19901_v24  ;;  %5711 = vst [vmem:[#allocation2 + $0x100] sm:$0xff] %v19707_v0  ;;  %v22095_v21 = vld [vmem:[#allocation38_spill] sm:$0xff]  ;;  %3708 = vmatmul.mubr.bf16.gmra.mxu0 %v19886_v31  ;;  %v19910_v54 = vld [vmem:[#allocation2 + $0xe7] sm:$0xff]  ;;  %16505 = vmatprep.subr.bf16.mxu0 %v17987_v37  ;;  %v16113_v10 = vadd.f32 %v19651_v40, %v19640_v58  ;;  %v16019_v37 = vadd.f32 %v19647_v11, %v19642_v57 }
 0x239   : > { %v16104_v34 = vadd.f32 %v19615_v41, %v22095_v21  ;;  %3562 = vmatprep.mubr.bf16.mxu1 %v22096_v36  ;;  %v17988_v55 = vld [vmem:[#allocation3 + $0x3d0] sm:$0xff]   ;;  %2465 = vst [vmem:[#allocation2 + $0x128] sm:$0xff] %v19896_v8  ;;  %v2330_v30 = vmul.f32 0.01, %v2254_v16  ;;  %3715 = vmatprep.mubr.bf16.mxu0 %v19901_v24  ;;  %v2106_v41 = vadd.f32 %v16101_v19, %v22097_v61  ;;  %5707 = vst [vmem:[#allocation2 + $0xe0] sm:$0xff] %v19707_v0  ;;  %v22098_v36 = vld [vmem:[#allocation39_spill] sm:$0xff]  ;;  %v17596_v20 = vpop.f32.mrf.mxu0 }
 0x23a   : > { %v19913_v4 = vmax.f32 %v2262_v52, %v2332_v2  ;;  %v19920_v43 = vld [vmem:[#allocation2 + $0x10f] sm:$0xff]  ;;  %v16130_v2 = vpop.f32.mrf.mxu1  ;;  %v2335_v48 = vmul.f32 0.01, %v2275_v63  ;;  %v2117_v61 = vadd.f32 %v16110_v18, %v22098_v36  ;;  %v16116_v36 = vadd.f32 %v19664_v12, %v19659_v45  ;;  %16506 = vmatpush3.bf16.msra.mxu0 %v17988_v55 }
 0x23b   : > { %v19922_v21 = vld [vmem:[#allocation2 + $0x111] sm:$0xff]  ;;  %v17989_v52 = vld [vmem:[#allocation3 + $0x408] sm:$0xff]   ;;  %v19925_v35 = vmax.f32 %v2254_v16, %v2330_v30  ;;  %v2267_v19 = vadd.f32 %v2266_v44, %v2106_v41  ;;  %v2269_v18 = vpop.f32.mrf.mxu0  ;;  %v19960_v45 = vpack.c.bf16 %v19796_v27, %v19806_v29  ;;  %v19973_v27 = vpack.c.bf16 %v19864_v25, %v19838_v38  ;;  %v17993_v25 = vld [vmem:[#allocation3 + $0x3c0] sm:$0xff]  }
 0x23c   : > { %2468 = vst [vmem:[#allocation2 + $0x150] sm:$0xff] %v19913_v4  ;;  %v19928_v39 = vld [vmem:[#allocation2 + $0x109] sm:$0xff]  ;;  %13724 = vst [vmem:[#allocation2 + $0x118] sm:$0xff] %v19707_v0  ;;  %v19940_v41 = vld [vmem:[#allocation2 + $0xf1] sm:$0xff]  ;;  %v19948_v58 = vmax.f32 %v2275_v63, %v2335_v48  ;;  %v2278_v11 = vadd.f32 %v17596_v20, %v2117_v61  ;;  %16507 = vmatprep.subr.bf16.mxu0 %v17989_v52  ;;  %v16132_v55 = vpop.f32.mrf.mxu1  ;;  %3563 = vmatmul.mubr.bf16.gmra.mxu1 %v19901_v24 }
 0x23d   : > { %v19931_v15 = vld [vmem:[#allocation2 + $0x110] sm:$0xff]  ;;  %v17991_v44 = vld [vmem:[#allocation3 + $0x3c8] sm:$0xff]   ;;  %2466 = vst [vmem:[#allocation2 + $0x130] sm:$0xff] %v19925_v35  ;;  %v2333_v57 = vmul.f32 0.01, %v2267_v19  ;;  %13720 = vst [vmem:[#allocation2 + $0xf8] sm:$0xff] %v19707_v0  ;;  %v17599_v61 = vpop.f32.mrf.mxu0  ;;  %v16131_v12 = vadd.f32 %v16130_v2, %v19893_v59  ;;  %v16125_v2 = vadd.f32 %v19784_v32, %v19758_v17 }
 0x23e   : > { %22099 = vst [vmem:[#allocation31_spill] sm:$0xff] %v19931_v15  ;;  %v22100_v3 = vld [vmem:[#allocation37_spill] sm:$0xff]  ;;  %5713 = vst [vmem:[#allocation2 + $0x110] sm:$0xff] %v19707_v0  ;;  %v2130_v15 = vadd.f32 %v16119_v28, %v19628_v42  ;;  %v17992_v63 = vld [vmem:[#allocation3 + $0x400] sm:$0xff]   ;;  %16508 = vmatpush3.bf16.msra.mxu0 %v17991_v44 }
 0x23f   : > { %v2109_v16 = vadd.f32 %v16104_v34, %v22100_v3  ;;  %v19938_v30 = vld [vmem:[#allocation2 + $0xef] sm:$0xff]  ;;  %v16122_v34 = vadd.f32 %v19721_v60, %v19702_v23  ;;  %v19964_v20 = vld [vmem:[#allocation2 + $0x147] sm:$0xff]  ;;  %2471 = vst [vmem:[#allocation2 + $0x188] sm:$0xff] %v19948_v58  ;;  %v19968_v23 = vmax.f32 %v2267_v19, %v2333_v57  ;;  %v2336_v60 = vmul.f32 0.01, %v2278_v11  ;;  %22102 = vst [vmem:[#allocation28_spill] sm:$0xff] %v19973_v27 }
 0x240   : > { %v19950_v40 = vld [vmem:[#allocation2 + $0xe9] sm:$0xff]  ;;  %13729 = vst [vmem:[#allocation2 + $0x140] sm:$0xff] %v19707_v0  ;;  %v22103_v29 = vld [vmem:[#allocation18_spill] sm:$0xff]  ;;  %3716 = vmatmul.mubr.bf16.gmra.mxu0 %v19960_v45  ;;  %v22105_v19 = vpack.c.bf16 %v19787_v62, %v19761_v56  ;;  %v2282_v56 = vpop.f32.mrf.mxu0  ;;  %16509 = vmatprep.subr.bf16.mxu0 %v17992_v63 }
 0x241   : > { %v19953_v3 = vld [vmem:[#allocation2 + $0xf0] sm:$0xff]  ;;  %v2270_v42 = vadd.f32 %v2269_v18, %v2109_v16  ;;  %v1985_v28 = vadd.f32 %v16019_v37, %v22103_v29  ;;  %v22106_v16 = vld [vmem:[#allocation40_spill] sm:$0xff]  ;;  %2469 = vst [vmem:[#allocation2 + $0x168] sm:$0xff] %v19968_v23  ;;  %v19988_v37 = vmax.f32 %v2278_v11, %v2336_v60  ;;  %v2291_v29 = vadd.f32 %v17599_v61, %v2130_v15  ;;  %v16133_v11 = vpop.f32.mrf.mxu1 }
 0x242   : > { %22101 = vst [vmem:[#allocation33_spill] sm:$0xff] %v19953_v3  ;;  %5709 = vst [vmem:[#allocation2 + $0xf0] sm:$0xff] %v19707_v0  ;;  %v22104_v52 = vld [vmem:[#allocation45_spill] sm:$0xff]  ;;  %3570 = vmatprep.mubr.bf16.mxu1 %v22105_v19  ;;  %v2122_v18 = vadd.f32 %v16113_v10, %v22106_v16  ;;  %3723 = vmatprep.mubr.bf16.mxu0 %v19973_v27  ;;  %v22107_v62 = vld [vmem:[#allocation42_spill] sm:$0xff]  ;;  %v16134_v32 = vadd.f32 %v16133_v11, %v16132_v55 }
 0x243   : > { %v16022_v48 = vadd.f32 %v22104_v52, %v19653_v13  ;;  %v19984_v57 = vld [vmem:[#allocation2 + $0x127] sm:$0xff]  ;;  %v2334_v13 = vmul.f32 0.01, %v2270_v42  ;;  %v2133_v10 = vadd.f32 %v16122_v34, %v22107_v62  ;;  %v19994_v16 = vld [vmem:[#allocation2 + $0x14f] sm:$0xff]  ;;  %2472 = vst [vmem:[#allocation2 + $0x190] sm:$0xff] %v19988_v37  ;;  %16510 = vmatpush3.bf16.msra.mxu0 %v17993_v25  ;;  %v22116_v11 = vld [vmem:[#allocation43_spill] sm:$0xff] }
 0x244   : > { %v2721_v38 = vld [vmem:[#allocation2 + $0x148] sm:$0xff]  ;;  %5715 = vst [vmem:[#allocation2 + $0x120] sm:$0xff] %v19707_v0  ;;  %v2566_v59 = vld [vmem:[#allocation2 + $0x151] sm:$0xff]  ;;  %v2339_v60 = vmul.f32 0.01, %v2291_v29  ;;  %v2283_v44 = vadd.f32 %v2282_v56, %v2122_v18  ;;  %3571 = vmatmul.mubr.bf16.gmra.mxu1 %v19973_v27 }
 0x245   : > { %v22108_v52 = vld [vmem:[#allocation41_spill] sm:$0xff]  ;;  %v19999_v15 = vmax.f32 %v2270_v42, %v2334_v13  ;;  %13732 = vst [vmem:[#allocation2 + $0x158] sm:$0xff] %v19707_v0 }
 0x246   : > { %v2125_v19 = vadd.f32 %v16116_v36, %v22108_v52  ;;  %v2565_v3 = vld [vmem:[#allocation2 + $0x149] sm:$0xff]  ;;  %v22109_v36 = vld [vmem:[#allocation19_spill] sm:$0xff]  ;;  %v17600_v52 = vpop.f32.mrf.mxu0  ;;  %v20008_v17 = vld [vmem:[#allocation2 + $0x131] sm:$0xff]  ;;  %v20018_v13 = vmax.f32 %v2291_v29, %v2339_v60  ;;  %v2138_v60 = vadd.f32 %v16125_v2, %v22116_v11 }
 0x247   : > { %v2719_v34 = vld [vmem:[#allocation2 + $0x128] sm:$0xff]  ;;  %v2722_v61 = vld [vmem:[#allocation2 + $0x150] sm:$0xff]  ;;  %13730 = vst [vmem:[#allocation2 + $0x148] sm:$0xff] %v19707_v0  ;;  %v1988_v62 = vadd.f32 %v16022_v48, %v22109_v36  ;;  %v20015_v18 = vpack.c.bf16 %v2566_v59, %v2565_v3  ;;  %2470 = vst [vmem:[#allocation2 + $0x170] sm:$0xff] %v19999_v15  ;;  %v2337_v48 = vmul.f32 0.01, %v2283_v44  ;;  %v2294_v56 = vadd.f32 %v17600_v52, %v2133_v10 }
 0x248   : > { %v20004_v63 = vld [vmem:[#allocation2 + $0x12f] sm:$0xff]  ;;  %v20012_v42 = vpack.c.bf16 %v2722_v61, %v2721_v38  ;;  %13731 = vst [vmem:[#allocation2 + $0x150] sm:$0xff] %v19707_v0  ;;  %v2146_v36 = vadd.f32 %v16131_v12, %v1985_v28  ;;  %13728 = vst [vmem:[#allocation2 + $0x138] sm:$0xff] %v19707_v0  ;;  %v2285_v38 = vpop.f32.mrf.mxu0  ;;  %v20024_v61 = vpack.c.bf16 %v19782_v22, %v19790_v47  ;;  %v20028_v29 = vld [vmem:[#allocation2 + $0x187] sm:$0xff] }
 0x249   : > { %v20006_v24 = vld [vmem:[#allocation2 + $0x129] sm:$0xff]  ;;  %2475 = vst [vmem:[#allocation2 + $0x1c8] sm:$0xff] %v20018_v13  ;;  %v20034_v12 = vmax.f32 %v2283_v44, %v2337_v48  ;;  %v2340_v28 = vmul.f32 0.01, %v2294_v56  ;;  %v2286_v55 = vadd.f32 %v2285_v38, %v2125_v19  ;;  %v20039_v22 = vpack.c.bf16 %v19848_v1, %v19820_v26  ;;  %13737 = vst [vmem:[#allocation2 + $0x180] sm:$0xff] %v19707_v0 }
 0x24a   : > { %22110 = vst [vmem:[#allocation34_spill] sm:$0xff] %v20012_v42  ;;  %v2720_v14 = vld [vmem:[#allocation2 + $0x130] sm:$0xff]  ;;  %5716 = vst [vmem:[#allocation2 + $0x128] sm:$0xff] %v19707_v0  ;;  %v17603_v47 = vpop.f32.mrf.mxu0  ;;  %3724 = vmatmul.mubr.bf16.gmra.mxu0 %v20024_v61  ;;  %v20047_v44 = vld [vmem:[#allocation2 + $0x167] sm:$0xff] }
 0x24b   : > { %22111 = vst [vmem:[#allocation29_spill] sm:$0xff] %v20024_v61  ;;  %v20030_v59 = vpack.c.bf16 %v2720_v14, %v2719_v34  ;;  %5717 = vst [vmem:[#allocation2 + $0x130] sm:$0xff] %v19707_v0  ;;  %v22113_v14 = vld [vmem:[#allocation12_spill] sm:$0xff]  ;;  %v22114_v25 = vld [vmem:[#allocation17_spill] sm:$0xff]  ;;  %v16128_v34 = vadd.f32 %v19852_v9, %v19823_v46  ;;  %v20052_v26 = vmax.f32 %v2294_v56, %v2340_v28  ;;  %v2338_v1 = vmul.f32 0.01, %v2286_v55 }
 0x24c   : > { %v22115_v10 = vpack.c.bf16 %v22113_v14, %v22114_v25  ;;  %v2725_v19 = vld [vmem:[#allocation2 + $0x188] sm:$0xff]  ;;  %2473 = vst [vmem:[#allocation2 + $0x1a8] sm:$0xff] %v20034_v12  ;;  %v2307_v52 = vadd.f32 %v17603_v47, %v2146_v36  ;;  %3731 = vmatprep.mubr.bf16.mxu0 %v20039_v22  ;;  %13733 = vst [vmem:[#allocation2 + $0x160] sm:$0xff] %v19707_v0  ;;  %v2298_v48 = vpop.f32.mrf.mxu0  ;;  %v2570_v14 = vld [vmem:[#allocation2 + $0x191] sm:$0xff] }
 0x24d   : > { %22112 = vst [vmem:[#allocation36_spill] sm:$0xff] %v20030_v59  ;;  %v20056_v38 = vld [vmem:[#allocation2 + $0x18f] sm:$0xff]  ;;  %2476 = vst [vmem:[#allocation2 + $0x1d0] sm:$0xff] %v20052_v26  ;;  %v20059_v25 = vmax.f32 %v2286_v55, %v2338_v1  ;;  %v2299_v9 = vadd.f32 %v2298_v48, %v2138_v60  ;;  %v22117_v1 = vld [vmem:[#allocation44_spill] sm:$0xff] }
 0x24e   : > { %3578 = vmatprep.mubr.bf16.mxu1 %v22115_v10  ;;  %v2569_v2 = vld [vmem:[#allocation2 + $0x189] sm:$0xff]  ;;  %v2343_v46 = vmul.f32 0.01, %v2307_v52  ;;  %v2149_v10 = vadd.f32 %v16134_v32, %v1988_v62  ;;  %13740 = vst [vmem:[#allocation2 + $0x198] sm:$0xff] %v19707_v0  ;;  %v17604_v28 = vpop.f32.mrf.mxu0  ;;  %v2568_v3 = vld [vmem:[#allocation2 + $0x171] sm:$0xff]  ;;  %v2141_v48 = vadd.f32 %v16128_v34, %v22117_v1 }
 0x24f   : > { %v2723_v56 = vld [vmem:[#allocation2 + $0x168] sm:$0xff]  ;;  %v2726_v36 = vld [vmem:[#allocation2 + $0x190] sm:$0xff]  ;;  %13738 = vst [vmem:[#allocation2 + $0x188] sm:$0xff] %v19707_v0  ;;  %v20070_v55 = vpack.c.bf16 %v2570_v14, %v2569_v2  ;;  %2474 = vst [vmem:[#allocation2 + $0x1b0] sm:$0xff] %v20059_v25  ;;  %v2341_v32 = vmul.f32 0.01, %v2299_v9  ;;  %3579 = vmatmul.mubr.bf16.gmra.mxu1 %v20039_v22 }
 0x250   : > { %v20063_v47 = vld [vmem:[#allocation2 + $0x16f] sm:$0xff]  ;;  %v20067_v59 = vpack.c.bf16 %v2726_v36, %v2725_v19  ;;  %13739 = vst [vmem:[#allocation2 + $0x190] sm:$0xff] %v19707_v0  ;;  %v2375_v62 = vmax.f32 %v2307_v52, %v2343_v46  ;;  %v2310_v60 = vadd.f32 %v17604_v28, %v2149_v10  ;;  %13736 = vst [vmem:[#allocation2 + $0x178] sm:$0xff] %v19707_v0  ;;  %v2301_v61 = vpop.f32.mrf.mxu0  ;;  %v20082_v14 = vld [vmem:[#allocation2 + $0x1c7] sm:$0xff] }
 0x251   : > { %v2567_v11 = vld [vmem:[#allocation2 + $0x169] sm:$0xff]  ;;  %v20078_v19 = vpack.c.bf16 %v19866_v53, %v19876_v50  ;;  %v20089_v46 = vmax.f32 %v2299_v9, %v2341_v32  ;;  %v2302_v36 = vadd.f32 %v2301_v61, %v2141_v48  ;;  %v20094_v53 = vpack.c.bf16 %v19938_v30, %v19910_v54  ;;  %13745 = vst [vmem:[#allocation2 + $0x1c0] sm:$0xff] %v19707_v0 }
 0x252   : > { %v2724_v27 = vld [vmem:[#allocation2 + $0x170] sm:$0xff]  ;;  %13734 = vst [vmem:[#allocation2 + $0x168] sm:$0xff] %v19707_v0  ;;  %v20087_v34 = vpack.c.bf16 %v2568_v3, %v2567_v11  ;;  %2479 = vst [vmem:[#allocation2 + $0x208] sm:$0xff] %v2375_v62  ;;  %v2344_v10 = vmul.f32 0.01, %v2310_v60  ;;  %v22118_v50 = vpack.c.bf16 %v19855_v5, %v19826_v7  ;;  %v2729_v3 = vld [vmem:[#allocation2 + $0x1c8] sm:$0xff] }
 0x253   : > { %v20084_v52 = vpack.c.bf16 %v2724_v27, %v2723_v56  ;;  %13735 = vst [vmem:[#allocation2 + $0x170] sm:$0xff] %v19707_v0  ;;  %3732 = vmatmul.mubr.bf16.gmra.mxu0 %v20078_v19  ;;  %v20101_v27 = vld [vmem:[#allocation2 + $0x1a7] sm:$0xff]  ;;  %2477 = vst [vmem:[#allocation2 + $0x1e8] sm:$0xff] %v20089_v46  ;;  %v2342_v9 = vmul.f32 0.01, %v2302_v36 }
 0x254   : > { %3586 = vmatprep.mubr.bf16.mxu1 %v22118_v50  ;;  %v2376_v61 = vmax.f32 %v2310_v60, %v2344_v10  ;;  %3739 = vmatprep.mubr.bf16.mxu0 %v20094_v53  ;;  %13741 = vst [vmem:[#allocation2 + $0x1a0] sm:$0xff] %v19707_v0  ;;  %v20106_v54 = vld [vmem:[#allocation2 + $0x1cf] sm:$0xff] }
 0x255   : > { %v2573_v30 = vld [vmem:[#allocation2 + $0x1c9] sm:$0xff]  ;;  %v2574_v56 = vld [vmem:[#allocation2 + $0x1d1] sm:$0xff]  ;;  %v20108_v11 = vmax.f32 %v2302_v36, %v2342_v9  ;;  %v20139_v9 = vpack.c.bf16 %v19920_v43, %v19890_v6 }
 0x256   : > { %v2727_v28 = vld [vmem:[#allocation2 + $0x1a8] sm:$0xff]  ;;  %2480 = vst [vmem:[#allocation2 + $0x210] sm:$0xff] %v2376_v61  ;;  %13748 = vst [vmem:[#allocation2 + $0x1d8] sm:$0xff] %v19707_v0  ;;  %v20111_v7 = vpack.c.bf16 %v2574_v56, %v2573_v30  ;;  %v2730_v5 = vld [vmem:[#allocation2 + $0x1d0] sm:$0xff] }
 0x257   : > { %13746 = vst [vmem:[#allocation2 + $0x1c8] sm:$0xff] %v19707_v0  ;;  %v20114_v62 = vld [vmem:[#allocation2 + $0x1af] sm:$0xff]  ;;  %v20116_v1 = vpack.c.bf16 %v2730_v5, %v2729_v3  ;;  %13747 = vst [vmem:[#allocation2 + $0x1d0] sm:$0xff] %v19707_v0  ;;  %v20130_v3 = vpack.c.bf16 %v19850_v33, %v19858_v51  ;;  %3587 = vmatmul.mubr.bf16.gmra.mxu1 %v20094_v53  ;;  %v22120_v56 = vld [vmem:[#allocation24_spill] sm:$0xff] }
 0x258   : > { %v2571_v32 = vld [vmem:[#allocation2 + $0x1a9] sm:$0xff]  ;;  %v2572_v60 = vld [vmem:[#allocation2 + $0x1b1] sm:$0xff]  ;;  %2478 = vst [vmem:[#allocation2 + $0x1f0] sm:$0xff] %v20108_v11 }
 0x259   : > { %13744 = vst [vmem:[#allocation2 + $0x1b8] sm:$0xff] %v19707_v0  ;;  %v2728_v10 = vld [vmem:[#allocation2 + $0x1b0] sm:$0xff]  ;;  %13742 = vst [vmem:[#allocation2 + $0x1a8] sm:$0xff] %v19707_v0  ;;  %v20124_v36 = vpack.c.bf16 %v2572_v60, %v2571_v32  ;;  %v20126_v50 = vld [vmem:[#allocation2 + $0x207] sm:$0xff] }
 0x25a   : > { %v20132_v61 = vpack.c.bf16 %v2728_v10, %v2727_v28  ;;  %13743 = vst [vmem:[#allocation2 + $0x1b0] sm:$0xff] %v19707_v0  ;;  %13753 = vst [vmem:[#allocation2 + $0x200] sm:$0xff] %v19707_v0  ;;  %v22119_v30 = vld [vmem:[#allocation26_spill] sm:$0xff]  ;;  %v2511_v51 = vld [vmem:[#allocation2 + $0x1e7] sm:$0xff] }
 0x25b   : > { %3740 = vmatmul.mubr.bf16.gmra.mxu0 %v20130_v3  ;;  %v22121_v5 = vpack.c.bf16 %v22119_v30, %v22120_v56  ;;  %13749 = vst [vmem:[#allocation2 + $0x1e0] sm:$0xff] %v19707_v0  ;;  %v2733_v33 = vld [vmem:[#allocation2 + $0x208] sm:$0xff] }
 0x25c   : > { %3747 = vmatprep.mubr.bf16.mxu0 %v20139_v9  ;;  %v2731_v10 = vld [vmem:[#allocation2 + $0x1e8] sm:$0xff] }
 0x25d   : > { %3594 = vmatprep.mubr.bf16.mxu1 %v22121_v5  ;;  %v2608_v28 = vld [vmem:[#allocation2 + $0x20f] sm:$0xff] }
 0x25e   : > { %v2671_v32 = vld [vmem:[#allocation2 + $0x209] sm:$0xff]  ;;  %v2672_v60 = vld [vmem:[#allocation2 + $0x211] sm:$0xff] }
 0x25f   : > { %13756 = vst [vmem:[#allocation2 + $0x218] sm:$0xff] %v19707_v0  ;;  %v20148_v6 = vpack.c.bf16 %v2672_v60, %v2671_v32  ;;  %v2734_v43 = vld [vmem:[#allocation2 + $0x210] sm:$0xff]  ;;  %13754 = vst [vmem:[#allocation2 + $0x208] sm:$0xff] %v19707_v0  ;;  %v20160_v32 = vpack.c.bf16 %v19940_v41, %v19950_v40  ;;  %3595 = vmatmul.mubr.bf16.gmra.mxu1 %v20139_v9 }
 0x260   : > { %v2512_v48 = vld [vmem:[#allocation2 + $0x1ef] sm:$0xff]  ;;  %v20151_v5 = vpack.c.bf16 %v2734_v43, %v2733_v33  ;;  %13755 = vst [vmem:[#allocation2 + $0x210] sm:$0xff] %v19707_v0  ;;  %v20168_v33 = vpack.c.bf16 %v20004_v63, %v19984_v57  ;;  %v22122_v43 = vpack.c.bf16 %v19925_v35, %v19896_v8  ;;  %v20184_v57 = vpack.c.bf16 %v19994_v16, %v19964_v20 }
 0x261   : > { %v2575_v30 = vld [vmem:[#allocation2 + $0x1e9] sm:$0xff]  ;;  %v2576_v56 = vld [vmem:[#allocation2 + $0x1f1] sm:$0xff]  ;;  %v22123_v8 = vpack.c.bf16 %v19913_v4, %v19874_v49  ;;  %v20193_v35 = vpack.c.bf16 %v20008_v17, %v20006_v24  ;;  %v20208_v49 = vpack.c.bf16 %v20056_v38, %v20028_v29  ;;  %v22125_v24 = vpack.c.bf16 %v19988_v37, %v19948_v58 }
 0x262   : > { %13752 = vst [vmem:[#allocation2 + $0x1f8] sm:$0xff] %v19707_v0  ;;  %v20155_v42 = vpack.c.bf16 %v2576_v56, %v2575_v30  ;;  %v2732_v2 = vld [vmem:[#allocation2 + $0x1f0] sm:$0xff]  ;;  %13750 = vst [vmem:[#allocation2 + $0x1e8] sm:$0xff] %v19707_v0  ;;  %3602 = vmatprep.mubr.bf16.mxu1 %v22122_v43  ;;  %v16175_v30 = vpop.f32.mrf.mxu1  ;;  %v20218_v4 = vpack.c.bf16 %v20114_v62, %v20101_v27  ;;  %v22126_v20 = vpack.c.bf16 %v20059_v25, %v20034_v12  ;;  %v2609_v17 = vld [vmem:[#allocation2 + $0x28] sm:$0xff] }
 0x263   : > { %v20162_v60 = vpack.c.bf16 %v2732_v2, %v2731_v10  ;;  %13751 = vst [vmem:[#allocation2 + $0x1f0] sm:$0xff] %v19707_v0  ;;  %3748 = vmatmul.mubr.bf16.gmra.mxu0 %v20160_v32  ;;  %v20179_v0 = vpack.c.bf16 %v19922_v21, %v19928_v39  ;;  %v20198_v21 = vpack.c.bf16 %v20063_v47, %v20047_v44  ;;  %v22129_v63 = vld [vmem:[#allocation25_spill] sm:$0xff]  ;;  %v18596_v25 = vld [vmem:[#allocation3 + $0x478] sm:$0xff]  }
 0x264   : > { %3755 = vmatprep.mubr.bf16.mxu0 %v20168_v33  ;;  %v16176_v41 = vpop.f32.mrf.mxu1  ;;  %v22124_v39 = vpack.c.bf16 %v19999_v15, %v19968_v23  ;;  %v20228_v58 = vpack.c.bf16 %v20106_v54, %v20082_v14  ;;  %v22127_v23 = vpack.c.bf16 %v20052_v26, %v20018_v13  ;;  %v20236_v37 = vpack.c.bf16 %v2512_v48, %v2511_v51  ;;  %v22130_v13 = vld [vmem:[#allocation15_spill] sm:$0xff]  ;;  %v2705_v12 = vld [vmem:[#allocation2 + $0x48] sm:$0xff]  ;;  %v17994_v44 = vld [vmem:[#allocation3 + $0x470] sm:$0xff]  }
 0x265   : > { %v20175_v40 = vadd.f32 %v16176_v41, %v16175_v30  ;;  %v22128_v16 = vpack.c.bf16 %v20108_v11, %v20089_v46  ;;  %v20245_v15 = vpack.c.bf16 %v2608_v28, %v20126_v50  ;;  %v2773_v29 = vpack.c.bf16 %v22130_v13, %v2609_v17  ;;  %v22131_v26 = vld [vmem:[#allocation46_spill] sm:$0xff]  ;;  %v17995_v47 = vld [vmem:[#allocation3 + $0x468] sm:$0xff]   ;;  %v17996_v14 = vld [vmem:[#allocation3 + $0x460] sm:$0xff]  }
 0x266   : > { %v2776_v38 = vpack.c.bf16 %v22131_v26, %v2705_v12  ;;  %v2707_v2 = vld [vmem:[#allocation2 + $0x68] sm:$0xff]  ;;  %v22132_v46 = vld [vmem:[#allocation10_spill] sm:$0xff]  ;;  %v22133_v54 = vld [vmem:[#allocation11_spill] sm:$0xff] }
 0x267   : > { %3603 = vmatmul.mubr.bf16.gmra.mxu1 %v20168_v33  ;;  %v2785_v27 = vpack.c.bf16 %v22132_v46, %v2707_v2  ;;  %v17997_v11 = vld [vmem:[#allocation3 + $0x458] sm:$0xff]   ;;  %v2709_v62 = vld [vmem:[#allocation2 + $0x88] sm:$0xff]  ;;  %v17998_v48 = vld [vmem:[#allocation3 + $0x450] sm:$0xff]  }
 0x268   : > { %3610 = vmatprep.mubr.bf16.mxu1 %v22123_v8  ;;  %v22134_v50 = vld [vmem:[#allocation27_spill] sm:$0xff]  ;;  %v22135_v28 = vld [vmem:[#allocation16_spill] sm:$0xff]  ;;  %v22136_v10 = vld [vmem:[#allocation29_spill] sm:$0xff] }
 0x269   : > { %v2794_v51 = vpack.c.bf16 %v22134_v50, %v2709_v62  ;;  %v17999_v56 = vld [vmem:[#allocation3 + $0x448] sm:$0xff]   ;;  %v18000_v30 = vld [vmem:[#allocation3 + $0x440] sm:$0xff]   ;;  %v22137_v41 = vld [vmem:[#allocation30_spill] sm:$0xff] }
 0x26a   : > { %v2711_v43 = vld [vmem:[#allocation2 + $0xa8] sm:$0xff]  ;;  %v22142_v12 = vld [vmem:[#allocation31_spill] sm:$0xff] }
 0x26b   : > { %3756 = vmatmul.mubr.bf16.gmra.mxu0 %v20179_v0  ;;  %v2803_v8 = vpack.c.bf16 %v22137_v41, %v2711_v43  ;;  %v22141_v17 = vld [vmem:[#allocation33_spill] sm:$0xff]  ;;  %v22143_v26 = vld [vmem:[#allocation36_spill] sm:$0xff] }
 0x26c   : > { %3763 = vmatprep.mubr.bf16.mxu0 %v20184_v57 }
 0x26f   : > { %3611 = vmatmul.mubr.bf16.gmra.mxu1 %v20184_v57 }
 0x270   : > { %3618 = vmatprep.mubr.bf16.mxu1 %v22124_v39  ;;  %v22138_v39 = vld [vmem:[#allocation32_spill] sm:$0xff] }
 0x273   : > { %3764 = vmatmul.mubr.bf16.gmra.mxu0 %v20193_v35 }
 0x274   : > { %3771 = vmatprep.mubr.bf16.mxu0 %v20198_v21 }
 0x277   : > { %3619 = vmatmul.mubr.bf16.gmra.mxu1 %v20198_v21 }
 0x278   : > { %3626 = vmatprep.mubr.bf16.mxu1 %v22125_v24  ;;  %v2713_v24 = vld [vmem:[#allocation2 + $0xc8] sm:$0xff] }
 0x27b   : > { %3772 = vmatmul.mubr.bf16.gmra.mxu0 %v20015_v18 }
 0x27c   : > { %3779 = vmatprep.mubr.bf16.mxu0 %v20208_v49 }
 0x27f   : > { %3627 = vmatmul.mubr.bf16.gmra.mxu1 %v20208_v49 }
 0x280   : > { %3634 = vmatprep.mubr.bf16.mxu1 %v22126_v20  ;;  %v22139_v20 = vld [vmem:[#allocation9_spill] sm:$0xff] }
 0x283   : > { %3780 = vmatmul.mubr.bf16.gmra.mxu0 %v20087_v34 }
 0x284   : > { %3787 = vmatprep.mubr.bf16.mxu0 %v20218_v4 }
 0x287   : > { %3635 = vmatmul.mubr.bf16.gmra.mxu1 %v20218_v4 }
 0x288   : > { %3642 = vmatprep.mubr.bf16.mxu1 %v22127_v23  ;;  %v2812_v23 = vpack.c.bf16 %v22139_v20, %v2713_v24 }
 0x28b   : > { %3788 = vmatmul.mubr.bf16.gmra.mxu0 %v20070_v55 }
 0x28c   : > { %3795 = vmatprep.mubr.bf16.mxu0 %v20228_v58 }
 0x28f   : > { %3643 = vmatmul.mubr.bf16.gmra.mxu1 %v20228_v58 }
 0x290   : > { %3650 = vmatprep.mubr.bf16.mxu1 %v22128_v16  ;;  %v22140_v16 = vld [vmem:[#allocation28_spill] sm:$0xff] }
 0x293   : > { %3796 = vmatmul.mubr.bf16.gmra.mxu0 %v20124_v36 }
 0x294   : > { %3803 = vmatprep.mubr.bf16.mxu0 %v20236_v37 }
 0x297   : > { %3651 = vmatmul.mubr.bf16.gmra.mxu1 %v20236_v37 }
 0x298   : > { %3852 = vmatprep.mubr.bf16.mxu1 %v22129_v63  ;;  %v2715_v63 = vld [vmem:[#allocation2 + $0xe8] sm:$0xff] }
 0x299   : > { %v2821_v13 = vpack.c.bf16 %v22141_v17, %v2715_v63 }
 0x29b   : > { %3804 = vmatmul.mubr.bf16.gmra.mxu0 %v20111_v7 }
 0x29c   : > { %3811 = vmatprep.mubr.bf16.mxu0 %v20245_v15 }
 0x29f   : > { %3853 = vmatmul.mubr.bf16.vlgmr.msra.gmra.mxu1 %v2773_v29  ;;  %v2717_v29 = vld [vmem:[#allocation2 + $0x108] sm:$0xff] }
 0x2a0   : > { %3860 = vmatprep.mubr.bf16.mxu1 %v19886_v31  ;;  %17606 = vmatpush3.bf16.msra.mxu1 %v18596_v25 }
 0x2a1   : > { %17607 = vmatprep.subr.bf16.mxu1 %v17994_v44 }
 0x2a3   : > { %3812 = vmatmul.mubr.bf16.gmra.mxu0 %v20155_v42 }
 0x2a4   : > { %4013 = vmatprep.mubr.bf16.mxu0 %v2776_v38  ;;  %17608 = vmatpush3.bf16.msra.mxu1 %v17994_v44  ;;  %v2830_v44 = vpack.c.bf16 %v22142_v12, %v2717_v29 }
 0x2a5   : > { %17609 = vmatprep.subr.bf16.mxu1 %v17995_v47 }
 0x2a7   : > { %3861 = vmatmul.mubr.bf16.gmra.mxu1 %v2776_v38  ;;  %v22144_v38 = vld [vmem:[#allocation34_spill] sm:$0xff] }
 0x2a8   : > { %3868 = vmatprep.mubr.bf16.mxu1 %v19960_v45  ;;  %17610 = vmatpush3.bf16.msra.mxu1 %v17995_v47  ;;  %v20280_v47 = vld [vmem:[#allocation5 + $0x1] ss:$0 sm:$0xff] }
 0x2a9   : > { %17611 = vmatprep.subr.bf16.mxu1 %v17996_v14  ;;  %v3533_v46 = vadd.f32 %v20175_v40, %v20280_v47 }
 0x2ab   : > { %4014 = vmatmul.mubr.bf16.vlgmr.msra.gmra.mxu0 %v22133_v54 }
 0x2ac   : > { %4021 = vmatprep.mubr.bf16.mxu0 %v2785_v27  ;;  %17612 = vmatpush3.bf16.msra.mxu1 %v17996_v14 }
 0x2ad   : > { %17613 = vmatprep.subr.bf16.mxu1 %v17997_v11 }
 0x2af   : > { %3869 = vmatmul.mubr.bf16.gmra.mxu1 %v2785_v27 }
 0x2b0   : > { %3876 = vmatprep.mubr.bf16.mxu1 %v22136_v10  ;;  %17614 = vmatpush3.bf16.msra.mxu1 %v17997_v11 }
 0x2b1   : > { %17615 = vmatprep.subr.bf16.mxu1 %v17998_v48 }
 0x2b3   : > { %4022 = vmatmul.mubr.bf16.gmra.mxu0 %v22135_v28 }
 0x2b4   : > { %4029 = vmatprep.mubr.bf16.mxu0 %v2794_v51  ;;  %17616 = vmatpush3.bf16.msra.mxu1 %v17998_v48 }
 0x2b5   : > { %17617 = vmatprep.subr.bf16.mxu1 %v17999_v56 }
 0x2b7   : > { %3877 = vmatmul.mubr.bf16.gmra.mxu1 %v2794_v51 }
 0x2b8   : > { %3884 = vmatprep.mubr.bf16.mxu1 %v20078_v19  ;;  %17618 = vmatpush3.bf16.msra.mxu1 %v17999_v56 }
 0x2b9   : > { %17619 = vmatprep.subr.bf16.mxu1 %v18000_v30 }
 0x2bb   : > { %4030 = vmatmul.mubr.bf16.gmra.mxu0 %v22138_v39 }
 0x2bc   : > { %4037 = vmatprep.mubr.bf16.mxu0 %v2803_v8  ;;  %17620 = vmatpush3.bf16.msra.mxu1 %v18000_v30 }
 0x2bf   : > { %3885 = vmatmul.mubr.bf16.gmra.mxu1 %v2803_v8 }
 0x2c0   : > { %3892 = vmatprep.mubr.bf16.mxu1 %v20130_v3 }
 0x2c3   : > { %4038 = vmatmul.mubr.bf16.gmra.mxu0 %v22140_v16 }
 0x2c4   : > { %4045 = vmatprep.mubr.bf16.mxu0 %v2812_v23 }
 0x2c7   : > { %3893 = vmatmul.mubr.bf16.gmra.mxu1 %v2812_v23 }
 0x2c8   : > { %3900 = vmatprep.mubr.bf16.mxu1 %v20160_v32 }
 0x2cb   : > { %4046 = vmatmul.mubr.bf16.gmra.mxu0 %v20039_v22  ;;  %v16178_v22 = vpop.f32.mrf.mxu1 }
 0x2cc   : > { %4053 = vmatprep.mubr.bf16.mxu0 %v2821_v13 }
 0x2cf   : > { %3901 = vmatmul.mubr.bf16.gmra.mxu1 %v2821_v13 }
 0x2d0   : > { %3908 = vmatprep.mubr.bf16.mxu1 %v20179_v0 }
 0x2d3   : > { %4054 = vmatmul.mubr.bf16.gmra.mxu0 %v20094_v53  ;;  %v16179_v53 = vpop.f32.mrf.mxu1 }
 0x2d4   : > { %4061 = vmatprep.mubr.bf16.mxu0 %v2830_v44  ;;  %v16180_v27 = vadd.f32 %v16179_v53, %v16178_v22 }
 0x2d7   : > { %3909 = vmatmul.mubr.bf16.gmra.mxu1 %v2830_v44 }
 0x2d8   : > { %3916 = vmatprep.mubr.bf16.mxu1 %v20193_v35 }
 0x2db   : > { %4062 = vmatmul.mubr.bf16.gmra.mxu0 %v20139_v9 }
 0x2dc   : > { %4069 = vmatprep.mubr.bf16.mxu0 %v22143_v26 }
 0x2df   : > { %3917 = vmatmul.mubr.bf16.gmra.mxu1 %v22143_v26 }
 0x2e0   : > { %3924 = vmatprep.mubr.bf16.mxu1 %v20015_v18 }
 0x2e3   : > { %4070 = vmatmul.mubr.bf16.gmra.mxu0 %v20168_v33 }
 0x2e4   : > { %4077 = vmatprep.mubr.bf16.mxu0 %v22144_v38  ;;  %v16181_v25 = vpop.f32.mrf.mxu1 }
 0x2e5   : > { %v16287_v9 = vpop.f32.mrf.mxu0 }
 0x2e6   : > { %v16182_v2 = vpop.f32.mrf.mxu1 }
 0x2e7   : > { %3925 = vmatmul.mubr.bf16.gmra.mxu1 %v22144_v38  ;;  %v16183_v33 = vadd.f32 %v16182_v2, %v16181_v25  ;;  %v16288_v14 = vpop.f32.mrf.mxu0 }
 0x2e8   : > { %3932 = vmatprep.mubr.bf16.mxu1 %v20087_v34  ;;  %v16289_v54 = vadd.f32 %v16288_v14, %v16287_v9  ;;  %v16184_v11 = vpop.f32.mrf.mxu1 }
 0x2e9   : > { %v16290_v62 = vpop.f32.mrf.mxu0  ;;  %v3541_v24 = vadd.f32 %v16183_v33, %v20280_v47 }
 0x2ea   : > { %v20287_v48 = vadd.f32 %v16289_v54, %v3533_v46  ;;  %v16185_v50 = vpop.f32.mrf.mxu1 }
 0x2eb   : > { %4078 = vmatmul.mubr.bf16.gmra.mxu0 %v20184_v57  ;;  %v16186_v51 = vadd.f32 %v16185_v50, %v16184_v11  ;;  %v16291_v28 = vpop.f32.mrf.mxu0  ;;  %v3536_v57 = vadd.f32 %v16180_v27, %v20280_v47 }
 0x2ec   : > { %4085 = vmatprep.mubr.bf16.mxu0 %v20084_v52  ;;  %v16292_v56 = vadd.f32 %v16291_v28, %v16290_v62  ;;  %v16187_v43 = vpop.f32.mrf.mxu1 }
 0x2ee   : > { %v20293_v40 = vadd.f32 %v16292_v56, %v3536_v57  ;;  %v16188_v41 = vpop.f32.mrf.mxu1 }
 0x2ef   : > { %3933 = vmatmul.mubr.bf16.gmra.mxu1 %v20084_v52  ;;  %v16189_v8 = vadd.f32 %v16188_v41, %v16187_v43 }
 0x2f0   : > { %v16293_v30 = vpop.f32.mrf.mxu0  ;;  %3940 = vmatprep.mubr.bf16.mxu1 %v20070_v55  ;;  %v16190_v23 = vpop.f32.mrf.mxu1 }
 0x2f1   : > { %v3549_v25 = vadd.f32 %v16189_v8, %v20280_v47 }
 0x2f2   : > { %v16294_v39 = vpop.f32.mrf.mxu0  ;;  %v16191_v52 = vpop.f32.mrf.mxu1 }
 0x2f3   : > { %4086 = vmatmul.mubr.bf16.gmra.mxu0 %v20198_v21  ;;  %v16295_v20 = vadd.f32 %v16294_v39, %v16293_v30  ;;  %v16192_v17 = vadd.f32 %v16191_v52, %v16190_v23  ;;  %v3544_v21 = vadd.f32 %v16186_v51, %v20280_v47 }
 0x2f4   : > { %4093 = vmatprep.mubr.bf16.mxu0 %v20067_v59  ;;  %v16296_v16 = vpop.f32.mrf.mxu0  ;;  %v16193_v12 = vpop.f32.mrf.mxu1 }
 0x2f5   : > { %v20297_v63 = vadd.f32 %v16295_v20, %v3541_v24 }
 0x2f6   : > { %v16297_v13 = vpop.f32.mrf.mxu0  ;;  %v16194_v22 = vpop.f32.mrf.mxu1 }
 0x2f7   : > { %v16298_v29 = vadd.f32 %v16297_v13, %v16296_v16  ;;  %3941 = vmatmul.mubr.bf16.gmra.mxu1 %v20067_v59  ;;  %v16195_v38 = vadd.f32 %v16194_v22, %v16193_v12 }
 0x2f8   : > { %v16299_v44 = vpop.f32.mrf.mxu0  ;;  %3948 = vmatprep.mubr.bf16.mxu1 %v20124_v36  ;;  %v16196_v2 = vpop.f32.mrf.mxu1 }
 0x2f9   : > { %v20303_v26 = vadd.f32 %v16298_v29, %v3544_v21  ;;  %v3557_v56 = vadd.f32 %v16195_v38, %v20280_v47 }
 0x2fa   : > { %v16300_v53 = vpop.f32.mrf.mxu0  ;;  %v16197_v59 = vpop.f32.mrf.mxu1 }
 0x2fb   : > { %4094 = vmatmul.mubr.bf16.gmra.mxu0 %v20208_v49  ;;  %v16301_v9 = vadd.f32 %v16300_v53, %v16299_v44  ;;  %v16198_v46 = vadd.f32 %v16197_v59, %v16196_v2  ;;  %v3552_v49 = vadd.f32 %v16192_v17, %v20280_v47 }
 0x2fc   : > { %4101 = vmatprep.mubr.bf16.mxu0 %v20132_v61  ;;  %v16302_v33 = vpop.f32.mrf.mxu0  ;;  %v16199_v11 = vpop.f32.mrf.mxu1 }
 0x2fd   : > { %v20307_v14 = vadd.f32 %v16301_v9, %v3549_v25 }
 0x2fe   : > { %v16303_v27 = vpop.f32.mrf.mxu0  ;;  %v16200_v51 = vpop.f32.mrf.mxu1 }
 0x2ff   : > { %v16304_v54 = vadd.f32 %v16303_v27, %v16302_v33  ;;  %3949 = vmatmul.mubr.bf16.gmra.mxu1 %v20132_v61  ;;  %v16201_v28 = vadd.f32 %v16200_v51, %v16199_v11 }
 0x300   : > { %v16305_v62 = vpop.f32.mrf.mxu0  ;;  %3956 = vmatprep.mubr.bf16.mxu1 %v20111_v7  ;;  %v16202_v30 = vpop.f32.mrf.mxu1 }
 0x301   : > { %v20313_v50 = vadd.f32 %v16304_v54, %v3552_v49  ;;  %v3565_v29 = vadd.f32 %v16201_v28, %v20280_v47 }
 0x302   : > { %v16306_v57 = vpop.f32.mrf.mxu0  ;;  %v16203_v61 = vpop.f32.mrf.mxu1 }
 0x303   : > { %4102 = vmatmul.mubr.bf16.gmra.mxu0 %v20218_v4  ;;  %v16307_v43 = vadd.f32 %v16306_v57, %v16305_v62  ;;  %v16204_v39 = vadd.f32 %v16203_v61, %v16202_v30  ;;  %v3560_v4 = vadd.f32 %v16198_v46, %v20280_v47  ;;  %v18597_v57 = vld [vmem:[#allocation2 + $0x18] sm:$0xff] }
 0x304   : > { %4109 = vmatprep.mubr.bf16.mxu0 %v20116_v1  ;;  %v16308_v41 = vpop.f32.mrf.mxu0  ;;  %v16205_v23 = vpop.f32.mrf.mxu1 }
 0x305   : > { %v20317_v8 = vadd.f32 %v16307_v43, %v3557_v56  ;;  %v2911_v56 = vpack.c.bf16 %v18597_v57, %v18597_v57 }
 0x306   : > { %v16309_v24 = vpop.f32.mrf.mxu0  ;;  %v16206_v17 = vpop.f32.mrf.mxu1 }
 0x307   : > { %v16310_v20 = vadd.f32 %v16309_v24, %v16308_v41  ;;  %3957 = vmatmul.mubr.bf16.gmra.mxu1 %v20116_v1  ;;  %v16207_v13 = vadd.f32 %v16206_v17, %v16205_v23 }
 0x308   : > { %3964 = vmatprep.mubr.bf16.mxu1 %v20155_v42  ;;  %v16208_v44 = vpop.f32.mrf.mxu1 }
 0x309   : > { %v20323_v52 = vadd.f32 %v16310_v20, %v3560_v4  ;;  %v3573_v54 = vadd.f32 %v16207_v13, %v20280_v47 }
 0x30a   : > { %v16311_v16 = vpop.f32.mrf.mxu0  ;;  %v16209_v1 = vpop.f32.mrf.mxu1 }
 0x30b   : > { %4110 = vmatmul.mubr.bf16.gmra.mxu0 %v20228_v58  ;;  %v16210_v53 = vadd.f32 %v16209_v1, %v16208_v44  ;;  %v3568_v58 = vadd.f32 %v16204_v39, %v20280_v47 }
 0x30c   : > { %4117 = vmatprep.mubr.bf16.mxu0 %v20162_v60  ;;  %v16312_v21 = vpop.f32.mrf.mxu0 }
 0x30d   : > { %v16313_v12 = vadd.f32 %v16312_v21, %v16311_v16  ;;  %v3576_v30 = vadd.f32 %v16210_v53, %v20280_v47 }
 0x30e   : > { %v16314_v22 = vpop.f32.mrf.mxu0 }
 0x30f   : > { %v20327_v38 = vadd.f32 %v16313_v12, %v3565_v29  ;;  %v16211_v2 = vpop.f32.mrf.mxu1  ;;  %3965 = vmatmul.mubr.bf16.gmra.mxu1 %v20162_v60  ;;  %v22145_v29 = vld [vmem:[#allocation20_spill] sm:$0xff]  ;;  %v22146_v12 = vld [vmem:[#allocation21_spill] sm:$0xff] }
 0x310   : > { %v16315_v25 = vpop.f32.mrf.mxu0  ;;  %3972 = vmatprep.mubr.bf16.mxu1 %v20148_v6  ;;  %v2910_v44 = vpack.c.bf16 %v22146_v12, %v22145_v29 }
 0x311   : > { %v16316_v9 = vadd.f32 %v16315_v25, %v16314_v22  ;;  %v16212_v46 = vpop.f32.mrf.mxu1 }
 0x312   : > { %v16213_v27 = vadd.f32 %v16212_v46, %v16211_v2  ;;  %v18002_v2 = vld [vmem:[#allocation3 + $0x4b8] sm:$0xff]  }
 0x313   : > { %v16317_v33 = vpop.f32.mrf.mxu0  ;;  %4118 = vmatmul.mubr.bf16.gmra.mxu0 %v20236_v37  ;;  %v20333_v59 = vadd.f32 %v16316_v9, %v3568_v58  ;;  %v16214_v62 = vpop.f32.mrf.mxu1  ;;  %v18001_v9 = vld [vmem:[#allocation3 + $0x4f8] sm:$0xff]  }
 0x314   : > { %4125 = vmatprep.mubr.bf16.mxu0 %v20151_v5  ;;  %v3581_v16 = vadd.f32 %v16213_v27, %v20280_v47  ;;  %16631 = vmatprep.subr.bf16.mxu0 %v18001_v9 }
 0x315   : > { %v16318_v49 = vpop.f32.mrf.mxu0  ;;  %v16215_v60 = vpop.f32.mrf.mxu1  ;;  %16632 = vmatpush3.bf16.msra.mxu0 %v18002_v2 }
 0x316   : > { %v16319_v11 = vadd.f32 %v16318_v49, %v16317_v33  ;;  %v16216_v37 = vadd.f32 %v16215_v60, %v16214_v62 }
 0x317   : > { %v16320_v51 = vpop.f32.mrf.mxu0  ;;  %v16217_v61 = vpop.f32.mrf.mxu1  ;;  %3973 = vmatmul.mubr.bf16.gmra.mxu1 %v20151_v5 }
 0x318   : > { %v20337_v28 = vadd.f32 %v16319_v11, %v3573_v54  ;;  %17621 = vmatprep.mubr.bf16.mxu1 %v19886_v31  ;;  %v3584_v31 = vadd.f32 %v16216_v37, %v20280_v47 }
 0x319   : > { %v16321_v43 = vpop.f32.mrf.mxu0  ;;  %v16218_v4 = vpop.f32.mrf.mxu1 }
 0x31a   : > { %v16322_v41 = vadd.f32 %v16321_v43, %v16320_v51  ;;  %v16219_v20 = vadd.f32 %v16218_v4, %v16217_v61 }
 0x31b   : > { %v16323_v39 = vpop.f32.mrf.mxu0  ;;  %4126 = vmatmul.mubr.bf16.gmra.mxu0 %v20245_v15  ;;  %v16220_v13 = vpop.f32.mrf.mxu1 }
 0x31c   : > { %v20343_v24 = vadd.f32 %v16322_v41, %v3576_v30  ;;  %4133 = vmatprep.mubr.bf16.mxu0 %v2911_v56  ;;  %v3589_v54 = vadd.f32 %v16219_v20, %v20280_v47 }
 0x31d   : > { %v16324_v23 = vpop.f32.mrf.mxu0  ;;  %v16221_v22 = vpop.f32.mrf.mxu1 }
 0x31e   : > { %v16325_v17 = vadd.f32 %v16324_v23, %v16323_v39  ;;  %v16222_v15 = vadd.f32 %v16221_v22, %v16220_v13 }
 0x31f   : > { %v16326_v21 = vpop.f32.mrf.mxu0  ;;  %v16223_v25 = vpop.f32.mrf.mxu1  ;;  %17622 = vmatmul.mubr.bf16.vlgmr.msra.gmra.mxu1 %v19960_v45 }
 0x320   : > { %v20348_v5 = vadd.f32 %v16325_v17, %v3581_v16  ;;  %17625 = vmatprep.mubr.bf16.mxu1 %v22136_v10  ;;  %v3592_v10 = vadd.f32 %v16222_v15, %v20280_v47  ;;  %v18003_v15 = vld [vmem:[#allocation3 + $0x4f0] sm:$0xff]  }
 0x321   : > { %v16327_v1 = vpop.f32.mrf.mxu0  ;;  %v16224_v46 = vpop.f32.mrf.mxu1  ;;  %16633 = vmatprep.subr.bf16.mxu0 %v18003_v15 }
 0x322   : > { %v16328_v53 = vadd.f32 %v16327_v1, %v16326_v21  ;;  %v16225_v27 = vadd.f32 %v16224_v46, %v16223_v25  ;;  %v18004_v1 = vld [vmem:[#allocation3 + $0x4b0] sm:$0xff]  }
 0x323   : > { %v16329_v58 = vpop.f32.mrf.mxu0  ;;  %4134 = vmatmul.mubr.bf16.gmra.mxu0 %v2910_v44  ;;  %v16226_v62 = vpop.f32.mrf.mxu1 }
 0x324   : > { %v20353_v33 = vadd.f32 %v16328_v53, %v3584_v31  ;;  %v3597_v20 = vadd.f32 %v16225_v27, %v20280_v47  ;;  %16634 = vmatpush3.bf16.msra.mxu0 %v18004_v1 }
 0x325   : > { %v16330_v49 = vpop.f32.mrf.mxu0  ;;  %v16227_v45 = vpop.f32.mrf.mxu1 }
 0x326   : > { %v16331_v11 = vadd.f32 %v16330_v49, %v16329_v58  ;;  %v16228_v57 = vadd.f32 %v16227_v45, %v16226_v62 }
 0x327   : > { %v16332_v51 = vpop.f32.mrf.mxu0  ;;  %v16229_v43 = vpop.f32.mrf.mxu1  ;;  %17626 = vmatmul.mubr.bf16.gmra.mxu1 %v20078_v19 }
 0x328   : > { %v20356_v60 = vadd.f32 %v16331_v11, %v3589_v54  ;;  %17629 = vmatprep.mubr.bf16.mxu1 %v20130_v3  ;;  %v3600_v19 = vadd.f32 %v16228_v57, %v20280_v47 }
 0x329   : > { %v16333_v56 = vpop.f32.mrf.mxu0  ;;  %v16230_v61 = vpop.f32.mrf.mxu1 }
 0x32a   : > { %v16334_v37 = vadd.f32 %v16333_v56, %v16332_v51  ;;  %v16231_v39 = vadd.f32 %v16230_v61, %v16229_v43 }
 0x32b   : > { %v16335_v30 = vpop.f32.mrf.mxu0  ;;  %v16232_v16 = vpop.f32.mrf.mxu1 }
 0x32c   : > { %v20361_v41 = vadd.f32 %v16334_v37, %v3592_v10  ;;  %v3605_v9 = vadd.f32 %v16231_v39, %v20280_v47 }
 0x32d   : > { %v16336_v4 = vpop.f32.mrf.mxu0  ;;  %v16233_v21 = vpop.f32.mrf.mxu1 }
 0x32e   : > { %v16337_v23 = vadd.f32 %v16336_v4, %v16335_v30  ;;  %v16234_v29 = vadd.f32 %v16233_v21, %v16232_v16 }
 0x32f   : > { %v16338_v17 = vpop.f32.mrf.mxu0  ;;  %v16235_v22 = vpop.f32.mrf.mxu1  ;;  %17630 = vmatmul.mubr.bf16.gmra.mxu1 %v20160_v32 }
 0x330   : > { %v20364_v13 = vadd.f32 %v16337_v23, %v3597_v20  ;;  %17633 = vmatprep.mubr.bf16.mxu1 %v20179_v0  ;;  %v3608_v0 = vadd.f32 %v16234_v29, %v20280_v47  ;;  %v18005_v29 = vld [vmem:[#allocation3 + $0x4e8] sm:$0xff]  }
 0x331   : > { %v16339_v12 = vpop.f32.mrf.mxu0  ;;  %v16236_v53 = vpop.f32.mrf.mxu1  ;;  %16635 = vmatprep.subr.bf16.mxu0 %v18005_v29 }
 0x332   : > { %v16340_v44 = vadd.f32 %v16339_v12, %v16338_v17  ;;  %v16237_v25 = vadd.f32 %v16236_v53, %v16235_v22  ;;  %v18006_v12 = vld [vmem:[#allocation3 + $0x4a8] sm:$0xff]  }
 0x333   : > { %v16341_v3 = vpop.f32.mrf.mxu0  ;;  %v16238_v46 = vpop.f32.mrf.mxu1  ;;  %16636 = vmatpush3.bf16.msra.mxu0 %v18006_v12 }
 0x334   : > { %v20369_v31 = vadd.f32 %v16340_v44, %v3600_v19  ;;  %v3613_v43 = vadd.f32 %v16237_v25, %v20280_v47 }
 0x335   : > { %v16342_v58 = vpop.f32.mrf.mxu0  ;;  %v16239_v32 = vpop.f32.mrf.mxu1 }
 0x336   : > { %v16343_v2 = vadd.f32 %v16342_v58, %v16341_v3  ;;  %v16240_v54 = vadd.f32 %v16239_v32, %v16238_v46 }
 0x337   : > { %v16344_v27 = vpop.f32.mrf.mxu0  ;;  %v16241_v51 = vpop.f32.mrf.mxu1  ;;  %17634 = vmatmul.mubr.bf16.gmra.mxu1 %v20193_v35 }
 0x338   : > { %v20372_v49 = vadd.f32 %v16343_v2, %v3605_v9  ;;  %17637 = vmatprep.mubr.bf16.mxu1 %v20015_v18  ;;  %v3616_v35 = vadd.f32 %v16240_v54, %v20280_v47 }
 0x339   : > { %v16345_v11 = vpop.f32.mrf.mxu0  ;;  %v16242_v56 = vpop.f32.mrf.mxu1 }
 0x33a   : > { %v16346_v62 = vadd.f32 %v16345_v11, %v16344_v27  ;;  %v16243_v10 = vadd.f32 %v16242_v56, %v16241_v51 }
 0x33b   : > { %v16347_v45 = vpop.f32.mrf.mxu0  ;;  %v16244_v61 = vpop.f32.mrf.mxu1 }
 0x33c   : > { %v20377_v57 = vadd.f32 %v16346_v62, %v3608_v0  ;;  %v3621_v15 = vadd.f32 %v16243_v10, %v20280_v47 }
 0x33d   : > { %v16348_v37 = vpop.f32.mrf.mxu0  ;;  %v16245_v20 = vpop.f32.mrf.mxu1 }
 0x33e   : > { %v16349_v30 = vadd.f32 %v16348_v37, %v16347_v45  ;;  %v16246_v23 = vadd.f32 %v16245_v20, %v16244_v61  ;;  %v18007_v20 = vld [vmem:[#allocation3 + $0x4e0] sm:$0xff]  }
 0x33f   : > { %v16350_v39 = vpop.f32.mrf.mxu0  ;;  %v16247_v21 = vpop.f32.mrf.mxu1  ;;  %17638 = vmatmul.mubr.bf16.gmra.mxu1 %v20087_v34  ;;  %16637 = vmatprep.subr.bf16.mxu0 %v18007_v20 }
 0x340   : > { %v20380_v4 = vadd.f32 %v16349_v30, %v3613_v43  ;;  %17641 = vmatprep.mubr.bf16.mxu1 %v20070_v55  ;;  %v3624_v55 = vadd.f32 %v16246_v23, %v20280_v47  ;;  %v18008_v23 = vld [vmem:[#allocation3 + $0x4a0] sm:$0xff]  }
 0x341   : > { %v16351_v16 = vpop.f32.mrf.mxu0  ;;  %v16248_v44 = vpop.f32.mrf.mxu1  ;;  %16638 = vmatpush3.bf16.msra.mxu0 %v18008_v23 }
 0x342   : > { %v16352_v17 = vadd.f32 %v16351_v16, %v16350_v39  ;;  %v16249_v22 = vadd.f32 %v16248_v44, %v16247_v21 }
 0x343   : > { %v16353_v18 = vpop.f32.mrf.mxu0  ;;  %v16250_v53 = vpop.f32.mrf.mxu1 }
 0x344   : > { %v20385_v19 = vadd.f32 %v16352_v17, %v3616_v35  ;;  %v3629_v62 = vadd.f32 %v16249_v22, %v20280_v47  ;;  %v22147_v22 = vld [vmem:[#allocation22_spill] sm:$0xff] }
 0x345   : > { %v16354_v3 = vpop.f32.mrf.mxu0  ;;  %v16251_v34 = vpop.f32.mrf.mxu1 }
 0x346   : > { %v16355_v1 = vadd.f32 %v16354_v3, %v16353_v18  ;;  %v16252_v51 = vadd.f32 %v16251_v34, %v16250_v53  ;;  %v22148_v3 = vld [vmem:[#allocation23_spill] sm:$0xff] }
 0x347   : > { %v16356_v25 = vpop.f32.mrf.mxu0  ;;  %v16253_v46 = vpop.f32.mrf.mxu1  ;;  %17642 = vmatmul.mubr.bf16.gmra.mxu1 %v20124_v36 }
 0x348   : > { %v20388_v58 = vadd.f32 %v16355_v1, %v3621_v15  ;;  %17645 = vmatprep.mubr.bf16.mxu1 %v20111_v7  ;;  %v3632_v36 = vadd.f32 %v16252_v51, %v20280_v47  ;;  %v2912_v15 = vpack.c.bf16 %v22148_v3, %v22147_v22 }
 0x349   : > { %v16357_v9 = vpop.f32.mrf.mxu0  ;;  %v16254_v54 = vpop.f32.mrf.mxu1 }
 0x34a   : > { %v16358_v2 = vadd.f32 %v16357_v9, %v16356_v25  ;;  %v16255_v11 = vadd.f32 %v16254_v54, %v16253_v46 }
 0x34b   : > { %v16359_v27 = vpop.f32.mrf.mxu0  ;;  %v16256_v56 = vpop.f32.mrf.mxu1 }
 0x34c   : > { %v20393_v32 = vadd.f32 %v16358_v2, %v3624_v55  ;;  %v3637_v18 = vadd.f32 %v16255_v11, %v20280_v47 }
 0x34d   : > { %v16360_v0 = vpop.f32.mrf.mxu0  ;;  %v16257_v43 = vpop.f32.mrf.mxu1 }
 0x34e   : > { %v16361_v45 = vadd.f32 %v16360_v0, %v16359_v27  ;;  %v16258_v29 = vadd.f32 %v16257_v43, %v16256_v56 }
 0x34f   : > { %v16362_v10 = vpop.f32.mrf.mxu0  ;;  %v16259_v39 = vpop.f32.mrf.mxu1  ;;  %17646 = vmatmul.mubr.bf16.gmra.mxu1 %v20155_v42 }
 0x350   : > { %v20396_v37 = vadd.f32 %v16361_v45, %v3629_v62  ;;  %17649 = vmatprep.mubr.bf16.mxu1 %v20148_v6  ;;  %v3640_v25 = vadd.f32 %v16258_v29, %v20280_v47 }
 0x351   : > { %v16363_v30 = vpop.f32.mrf.mxu0  ;;  %v16260_v35 = vpop.f32.mrf.mxu1 }
 0x352   : > { %v16364_v61 = vadd.f32 %v16363_v30, %v16362_v10  ;;  %v16261_v17 = vadd.f32 %v16260_v35, %v16259_v39 }
 0x353   : > { %v16365_v7 = vpop.f32.mrf.mxu0  ;;  %v16262_v44 = vpop.f32.mrf.mxu1 }
 0x354   : > { %v20401_v16 = vadd.f32 %v16364_v61, %v3632_v36  ;;  %v3645_v11 = vadd.f32 %v16261_v17, %v20280_v47 }
 0x355   : > { %v16366_v21 = vpop.f32.mrf.mxu0  ;;  %v16263_v6 = vpop.f32.mrf.mxu1 }
 0x356   : > { %v16367_v12 = vadd.f32 %v16366_v21, %v16365_v7  ;;  %v16264_v0 = vadd.f32 %v16263_v6, %v16262_v44  ;;  %v18009_v7 = vld [vmem:[#allocation3 + $0x4d8] sm:$0xff]  }
 0x357   : > { %v16368_v42 = vpop.f32.mrf.mxu0  ;;  %v16265_v9 = vpop.f32.mrf.mxu1  ;;  %17650 = vmatmul.mubr.bf16.gmra.mxu1 %v2912_v15  ;;  %16639 = vmatprep.subr.bf16.mxu0 %v18009_v7 }
 0x358   : > { %v20406_v1 = vadd.f32 %v16367_v12, %v3637_v18  ;;  %v3648_v30 = vadd.f32 %v16264_v0, %v20280_v47 }
 0x359   : > { %v16369_v53 = vpop.f32.mrf.mxu0  ;;  %v16266_v46 = vpop.f32.mrf.mxu1 }
 0x35a   : > { %v16370_v34 = vadd.f32 %v16369_v53, %v16368_v42  ;;  %v16267_v27 = vadd.f32 %v16266_v46, %v16265_v9 }
 0x35b   : > { %v16371_v55 = vpop.f32.mrf.mxu0  ;;  %v16268_v51 = vpop.f32.mrf.mxu1 }
 0x35c   : > { %v20409_v2 = vadd.f32 %v16370_v34, %v3640_v25  ;;  %v3653_v17 = vadd.f32 %v16267_v27, %v20280_v47 }
 0x35d   : > { %v16372_v54 = vpop.f32.mrf.mxu0  ;;  %v16269_v10 = vpop.f32.mrf.mxu1 }
 0x35e   : > { %v16373_v62 = vadd.f32 %v16372_v54, %v16371_v55  ;;  %v16270_v18 = vadd.f32 %v16269_v10, %v16268_v51 }
 0x35f   : > { %v16374_v45 = vpop.f32.mrf.mxu0  ;;  %v16399_v61 = vpop.f32.mrf.mxu1 }
 0x360   : > { %v20412_v56 = vadd.f32 %v16373_v62, %v3645_v11  ;;  %v3656_v53 = vadd.f32 %v16270_v18, %v20280_v47 }
 0x361   : > { %v16375_v43 = vpop.f32.mrf.mxu0  ;;  %v16400_v23 = vpop.f32.mrf.mxu1 }
 0x362   : > { %v16376_v36 = vadd.f32 %v16375_v43, %v16374_v45  ;;  %v16401_v21 = vadd.f32 %v16400_v23, %v16399_v61 }
 0x363   : > { %v16377_v39 = vpop.f32.mrf.mxu0  ;;  %v16402_v12 = vpop.f32.mrf.mxu1 }
 0x364   : > { %v20415_v20 = vadd.f32 %v16376_v36, %v3648_v30  ;;  %v20419_v44 = vadd.f32 %v16401_v21, %v20287_v48 }
 0x365   : > { %v16378_v35 = vpop.f32.mrf.mxu0  ;;  %v16403_v15 = vpop.f32.mrf.mxu1 }
 0x366   : > { %v16379_v29 = vadd.f32 %v16378_v35, %v16377_v39  ;;  %v16404_v6 = vadd.f32 %v16403_v15, %v16402_v12 }
 0x367   : > { %v16380_v22 = vpop.f32.mrf.mxu0  ;;  %v16405_v34 = vpop.f32.mrf.mxu1 }
 0x368   : > { %v20421_v3 = vadd.f32 %v16379_v29, %v3653_v17  ;;  %v20425_v9 = vadd.f32 %v16404_v6, %v20293_v40  ;;  %v18010_v40 = vld [vmem:[#allocation3 + $0x498] sm:$0xff]  }
 0x369   : > { %v16381_v42 = vpop.f32.mrf.mxu0  ;;  %v16406_v27 = vpop.f32.mrf.mxu1  ;;  %16640 = vmatpush3.bf16.msra.mxu0 %v18010_v40 }
 0x36a   : > { %22149 = vst [vmem:[#allocation38_spill] sm:$0xff] %v20421_v3  ;;  %v16382_v25 = vadd.f32 %v16381_v42, %v16380_v22  ;;  %v16407_v48 = vadd.f32 %v16406_v27, %v16405_v34 }
 0x36b   : > { %v20427_v55 = vpop.f32.mrf.mxu0  ;;  %v16408_v11 = vpop.f32.mrf.mxu1 }
 0x36c   : > { %v20429_v46 = vadd.f32 %v16382_v25, %v3656_v53  ;;  %v20434_v0 = vadd.f32 %v16407_v48, %v20297_v63 }
 0x36d   : > { %v20431_v54 = vpop.f32.mrf.mxu0  ;;  %v16409_v47 = vpop.f32.mrf.mxu1 }
 0x36e   : > { %22150 = vst [vmem:[#allocation35_spill] sm:$0xff] %v20429_v46  ;;  %v16410_v51 = vadd.f32 %v16409_v47, %v16408_v11  ;;  %v18012_v47 = vld [vmem:[#allocation3 + $0x578] sm:$0xff]  }
 0x36f   : > { %v20436_v62 = vpop.f32.mrf.mxu0  ;;  %v16411_v10 = vpop.f32.mrf.mxu1  ;;  %16671 = vmatprep.subr.bf16.mxu1 %v18012_v47 }
 0x370   : > { %v20441_v43 = vadd.f32 %v16410_v51, %v20303_v26 }
 0x371   : > { %v20438_v45 = vpop.f32.mrf.mxu0  ;;  %v16412_v36 = vpop.f32.mrf.mxu1 }
 0x372   : > { %v16413_v61 = vadd.f32 %v16412_v36, %v16411_v10 }
 0x373   : > { %v20443_v30 = vpop.f32.mrf.mxu0  ;;  %v16414_v63 = vpop.f32.mrf.mxu1 }
 0x374   : > { %v20448_v7 = vadd.f32 %v16413_v61, %v20307_v14  ;;  %v18014_v61 = vld [vmem:[#allocation3 + $0x538] sm:$0xff]  }
 0x375   : > { %v20445_v39 = vpop.f32.mrf.mxu0  ;;  %v16415_v35 = vpop.f32.mrf.mxu1  ;;  %16672 = vmatpush3.bf16.msra.mxu1 %v18014_v61  ;;  %v18013_v61 = vld [vmem:[#allocation3 + $0x490] sm:$0xff]  }
 0x376   : > { %v16416_v21 = vadd.f32 %v16415_v35, %v16414_v63 }
 0x377   : > { %v20450_v23 = vpop.f32.mrf.mxu0  ;;  %v16417_v18 = vpop.f32.mrf.mxu1 }
 0x378   : > { %v20455_v26 = vadd.f32 %v16416_v21, %v20313_v50 }
 0x379   : > { %v20452_v17 = vpop.f32.mrf.mxu0  ;;  %v16418_v12 = vpop.f32.mrf.mxu1 }
 0x37a   : > { %22151 = vst [vmem:[#allocation39_spill] sm:$0xff] %v20455_v26  ;;  %v16419_v22 = vadd.f32 %v16418_v12, %v16417_v18 }
 0x37b   : > { %v20457_v29 = vpop.f32.mrf.mxu0  ;;  %v16420_v42 = vpop.f32.mrf.mxu1 }
 0x37c   : > { %v20462_v14 = vadd.f32 %v16419_v22, %v20317_v8 }
 0x37d   : > { %v20459_v15 = vpop.f32.mrf.mxu0  ;;  %v16421_v53 = vpop.f32.mrf.mxu1 }
 0x37e   : > { %22152 = vst [vmem:[#allocation37_spill] sm:$0xff] %v20462_v14  ;;  %v16422_v25 = vadd.f32 %v16421_v53, %v16420_v42 }
 0x37f   : > { %v20464_v6 = vpop.f32.mrf.mxu0  ;;  %v16423_v27 = vpop.f32.mrf.mxu1 }
 0x380   : > { %v20469_v50 = vadd.f32 %v16422_v25, %v20323_v52 }
 0x381   : > { %v20466_v34 = vpop.f32.mrf.mxu0  ;;  %v16424_v11 = vpop.f32.mrf.mxu1 }
 0x382   : > { %22153 = vst [vmem:[#allocation18_spill] sm:$0xff] %v20469_v50  ;;  %v16425_v51 = vadd.f32 %v16424_v11, %v16423_v27  ;;  %v18011_v11 = vld [vmem:[#allocation3 + $0x4d0] sm:$0xff]  }
 0x383   : > { %v20471_v48 = vpop.f32.mrf.mxu0  ;;  %v16426_v10 = vpop.f32.mrf.mxu1  ;;  %16641 = vmatprep.subr.bf16.mxu0 %v18011_v11 }
 0x384   : > { %v20476_v8 = vadd.f32 %v16425_v51, %v20327_v38  ;;  %16642 = vmatpush3.bf16.msra.mxu0 %v18013_v61 }
 0x385   : > { %v20473_v40 = vpop.f32.mrf.mxu0  ;;  %v16427_v63 = vpop.f32.mrf.mxu1 }
 0x386   : > { %22154 = vst [vmem:[#allocation45_spill] sm:$0xff] %v20476_v8  ;;  %v16428_v35 = vadd.f32 %v16427_v63, %v16426_v10  ;;  %v18015_v63 = vld [vmem:[#allocation3 + $0x570] sm:$0xff]  }
 0x387   : > { %v20478_v36 = vpop.f32.mrf.mxu0  ;;  %v16429_v52 = vpop.f32.mrf.mxu1  ;;  %16673 = vmatprep.subr.bf16.mxu1 %v18015_v63 }
 0x388   : > { %v20483_v18 = vadd.f32 %v16428_v35, %v20333_v59 }
 0x389   : > { %v20480_v21 = vpop.f32.mrf.mxu0  ;;  %v16430_v22 = vpop.f32.mrf.mxu1 }
 0x38a   : > { %22155 = vst [vmem:[#allocation40_spill] sm:$0xff] %v20483_v18  ;;  %v16431_v42 = vadd.f32 %v16430_v22, %v16429_v52 }
 0x38b   : > { %v20485_v12 = vpop.f32.mrf.mxu0  ;;  %v16432_v38 = vpop.f32.mrf.mxu1 }
 0x38c   : > { %v20490_v25 = vadd.f32 %v16431_v42, %v20337_v28  ;;  %v18016_v28 = vld [vmem:[#allocation3 + $0x530] sm:$0xff]  }
 0x38d   : > { %v20487_v53 = vpop.f32.mrf.mxu0  ;;  %v16433_v47 = vpop.f32.mrf.mxu1  ;;  %16674 = vmatpush3.bf16.msra.mxu1 %v18016_v28 }
 0x38e   : > { %22156 = vst [vmem:[#allocation42_spill] sm:$0xff] %v20490_v25  ;;  %v16434_v51 = vadd.f32 %v16433_v47, %v16432_v38 }
 0x38f   : > { %v20492_v27 = vpop.f32.mrf.mxu0  ;;  %v16435_v59 = vpop.f32.mrf.mxu1 }
 0x390   : > { %v20497_v35 = vadd.f32 %v16434_v51, %v20343_v24 }
 0x391   : > { %v20494_v10 = vpop.f32.mrf.mxu0  ;;  %v16436_v22 = vpop.f32.mrf.mxu1 }
 0x392   : > { %22157 = vst [vmem:[#allocation41_spill] sm:$0xff] %v20497_v35  ;;  %v16437_v42 = vadd.f32 %v16436_v22, %v16435_v59  ;;  %v18017_v59 = vld [vmem:[#allocation3 + $0x568] sm:$0xff]  }
 0x393   : > { %v20499_v52 = vpop.f32.mrf.mxu0  ;;  %v16438_v25 = vpop.f32.mrf.mxu1  ;;  %16675 = vmatprep.subr.bf16.mxu1 %v18017_v59 }
 0x394   : > { %v20504_v38 = vadd.f32 %v16437_v42, %v20348_v5 }
 0x395   : > { %v20501_v46 = vpop.f32.mrf.mxu0  ;;  %v16439_v47 = vpop.f32.mrf.mxu1 }
 0x396   : > { %22158 = vst [vmem:[#allocation19_spill] sm:$0xff] %v20504_v38  ;;  %v16440_v3 = vadd.f32 %v16439_v47, %v16438_v25  ;;  %v18018_v25 = vld [vmem:[#allocation3 + $0x528] sm:$0xff]  }
 0x397   : > { %v20506_v11 = vpop.f32.mrf.mxu0  ;;  %v16441_v51 = vpop.f32.mrf.mxu1  ;;  %16676 = vmatpush3.bf16.msra.mxu1 %v18018_v25 }
 0x398   : > { %v20511_v35 = vadd.f32 %v16440_v3, %v20353_v33 }
 0x399   : > { %v20508_v24 = vpop.f32.mrf.mxu0  ;;  %v16442_v63 = vpop.f32.mrf.mxu1 }
 0x39a   : > { %22159 = vst [vmem:[#allocation12_spill] sm:$0xff] %v20511_v35  ;;  %v16443_v22 = vadd.f32 %v16442_v63, %v16441_v51 }
 0x39b   : > { %v20513_v61 = vpop.f32.mrf.mxu0  ;;  %v16444_v5 = vpop.f32.mrf.mxu1 }
 0x39c   : > { %v20518_v28 = vadd.f32 %v16443_v22, %v20356_v60  ;;  %v18019_v60 = vld [vmem:[#allocation3 + $0x560] sm:$0xff]  }
 0x39d   : > { %v20515_v18 = vpop.f32.mrf.mxu0  ;;  %v16445_v47 = vpop.f32.mrf.mxu1  ;;  %16677 = vmatprep.subr.bf16.mxu1 %v18019_v60 }
 0x39e   : > { %22160 = vst [vmem:[#allocation17_spill] sm:$0xff] %v20518_v28  ;;  %v16446_v38 = vadd.f32 %v16445_v47, %v16444_v5  ;;  %v18020_v5 = vld [vmem:[#allocation3 + $0x520] sm:$0xff]  }
 0x39f   : > { %v20520_v42 = vpop.f32.mrf.mxu0  ;;  %v16447_v33 = vpop.f32.mrf.mxu1  ;;  %16678 = vmatpush3.bf16.msra.mxu1 %v18020_v5 }
 0x3a0   : > { %v20525_v3 = vadd.f32 %v16446_v38, %v20361_v41 }
 0x3a1   : > { %v20522_v8 = vpop.f32.mrf.mxu0  ;;  %v16448_v63 = vpop.f32.mrf.mxu1 }
 0x3a2   : > { %22161 = vst [vmem:[#allocation43_spill] sm:$0xff] %v20525_v3  ;;  %v16449_v59 = vadd.f32 %v16448_v63, %v16447_v33 }
 0x3a3   : > { %v20527_v51 = vpop.f32.mrf.mxu0  ;;  %v16450_v22 = vpop.f32.mrf.mxu1 }
 0x3a4   : > { %v20532_v28 = vadd.f32 %v16449_v59, %v20364_v13 }
 0x3a5   : > { %v20529_v35 = vpop.f32.mrf.mxu0  ;;  %v16451_v25 = vpop.f32.mrf.mxu1 }
 0x3a6   : > { %22162 = vst [vmem:[#allocation44_spill] sm:$0xff] %v20532_v28  ;;  %v16452_v47 = vadd.f32 %v16451_v25, %v16450_v22  ;;  %v18021_v22 = vld [vmem:[#allocation3 + $0x4c8] sm:$0xff]   ;;  %v18022_v28 = vld [vmem:[#allocation3 + $0x558] sm:$0xff]  }
 0x3a7   : > { %v20534_v50 = vpop.f32.mrf.mxu0  ;;  %v16453_v41 = vpop.f32.mrf.mxu1  ;;  %16643 = vmatprep.subr.bf16.mxu0 %v18021_v22  ;;  %16679 = vmatprep.subr.bf16.mxu1 %v18022_v28 }
 0x3a8   : > { %v20539_v38 = vadd.f32 %v16452_v47, %v20369_v31 }
 0x3a9   : > { %v20536_v26 = vpop.f32.mrf.mxu0  ;;  %v16454_v63 = vpop.f32.mrf.mxu1 }
 0x3aa   : > { %22163 = vst [vmem:[#allocation26_spill] sm:$0xff] %v20536_v26  ;;  %22164 = vst [vmem:[#allocation24_spill] sm:$0xff] %v20539_v38  ;;  %v16455_v3 = vadd.f32 %v16454_v63, %v16453_v41  ;;  %v18023_v63 = vld [vmem:[#allocation3 + $0x488] sm:$0xff]  }
 0x3ab   : > { %v20541_v33 = vpop.f32.mrf.mxu0  ;;  %v16456_v13 = vpop.f32.mrf.mxu1  ;;  %16644 = vmatpush3.bf16.msra.mxu0 %v18023_v63 }
 0x3ac   : > { %v20546_v59 = vadd.f32 %v16455_v3, %v20372_v49  ;;  %v18024_v49 = vld [vmem:[#allocation3 + $0x518] sm:$0xff]  }
 0x3ad   : > { %v20543_v14 = vpop.f32.mrf.mxu0  ;;  %v16457_v25 = vpop.f32.mrf.mxu1  ;;  %16680 = vmatpush3.bf16.msra.mxu1 %v18024_v49  ;;  %v18027_v49 = vld [vmem:[#allocation3 + $0x480] sm:$0xff]  }
 0x3ae   : > { %22165 = vst [vmem:[#allocation25_spill] sm:$0xff] %v20546_v59  ;;  %v16458_v5 = vadd.f32 %v16457_v25, %v16456_v13 }
 0x3af   : > { %v20548_v60 = vpop.f32.mrf.mxu0  ;;  %v16459_v31 = vpop.f32.mrf.mxu1 }
 0x3b0   : > { %22166 = vst [vmem:[#allocation15_spill] sm:$0xff] %v20548_v60  ;;  %v20553_v47 = vadd.f32 %v16458_v5, %v20377_v57 }
 0x3b1   : > { %v20550_v26 = vpop.f32.mrf.mxu0  ;;  %v16460_v38 = vpop.f32.mrf.mxu1 }
 0x3b2   : > { %22167 = vst [vmem:[#allocation46_spill] sm:$0xff] %v20553_v47  ;;  %v16461_v3 = vadd.f32 %v16460_v38, %v16459_v31  ;;  %v18025_v47 = vld [vmem:[#allocation3 + $0x4c0] sm:$0xff]   ;;  %v18026_v31 = vld [vmem:[#allocation3 + $0x550] sm:$0xff]  }
 0x3b3   : > { %v20555_v41 = vpop.f32.mrf.mxu0  ;;  %v16462_v60 = vpop.f32.mrf.mxu1  ;;  %16645 = vmatprep.subr.bf16.mxu0 %v18025_v47  ;;  %16681 = vmatprep.subr.bf16.mxu1 %v18026_v31 }
 0x3b4   : > { %22168 = vst [vmem:[#allocation10_spill] sm:$0xff] %v20555_v41  ;;  %v20560_v13 = vadd.f32 %v16461_v3, %v20380_v4  ;;  %v18028_v3 = vld [vmem:[#allocation3 + $0x510] sm:$0xff]   ;;  %16646 = vmatpush3.bf16.msra.mxu0 %v18027_v49 }
 0x3b5   : > { %v20557_v59 = vpop.f32.mrf.mxu0  ;;  %v16463_v28 = vpop.f32.mrf.mxu1  ;;  %16682 = vmatpush3.bf16.msra.mxu1 %v18028_v3 }
 0x3b6   : > { %22169 = vst [vmem:[#allocation11_spill] sm:$0xff] %v20557_v59  ;;  %22170 = vst [vmem:[#allocation27_spill] sm:$0xff] %v20560_v13  ;;  %v16464_v25 = vadd.f32 %v16463_v28, %v16462_v60 }
 0x3b7   : > { %v20562_v22 = vpop.f32.mrf.mxu0  ;;  %v16465_v5 = vpop.f32.mrf.mxu1 }
 0x3b8   : > { %v20567_v41 = vadd.f32 %v16464_v25, %v20385_v19 }
 0x3b9   : > { %v20564_v57 = vpop.f32.mrf.mxu0  ;;  %v16466_v63 = vpop.f32.mrf.mxu1 }
 0x3ba   : > { %22171 = vst [vmem:[#allocation16_spill] sm:$0xff] %v20567_v41  ;;  %v16467_v59 = vadd.f32 %v16466_v63, %v16465_v5 }
 0x3bb   : > { %v20569_v38 = vpop.f32.mrf.mxu0  ;;  %v16468_v13 = vpop.f32.mrf.mxu1 }
 0x3bc   : > { %22172 = vst [vmem:[#allocation29_spill] sm:$0xff] %v20569_v38  ;;  %v20574_v60 = vadd.f32 %v16467_v59, %v20388_v58 }
 0x3bd   : > { %v20571_v4 = vpop.f32.mrf.mxu0  ;;  %v16469_v19 = vpop.f32.mrf.mxu1 }
 0x3be   : > { %22173 = vst [vmem:[#allocation30_spill] sm:$0xff] %v20571_v4  ;;  %22174 = vst [vmem:[#allocation32_spill] sm:$0xff] %v20574_v60  ;;  %v16470_v25 = vadd.f32 %v16469_v19, %v16468_v13 }
 0x3bf   : > { %v20576_v28 = vpop.f32.mrf.mxu0  ;;  %v16471_v38 = vpop.f32.mrf.mxu1 }
 0x3c0   : > { %v20581_v47 = vadd.f32 %v16470_v25, %v20393_v32 }
 0x3c1   : > { %v20578_v41 = vpop.f32.mrf.mxu0  ;;  %v16472_v31 = vpop.f32.mrf.mxu1 }
 0x3c2   : > { %22175 = vst [vmem:[#allocation9_spill] sm:$0xff] %v20581_v47  ;;  %v16473_v63 = vadd.f32 %v16472_v31, %v16471_v38 }
 0x3c3   : > { %v20583_v5 = vpop.f32.mrf.mxu0  ;;  %v16474_v49 = vpop.f32.mrf.mxu1 }
 0x3c4   : > { %22176 = vst [vmem:[#allocation28_spill] sm:$0xff] %v20583_v5  ;;  %v20588_v58 = vadd.f32 %v16473_v63, %v20396_v37 }
 0x3c5   : > { %v20585_v4 = vpop.f32.mrf.mxu0  ;;  %v16475_v3 = vpop.f32.mrf.mxu1 }
 0x3c6   : > { %22177 = vst [vmem:[#allocation33_spill] sm:$0xff] %v20585_v4  ;;  %22178 = vst [vmem:[#allocation31_spill] sm:$0xff] %v20588_v58  ;;  %v16476_v13 = vadd.f32 %v16475_v3, %v16474_v49  ;;  %v18680_v49 = vmov 1983009808  }
 0x3c7   : > { %v20590_v59 = vpop.f32.mrf.mxu0  ;;  %v16477_v60 = vpop.f32.mrf.mxu1  ;;  %v4433_v3 = vunpack.c.l.s4 %v18680_v49 }
 0x3c8   : > { %22179 = vst [vmem:[#allocation36_spill] sm:$0xff] %v20590_v59  ;;  %v20595_v32 = vadd.f32 %v16476_v13, %v20401_v16 }
 0x3c9   : > { %v20592_v19 = vpop.f32.mrf.mxu0  ;;  %v16478_v47 = vpop.f32.mrf.mxu1 }
 0x3ca   : > { %22180 = vst [vmem:[#allocation34_spill] sm:$0xff] %v20592_v19  ;;  %22181 = vst [vmem:[#allocation20_spill] sm:$0xff] %v20595_v32  ;;  %v16479_v38 = vadd.f32 %v16478_v47, %v16477_v60  ;;  %v4435_v19 = vlaneseq  ;;  %v16513_v47 = vadd.f32 %v20431_v54, %v20427_v55  ;;  %v4434_v32 = vunpack.c.0.s8 %v4433_v3 }
 0x3cb   : > { %v20597_v25 = vpop.f32.mrf.mxu0  ;;  %v16480_v4 = vpop.f32.mrf.mxu1  ;;  %v16525_v55 = vadd.f32 %v20459_v15, %v20457_v29 }
 0x3cc   : > { %v20602_v37 = vadd.f32 %v16479_v38, %v20406_v1  ;;  %v16516_v1 = vadd.f32 %v20438_v45, %v20436_v62  ;;  %v18030_v45 = vld [vmem:[#allocation3 + $0x508] sm:$0xff]  }
 0x3cd   : > { %v20599_v31 = vpop.f32.mrf.mxu0  ;;  %v16481_v58 = vpop.f32.mrf.mxu1 }
 0x3ce   : > { %22182 = vst [vmem:[#allocation21_spill] sm:$0xff] %v20602_v37  ;;  %v16482_v59 = vadd.f32 %v16481_v58, %v16480_v4  ;;  %v4436_v37 = vshrl.u32 %v4435_v19, 7  ;;  %v16519_v4 = vadd.f32 %v20445_v39, %v20443_v30  ;;  %v20633_v30 = vadd.f32 %v16513_v47, %v20419_v44  ;;  %v22192_v47 = vld [vmem:[#allocation45_spill] sm:$0xff] }
 0x3cf   : > { %v20604_v63 = vpop.f32.mrf.mxu0  ;;  %v16483_v16 = vpop.f32.mrf.mxu1  ;;  %v16534_v44 = vadd.f32 %v20480_v21, %v20478_v36  ;;  %v20662_v21 = vadd.f32 %v16525_v55, %v20448_v7 }
 0x3d0   : > { %v20609_v13 = vadd.f32 %v16482_v59, %v20409_v2  ;;  %v16522_v2 = vadd.f32 %v20452_v17, %v20450_v23  ;;  %v20630_v3 = vsub.s32 %v4434_v32, %v4436_v37  ;;  %v20635_v39 = vsub.s32 0, %v4436_v37 }
 0x3d1   : > { %v20606_v5 = vpop.f32.mrf.mxu0  ;;  %v16484_v38 = vpop.f32.mrf.mxu1  ;;  %v20638_v23 = vadd.f32 %v16516_v1, %v20425_v9  ;;  %v16528_v17 = vadd.f32 %v20466_v34, %v20464_v6  ;;  %v4024_v32 = vadd.f32 %v16519_v4, %v20434_v0  ;;  %v16537_v37 = vadd.f32 %v20487_v53, %v20485_v12  ;;  %v18031_v34 = vld [vmem:[#allocation3 + $0x540] sm:$0xff]  }
 0x3d2   : > { %22183 = vst [vmem:[#allocation22_spill] sm:$0xff] %v20609_v13  ;;  %v16485_v58 = vadd.f32 %v16484_v38, %v16483_v16  ;;  %v18029_v13 = vld [vmem:[#allocation3 + $0x548] sm:$0xff]   ;;  %22184 = vst [vmem:[#allocation23_spill] sm:$0xff] %v20630_v3  ;;  %v16540_v9 = vadd.f32 %v20494_v10, %v20492_v27  ;;  %v20652_v6 = vadd.f32 %v16522_v2, %v20441_v43  ;;  %v18032_v12 = vld [vmem:[#allocation3 + $0x500] sm:$0xff]  }
 0x3d3   : > { %v20611_v60 = vpop.f32.mrf.mxu0  ;;  %v16486_v59 = vpop.f32.mrf.mxu1  ;;  %22185 = vst [vmem:[#allocation47_spill] sm:$0xff] %v20635_v39  ;;  %16683 = vmatprep.subr.bf16.mxu1 %v18029_v13  ;;  %v16546_v0 = vadd.f32 %v20508_v24, %v20506_v11  ;;  %v16549_v53 = vadd.f32 %v20515_v18, %v20513_v61  ;;  %v16552_v43 = vadd.f32 %v20522_v8, %v20520_v42  ;;  %v22187_v27 = vld [vmem:[#allocation26_spill] sm:$0xff]  ;;  %v22188_v24 = vld [vmem:[#allocation37_spill] sm:$0xff]  ;;  %v22189_v18 = vld [vmem:[#allocation39_spill] sm:$0xff] }
 0x3d4   : > { %v20626_v54 = vadd.f32 %v16485_v58, %v20412_v56  ;;  %v16531_v56 = vadd.f32 %v20473_v40, %v20471_v48  ;;  %16684 = vmatpush3.bf16.msra.mxu1 %v18030_v45  ;;  %v16543_v48 = vadd.f32 %v20501_v46, %v20499_v52  ;;  %v16555_v46 = vadd.f32 %v20529_v35, %v20527_v51  ;;  %v22190_v8 = vld [vmem:[#allocation15_spill] sm:$0xff]  ;;  %v22191_v51 = vld [vmem:[#allocation18_spill] sm:$0xff] }
 0x3d5   : > { %v20619_v49 = vpop.f32.mrf.mxu0  ;;  %v16487_v19 = vpop.f32.mrf.mxu1  ;;  %v16558_v10 = vadd.f32 %v22187_v27, %v20534_v50  ;;  %16685 = vmatprep.subr.bf16.mxu1 %v18031_v34  ;;  %v20678_v61 = vadd.f32 %v16528_v17, %v22189_v18  ;;  %v16564_v35 = vadd.f32 %v20550_v26, %v22190_v8  ;;  %v20683_v50 = vadd.f32 %v16534_v44, %v22191_v51  ;;  %v22194_v38 = vld [vmem:[#allocation10_spill] sm:$0xff]  ;;  %v22195_v4 = vld [vmem:[#allocation11_spill] sm:$0xff]  ;;  %v22198_v26 = vld [vmem:[#allocation41_spill] sm:$0xff] }
 0x3d6   : > { %v16488_v29 = vadd.f32 %v16487_v19, %v16486_v59  ;;  %v20675_v13 = vadd.f32 %v16531_v56, %v22188_v24  ;;  %v20686_v1 = vadd.f32 %v16537_v37, %v22192_v47  ;;  %v16567_v58 = vadd.f32 %v22195_v4, %v22194_v38  ;;  %v22196_v2 = vld [vmem:[#allocation38_spill] sm:$0xff]  ;;  %v22200_v37 = vld [vmem:[#allocation19_spill] sm:$0xff]  ;;  %v22205_v8 = vld [vmem:[#allocation44_spill] sm:$0xff] }
 0x3d7   : > { %v20628_v62 = vpop.f32.mrf.mxu0  ;;  %v16489_v16 = vpop.f32.mrf.mxu1  ;;  %v22197_v45 = vld [vmem:[#allocation42_spill] sm:$0xff]  ;;  %v20698_v17 = vadd.f32 %v16546_v0, %v22198_v26  ;;  %v22206_v51 = vld [vmem:[#allocation28_spill] sm:$0xff] }
 0x3d8   : > { %v20659_v40 = vadd.f32 %v16488_v29, %v20415_v20  ;;  %v16561_v20 = vadd.f32 %v20543_v14, %v20541_v33  ;;  %16686 = vmatpush3.bf16.msra.mxu1 %v18032_v12  ;;  %v22193_v14 = vld [vmem:[#allocation40_spill] sm:$0xff]  ;;  %v20695_v19 = vadd.f32 %v16543_v48, %v22197_v45  ;;  %v22199_v29 = vld [vmem:[#allocation17_spill] sm:$0xff]  ;;  %v16570_v48 = vadd.f32 %v20564_v57, %v20562_v22 }
 0x3d9   : > { %v16593_v15 = vpop.f32.mrf.mxu0  ;;  %v16490_v52 = vpop.f32.mrf.mxu1  ;;  %v20689_v33 = vadd.f32 %v16540_v9, %v22193_v14  ;;  %v20701_v44 = vadd.f32 %v16555_v46, %v22199_v29  ;;  %v22201_v9 = vld [vmem:[#allocation43_spill] sm:$0xff]  ;;  %v22202_v12 = vld [vmem:[#allocation12_spill] sm:$0xff]  ;;  %v16585_v57 = vadd.f32 %v20599_v31, %v20597_v25  ;;  %v16591_v29 = vadd.f32 %v20619_v49, %v20611_v60 }
 0x3da   : > { %22186 = vst [vmem:[#allocation48_spill] sm:$0xff] %v20659_v40  ;;  %v16491_v7 = vadd.f32 %v16490_v52, %v16489_v16  ;;  %v20704_v16 = vadd.f32 %v16549_v53, %v22200_v37  ;;  %v20707_v34 = vadd.f32 %v16558_v10, %v22201_v9  ;;  %v20710_v27 = vadd.f32 %v16552_v43, %v22202_v12  ;;  %v22203_v52 = vld [vmem:[#allocation29_spill] sm:$0xff]  ;;  %v22208_v14 = vld [vmem:[#allocation36_spill] sm:$0xff]  ;;  %v22209_v43 = vld [vmem:[#allocation34_spill] sm:$0xff] }
 0x3db   : > { %v16595_v36 = vpop.f32.mrf.mxu0  ;;  %v16492_v42 = vpop.f32.mrf.mxu1  ;;  %v20717_v46 = vadd.f32 %v16561_v20, %v22205_v8  ;;  %v16576_v53 = vadd.f32 %v20578_v41, %v20576_v28  ;;  %v22207_v10 = vld [vmem:[#allocation33_spill] sm:$0xff]  ;;  %v16582_v38 = vadd.f32 %v22209_v43, %v22208_v14  ;;  %v22215_v60 = vld [vmem:[#allocation32_spill] sm:$0xff]  ;;  %v22218_v8 = vld [vmem:[#allocation31_spill] sm:$0xff] }
 0x3dc   : > { %v3975_v59 = vadd.f32 %v16491_v7, %v22196_v2  ;;  %v22204_v7 = vld [vmem:[#allocation30_spill] sm:$0xff]  ;;  %v16579_v47 = vadd.f32 %v22207_v10, %v22206_v51  ;;  %v22210_v2 = vld [vmem:[#allocation24_spill] sm:$0xff]  ;;  %v22212_v41 = vld [vmem:[#allocation25_spill] sm:$0xff]  ;;  %v20766_v51 = vadd.f32 %v16585_v57, %v22218_v8 }
 0x3dd   : > { %v16596_v11 = vpop.f32.mrf.mxu0  ;;  %v16493_v56 = vpop.f32.mrf.mxu1  ;;  %v16573_v0 = vadd.f32 %v22204_v7, %v22203_v52  ;;  %v20726_v22 = vadd.f32 %v16564_v35, %v22210_v2  ;;  %v20734_v28 = vadd.f32 %v16567_v58, %v22212_v41  ;;  %v16594_v35 = vadd.f32 %v16593_v15, %v20628_v62  ;;  %v22213_v52 = vld [vmem:[#allocation46_spill] sm:$0xff]  ;;  %v22216_v62 = vld [vmem:[#allocation9_spill] sm:$0xff]  ;;  %v22217_v15 = vld [vmem:[#allocation16_spill] sm:$0xff] }
 0x3de   : > { %v16494_v24 = vadd.f32 %v16493_v56, %v16492_v42  ;;  %v22211_v42 = vld [vmem:[#allocation35_spill] sm:$0xff]  ;;  %v16588_v56 = vadd.f32 %v20606_v5, %v20604_v63  ;;  %v16597_v37 = vadd.f32 %v16596_v11, %v16595_v36  ;;  %v20743_v7 = vadd.f32 %v16570_v48, %v22213_v52  ;;  %v22219_v14 = vld [vmem:[#allocation21_spill] sm:$0xff] }
 0x3df   : > { %v16598_v55 = vpop.f32.mrf.mxu0  ;;  %v17623_v4 = vpop.f32.mrf.mxu1  ;;  %v20756_v49 = vadd.f32 %v16579_v47, %v22215_v60  ;;  %v20762_v36 = vadd.f32 %v16576_v53, %v22217_v15  ;;  %v20769_v43 = vadd.f32 %v16591_v29, %v22219_v14  ;;  %v22220_v47 = vld [vmem:[#allocation22_spill] sm:$0xff] }
 0x3e0   : > { %v20731_v20 = vadd.f32 %v16494_v24, %v22211_v42  ;;  %v4185_v26 = vadd.f32 %v17623_v4, %v4024_v32  ;;  %v22214_v32 = vld [vmem:[#allocation27_spill] sm:$0xff]  ;;  %v20772_v4 = vadd.f32 %v16594_v35, %v22220_v47  ;;  %v20778_v53 = vadd.f32 %v16597_v37, %v20626_v54 }
 0x3e1   : > { %v16599_v18 = vpop.f32.mrf.mxu0  ;;  %v4176_v9 = vpop.f32.mrf.mxu1  ;;  %v20746_v58 = vadd.f32 %v16573_v0, %v22214_v32 }
 0x3e2   : > { %v4305_v12 = vmul.f32 0.01, %v4185_v26  ;;  %v4177_v31 = vadd.f32 %v4176_v9, %v20633_v30  ;;  %v20759_v30 = vadd.f32 %v16582_v38, %v22216_v62  ;;  %v22221_v38 = vld [vmem:[#allocation20_spill] sm:$0xff]  ;;  %v20782_v41 = vadd.f32 %v16599_v18, %v16598_v55 }
 0x3e3   : > { %v16601_v45 = vpop.f32.mrf.mxu0  ;;  %v17624_v63 = vpop.f32.mrf.mxu1  ;;  %v20775_v2 = vadd.f32 %v16588_v56, %v22221_v38 }
 0x3e4   : > { %v4337_v11 = vmax.f32 %v4185_v26, %v4305_v12  ;;  %v4303_v48 = vmul.f32 0.01, %v4177_v31  ;;  %v4188_v24 = vadd.f32 %v17624_v63, %v20652_v6  ;;  %22222 = vst [vmem:[#allocation26_spill] sm:$0xff] %v20782_v41 }
 0x3e5   : > { %v16602_v25 = vpop.f32.mrf.mxu0  ;;  %v4179_v10 = vpop.f32.mrf.mxu1 }
 0x3e6   : > { %v16603_v5 = vadd.f32 %v16602_v25, %v16601_v45  ;;  %4369 = vst [vmem:[%s20753_s26 + $0x10] sm:$0xff] %v4337_v11  ;;  %v4465_v42 = vcombine.high %v4337_v11, %v4337_v11  ;;  %v4472_v6 = vrot.slane %v4337_v11, %v20630_v3  ;;  %v4335_v57 = vmax.f32 %v4177_v31, %v4303_v48 }
 0x3e7   : > { %v16604_v0 = vpop.f32.mrf.mxu0  ;;  %v4306_v45 = vmul.f32 0.01, %v4188_v24  ;;  %v4180_v35 = vadd.f32 %v4179_v10, %v20638_v23  ;;  %v17627_v9 = vpop.f32.mrf.mxu1 }
 0x3e8   : > { %v20787_v56 = vadd.f32 %v16603_v5, %v3975_v59  ;;  %v4479_v12 = vrot.slane %v4465_v42, %v20630_v3  ;;  %v4480_v54 = vcombine.high %v4472_v6, %v4472_v6  ;;  %v14992_v37 = vrot.slane %v4472_v6, 9  ;;  %4367 = vst [vmem:[%s20753_s26] sm:$0xff] %v4335_v57 }
 0x3e9   : > { %v16605_v26 = vpop.f32.mrf.mxu0  ;;  %v4431_v25 = vcombine.high %v4335_v57, %v4335_v57  ;;  %v4438_v31 = vrot.slane %v4335_v57, %v20630_v3  ;;  %v4338_v52 = vmax.f32 %v4188_v24, %v4306_v45  ;;  %v4304_v32 = vmul.f32 0.01, %v4180_v35  ;;  %v4192_v57 = vpop.f32.mrf.mxu1 }
 0x3ea   : > { %v20784_v29 = vadd.f32 %v16605_v26, %v16604_v0  ;;  %v4201_v55 = vadd.f32 %v17627_v9, %v20675_v13  ;;  %v4481_v18 = vcombine.high %v4479_v12, %v4479_v12  ;;  %v14993_v63 = vrot.slane %v4480_v54, 9 }
 0x3eb   : > { %v14994_v60 = vrot.slane %v4479_v12, 9  ;;  %v5551_v23 = vmax.f32 %v4472_v6, %v14992_v37  ;;  %v4445_v59 = vrot.slane %v4431_v25, %v20630_v3  ;;  %v4446_v5 = vcombine.high %v4438_v31, %v4438_v31  ;;  %4370 = vst [vmem:[%s20753_s26 + $0x18] sm:$0xff] %v4338_v52  ;;  %v17628_v40 = vpop.f32.mrf.mxu1 }
 0x3ec   : > { %22223 = vst [vmem:[#allocation37_spill] sm:$0xff] %v20784_v29  ;;  %v14928_v62 = vrot.slane %v4438_v31, 9  ;;  %v4482_v15 = vcombine.high %v4338_v52, %v4338_v52  ;;  %v14995_v11 = vrot.slane %v4481_v18, 9  ;;  %v5552_v48 = vmax.f32 %v4480_v54, %v14993_v63 }
 0x3ed   : > { %v5553_v0 = vmax.f32 %v4479_v12, %v14994_v60  ;;  %v4489_v24 = vrot.slane %v4338_v52, %v20630_v3  ;;  %v4447_v8 = vcombine.high %v4445_v59, %v4445_v59  ;;  %v14929_v13 = vrot.slane %v4446_v5, 9 }
 0x3ee   : > { %v14930_v10 = vrot.slane %v4445_v59, 9  ;;  %v5295_v14 = vmax.f32 %v4438_v31, %v14928_v62  ;;  %v5554_v47 = vmax.f32 %v4481_v18, %v14995_v11  ;;  %v4496_v38 = vrot.slane %v4482_v15, %v20630_v3 }
 0x3ef   : > { %v4497_v42 = vcombine.high %v4489_v24, %v4489_v24  ;;  %v14996_v6 = vrot.slane %v4489_v24, 9  ;;  %v14931_v45 = vrot.slane %v4447_v8, 9  ;;  %v5296_v26 = vmax.f32 %v4446_v5, %v14929_v13 }
 0x3f0   : > { %v5297_v9 = vmax.f32 %v4445_v59, %v14930_v10  ;;  %v5615_v37 = vmax.f32 %v5295_v14, %v5551_v23  ;;  %v4498_v25 = vcombine.high %v4496_v38, %v4496_v38  ;;  %v14998_v12 = vrot.slane %v4496_v38, 9 }
 0x3f1   : > { %v14997_v54 = vrot.slane %v4497_v42, 9  ;;  %v5555_v63 = vmax.f32 %v4489_v24, %v14996_v6  ;;  %v5298_v52 = vmax.f32 %v4447_v8, %v14931_v45  ;;  %v5616_v60 = vmax.f32 %v5296_v26, %v5552_v48 }
 0x3f2   : > { %v5617_v41 = vmax.f32 %v5297_v9, %v5553_v0  ;;  %v5818_v31 = vrot.slane %v5615_v37, %v20635_v39  ;;  %v14999_v18 = vrot.slane %v4498_v25, 9  ;;  %v5557_v15 = vmax.f32 %v4496_v38, %v14998_v12 }
 0x3f3   : > { %v5556_v62 = vmax.f32 %v4497_v42, %v14997_v54  ;;  %v4336_v11 = vmax.f32 %v4180_v35, %v4304_v32  ;;  %v5618_v29 = vmax.f32 %v5298_v52, %v5554_v47  ;;  %v5822_v5 = vrot.slane %v5616_v60, %v20635_v39 }
 0x3f4   : > { %v5826_v23 = vrot.slane %v5617_v41, %v20635_v39  ;;  %v4309_v59 = vmul.f32 0.01, %v4201_v55  ;;  %v5558_v13 = vmax.f32 %v4498_v25, %v14999_v18  ;;  %v4193_v0 = vadd.f32 %v4192_v57, %v20662_v21  ;;  %v4195_v57 = vpop.f32.mrf.mxu1 }
 0x3f5   : > { %4368 = vst [vmem:[%s20753_s26 + $0x8] sm:$0xff] %v4336_v11  ;;  %v4448_v24 = vcombine.high %v4336_v11, %v4336_v11  ;;  %v4455_v48 = vrot.slane %v4336_v11, %v20630_v3  ;;  %v5830_v8 = vrot.slane %v5618_v29, %v20635_v39  ;;  %v6072_v35 = vsel %vm6071_vm0, %v5822_v5, %v5818_v31 }
 0x3f6   : > { %v4341_v32 = vmax.f32 %v4201_v55, %v4309_v59  ;;  %v4204_v10 = vadd.f32 %v17628_v40, %v20683_v50  ;;  %v6074_v41 = vsel %vm6073_vm1, %v5826_v23, %v6072_v35  ;;  %v4307_v6 = vmul.f32 0.01, %v4193_v0  ;;  %v17631_v23 = vpop.f32.mrf.mxu1 }
 0x3f7   : > { %v4462_v14 = vrot.slane %v4448_v24, %v20630_v3  ;;  %v4463_v47 = vcombine.high %v4455_v48, %v4455_v48  ;;  %v14932_v38 = vrot.slane %v4455_v48, 9  ;;  %v6076_v42 = vsel %vm6075_vm2, %v5830_v8, %v6074_v41 }
 0x3f8   : > { %4373 = vst [vmem:[%s20753_s26 + $0x30] sm:$0xff] %v4341_v32  ;;  %v4533_v21 = vcombine.high %v4341_v32, %v4341_v32  ;;  %v4540_v29 = vrot.slane %v4341_v32, %v20630_v3  ;;  %v4339_v25 = vmax.f32 %v4193_v0, %v4307_v6 }
 0x3f9   : > { %v4464_v45 = vcombine.high %v4462_v14, %v4462_v14  ;;  %v14933_v55 = vrot.slane %v4463_v47, 9  ;;  %v14934_v40 = vrot.slane %v4462_v14, 9  ;;  %v5299_v50 = vmax.f32 %v4455_v48, %v14932_v38 }
 0x3fa   : > { %v4547_v26 = vrot.slane %v4533_v21, %v20630_v3  ;;  %v4548_v9 = vcombine.high %v4540_v29, %v4540_v29  ;;  %v15000_v37 = vrot.slane %v4540_v29, 9  ;;  %4371 = vst [vmem:[%s20753_s26 + $0x20] sm:$0xff] %v4339_v25  ;;  %v4499_v38 = vcombine.high %v4339_v25, %v4339_v25 }
 0x3fb   : > { %v14935_v54 = vrot.slane %v4464_v45, 9  ;;  %v5300_v12 = vmax.f32 %v4463_v47, %v14933_v55  ;;  %v5301_v52 = vmax.f32 %v4462_v14, %v14934_v40  ;;  %v5619_v60 = vmax.f32 %v5299_v50, %v5555_v63 }
 0x3fc   : > { %v4549_v31 = vcombine.high %v4547_v26, %v4547_v26  ;;  %v15001_v18 = vrot.slane %v4548_v9, 9  ;;  %v15002_v11 = vrot.slane %v4547_v26, 9  ;;  %v5559_v5 = vmax.f32 %v4540_v29, %v15000_v37 }
 0x3fd   : > { %v5302_v59 = vmax.f32 %v4464_v45, %v14935_v54  ;;  %v5620_v24 = vmax.f32 %v5300_v12, %v5556_v62  ;;  %v5621_v8 = vmax.f32 %v5301_v52, %v5557_v15  ;;  %v5834_v48 = vrot.slane %v5619_v60, %v20635_v39  ;;  %v20819_v15 = vpop.f32.mrf.mxu1 }
 0x3fe   : > { %v15003_v35 = vrot.slane %v4549_v31, 9  ;;  %v5560_v32 = vmax.f32 %v4548_v9, %v15001_v18  ;;  %v5561_v41 = vmax.f32 %v4547_v26, %v15002_v11  ;;  %v4506_v29 = vrot.slane %v4339_v25, %v20630_v3 }
 0x3ff   : > { %v5622_v0 = vmax.f32 %v5302_v59, %v5558_v13  ;;  %v5838_v47 = vrot.slane %v5620_v24, %v20635_v39  ;;  %v5842_v63 = vrot.slane %v5621_v8, %v20635_v39  ;;  %v6078_v14 = vsel %vm6077_vm3, %v5834_v48, %v6076_v42 }
 0x400   : > { %v5562_v21 = vmax.f32 %v4549_v31, %v15003_v35  ;;  %v4513_v6 = vrot.slane %v4499_v38, %v20630_v3  ;;  %v4310_v62 = vmul.f32 0.01, %v4204_v10  ;;  %v4196_v13 = vadd.f32 %v4195_v57, %v20678_v61 }
 0x401   : > { %v5846_v45 = vrot.slane %v5622_v0, %v20635_v39  ;;  %v6080_v55 = vsel %vm6079_vm4, %v5838_v47, %v6078_v14  ;;  %v4217_v40 = vadd.f32 %v17631_v23, %v20695_v19  ;;  %v4514_v42 = vcombine.high %v4506_v29, %v4506_v29  ;;  %v20830_v19 = vpop.f32.mrf.mxu1 }
 0x402   : > { %v6082_v50 = vsel %vm6081_vm5, %v5842_v63, %v6080_v55  ;;  %v4515_v26 = vcombine.high %v4513_v6, %v4513_v6  ;;  %v14936_v9 = vrot.slane %v4506_v29, 9  ;;  %v14938_v25 = vrot.slane %v4513_v6, 9 }
 0x403   : > { %v20827_v37 = vsel %vm6083_vm6, %v5846_v45, %v6082_v50  ;;  %v4342_v54 = vmax.f32 %v4204_v10, %v4310_v62  ;;  %v4308_v12 = vmul.f32 0.01, %v4196_v13  ;;  %v14937_v52 = vrot.slane %v4514_v42, 9 }
 0x404   : > { %6142 = vst [vmem:[#allocation2 + $0x28] sm:$0xff] %v20827_v37  ;;  %v14939_v60 = vrot.slane %v4515_v26, 9  ;;  %v5303_v31 = vmax.f32 %v4506_v29, %v14936_v9  ;;  %v4313_v61 = vmul.f32 0.01, %v4217_v40  ;;  %v5305_v57 = vmax.f32 %v4513_v6, %v14938_v25  ;;  %v4211_v6 = vpop.f32.mrf.mxu1 }
 0x405   : > { %4374 = vst [vmem:[%s20753_s26 + $0x38] sm:$0xff] %v4342_v54  ;;  %v4550_v18 = vcombine.high %v4342_v54, %v4342_v54  ;;  %v4557_v11 = vrot.slane %v4342_v54, %v20630_v3  ;;  %v4340_v23 = vmax.f32 %v4196_v13, %v4308_v12  ;;  %v5304_v59 = vmax.f32 %v4514_v42, %v14937_v52 }
 0x406   : > { %v5306_v24 = vmax.f32 %v4515_v26, %v14939_v60  ;;  %v5623_v10 = vmax.f32 %v5303_v31, %v5559_v5  ;;  %v4345_v8 = vmax.f32 %v4217_v40, %v4313_v61  ;;  %v5625_v48 = vmax.f32 %v5305_v57, %v5561_v41  ;;  %v17635_v31 = vpop.f32.mrf.mxu1  ;;  %v20848_v61 = vld [vmem:[#allocation2 + $0x18] sm:$0xff] }
 0x407   : > { %v4564_v35 = vrot.slane %v4550_v18, %v20630_v3  ;;  %v4565_v38 = vcombine.high %v4557_v11, %v4557_v11  ;;  %v15004_v0 = vrot.slane %v4557_v11, 9  ;;  %4372 = vst [vmem:[%s20753_s26 + $0x28] sm:$0xff] %v4340_v23  ;;  %v5624_v47 = vmax.f32 %v5304_v59, %v5560_v32 }
 0x408   : > { %v5626_v63 = vmax.f32 %v5306_v24, %v5562_v21  ;;  %v5850_v14 = vrot.slane %v5623_v10, %v20635_v39  ;;  %v4516_v29 = vcombine.high %v4340_v23, %v4340_v23  ;;  %4377 = vst [vmem:[%s20753_s26 + $0x50] sm:$0xff] %v4345_v8  ;;  %v5858_v62 = vrot.slane %v5625_v48, %v20635_v39 }
 0x409   : > { %v4566_v45 = vcombine.high %v4564_v35, %v4564_v35  ;;  %v15005_v55 = vrot.slane %v4565_v38, 9  ;;  %v15006_v13 = vrot.slane %v4564_v35, 9  ;;  %v5854_v5 = vrot.slane %v5624_v47, %v20635_v39 }
 0x40a   : > { %v5862_v41 = vrot.slane %v5626_v63, %v20635_v39  ;;  %v5563_v40 = vmax.f32 %v4557_v11, %v15004_v0  ;;  %v4523_v50 = vrot.slane %v4340_v23, %v20630_v3  ;;  %v4530_v26 = vrot.slane %v4516_v29, %v20630_v3 }
 0x40b   : > { %v15007_v42 = vrot.slane %v4566_v45, 9  ;;  %v5564_v32 = vmax.f32 %v4565_v38, %v15005_v55  ;;  %v5565_v21 = vmax.f32 %v4564_v35, %v15006_v13  ;;  %v20843_v9 = vld [vmem:[#allocation2 + $0x27] sm:$0xff]  ;;  %v6085_v54 = vsel %vm6071_vm0, %v5854_v5, %v5850_v14 }
 0x40c   : > { %v20845_v25 = vld [vmem:[#allocation2 + $0x29] sm:$0xff]  ;;  %v4531_v12 = vcombine.high %v4523_v50, %v4523_v50  ;;  %v14940_v52 = vrot.slane %v4523_v50, 9  ;;  %v4601_v60 = vcombine.high %v4345_v8, %v4345_v8  ;;  %7188 = vst [vmem:[#allocation2 + $0x20] sm:$0xff] %v20848_v61  ;;  %v6086_v57 = vsel %vm6073_vm1, %v5858_v62, %v6085_v54 }
 0x40d   : > { %7190 = vst [vmem:[#allocation2 + $0x30] sm:$0xff] %v20848_v61  ;;  %v5566_v18 = vmax.f32 %v4566_v45, %v15007_v42  ;;  %v4532_v11 = vcombine.high %v4530_v26, %v4530_v26  ;;  %v14942_v23 = vrot.slane %v4530_v26, 9  ;;  %v6087_v10 = vsel %vm6075_vm2, %v5862_v41, %v6086_v57  ;;  %v4224_v45 = vpop.f32.mrf.mxu1 }
 0x40e   : > { %v14941_v59 = vrot.slane %v4531_v12, 9  ;;  %v5307_v24 = vmax.f32 %v4523_v50, %v14940_v52  ;;  %v4608_v48 = vrot.slane %v4345_v8, %v20630_v3  ;;  %v4615_v0 = vrot.slane %v4601_v60, %v20630_v3 }
 0x40f   : > { %v14943_v35 = vrot.slane %v4532_v11, 9  ;;  %v5309_v38 = vmax.f32 %v4530_v26, %v14942_v23  ;;  %v4209_v47 = vadd.f32 %v20819_v15, %v20686_v1  ;;  %v4212_v23 = vadd.f32 %v4211_v6, %v20689_v33 }
 0x410   : > { %v5308_v63 = vmax.f32 %v4531_v12, %v14941_v59  ;;  %v5627_v14 = vmax.f32 %v5307_v24, %v5563_v40  ;;  %v4616_v29 = vcombine.high %v4608_v48, %v4608_v48  ;;  %v15008_v62 = vrot.slane %v4608_v48, 9 }
 0x411   : > { %v5310_v55 = vmax.f32 %v4532_v11, %v14943_v35  ;;  %v5629_v13 = vmax.f32 %v5309_v38, %v5565_v21  ;;  %v4617_v5 = vcombine.high %v4615_v0, %v4615_v0  ;;  %v15010_v50 = vrot.slane %v4615_v0, 9 }
 0x412   : > { %v5628_v42 = vmax.f32 %v5308_v63, %v5564_v32  ;;  %v5866_v41 = vrot.slane %v5627_v14, %v20635_v39  ;;  %v15009_v8 = vrot.slane %v4616_v29, 9  ;;  %v20859_v54 = vmax.f32 %v4608_v48, %v15008_v62  ;;  %v17636_v32 = vpop.f32.mrf.mxu1 }
 0x413   : > { %v5630_v26 = vmax.f32 %v5310_v55, %v5566_v18  ;;  %v5874_v52 = vrot.slane %v5629_v13, %v20635_v39  ;;  %v15011_v60 = vrot.slane %v4617_v5, 9  ;;  %v20862_v1 = vmax.f32 %v4615_v0, %v15010_v50 }
 0x414   : > { %v5870_v15 = vrot.slane %v5628_v42, %v20635_v39  ;;  %v6088_v40 = vsel %vm6077_vm3, %v5866_v41, %v6087_v10  ;;  %v20866_v12 = vmax.f32 %v4616_v29, %v15009_v8  ;;  %v4311_v21 = vmul.f32 0.01, %v4209_v47 }
 0x415   : > { %v5878_v57 = vrot.slane %v5630_v26, %v20635_v39  ;;  %v20869_v11 = vmax.f32 %v4617_v5, %v15011_v60  ;;  %v4220_v18 = vadd.f32 %v20830_v19, %v20698_v17  ;;  %v4233_v48 = vadd.f32 %v17635_v31, %v20701_v44  ;;  %v18033_v26 = vld [vmem:[#allocation3 + $0x5f8] sm:$0xff]  }
 0x416   : > { %v6089_v59 = vsel %vm6079_vm4, %v5870_v15, %v6088_v40  ;;  %v4343_v24 = vmax.f32 %v4209_v47, %v4311_v21  ;;  %v20877_v10 = vadd.f32 %v4224_v45, %v20704_v16  ;;  %v4312_v0 = vmul.f32 0.01, %v4212_v23  ;;  %v18038_v21 = vld [vmem:[#allocation3 + $0x678] sm:$0xff]   ;;  %16711 = vmatprep.subr.bf16.mxu0 %v18033_v26 }
 0x417   : > { %v6090_v35 = vsel %vm6081_vm5, %v5874_v52, %v6089_v59  ;;  %v4314_v38 = vmul.f32 0.01, %v4220_v18  ;;  %v20881_v63 = vadd.f32 %v17636_v32, %v20707_v34  ;;  %v4317_v6 = vmul.f32 0.01, %v4233_v48  ;;  %16751 = vmatprep.subr.bf16.mxu1 %v18038_v21 }
 0x418   : > { %v6091_v17 = vsel %vm6083_vm6, %v5878_v57, %v6090_v35  ;;  %4375 = vst [vmem:[%s20753_s26 + $0x40] sm:$0xff] %v4343_v24  ;;  %v4567_v33 = vcombine.high %v4343_v24, %v4343_v24  ;;  %v4574_v19 = vrot.slane %v4343_v24, %v20630_v3  ;;  %v4344_v16 = vmax.f32 %v4212_v23, %v4312_v0 }
 0x419   : > { %6143 = vst [vmem:[#allocation2 + $0x48] sm:$0xff] %v6091_v17  ;;  %v4346_v44 = vmax.f32 %v4220_v18, %v4314_v38  ;;  %v20887_v31 = vmul.f32 0.01, %v20877_v10  ;;  %v20890_v47 = vmul.f32 0.01, %v20881_v63  ;;  %v4349_v62 = vmax.f32 %v4233_v48, %v4317_v6 }
 0x41a   : > { %v4581_v34 = vrot.slane %v4567_v33, %v20630_v3  ;;  %v4582_v14 = vcombine.high %v4574_v19, %v4574_v19  ;;  %v14944_v29 = vrot.slane %v4574_v19, 9  ;;  %4376 = vst [vmem:[%s20753_s26 + $0x48] sm:$0xff] %v4344_v16  ;;  %v4584_v13 = vcombine.high %v4344_v16, %v4344_v16 }
 0x41b   : > { %4378 = vst [vmem:[%s20753_s26 + $0x58] sm:$0xff] %v4346_v44  ;;  %v4618_v45 = vcombine.high %v4346_v44, %v4346_v44  ;;  %v4625_v55 = vrot.slane %v4346_v44, %v20630_v3  ;;  %v4591_v5 = vrot.slane %v4344_v16, %v20630_v3  ;;  %4381 = vst [vmem:[%s20753_s26 + $0x70] sm:$0xff] %v4349_v62 }
 0x41c   : > { %v4583_v50 = vcombine.high %v4581_v34, %v4581_v34  ;;  %v14945_v42 = vrot.slane %v4582_v14, 9  ;;  %v14946_v41 = vrot.slane %v4581_v34, 9  ;;  %v5311_v8 = vmax.f32 %v4574_v19, %v14944_v29 }
 0x41d   : > { %v4632_v52 = vrot.slane %v4618_v45, %v20630_v3  ;;  %v4633_v60 = vcombine.high %v4625_v55, %v4625_v55  ;;  %v15012_v15 = vrot.slane %v4625_v55, 9  ;;  %v4598_v40 = vrot.slane %v4584_v13, %v20630_v3 }
 0x41e   : > { %v14947_v32 = vrot.slane %v4583_v50, 9  ;;  %v5312_v57 = vmax.f32 %v4582_v14, %v14945_v42  ;;  %v5313_v18 = vmax.f32 %v4581_v34, %v14946_v41  ;;  %v5631_v23 = vmax.f32 %v5311_v8, %v20859_v54 }
 0x41f   : > { %v4634_v59 = vcombine.high %v4632_v52, %v4632_v52  ;;  %v15013_v24 = vrot.slane %v4633_v60, 9  ;;  %v15014_v48 = vrot.slane %v4632_v52, 9  ;;  %v5571_v35 = vmax.f32 %v4625_v55, %v15012_v15 }
 0x420   : > { %v5314_v38 = vmax.f32 %v4583_v50, %v14947_v32  ;;  %v5632_v0 = vmax.f32 %v5312_v57, %v20866_v12  ;;  %v5633_v17 = vmax.f32 %v5313_v18, %v20862_v1  ;;  %v5882_v33 = vrot.slane %v5631_v23, %v20635_v39  ;;  %v20904_v19 = vld [vmem:[#allocation2 + $0x47] sm:$0xff] }
 0x421   : > { %v20906_v6 = vld [vmem:[#allocation2 + $0x49] sm:$0xff]  ;;  %v15015_v44 = vrot.slane %v4634_v59, 9  ;;  %v5572_v16 = vmax.f32 %v4633_v60, %v15013_v24  ;;  %v5573_v54 = vmax.f32 %v4632_v52, %v15014_v48  ;;  %v4599_v34 = vcombine.high %v4591_v5, %v4591_v5  ;;  %7192 = vst [vmem:[#allocation2 + $0x40] sm:$0xff] %v20848_v61 }
 0x422   : > { %7194 = vst [vmem:[#allocation2 + $0x50] sm:$0xff] %v20848_v61  ;;  %v5634_v14 = vmax.f32 %v5314_v38, %v20869_v11  ;;  %v5886_v12 = vrot.slane %v5632_v0, %v20635_v39  ;;  %v5890_v1 = vrot.slane %v5633_v17, %v20635_v39  ;;  %v4600_v29 = vcombine.high %v4598_v40, %v4598_v40 }
 0x423   : > { %v5574_v45 = vmax.f32 %v4634_v59, %v15015_v44  ;;  %v14948_v55 = vrot.slane %v4591_v5, 9  ;;  %v14949_v13 = vrot.slane %v4599_v34, 9  ;;  %v14950_v50 = vrot.slane %v4598_v40, 9 }
 0x424   : > { %v5894_v42 = vrot.slane %v5634_v14, %v20635_v39  ;;  %v6092_v41 = vsel %vm6071_vm0, %v5886_v12, %v5882_v33  ;;  %v14951_v8 = vrot.slane %v4600_v29, 9  ;;  %v4669_v26 = vcombine.high %v4349_v62, %v4349_v62  ;;  %v4227_v33 = vpop.f32.mrf.mxu1 }
 0x425   : > { %v6093_v52 = vsel %vm6073_vm1, %v5890_v1, %v6092_v41  ;;  %v5315_v60 = vmax.f32 %v4591_v5, %v14948_v55  ;;  %v5316_v15 = vmax.f32 %v4599_v34, %v14949_v13  ;;  %v5317_v11 = vmax.f32 %v4598_v40, %v14950_v50 }
 0x426   : > { %v5318_v21 = vmax.f32 %v4600_v29, %v14951_v8  ;;  %v6094_v32 = vsel %vm6075_vm2, %v5894_v42, %v6093_v52  ;;  %v4676_v57 = vrot.slane %v4349_v62, %v20630_v3  ;;  %v4683_v18 = vrot.slane %v4669_v26, %v20630_v3  ;;  %v17639_v50 = vpop.f32.mrf.mxu1 }
 0x427   : > { %v5635_v23 = vmax.f32 %v5315_v60, %v5571_v35  ;;  %v5636_v59 = vmax.f32 %v5316_v15, %v5572_v16  ;;  %v5637_v24 = vmax.f32 %v5317_v11, %v5573_v54  ;;  %v4347_v48 = vmax.f32 %v20877_v10, %v20887_v31 }
 0x428   : > { %v5638_v38 = vmax.f32 %v5318_v21, %v5574_v45  ;;  %v4684_v0 = vcombine.high %v4676_v57, %v4676_v57  ;;  %v4685_v17 = vcombine.high %v4683_v18, %v4683_v18  ;;  %v15016_v5 = vrot.slane %v4676_v57, 9 }
 0x429   : > { %v5898_v40 = vrot.slane %v5635_v23, %v20635_v39  ;;  %v5902_v44 = vrot.slane %v5636_v59, %v20635_v39  ;;  %v5906_v34 = vrot.slane %v5637_v24, %v20635_v39  ;;  %v15018_v62 = vrot.slane %v4683_v18, 9  ;;  %4379 = vst [vmem:[%s20753_s26 + $0x60] sm:$0xff] %v4347_v48  ;;  %v4240_v24 = vpop.f32.mrf.mxu1 }
 0x42a   : > { %v5910_v35 = vrot.slane %v5638_v38, %v20635_v39  ;;  %v15017_v16 = vrot.slane %v4684_v0, 9  ;;  %v15019_v54 = vrot.slane %v4685_v17, 9  ;;  %v5575_v14 = vmax.f32 %v4676_v57, %v15016_v5 }
 0x42b   : > { %v6095_v10 = vsel %vm6077_vm3, %v5898_v40, %v6094_v32  ;;  %v5577_v31 = vmax.f32 %v4683_v18, %v15018_v62  ;;  %v4635_v12 = vcombine.high %v4347_v48, %v4347_v48  ;;  %v4642_v1 = vrot.slane %v4347_v48, %v20630_v3 }
 0x42c   : > { %v6096_v29 = vsel %vm6079_vm4, %v5902_v44, %v6095_v10  ;;  %v5576_v45 = vmax.f32 %v4684_v0, %v15017_v16  ;;  %v5578_v55 = vmax.f32 %v4685_v17, %v15019_v54  ;;  %v4350_v13 = vmax.f32 %v20881_v63, %v20890_v47 }
 0x42d   : > { %v6097_v42 = vsel %vm6081_vm5, %v5906_v34, %v6096_v29  ;;  %v4649_v41 = vrot.slane %v4635_v12, %v20630_v3  ;;  %v4650_v8 = vcombine.high %v4642_v1, %v4642_v1  ;;  %v14952_v26 = vrot.slane %v4642_v1, 9 }
 0x42e   : > { %v20934_v52 = vsel %vm6083_vm6, %v5910_v35, %v6097_v42  ;;  %4382 = vst [vmem:[%s20753_s26 + $0x78] sm:$0xff] %v4350_v13  ;;  %v4686_v60 = vcombine.high %v4350_v13, %v4350_v13  ;;  %v4693_v15 = vrot.slane %v4350_v13, %v20630_v3  ;;  %v4228_v11 = vadd.f32 %v4227_v33, %v20710_v27 }
 0x42f   : > { %6144 = vst [vmem:[#allocation2 + $0x68] sm:$0xff] %v20934_v52  ;;  %v4651_v21 = vcombine.high %v4649_v41, %v4649_v41  ;;  %v14953_v63 = vrot.slane %v4650_v8, 9  ;;  %v14954_v47 = vrot.slane %v4649_v41, 9  ;;  %v5319_v32 = vmax.f32 %v4642_v1, %v14952_v26  ;;  %v17640_v1 = vpop.f32.mrf.mxu1 }
 0x430   : > { %v4700_v57 = vrot.slane %v4686_v60, %v20630_v3  ;;  %v4701_v18 = vcombine.high %v4693_v15, %v4693_v15  ;;  %v15020_v23 = vrot.slane %v4693_v15, 9  ;;  %v4316_v59 = vmul.f32 0.01, %v4228_v11 }
 0x431   : > { %v14955_v48 = vrot.slane %v4651_v21, 9  ;;  %v5320_v38 = vmax.f32 %v4650_v8, %v14953_v63  ;;  %v5321_v0 = vmax.f32 %v4649_v41, %v14954_v47  ;;  %v5639_v17 = vmax.f32 %v5319_v32, %v5575_v14 }
 0x432   : > { %v4702_v5 = vcombine.high %v4700_v57, %v4700_v57  ;;  %v15021_v40 = vrot.slane %v4701_v18, 9  ;;  %v15022_v44 = vrot.slane %v4700_v57, 9  ;;  %v5579_v27 = vmax.f32 %v4693_v15, %v15020_v23 }
 0x433   : > { %v5322_v33 = vmax.f32 %v4651_v21, %v14955_v48  ;;  %v5640_v34 = vmax.f32 %v5320_v38, %v5576_v45  ;;  %v5641_v62 = vmax.f32 %v5321_v0, %v5577_v31  ;;  %v5914_v35 = vrot.slane %v5639_v17, %v20635_v39  ;;  %v4243_v48 = vpop.f32.mrf.mxu1 }
 0x434   : > { %v15023_v16 = vrot.slane %v4702_v5, 9  ;;  %v5580_v54 = vmax.f32 %v4701_v18, %v15021_v40  ;;  %v5581_v10 = vmax.f32 %v4700_v57, %v15022_v44  ;;  %v4348_v12 = vmax.f32 %v4228_v11, %v4316_v59 }
 0x435   : > { %v5642_v29 = vmax.f32 %v5322_v33, %v5578_v55  ;;  %v5918_v13 = vrot.slane %v5640_v34, %v20635_v39  ;;  %v5922_v14 = vrot.slane %v5641_v62, %v20635_v39  ;;  %v4249_v42 = vadd.f32 %v17639_v50, %v20734_v28 }
 0x436   : > { %v5582_v41 = vmax.f32 %v4702_v5, %v15023_v16  ;;  %4380 = vst [vmem:[%s20753_s26 + $0x68] sm:$0xff] %v4348_v12  ;;  %v4652_v8 = vcombine.high %v4348_v12, %v4348_v12  ;;  %v4659_v45 = vrot.slane %v4348_v12, %v20630_v3  ;;  %v4241_v31 = vadd.f32 %v4240_v24, %v20717_v46  ;;  %v20948_v26 = vld [vmem:[#allocation2 + $0x67] sm:$0xff] }
 0x437   : > { %v20950_v60 = vld [vmem:[#allocation2 + $0x69] sm:$0xff]  ;;  %v5926_v15 = vrot.slane %v5642_v29, %v20635_v39  ;;  %v6099_v55 = vsel %vm6071_vm0, %v5918_v13, %v5914_v35  ;;  %v4321_v11 = vmul.f32 0.01, %v4249_v42  ;;  %v4252_v21 = vadd.f32 %v17640_v1, %v20743_v7  ;;  %7196 = vst [vmem:[#allocation2 + $0x60] sm:$0xff] %v20848_v61 }
 0x438   : > { %7198 = vst [vmem:[#allocation2 + $0x70] sm:$0xff] %v20848_v61  ;;  %v6100_v28 = vsel %vm6073_vm1, %v5922_v14, %v6099_v55  ;;  %v4666_v46 = vrot.slane %v4652_v8, %v20630_v3  ;;  %v4667_v50 = vcombine.high %v4659_v45, %v4659_v45  ;;  %v14956_v63 = vrot.slane %v4659_v45, 9 }
 0x439   : > { %v6101_v47 = vsel %vm6075_vm2, %v5926_v15, %v6100_v28  ;;  %v4353_v32 = vmax.f32 %v4249_v42, %v4321_v11  ;;  %v4319_v57 = vmul.f32 0.01, %v4241_v31  ;;  %v4322_v18 = vmul.f32 0.01, %v4252_v21  ;;  %v20966_v42 = vpop.f32.mrf.mxu1 }
 0x43a   : > { %v4668_v23 = vcombine.high %v4666_v46, %v4666_v46  ;;  %v14957_v59 = vrot.slane %v4667_v50, 9  ;;  %v14958_v7 = vrot.slane %v4666_v46, 9  ;;  %v5323_v24 = vmax.f32 %v4659_v45, %v14956_v63 }
 0x43b   : > { %4385 = vst [vmem:[%s20753_s26 + $0x90] sm:$0xff] %v4353_v32  ;;  %v4737_v38 = vcombine.high %v4353_v32, %v4353_v32  ;;  %v4744_v0 = vrot.slane %v4353_v32, %v20630_v3  ;;  %v4351_v17 = vmax.f32 %v4241_v31, %v4319_v57  ;;  %v4354_v5 = vmax.f32 %v4252_v21, %v4322_v18  ;;  %v4256_v18 = vpop.f32.mrf.mxu1 }
 0x43c   : > { %v14959_v40 = vrot.slane %v4668_v23, 9  ;;  %v5324_v44 = vmax.f32 %v4667_v50, %v14957_v59  ;;  %v5325_v33 = vmax.f32 %v4666_v46, %v14958_v7  ;;  %v5643_v34 = vmax.f32 %v5323_v24, %v5579_v27 }
 0x43d   : > { %v4751_v62 = vrot.slane %v4737_v38, %v20630_v3  ;;  %v4752_v35 = vcombine.high %v4744_v0, %v4744_v0  ;;  %v15024_v16 = vrot.slane %v4744_v0, 9  ;;  %4383 = vst [vmem:[%s20753_s26 + $0x80] sm:$0xff] %v4351_v17  ;;  %v4703_v12 = vcombine.high %v4351_v17, %v4351_v17  ;;  %4386 = vst [vmem:[%s20753_s26 + $0x98] sm:$0xff] %v4354_v5 }
 0x43e   : > { %v5326_v1 = vmax.f32 %v4668_v23, %v14959_v40  ;;  %v5644_v29 = vmax.f32 %v5324_v44, %v5580_v54  ;;  %v5645_v13 = vmax.f32 %v5325_v33, %v5581_v10  ;;  %v5930_v14 = vrot.slane %v5643_v34, %v20635_v39 }
 0x43f   : > { %v4753_v8 = vcombine.high %v4751_v62, %v4751_v62  ;;  %v15025_v45 = vrot.slane %v4752_v35, 9  ;;  %v15026_v31 = vrot.slane %v4751_v62, 9  ;;  %v5583_v15 = vmax.f32 %v4744_v0, %v15024_v16 }
 0x440   : > { %v5646_v55 = vmax.f32 %v5326_v1, %v5582_v41  ;;  %v5934_v27 = vrot.slane %v5644_v29, %v20635_v39  ;;  %v5938_v11 = vrot.slane %v5645_v13, %v20635_v39  ;;  %v6102_v21 = vsel %vm6077_vm3, %v5930_v14, %v6101_v47  ;;  %v17644_v1 = vpop.f32.mrf.mxu1 }
 0x441   : > { %v15027_v28 = vrot.slane %v4753_v8, 9  ;;  %v5584_v46 = vmax.f32 %v4752_v35, %v15025_v45  ;;  %v5585_v50 = vmax.f32 %v4751_v62, %v15026_v31  ;;  %v4710_v54 = vrot.slane %v4351_v17, %v20630_v3  ;;  %v20980_v17 = vld [vmem:[#allocation2 + $0x127] sm:$0xff] }
 0x442   : > { %v5942_v10 = vrot.slane %v5646_v55, %v20635_v39  ;;  %v6103_v63 = vsel %vm6079_vm4, %v5934_v27, %v6102_v21  ;;  %v4717_v32 = vrot.slane %v4703_v12, %v20630_v3  ;;  %v4754_v57 = vcombine.high %v4354_v5, %v4354_v5  ;;  %7220 = vst [vmem:[#allocation2 + $0x120] sm:$0xff] %v20848_v61  ;;  %v20988_v27 = vld [vmem:[#allocation2 + $0x129] sm:$0xff] }
 0x443   : > { %v6104_v41 = vsel %vm6081_vm5, %v5938_v11, %v6103_v63  ;;  %v5586_v23 = vmax.f32 %v4753_v8, %v15027_v28  ;;  %v4718_v59 = vcombine.high %v4710_v54, %v4710_v54  ;;  %v14960_v7 = vrot.slane %v4710_v54, 9  ;;  %7221 = vst [vmem:[#allocation2 + $0x128] sm:$0xff] %v20848_v61  ;;  %7222 = vst [vmem:[#allocation2 + $0x130] sm:$0xff] %v20848_v61 }
 0x444   : > { %v20977_v47 = vsel %vm6083_vm6, %v5942_v10, %v6104_v41  ;;  %v4719_v24 = vcombine.high %v4717_v32, %v4717_v32  ;;  %v14962_v38 = vrot.slane %v4717_v32, 9  ;;  %v4761_v0 = vrot.slane %v4354_v5, %v20630_v3  ;;  %v4259_v10 = vpop.f32.mrf.mxu1 }
 0x445   : > { %6145 = vst [vmem:[#allocation2 + $0x88] sm:$0xff] %v20977_v47  ;;  %v14961_v40 = vrot.slane %v4718_v59, 9  ;;  %v5327_v44 = vmax.f32 %v4710_v54, %v14960_v7  ;;  %v4768_v33 = vrot.slane %v4754_v57, %v20630_v3  ;;  %v4244_v34 = vadd.f32 %v4243_v48, %v20726_v22  ;;  %v22224_v57 = vld [vmem:[#allocation13_spill] sm:$0xff] }
 0x446   : > { %v14963_v62 = vrot.slane %v4719_v24, 9  ;;  %v5329_v35 = vmax.f32 %v4717_v32, %v14962_v38  ;;  %v4769_v16 = vcombine.high %v4761_v0, %v4761_v0  ;;  %v15028_v12 = vrot.slane %v4761_v0, 9 }
 0x447   : > { %v5328_v29 = vmax.f32 %v4718_v59, %v14961_v40  ;;  %v5647_v13 = vmax.f32 %v5327_v44, %v5583_v15  ;;  %v4770_v5 = vcombine.high %v4768_v33, %v4768_v33  ;;  %v15030_v14 = vrot.slane %v4768_v33, 9  ;;  %v18034_v59 = vld [vmem:[#allocation3 + $0x5b8] sm:$0xff]   ;;  %v18035_v40 = vld [vmem:[#allocation3 + $0x5f0] sm:$0xff]  }
 0x448   : > { %v5330_v8 = vmax.f32 %v4719_v24, %v14963_v62  ;;  %v5649_v45 = vmax.f32 %v5329_v35, %v5585_v50  ;;  %v15029_v31 = vrot.slane %v4769_v16, 9  ;;  %v20986_v55 = vmax.f32 %v4761_v0, %v15028_v12 }
 0x449   : > { %v5648_v11 = vmax.f32 %v5328_v29, %v5584_v46  ;;  %v5946_v22 = vrot.slane %v5647_v13, %v20635_v39  ;;  %v15031_v48 = vrot.slane %v4770_v5, 9  ;;  %v20991_v21 = vmax.f32 %v4768_v33, %v15030_v14  ;;  %v18036_v13 = vld [vmem:[#allocation3 + $0x5b0] sm:$0xff]  }
 0x44a   : > { %v5650_v15 = vmax.f32 %v5330_v8, %v5586_v23  ;;  %v5954_v28 = vrot.slane %v5649_v45, %v20635_v39  ;;  %v20996_v54 = vmax.f32 %v4769_v16, %v15029_v31  ;;  %v4320_v50 = vmul.f32 0.01, %v4244_v34  ;;  %v22225_v31 = vld [vmem:[#allocation14_spill] sm:$0xff] }
 0x44b   : > { %v5950_v63 = vrot.slane %v5648_v11, %v20635_v39  ;;  %v20999_v32 = vmax.f32 %v4770_v5, %v15031_v48  ;;  %v6223_v46 = vpack.c.bf16 %v20827_v37, %v20848_v61  ;;  %v6222_v41 = vpack.c.bf16 %v20843_v9, %v22224_v57  ;;  %v18040_v5 = vld [vmem:[#allocation3 + $0x638] sm:$0xff]   ;;  %v18042_v48 = vld [vmem:[#allocation3 + $0x670] sm:$0xff]  }
 0x44c   : > { %v5958_v23 = vrot.slane %v5650_v15, %v20635_v39  ;;  %v4352_v7 = vmax.f32 %v4244_v34, %v4320_v50  ;;  %v4265_v24 = vadd.f32 %v20966_v42, %v20756_v49  ;;  %v4257_v38 = vadd.f32 %v4256_v18, %v20746_v58  ;;  %v21009_v0 = vld [vmem:[#allocation2 + $0x87] sm:$0xff] }
 0x44d   : > { %v21011_v44 = vld [vmem:[#allocation2 + $0x89] sm:$0xff]  ;;  %v6106_v37 = vsel %vm6071_vm0, %v5950_v63, %v5946_v22  ;;  %6875 = vmatprep.mubr.bf16.mxu0 %v6223_v46  ;;  %v4268_v33 = vadd.f32 %v17644_v1, %v20759_v30  ;;  %v4260_v62 = vadd.f32 %v4259_v10, %v20762_v36  ;;  %v6225_v34 = vpack.c.bf16 %v20904_v19, %v20843_v9 }
 0x44e   : > { %7200 = vst [vmem:[#allocation2 + $0x80] sm:$0xff] %v20848_v61  ;;  %7202 = vst [vmem:[#allocation2 + $0x90] sm:$0xff] %v20848_v61  ;;  %v6107_v58 = vsel %vm6073_vm1, %v5954_v28, %v6106_v37  ;;  %v4720_v49 = vcombine.high %v4352_v7, %v4352_v7  ;;  %v4727_v42 = vrot.slane %v4352_v7, %v20630_v3  ;;  %6876 = vmatmul.mubr.bf16.vlgmr.msra.gmra.mxu0 %v6222_v41  ;;  %v18037_v22 = vld [vmem:[#allocation3 + $0x5e8] sm:$0xff]  }
 0x44f   : > { %4384 = vst [vmem:[%s20753_s26 + $0x88] sm:$0xff] %v4352_v7  ;;  %v4325_v18 = vmul.f32 0.01, %v4265_v24  ;;  %v6108_v35 = vsel %vm6075_vm2, %v5958_v23, %v6107_v58  ;;  %v4323_v30 = vmul.f32 0.01, %v4257_v38  ;;  %6940 = vmatprep.mubr.bf16.mxu1 %v6225_v34  ;;  %16712 = vmatpush3.bf16.msra.mxu0 %v18034_v59  ;;  %v6224_v11 = vpack.c.bf16 %v20845_v25, %v22225_v31  ;;  %v18041_v34 = vld [vmem:[#allocation3 + $0x5e0] sm:$0xff]  }
 0x450   : > { %v4326_v16 = vmul.f32 0.01, %v4268_v33  ;;  %v4324_v36 = vmul.f32 0.01, %v4260_v62  ;;  %v4734_v9 = vrot.slane %v4720_v49, %v20630_v3  ;;  %v4735_v12 = vcombine.high %v4727_v42, %v4727_v42  ;;  %16713 = vmatprep.subr.bf16.mxu0 %v18035_v40  ;;  %v18044_v58 = vld [vmem:[#allocation3 + $0x630] sm:$0xff]  }
 0x451   : > { %v14964_v1 = vrot.slane %v4727_v42, 9  ;;  %v4357_v29 = vmax.f32 %v4265_v24, %v4325_v18  ;;  %v4355_v14 = vmax.f32 %v4257_v38, %v4323_v30  ;;  %6941 = vmatmul.mubr.bf16.vlgmr.msra.gmra.mxu1 %v6224_v11  ;;  %v18039_v38 = vld [vmem:[#allocation3 + $0x5a8] sm:$0xff]  }
 0x452   : > { %v21025_v8 = vmax.f32 %v4268_v33, %v4326_v16  ;;  %v21027_v45 = vmax.f32 %v4260_v62, %v4324_v36  ;;  %v4736_v15 = vcombine.high %v4734_v9, %v4734_v9  ;;  %v14965_v28 = vrot.slane %v4735_v12, 9  ;;  %16752 = vmatpush3.bf16.msra.mxu1 %v18040_v5  ;;  %v18046_v30 = vld [vmem:[#allocation3 + $0x668] sm:$0xff]  }
 0x453   : > { %v14966_v50 = vrot.slane %v4734_v9, 9  ;;  %v5331_v10 = vmax.f32 %v4727_v42, %v14964_v1  ;;  %4389 = vst [vmem:[%s20753_s26 + $0xb0] sm:$0xff] %v4357_v29  ;;  %v4805_v63 = vcombine.high %v4357_v29, %v4357_v29  ;;  %v4812_v46 = vrot.slane %v4357_v29, %v20630_v3  ;;  %4387 = vst [vmem:[%s20753_s26 + $0xa0] sm:$0xff] %v4355_v14 }
 0x454   : > { %v4771_v57 = vcombine.high %v4355_v14, %v4355_v14  ;;  %v4778_v41 = vrot.slane %v4355_v14, %v20630_v3  ;;  %4390 = vst [vmem:[%s20753_s26 + $0xb8] sm:$0xff] %v21025_v8  ;;  %4388 = vst [vmem:[%s20753_s26 + $0xa8] sm:$0xff] %v21027_v45  ;;  %v14967_v59 = vrot.slane %v4736_v15, 9  ;;  %v5332_v23 = vmax.f32 %v4735_v12, %v14965_v28  ;;  %v21049_v14 = vpop.f32.mrf.mxu1 }
 0x455   : > { %v5333_v7 = vmax.f32 %v4734_v9, %v14966_v50  ;;  %v5651_v24 = vmax.f32 %v5331_v10, %v20986_v55  ;;  %16714 = vmatpush3.bf16.msra.mxu0 %v18036_v13  ;;  %v4819_v40 = vrot.slane %v4805_v63, %v20630_v3  ;;  %v4820_v37 = vcombine.high %v4812_v46, %v4812_v46  ;;  %v18048_v10 = vld [vmem:[#allocation3 + $0x628] sm:$0xff]  }
 0x456   : > { %v15032_v33 = vrot.slane %v4812_v46, 9  ;;  %v4785_v62 = vrot.slane %v4771_v57, %v20630_v3  ;;  %16715 = vmatprep.subr.bf16.mxu0 %v18037_v22  ;;  %16753 = vmatprep.subr.bf16.mxu1 %v18042_v48  ;;  %v5334_v49 = vmax.f32 %v4736_v15, %v14967_v59  ;;  %v5652_v42 = vmax.f32 %v5332_v23, %v20996_v54  ;;  %v18043_v54 = vld [vmem:[#allocation3 + $0x5a0] sm:$0xff]   ;;  %v18045_v48 = vld [vmem:[#allocation3 + $0x5d8] sm:$0xff]  }
 0x457   : > { %v5653_v18 = vmax.f32 %v5333_v7, %v20991_v21  ;;  %v5962_v55 = vrot.slane %v5651_v24, %v20635_v39  ;;  %v4821_v16 = vcombine.high %v4819_v40, %v4819_v40  ;;  %v15033_v36 = vrot.slane %v4820_v37, 9  ;;  %16754 = vmatpush3.bf16.msra.mxu1 %v18044_v58  ;;  %v18050_v59 = vld [vmem:[#allocation3 + $0x660] sm:$0xff]  }
 0x458   : > { %v15034_v9 = vrot.slane %v4819_v40, 9  ;;  %v5591_v12 = vmax.f32 %v4812_v46, %v15032_v33  ;;  %v5654_v1 = vmax.f32 %v5334_v49, %v20999_v32  ;;  %v5966_v29 = vrot.slane %v5652_v42, %v20635_v39  ;;  %16755 = vmatprep.subr.bf16.mxu1 %v18046_v30  ;;  %v18049_v42 = vld [vmem:[#allocation3 + $0x5d0] sm:$0xff]  }
 0x459   : > { %v5970_v13 = vrot.slane %v5653_v18, %v20635_v39  ;;  %v6109_v5 = vsel %vm6077_vm3, %v5962_v55, %v6108_v35  ;;  %16716 = vmatpush3.bf16.msra.mxu0 %v18039_v38  ;;  %v15035_v21 = vrot.slane %v4821_v16, 9  ;;  %v5592_v31 = vmax.f32 %v4820_v37, %v15033_v36  ;;  %v18047_v37 = vld [vmem:[#allocation3 + $0x598] sm:$0xff]  }
 0x45a   : > { %v5593_v11 = vmax.f32 %v4819_v40, %v15034_v9  ;;  %v4786_v22 = vcombine.high %v4778_v41, %v4778_v41  ;;  %16717 = vmatprep.subr.bf16.mxu0 %v18041_v34  ;;  %v5974_v15 = vrot.slane %v5654_v1, %v20635_v39  ;;  %v6110_v32 = vsel %vm6079_vm4, %v5966_v29, %v6109_v5  ;;  %v21059_v40 = vpop.f32.mrf.mxu1 }
 0x45b   : > { %v4787_v28 = vcombine.high %v4785_v62, %v4785_v62  ;;  %v14968_v50 = vrot.slane %v4778_v41, 9  ;;  %v6111_v35 = vsel %vm6081_vm5, %v5970_v13, %v6110_v32  ;;  %v5594_v63 = vmax.f32 %v4821_v16, %v15035_v21  ;;  %16756 = vmatpush3.bf16.msra.mxu1 %v18048_v10  ;;  %v18052_v16 = vld [vmem:[#allocation3 + $0x620] sm:$0xff]   ;;  %v18056_v10 = vld [vmem:[#allocation3 + $0x618] sm:$0xff]  }
 0x45c   : > { %v14969_v46 = vrot.slane %v4786_v22, 9  ;;  %v14970_v57 = vrot.slane %v4785_v62, 9  ;;  %v21055_v23 = vsel %vm6083_vm6, %v5974_v15, %v6111_v35  ;;  %v4822_v38 = vcombine.high %v21025_v8, %v21025_v8  ;;  %16757 = vmatprep.subr.bf16.mxu1 %v18050_v59  ;;  %v17648_v21 = vpop.f32.mrf.mxu1  ;;  %v18058_v59 = vld [vmem:[#allocation3 + $0x650] sm:$0xff]  }
 0x45d   : > { %v14971_v7 = vrot.slane %v4787_v28, 9  ;;  %v5335_v24 = vmax.f32 %v4778_v41, %v14968_v50  ;;  %16718 = vmatpush3.bf16.msra.mxu0 %v18043_v54  ;;  %6146 = vst [vmem:[#allocation2 + $0xa8] sm:$0xff] %v21055_v23  ;;  %v4829_v58 = vrot.slane %v21025_v8, %v20630_v3  ;;  %v4788_v49 = vcombine.high %v21027_v45, %v21027_v45  ;;  %v18054_v8 = vld [vmem:[#allocation3 + $0x658] sm:$0xff]  }
 0x45e   : > { %v5336_v33 = vmax.f32 %v4786_v22, %v14969_v46  ;;  %v5337_v34 = vmax.f32 %v4785_v62, %v14970_v57  ;;  %16719 = vmatprep.subr.bf16.mxu0 %v18045_v48  ;;  %v4836_v55 = vrot.slane %v4822_v38, %v20630_v3  ;;  %v4795_v30 = vrot.slane %v21027_v45, %v20630_v3 }
 0x45f   : > { %v5338_v41 = vmax.f32 %v4787_v28, %v14971_v7  ;;  %v5655_v18 = vmax.f32 %v5335_v24, %v5591_v12  ;;  %v4837_v62 = vcombine.high %v4829_v58, %v4829_v58  ;;  %v15036_v1 = vrot.slane %v4829_v58, 9  ;;  %v18051_v12 = vld [vmem:[#allocation3 + $0x590] sm:$0xff]   ;;  %16758 = vmatpush3.bf16.msra.mxu1 %v18052_v16  ;;  %v18057_v16 = vld [vmem:[#allocation3 + $0x5c0] sm:$0xff]  }
 0x460   : > { %v5656_v36 = vmax.f32 %v5336_v33, %v5592_v31  ;;  %v5657_v9 = vmax.f32 %v5337_v34, %v5593_v11  ;;  %v4838_v5 = vcombine.high %v4836_v55, %v4836_v55  ;;  %v15038_v54 = vrot.slane %v4836_v55, 9  ;;  %v18053_v31 = vld [vmem:[#allocation3 + $0x5c8] sm:$0xff]   ;;  %16759 = vmatprep.subr.bf16.mxu1 %v18054_v8  ;;  %v4275_v33 = vpop.f32.mrf.mxu1 }
 0x461   : > { %v5658_v29 = vmax.f32 %v5338_v41, %v5594_v63  ;;  %v5978_v13 = vrot.slane %v5655_v18, %v20635_v39  ;;  %16720 = vmatpush3.bf16.msra.mxu0 %v18047_v37  ;;  %v15037_v48 = vrot.slane %v4837_v62, 9  ;;  %v5595_v15 = vmax.f32 %v4829_v58, %v15036_v1 }
 0x462   : > { %v5982_v22 = vrot.slane %v5656_v36, %v20635_v39  ;;  %v5986_v45 = vrot.slane %v5657_v9, %v20635_v39  ;;  %16721 = vmatprep.subr.bf16.mxu0 %v18049_v42  ;;  %v15039_v32 = vrot.slane %v4838_v5, 9  ;;  %v5597_v28 = vmax.f32 %v4836_v55, %v15038_v54 }
 0x463   : > { %v5990_v11 = vrot.slane %v5658_v29, %v20635_v39  ;;  %v4802_v50 = vrot.slane %v4788_v49, %v20630_v3  ;;  %v5596_v63 = vmax.f32 %v4837_v62, %v15037_v48  ;;  %v4803_v46 = vcombine.high %v4795_v30, %v4795_v30  ;;  %v18055_v49 = vld [vmem:[#allocation3 + $0x588] sm:$0xff]   ;;  %16760 = vmatpush3.bf16.msra.mxu1 %v18056_v10 }
 0x464   : > { %v6113_v35 = vsel %vm6071_vm0, %v5982_v22, %v5978_v13  ;;  %v14972_v57 = vrot.slane %v4795_v30, 9  ;;  %v5598_v24 = vmax.f32 %v4838_v5, %v15039_v32  ;;  %v21076_v34 = vld [vmem:[#allocation2 + $0xa7] sm:$0xff]  ;;  %v4281_v55 = vadd.f32 %v21049_v14, %v20769_v43  ;;  %16761 = vmatprep.subr.bf16.mxu1 %v18058_v59 }
 0x465   : > { %v6114_v7 = vsel %vm6073_vm1, %v5986_v45, %v6113_v35  ;;  %v4804_v38 = vcombine.high %v4802_v50, %v4802_v50  ;;  %v14974_v37 = vrot.slane %v4802_v50, 9  ;;  %v21078_v58 = vld [vmem:[#allocation2 + $0xa9] sm:$0xff]  ;;  %16722 = vmatpush3.bf16.msra.mxu0 %v18051_v12  ;;  %v14973_v42 = vrot.slane %v4803_v46, 9  ;;  %7204 = vst [vmem:[#allocation2 + $0xa0] sm:$0xff] %v20848_v61  ;;  %v18059_v22 = vld [vmem:[#allocation3 + $0x580] sm:$0xff]   ;;  %v21093_v45 = vld [vmem:[#allocation3 + $0x6b8] sm:$0xff]  }
 0x466   : > { %v5339_v41 = vmax.f32 %v4795_v30, %v14972_v57  ;;  %v6115_v18 = vsel %vm6075_vm2, %v5990_v11, %v6114_v7  ;;  %16723 = vmatprep.subr.bf16.mxu0 %v18053_v31  ;;  %7206 = vst [vmem:[#allocation2 + $0xb0] sm:$0xff] %v20848_v61  ;;  %v4273_v62 = vadd.f32 %v21059_v40, %v20766_v51  ;;  %v18060_v30 = vld [vmem:[#allocation3 + $0x610] sm:$0xff]   ;;  %v4329_v13 = vmul.f32 0.01, %v4281_v55  ;;  %v18061_v14 = vld [vmem:[#allocation3 + $0x648] sm:$0xff]   ;;  %v18064_v35 = vld [vmem:[#allocation3 + $0x640] sm:$0xff]  }
 0x467   : > { %v14975_v36 = vrot.slane %v4804_v38, 9  ;;  %v5341_v9 = vmax.f32 %v4802_v50, %v14974_v37  ;;  %v4284_v1 = vadd.f32 %v17648_v21, %v20772_v4  ;;  %v5340_v8 = vmax.f32 %v4803_v46, %v14973_v42  ;;  %16762 = vmatpush3.bf16.msra.mxu1 %v18060_v30  ;;  %v18063_v11 = vld [vmem:[#allocation3 + $0x608] sm:$0xff]  }
 0x468   : > { %v5659_v29 = vmax.f32 %v5339_v41, %v5595_v15  ;;  %v21089_v43 = vadd.f32 %v4275_v33, %v20775_v2  ;;  %v4327_v61 = vmul.f32 0.01, %v4273_v62  ;;  %v4361_v40 = vmax.f32 %v4281_v55, %v4329_v13  ;;  %16763 = vmatprep.subr.bf16.mxu1 %v18061_v14 }
 0x469   : > { %v5342_v5 = vmax.f32 %v4804_v38, %v14975_v36  ;;  %v5661_v54 = vmax.f32 %v5341_v9, %v5597_v28  ;;  %v4330_v12 = vmul.f32 0.01, %v4284_v1  ;;  %16724 = vmatpush3.bf16.msra.mxu0 %v18055_v49  ;;  %v5660_v51 = vmax.f32 %v5340_v8, %v5596_v63 }
 0x46a   : > { %v5994_v4 = vrot.slane %v5659_v29, %v20635_v39  ;;  %v4328_v21 = vmul.f32 0.01, %v21089_v43  ;;  %16725 = vmatprep.subr.bf16.mxu0 %v18057_v16  ;;  %v4359_v15 = vmax.f32 %v4273_v62, %v4327_v61  ;;  %4393 = vst [vmem:[%s20753_s26 + $0xd0] sm:$0xff] %v4361_v40  ;;  %v4873_v50 = vcombine.high %v4361_v40, %v4361_v40  ;;  %v17651_v62 = vpop.f32.mrf.mxu1 }
 0x46b   : > { %v5662_v2 = vmax.f32 %v5342_v5, %v5598_v24  ;;  %v6002_v48 = vrot.slane %v5661_v54, %v20635_v39  ;;  %v4362_v31 = vmax.f32 %v4284_v1, %v4330_v12  ;;  %v5998_v32 = vrot.slane %v5660_v51, %v20635_v39  ;;  %16764 = vmatpush3.bf16.msra.mxu1 %v18063_v11 }
 0x46c   : > { %v6116_v28 = vsel %vm6077_vm3, %v5994_v4, %v6115_v18  ;;  %v4880_v10 = vrot.slane %v4361_v40, %v20630_v3  ;;  %4391 = vst [vmem:[%s20753_s26 + $0xc0] sm:$0xff] %v4359_v15  ;;  %v4839_v46 = vcombine.high %v4359_v15, %v4359_v15  ;;  %v4846_v57 = vrot.slane %v4359_v15, %v20630_v3  ;;  %v18066_v18 = vld [vmem:[#allocation3 + $0x600] sm:$0xff]   ;;  %v4288_v15 = vpop.f32.mrf.mxu1 }
 0x46d   : > { %v6006_v63 = vrot.slane %v5662_v2, %v20635_v39  ;;  %4394 = vst [vmem:[%s20753_s26 + $0xd8] sm:$0xff] %v4362_v31  ;;  %v4890_v59 = vcombine.high %v4362_v31, %v4362_v31  ;;  %16726 = vmatpush3.bf16.msra.mxu0 %v18059_v22  ;;  %v6117_v7 = vsel %vm6079_vm4, %v5998_v32, %v6116_v28 }
 0x46e   : > { %v4887_v24 = vrot.slane %v4873_v50, %v20630_v3  ;;  %v4888_v38 = vcombine.high %v4880_v10, %v4880_v10  ;;  %v15040_v37 = vrot.slane %v4880_v10, 9  ;;  %17653 = vmatprep.subr.bf16.mxu0 %v21093_v45  ;;  %v6118_v33 = vsel %vm6081_vm5, %v6002_v48, %v6117_v7  ;;  %16765 = vmatprep.subr.bf16.mxu1 %v18064_v35 }
 0x46f   : > { %v4853_v49 = vrot.slane %v4839_v46, %v20630_v3  ;;  %v4854_v42 = vcombine.high %v4846_v57, %v4846_v57  ;;  %v14976_v41 = vrot.slane %v4846_v57, 9  ;;  %v21110_v55 = vsel %vm6083_vm6, %v6006_v63, %v6118_v33  ;;  %16766 = vmatpush3.bf16.msra.mxu1 %v18066_v18  ;;  %v17652_v33 = vpop.f32.mrf.mxu1 }
 0x470   : > { %v4889_v16 = vcombine.high %v4887_v24, %v4887_v24  ;;  %v15041_v36 = vrot.slane %v4888_v38, 9  ;;  %v15042_v9 = vrot.slane %v4887_v24, 9  ;;  %6147 = vst [vmem:[#allocation2 + $0xc8] sm:$0xff] %v21110_v55  ;;  %v5599_v1 = vmax.f32 %v4880_v10, %v15040_v37 }
 0x471   : > { %v4855_v30 = vcombine.high %v4853_v49, %v4853_v49  ;;  %v14977_v8 = vrot.slane %v4854_v42, 9  ;;  %v14978_v29 = vrot.slane %v4853_v49, 9  ;;  %v5343_v54 = vmax.f32 %v4846_v57, %v14976_v41 }
 0x472   : > { %v15043_v13 = vrot.slane %v4889_v16, 9  ;;  %v5600_v14 = vmax.f32 %v4888_v38, %v15041_v36  ;;  %v5601_v5 = vmax.f32 %v4887_v24, %v15042_v9  ;;  %v4897_v51 = vrot.slane %v4362_v31, %v20630_v3  ;;  %v21129_v9 = vld [vmem:[#allocation2 + $0x18] sm:$0xff] }
 0x473   : > { %v14979_v61 = vrot.slane %v4855_v30, 9  ;;  %v5344_v12 = vmax.f32 %v4854_v42, %v14977_v8  ;;  %v5345_v22 = vmax.f32 %v4853_v49, %v14978_v29  ;;  %v5663_v40 = vmax.f32 %v5343_v54, %v5599_v1  ;;  %22226 = vst [vmem:[#allocation39_spill] sm:$0xff] %v21129_v9 }
 0x474   : > { %v5602_v4 = vmax.f32 %v4889_v16, %v15043_v13  ;;  %v4904_v2 = vrot.slane %v4890_v59, %v20630_v3  ;;  %v4360_v48 = vmax.f32 %v21089_v43, %v4328_v21  ;;  %v4905_v50 = vcombine.high %v4897_v51, %v4897_v51  ;;  %v21120_v59 = vld [vmem:[#allocation2 + $0x48] sm:$0xff] }
 0x475   : > { %v5346_v11 = vmax.f32 %v4855_v30, %v14979_v61  ;;  %v5664_v32 = vmax.f32 %v5344_v12, %v5600_v14  ;;  %v5665_v28 = vmax.f32 %v5345_v22, %v5601_v5  ;;  %v6010_v10 = vrot.slane %v5663_v40, %v20635_v39 }
 0x476   : > { %v4906_v35 = vcombine.high %v4904_v2, %v4904_v2  ;;  %v15044_v63 = vrot.slane %v4897_v51, 9  ;;  %v15046_v46 = vrot.slane %v4904_v2, 9  ;;  %4392 = vst [vmem:[%s20753_s26 + $0xc8] sm:$0xff] %v4360_v48  ;;  %v15045_v24 = vrot.slane %v4905_v50, 9 }
 0x477   : > { %v5666_v57 = vmax.f32 %v5346_v11, %v5602_v4  ;;  %v6014_v31 = vrot.slane %v5664_v32, %v20635_v39  ;;  %v6018_v7 = vrot.slane %v5665_v28, %v20635_v39  ;;  %v4856_v37 = vcombine.high %v4360_v48, %v4360_v48  ;;  %v21122_v49 = vld [vmem:[#allocation2 + $0xc7] sm:$0xff]  ;;  %v4291_v4 = vpop.f32.mrf.mxu1  ;;  %v22229_v32 = vld [vmem:[#allocation26_spill] sm:$0xff] }
 0x478   : > { %v15047_v43 = vrot.slane %v4906_v35, 9  ;;  %v5603_v21 = vmax.f32 %v4897_v51, %v15044_v63  ;;  %v5605_v38 = vmax.f32 %v4904_v2, %v15046_v46  ;;  %v21124_v42 = vld [vmem:[#allocation2 + $0xc9] sm:$0xff]  ;;  %v5604_v16 = vmax.f32 %v4905_v50, %v15045_v24  ;;  %7208 = vst [vmem:[#allocation2 + $0xc0] sm:$0xff] %v21129_v9 }
 0x479   : > { %v6022_v41 = vrot.slane %v5666_v57, %v20635_v39  ;;  %v6120_v18 = vsel %vm6071_vm0, %v6014_v31, %v6010_v10  ;;  %v4863_v36 = vrot.slane %v4360_v48, %v20630_v3  ;;  %7210 = vst [vmem:[#allocation2 + $0xd0] sm:$0xff] %v21129_v9  ;;  %v4870_v8 = vrot.slane %v4856_v37, %v20630_v3  ;;  %v22228_v11 = vld [vmem:[#allocation48_spill] sm:$0xff] }
 0x47a   : > { %v6121_v1 = vsel %vm6073_vm1, %v6018_v7, %v6120_v18  ;;  %v5606_v30 = vmax.f32 %v4906_v35, %v15047_v43  ;;  %v6232_v29 = vpack.c.bf16 %v20934_v52, %v21120_v59  ;;  %v21140_v54 = vpack.c.bf16 %v20948_v26, %v20904_v19  ;;  %v22227_v52 = vld [vmem:[#allocation37_spill] sm:$0xff] }
 0x47b   : > { %v4871_v13 = vcombine.high %v4863_v36, %v4863_v36  ;;  %v14980_v14 = vrot.slane %v4863_v36, 9  ;;  %v6122_v5 = vsel %vm6075_vm2, %v6022_v41, %v6121_v1  ;;  %v4872_v61 = vcombine.high %v4870_v8, %v4870_v8 }
 0x47c   : > { %v14982_v12 = vrot.slane %v4870_v8, 9  ;;  %6883 = vmatprep.mubr.bf16.mxu0 %v6232_v29  ;;  %v4297_v22 = vadd.f32 %v17651_v62, %v20787_v56  ;;  %v4289_v51 = vadd.f32 %v4288_v15, %v20778_v53  ;;  %v4139_v48 = vadd.f32 %v22227_v52, %v20731_v20 }
 0x47d   : > { %v14981_v40 = vrot.slane %v4871_v13, 9  ;;  %v5347_v2 = vmax.f32 %v4863_v36, %v14980_v14  ;;  %6884 = vmatmul.mubr.bf16.gmra.mxu0 %v21140_v54  ;;  %v4131_v28 = vadd.f32 %v22229_v32, %v22228_v11  ;;  %v14983_v19 = vrot.slane %v4872_v61, 9 }
 0x47e   : > { %v5349_v50 = vmax.f32 %v4870_v8, %v14982_v12  ;;  %v4333_v10 = vmul.f32 0.01, %v4297_v22  ;;  %v4331_v35 = vmul.f32 0.01, %v4289_v51  ;;  %v4300_v53 = vadd.f32 %v17652_v33, %v4139_v48 }
 0x47f   : > { %v5348_v63 = vmax.f32 %v4871_v13, %v14981_v40  ;;  %v5667_v56 = vmax.f32 %v5347_v2, %v5603_v21  ;;  %v4292_v62 = vadd.f32 %v4291_v4, %v4131_v28  ;;  %v5350_v15 = vmax.f32 %v4872_v61, %v14983_v19 }
 0x480   : > { %v5669_v46 = vmax.f32 %v5349_v50, %v5605_v38  ;;  %v4365_v57 = vmax.f32 %v4297_v22, %v4333_v10  ;;  %v4363_v31 = vmax.f32 %v4289_v51, %v4331_v35  ;;  %v4334_v24 = vmul.f32 0.01, %v4300_v53 }
 0x481   : > { %v5668_v7 = vmax.f32 %v5348_v63, %v5604_v16  ;;  %v6026_v20 = vrot.slane %v5667_v56, %v20635_v39  ;;  %v4332_v43 = vmul.f32 0.01, %v4292_v62  ;;  %v5670_v37 = vmax.f32 %v5350_v15, %v5606_v30 }
 0x482   : > { %v6034_v41 = vrot.slane %v5669_v46, %v20635_v39  ;;  %4397 = vst [vmem:[%s20753_s26 + $0xf0] sm:$0xff] %v4365_v57  ;;  %v4941_v18 = vcombine.high %v4365_v57, %v4365_v57  ;;  %v4948_v36 = vrot.slane %v4365_v57, %v20630_v3  ;;  %4395 = vst [vmem:[%s20753_s26 + $0xe0] sm:$0xff] %v4363_v31 }
 0x483   : > { %v6030_v21 = vrot.slane %v5668_v7, %v20635_v39  ;;  %v6123_v33 = vsel %vm6077_vm3, %v6026_v20, %v6122_v5  ;;  %v4907_v38 = vcombine.high %v4363_v31, %v4363_v31  ;;  %v4914_v1 = vrot.slane %v4363_v31, %v20630_v3 }
 0x484   : > { %v6038_v16 = vrot.slane %v5670_v37, %v20635_v39  ;;  %v4955_v8 = vrot.slane %v4941_v18, %v20630_v3  ;;  %v4956_v29 = vcombine.high %v4948_v36, %v4948_v36  ;;  %v15048_v30 = vrot.slane %v4948_v36, 9 }
 0x485   : > { %v6124_v13 = vsel %vm6079_vm4, %v6030_v21, %v6123_v33  ;;  %v4921_v14 = vrot.slane %v4907_v38, %v20630_v3  ;;  %v4922_v61 = vcombine.high %v4914_v1, %v4914_v1  ;;  %v14984_v12 = vrot.slane %v4914_v1, 9 }
 0x486   : > { %v6125_v22 = vsel %vm6081_vm5, %v6034_v41, %v6124_v13  ;;  %v4957_v51 = vcombine.high %v4955_v8, %v4955_v8  ;;  %v15049_v4 = vrot.slane %v4956_v29, 9  ;;  %v15050_v5 = vrot.slane %v4955_v8, 9 }
 0x487   : > { %v21163_v40 = vsel %vm6083_vm6, %v6038_v16, %v6125_v22  ;;  %v5607_v2 = vmax.f32 %v4948_v36, %v15048_v30  ;;  %v4923_v52 = vcombine.high %v4921_v14, %v4921_v14  ;;  %v14985_v48 = vrot.slane %v4922_v61, 9 }
 0x488   : > { %6148 = vst [vmem:[#allocation2 + $0xe8] sm:$0xff] %v21163_v40  ;;  %v15051_v11 = vrot.slane %v4957_v51, 9  ;;  %v5608_v32 = vmax.f32 %v4956_v29, %v15049_v4  ;;  %v5609_v28 = vmax.f32 %v4955_v8, %v15050_v5  ;;  %v14986_v19 = vrot.slane %v4921_v14, 9 }
 0x489   : > { %v14987_v50 = vrot.slane %v4923_v52, 9  ;;  %v5351_v10 = vmax.f32 %v4914_v1, %v14984_v12  ;;  %v5352_v35 = vmax.f32 %v4922_v61, %v14985_v48  ;;  %v4366_v63 = vmax.f32 %v4300_v53, %v4334_v24 }
 0x48a   : > { %v5610_v56 = vmax.f32 %v4957_v51, %v15051_v11  ;;  %v5353_v15 = vmax.f32 %v4921_v14, %v14986_v19  ;;  %v4364_v46 = vmax.f32 %v4292_v62, %v4332_v43  ;;  %v6234_v57 = vpack.c.bf16 %v21009_v0, %v20948_v26 }
 0x48b   : > { %v5354_v31 = vmax.f32 %v4923_v52, %v14987_v50  ;;  %v5671_v7 = vmax.f32 %v5351_v10, %v5607_v2  ;;  %v5672_v20 = vmax.f32 %v5352_v35, %v5608_v32  ;;  %4398 = vst [vmem:[%s20753_s26 + $0xf8] sm:$0xff] %v4366_v63  ;;  %v4958_v37 = vcombine.high %v4366_v63, %v4366_v63 }
 0x48c   : > { %v5673_v41 = vmax.f32 %v5353_v15, %v5609_v28  ;;  %v4965_v18 = vrot.slane %v4366_v63, %v20630_v3  ;;  %4396 = vst [vmem:[%s20753_s26 + $0xe8] sm:$0xff] %v4364_v46  ;;  %v4924_v36 = vcombine.high %v4364_v46, %v4364_v46  ;;  %v4931_v21 = vrot.slane %v4364_v46, %v20630_v3 }
 0x48d   : > { %6948 = vmatprep.mubr.bf16.mxu1 %v6234_v57  ;;  %v5674_v53 = vmax.f32 %v5354_v31, %v5610_v56  ;;  %v6042_v24 = vrot.slane %v5671_v7, %v20635_v39  ;;  %v6046_v62 = vrot.slane %v5672_v20, %v20635_v39  ;;  %v4972_v26 = vrot.slane %v4958_v37, %v20630_v3 }
 0x48e   : > { %v6050_v43 = vrot.slane %v5673_v41, %v20635_v39  ;;  %v4973_v33 = vcombine.high %v4965_v18, %v4965_v18  ;;  %v15052_v38 = vrot.slane %v4965_v18, 9  ;;  %v4938_v1 = vrot.slane %v4924_v36, %v20630_v3 }
 0x48f   : > { %v6054_v16 = vrot.slane %v5674_v53, %v20635_v39  ;;  %v6127_v8 = vsel %vm6071_vm0, %v6046_v62, %v6042_v24  ;;  %v4974_v29 = vcombine.high %v4972_v26, %v4972_v26  ;;  %v15054_v30 = vrot.slane %v4972_v26, 9  ;;  %v21179_v13 = vld [vmem:[#allocation2 + $0xe7] sm:$0xff] }
 0x490   : > { %v21181_v14 = vld [vmem:[#allocation2 + $0xe9] sm:$0xff]  ;;  %v6128_v61 = vsel %vm6073_vm1, %v6050_v43, %v6127_v8  ;;  %v15053_v12 = vrot.slane %v4973_v33, 9  ;;  %v4939_v22 = vcombine.high %v4931_v21, %v4931_v21  ;;  %7212 = vst [vmem:[#allocation2 + $0xe0] sm:$0xff] %v21129_v9  ;;  %v5611_v4 = vmax.f32 %v4965_v18, %v15052_v38 }
 0x491   : > { %7214 = vst [vmem:[#allocation2 + $0xf0] sm:$0xff] %v21129_v9  ;;  %v15055_v51 = vrot.slane %v4974_v29, 9  ;;  %v4940_v5 = vcombine.high %v4938_v1, %v4938_v1  ;;  %v14988_v2 = vrot.slane %v4931_v21, 9  ;;  %v5613_v52 = vmax.f32 %v4972_v26, %v15054_v30  ;;  %v6182_v38 = vld [vmem:[#allocation2 + $0x28] sm:$0xff] }
 0x492   : > { %v14989_v48 = vrot.slane %v4939_v22, 9  ;;  %v14990_v11 = vrot.slane %v4938_v1, 9  ;;  %v6129_v32 = vsel %vm6075_vm2, %v6054_v16, %v6128_v61  ;;  %v5612_v28 = vmax.f32 %v4973_v33, %v15053_v12  ;;  %v6207_v16 = vld [vmem:[#allocation2 + $0x68] sm:$0xff] }
 0x493   : > { %v14991_v19 = vrot.slane %v4940_v5, 9  ;;  %v5355_v50 = vmax.f32 %v4931_v21, %v14988_v2  ;;  %v21189_v10 = vpack.c.bf16 %v20950_v60, %v20906_v6  ;;  %v6241_v56 = vpack.c.bf16 %v21055_v23, %v20977_v47  ;;  %v18067_v61 = vld [vmem:[#allocation3 + $0x6a8] sm:$0xff]   ;;  %v18073_v2 = vld [vmem:[#allocation3 + $0x738] sm:$0xff]  }
 0x494   : > { %v5356_v35 = vmax.f32 %v4939_v22, %v14989_v48  ;;  %v5357_v63 = vmax.f32 %v4938_v1, %v14990_v11  ;;  %v21195_v15 = vpack.c.bf16 %v21076_v34, %v21009_v0  ;;  %v5614_v46 = vmax.f32 %v4974_v29, %v15055_v51  ;;  %v6209_v12 = vld [vmem:[#allocation2 + $0xa8] sm:$0xff]  ;;  %16803 = vmatprep.subr.bf16.mxu1 %v18073_v2  ;;  %v18075_v48 = vld [vmem:[#allocation3 + $0x730] sm:$0xff]   ;;  %v18076_v11 = vld [vmem:[#allocation3 + $0x7b8] sm:$0xff]  }
 0x495   : > { %v5358_v57 = vmax.f32 %v4940_v5, %v14991_v19  ;;  %v5675_v31 = vmax.f32 %v5355_v50, %v5611_v4  ;;  %6949 = vmatmul.mubr.bf16.gmra.mxu1 %v21189_v10  ;;  %v6243_v7 = vpack.c.bf16 %v21122_v49, %v21076_v34  ;;  %6891 = vmatprep.mubr.bf16.mxu0 %v6241_v56  ;;  %v18070_v5 = vld [vmem:[#allocation3 + $0x690] sm:$0xff]   ;;  %v18081_v50 = vld [vmem:[#allocation3 + $0x6e8] sm:$0xff]  }
 0x496   : > { %v5676_v20 = vmax.f32 %v5356_v35, %v5612_v28  ;;  %v5677_v37 = vmax.f32 %v5357_v63, %v5613_v52  ;;  %v21202_v41 = vpack.c.bf16 %v21163_v40, %v21110_v55  ;;  %6892 = vmatmul.mubr.bf16.gmra.mxu0 %v21195_v15  ;;  %v21215_v24 = vpack.c.bf16 %v21078_v58, %v21011_v44  ;;  %v18074_v52 = vld [vmem:[#allocation3 + $0x6f8] sm:$0xff]   ;;  %v18080_v19 = vld [vmem:[#allocation3 + $0x7b0] sm:$0xff]   ;;  %v18084_v35 = vld [vmem:[#allocation3 + $0x7a8] sm:$0xff]  }
 0x497   : > { %v5678_v47 = vmax.f32 %v5358_v57, %v5614_v46  ;;  %v6058_v23 = vrot.slane %v5675_v31, %v20635_v39  ;;  %6956 = vmatprep.mubr.bf16.mxu1 %v6243_v7  ;;  %v6249_v62 = vpack.c.bf16 %v21179_v13, %v21122_v49  ;;  %v6227_v33 = vpack.c.bf16 %v20906_v6, %v20845_v25  ;;  %v18065_v6 = vld [vmem:[#allocation3 + $0x6b0] sm:$0xff]   ;;  %v18078_v28 = vld [vmem:[#allocation3 + $0x778] sm:$0xff]   ;;  %v18085_v63 = vld [vmem:[#allocation3 + $0x6e0] sm:$0xff]  }
 0x498   : > { %v6062_v0 = vrot.slane %v5676_v20, %v20635_v39  ;;  %v6066_v18 = vrot.slane %v5677_v37, %v20635_v39  ;;  %6899 = vmatprep.mubr.bf16.mxu0 %v21202_v41  ;;  %v6226_v49 = vpack.c.bf16 %v21120_v59, %v6182_v38  ;;  %v6236_v25 = vpack.c.bf16 %v21011_v44, %v20950_v60  ;;  %v18068_v44 = vld [vmem:[#allocation3 + $0x6a0] sm:$0xff]   ;;  %v18086_v56 = vld [vmem:[#allocation3 + $0x768] sm:$0xff]   ;;  %v18089_v57 = vld [vmem:[#allocation3 + $0x6d8] sm:$0xff]  }
 0x499   : > { %v6070_v34 = vrot.slane %v5678_v47, %v20635_v39  ;;  %v6130_v36 = vsel %vm6077_vm3, %v6058_v23, %v6129_v32  ;;  %v6229_v30 = vpack.c.bf16 %v6207_v16, %v21120_v59  ;;  %v6245_v60 = vpack.c.bf16 %v21124_v42, %v21078_v58  ;;  %v18071_v58 = vld [vmem:[#allocation3 + $0x688] sm:$0xff]   ;;  %v18077_v32 = vld [vmem:[#allocation3 + $0x6f0] sm:$0xff]   ;;  %v18088_v46 = vld [vmem:[#allocation3 + $0x7a0] sm:$0xff]  }
 0x49a   : > { %v6131_v21 = vsel %vm6079_vm4, %v6062_v0, %v6130_v36  ;;  %v6244_v59 = vpack.c.bf16 %v21110_v55, %v6209_v12  ;;  %v18090_v31 = vld [vmem:[#allocation3 + $0x760] sm:$0xff]   ;;  %v18091_v7 = vld [vmem:[#allocation3 + $0x710] sm:$0xff]   ;;  %v18092_v20 = vld [vmem:[#allocation3 + $0x798] sm:$0xff]  }
 0x49b   : > { %v6132_v53 = vsel %vm6081_vm5, %v6066_v18, %v6131_v21  ;;  %v18093_v37 = vld [vmem:[#allocation3 + $0x6d0] sm:$0xff]   ;;  %v18095_v47 = vld [vmem:[#allocation3 + $0x708] sm:$0xff]   ;;  %v18101_v21 = vld [vmem:[#allocation3 + $0x6c0] sm:$0xff]  }
 0x49c   : > { %v6133_v26 = vsel %vm6083_vm6, %v6070_v34, %v6132_v53  ;;  %v18096_v23 = vld [vmem:[#allocation3 + $0x790] sm:$0xff]   ;;  %v18097_v0 = vld [vmem:[#allocation3 + $0x6c8] sm:$0xff]   ;;  %v18099_v34 = vld [vmem:[#allocation3 + $0x700] sm:$0xff]  }
 0x49d   : > { %6149 = vst [vmem:[#allocation2 + $0x108] sm:$0xff] %v6133_v26  ;;  %6957 = vmatmul.mubr.bf16.gmra.mxu1 %v21215_v24  ;;  %v6253_v43 = vpack.c.bf16 %v6133_v26, %v21163_v40  ;;  %v6251_v40 = vpack.c.bf16 %v21181_v14, %v21124_v42  ;;  %v18072_v42 = vld [vmem:[#allocation3 + $0x680] sm:$0xff]   ;;  %v18098_v18 = vld [vmem:[#allocation3 + $0x750] sm:$0xff]   ;;  %v18100_v36 = vld [vmem:[#allocation3 + $0x788] sm:$0xff]  }
 0x49e   : > { %6900 = vmatmul.mubr.bf16.gmra.mxu0 %v6249_v62  ;;  %v18102_v53 = vld [vmem:[#allocation3 + $0x748] sm:$0xff]   ;;  %v18108_v38 = vld [vmem:[#allocation3 + $0x8b8] sm:$0xff]  }
 0x49f   : > { %7005 = vmatprep.mubr.bf16.mxu0 %v6227_v33  ;;  %v18105_v33 = vld [vmem:[#allocation3 + $0x740] sm:$0xff]  }
 0x4a4   : > { %v6181_v1 = vld [vmem:[#allocation2 + $0x107] sm:$0xff] }
 0x4a5   : > { %v6197_v8 = vld [vmem:[#allocation2 + $0x109] sm:$0xff]  ;;  %v6252_v29 = vpack.c.bf16 %v6181_v1, %v21179_v13  ;;  %7216 = vst [vmem:[#allocation2 + $0x100] sm:$0xff] %v21129_v9  ;;  %v6255_v55 = vpack.c.bf16 %v20980_v17, %v6181_v1 }
 0x4a6   : > { %7218 = vst [vmem:[#allocation2 + $0x110] sm:$0xff] %v21129_v9  ;;  %7006 = vmatmul.mubr.bf16.vlgmr.msra.gmra.mxu0 %v6226_v49  ;;  %v6185_v13 = vld [vmem:[#allocation2 + $0x88] sm:$0xff]  ;;  %v6254_v4 = vpack.c.bf16 %v6197_v8, %v21181_v14  ;;  %v6257_v14 = vpack.c.bf16 %v20988_v27, %v6197_v8  ;;  %v18083_v27 = vld [vmem:[#allocation3 + $0x720] sm:$0xff]  }
 0x4a7   : > { %6964 = vmatprep.mubr.bf16.mxu1 %v6252_v29  ;;  %7013 = vmatprep.mubr.bf16.mxu0 %v6236_v25  ;;  %v6235_v22 = vpack.c.bf16 %v6185_v13, %v6207_v16  ;;  %v6238_v51 = vpack.c.bf16 %v6209_v12, %v6185_v13  ;;  %v18079_v17 = vld [vmem:[#allocation3 + $0x728] sm:$0xff]  }
 0x4a8   : > { %6965 = vmatmul.mubr.bf16.gmra.mxu1 %v6251_v40  ;;  %17654 = vmatpush3.bf16.msra.mxu0 %v21093_v45  ;;  %v18069_v45 = vld [vmem:[#allocation3 + $0x698] sm:$0xff]   ;;  %v21253_v12 = vld [vmem:[#allocation2 + $0x127] sm:$0xff] }
 0x4a9   : > { %7070 = vmatprep.mubr.bf16.mxu1 %v6229_v30  ;;  %17655 = vmatprep.subr.bf16.mxu0 %v18065_v6  ;;  %22232 = vst [vmem:[#allocation45_spill] sm:$0xff] %v21253_v12  ;;  %13725 = vst [vmem:[#allocation2 + $0x120] sm:$0xff] %v21129_v9 }
 0x4ac   : > { %17656 = vmatpush3.bf16.msra.mxu0 %v18065_v6 }
 0x4ad   : > { %17657 = vmatprep.subr.bf16.mxu0 %v18067_v61 }
 0x4ae   : > { %7014 = vmatmul.mubr.bf16.gmra.mxu0 %v6235_v22  ;;  %v21255_v22 = vld [vmem:[#allocation2 + $0x129] sm:$0xff] }
 0x4af   : > { %7021 = vmatprep.mubr.bf16.mxu0 %v6245_v60  ;;  %22233 = vst [vmem:[#allocation40_spill] sm:$0xff] %v21255_v22  ;;  %13726 = vst [vmem:[#allocation2 + $0x128] sm:$0xff] %v21129_v9 }
 0x4b0   : > { %7071 = vmatmul.mubr.bf16.vlgmr.msra.gmra.mxu1 %v21140_v54  ;;  %17658 = vmatpush3.bf16.msra.mxu0 %v18067_v61  ;;  %v6256_v54 = vpack.c.bf16 %v21129_v9, %v6133_v26  ;;  %v18104_v26 = vld [vmem:[#allocation3 + $0x838] sm:$0xff]   ;;  %13727 = vst [vmem:[#allocation2 + $0x130] sm:$0xff] %v21129_v9 }
 0x4b1   : > { %7078 = vmatprep.mubr.bf16.mxu1 %v6238_v51  ;;  %17659 = vmatprep.subr.bf16.mxu0 %v18068_v44 }
 0x4b2   : > { %16804 = vmatpush3.bf16.msra.mxu1 %v18074_v52 }
 0x4b3   : > { %16805 = vmatprep.subr.bf16.mxu1 %v18075_v48 }
 0x4b4   : > { %17660 = vmatpush3.bf16.msra.mxu0 %v18068_v44 }
 0x4b5   : > { %17661 = vmatprep.subr.bf16.mxu0 %v18069_v45 }
 0x4b6   : > { %7022 = vmatmul.mubr.bf16.gmra.mxu0 %v6244_v59  ;;  %16806 = vmatpush3.bf16.msra.mxu1 %v18077_v32 }
 0x4b7   : > { %7029 = vmatprep.mubr.bf16.mxu0 %v6254_v4  ;;  %16807 = vmatprep.subr.bf16.mxu1 %v18079_v17 }
 0x4b8   : > { %7079 = vmatmul.mubr.bf16.gmra.mxu1 %v21195_v15  ;;  %17662 = vmatpush3.bf16.msra.mxu0 %v18069_v45  ;;  %v18087_v15 = vld [vmem:[#allocation3 + $0x718] sm:$0xff]  }
 0x4b9   : > { %7086 = vmatprep.mubr.bf16.mxu1 %v21202_v41  ;;  %17663 = vmatprep.subr.bf16.mxu0 %v18070_v5  ;;  %v18094_v41 = vld [vmem:[#allocation3 + $0x758] sm:$0xff]  }
 0x4ba   : > { %16808 = vmatpush3.bf16.msra.mxu1 %v18081_v50 }
 0x4bb   : > { %16809 = vmatprep.subr.bf16.mxu1 %v18083_v27 }
 0x4bc   : > { %17664 = vmatpush3.bf16.msra.mxu0 %v18070_v5 }
 0x4bd   : > { %17665 = vmatprep.subr.bf16.mxu0 %v18071_v58 }
 0x4be   : > { %7030 = vmatmul.mubr.bf16.gmra.mxu0 %v6253_v43  ;;  %16810 = vmatpush3.bf16.msra.mxu1 %v18085_v63  ;;  %v21249_v43 = vld [vmem:[#allocation2 + $0x9] sm:$0xff] }
 0x4bf   : > { %17669 = vmatprep.mubr.bf16.mxu0 %v21189_v10  ;;  %v18082_v10 = vld [vmem:[#allocation3 + $0x770] sm:$0xff]   ;;  %16811 = vmatprep.subr.bf16.mxu1 %v18087_v15  ;;  %22231 = vst [vmem:[#allocation18_spill] sm:$0xff] %v21249_v43  ;;  %13691 = vst [vmem:[#allocation2 + $0x10] sm:$0xff] %v21129_v9 }
 0x4c0   : > { %7087 = vmatmul.mubr.bf16.gmra.mxu1 %v6249_v62  ;;  %17666 = vmatpush3.bf16.msra.mxu0 %v18071_v58  ;;  %v18103_v62 = vld [vmem:[#allocation3 + $0x780] sm:$0xff]  }
 0x4c1   : > { %7094 = vmatprep.mubr.bf16.mxu1 %v6256_v54  ;;  %17667 = vmatprep.subr.bf16.mxu0 %v18072_v42 }
 0x4c2   : > { %16812 = vmatpush3.bf16.msra.mxu1 %v18089_v57 }
 0x4c3   : > { %16813 = vmatprep.subr.bf16.mxu1 %v18091_v7 }
 0x4c4   : > { %17668 = vmatpush3.bf16.msra.mxu0 %v18072_v42 }
 0x4c5   : > { %16843 = vmatprep.subr.bf16.mxu0 %v18076_v11 }
 0x4c6   : > { %16814 = vmatpush3.bf16.msra.mxu1 %v18093_v37 }
 0x4c7   : > { %17670 = vmatmul.mubr.bf16.vlgmr.msra.gmra.mxu0 %v21215_v24  ;;  %16815 = vmatprep.subr.bf16.mxu1 %v18095_v47  ;;  %v21246_v24 = vld [vmem:[#allocation2 + $0x7] sm:$0xff] }
 0x4c8   : > { %7095 = vmatmul.mubr.bf16.gmra.mxu1 %v6255_v55  ;;  %17673 = vmatprep.mubr.bf16.mxu0 %v6251_v40  ;;  %22230 = vst [vmem:[#allocation15_spill] sm:$0xff] %v21246_v24  ;;  %8626 = vst [vmem:[#allocation2] sm:$0xff] %v21129_v9 }
 0x4c9   : > { %16844 = vmatpush3.bf16.msra.mxu0 %v18078_v28  ;;  %8627 = vst [vmem:[#allocation2 + $0x8] sm:$0xff] %v21129_v9 }
 0x4ca   : > { %16845 = vmatprep.subr.bf16.mxu0 %v18080_v19  ;;  %16816 = vmatpush3.bf16.msra.mxu1 %v18097_v0 }
 0x4cb   : > { %16817 = vmatprep.subr.bf16.mxu1 %v18099_v34 }
 0x4cd   : > { %16846 = vmatpush3.bf16.msra.mxu0 %v18082_v10 }
 0x4ce   : > { %16847 = vmatprep.subr.bf16.mxu0 %v18084_v35  ;;  %16818 = vmatpush3.bf16.msra.mxu1 %v18101_v21 }
 0x4cf   : > { %17674 = vmatmul.mubr.bf16.gmra.mxu0 %v6257_v14  ;;  %16883 = vmatprep.subr.bf16.mxu1 %v18104_v26 }
 0x4d1   : > { %16848 = vmatpush3.bf16.msra.mxu0 %v18086_v56 }
 0x4d2   : > { %16849 = vmatprep.subr.bf16.mxu0 %v18088_v46 }
 0x4d5   : > { %16850 = vmatpush3.bf16.msra.mxu0 %v18090_v31 }
 0x4d6   : > { %16851 = vmatprep.subr.bf16.mxu0 %v18092_v20 }
 0x4d9   : > { %16852 = vmatpush3.bf16.msra.mxu0 %v18094_v41 }
 0x4da   : > { %16853 = vmatprep.subr.bf16.mxu0 %v18096_v23 }
 0x4dd   : > { %16854 = vmatpush3.bf16.msra.mxu0 %v18098_v18 }
 0x4de   : > { %16855 = vmatprep.subr.bf16.mxu0 %v18100_v36 }
 0x4e1   : > { %16856 = vmatpush3.bf16.msra.mxu0 %v18102_v53  ;;  %v21274_v53 = vld [vmem:[#allocation5 + $0x2] ss:$0 sm:$0xff] }
 0x4e2   : > { %16857 = vmatprep.subr.bf16.mxu0 %v18103_v62 }
 0x4e5   : > { %16858 = vmatpush3.bf16.msra.mxu0 %v18105_v33 }
 0x4e6   : > { %16923 = vmatprep.subr.bf16.mxu0 %v18108_v38 }
 0x50e   : > { %v16647_v1 = vpop.f32.mrf.mxu0 }
 0x510   : > { %v16648_v16 = vpop.f32.mrf.mxu0 }
 0x511   : > { %v16687_v49 = vpop.f32.mrf.mxu1  ;;  %v16649_v34 = vadd.f32 %v16648_v16, %v16647_v1 }
 0x512   : > { %v16650_v8 = vpop.f32.mrf.mxu0 }
 0x513   : > { %v16688_v25 = vpop.f32.mrf.mxu1  ;;  %v6878_v12 = vadd.f32 %v16649_v34, %v21274_v53 }
 0x514   : > { %v16651_v29 = vpop.f32.mrf.mxu0  ;;  %v16689_v33 = vadd.f32 %v16688_v25, %v16687_v49 }
 0x515   : > { %v16690_v30 = vpop.f32.mrf.mxu1  ;;  %v16652_v36 = vadd.f32 %v16651_v29, %v16650_v8 }
 0x516   : > { %v6943_v29 = vadd.f32 %v16689_v33, %v6878_v12 }
 0x517   : > { %v16691_v61 = vpop.f32.mrf.mxu1  ;;  %v6881_v43 = vadd.f32 %v16652_v36, %v21274_v53 }
 0x518   : > { %v16692_v38 = vadd.f32 %v16691_v61, %v16690_v30 }
 0x53d   : > { %v16653_v40 = vpop.f32.mrf.mxu0 }
 0x53f   : > { %v16654_v6 = vpop.f32.mrf.mxu0 }
 0x540   : > { %v16655_v62 = vadd.f32 %v16654_v6, %v16653_v40  ;;  %v6946_v40 = vadd.f32 %v16692_v38, %v6881_v43 }
 0x541   : > { %v16656_v13 = vpop.f32.mrf.mxu0 }
 0x542   : > { %v6886_v1 = vadd.f32 %v16655_v62, %v21274_v53 }
 0x543   : > { %v16657_v60 = vpop.f32.mrf.mxu0 }
 0x544   : > { %v16658_v24 = vadd.f32 %v16657_v60, %v16656_v13 }
 0x555   : > { %v16693_v44 = vpop.f32.mrf.mxu1 }
 0x556   : > { %v16659_v45 = vpop.f32.mrf.mxu0 }
 0x557   : > { %v16694_v51 = vpop.f32.mrf.mxu1 }
 0x558   : > { %v16660_v4 = vpop.f32.mrf.mxu0  ;;  %v16695_v3 = vadd.f32 %v16694_v51, %v16693_v44  ;;  %v6889_v51 = vadd.f32 %v16658_v24, %v21274_v53 }
 0x559   : > { %v16696_v59 = vpop.f32.mrf.mxu1  ;;  %v16661_v9 = vadd.f32 %v16660_v4, %v16659_v45 }
 0x55a   : > { %v21260_v58 = vpop.f32.mrf.mxu0  ;;  %v6951_v49 = vadd.f32 %v16695_v3, %v6886_v1 }
 0x55b   : > { %v16697_v5 = vpop.f32.mrf.mxu1  ;;  %v6894_v34 = vadd.f32 %v16661_v9, %v21274_v53 }
 0x55c   : > { %v21262_v42 = vpop.f32.mrf.mxu0  ;;  %v16698_v6 = vadd.f32 %v16697_v5, %v16696_v59 }
 0x55d   : > { %v16699_v54 = vpop.f32.mrf.mxu1  ;;  %v16664_v3 = vadd.f32 %v21262_v42, %v21260_v58 }
 0x55e   : > { %v16665_v14 = vpop.f32.mrf.mxu0  ;;  %v6954_v43 = vadd.f32 %v16698_v6, %v6889_v51 }
 0x55f   : > { %v16700_v55 = vpop.f32.mrf.mxu1 }
 0x560   : > { %v16666_v2 = vpop.f32.mrf.mxu0  ;;  %v16701_v13 = vadd.f32 %v16700_v55, %v16699_v54 }
 0x561   : > { %v21264_v52 = vpop.f32.mrf.mxu1  ;;  %v16667_v25 = vadd.f32 %v16666_v2, %v16665_v14 }
 0x562   : > { %v16668_v48 = vpop.f32.mrf.mxu0  ;;  %v6959_v54 = vadd.f32 %v16701_v13, %v6894_v34 }
 0x563   : > { %v21266_v32 = vpop.f32.mrf.mxu1  ;;  %v6902_v2 = vadd.f32 %v16667_v25, %v21274_v53 }
 0x564   : > { %v16669_v11 = vpop.f32.mrf.mxu0 }
 0x565   : > { %v16670_v4 = vadd.f32 %v16669_v11, %v16668_v48 }
 0x566   : > { %v16727_v28 = vpop.f32.mrf.mxu0 }
 0x568   : > { %v16705_v17 = vpop.f32.mrf.mxu1  ;;  %v16728_v19 = vpop.f32.mrf.mxu0 }
 0x569   : > { %v16729_v30 = vadd.f32 %v16728_v19, %v16727_v28 }
 0x56a   : > { %v16706_v50 = vpop.f32.mrf.mxu1  ;;  %v16730_v10 = vpop.f32.mrf.mxu0 }
 0x56b   : > { %v16707_v36 = vadd.f32 %v16706_v50, %v16705_v17  ;;  %v7008_v24 = vadd.f32 %v16729_v30, %v6943_v29  ;;  %v6905_v50 = vadd.f32 %v16670_v4, %v21274_v53 }
 0x56c   : > { %v21268_v27 = vpop.f32.mrf.mxu1  ;;  %v16731_v35 = vpop.f32.mrf.mxu0 }
 0x56d   : > { %v16732_v59 = vadd.f32 %v16731_v35, %v16730_v10 }
 0x56e   : > { %v16709_v63 = vpop.f32.mrf.mxu1  ;;  %v16733_v56 = vpop.f32.mrf.mxu0 }
 0x56f   : > { %v16710_v55 = vadd.f32 %v16709_v63, %v21268_v27  ;;  %v7011_v42 = vadd.f32 %v16732_v59, %v6946_v40  ;;  %v16704_v63 = vadd.f32 %v21266_v32, %v21264_v52 }
 0x570   : > { %v16767_v15 = vpop.f32.mrf.mxu1  ;;  %v16734_v46 = vpop.f32.mrf.mxu0 }
 0x571   : > { %v16735_v16 = vadd.f32 %v16734_v46, %v16733_v56 }
 0x572   : > { %v16768_v57 = vpop.f32.mrf.mxu1  ;;  %v16736_v31 = vpop.f32.mrf.mxu0 }
 0x573   : > { %v7016_v56 = vadd.f32 %v16735_v16, %v6951_v49  ;;  %v16769_v46 = vadd.f32 %v16768_v57, %v16767_v15  ;;  %v6967_v15 = vadd.f32 %v16707_v36, %v6902_v2  ;;  %v6897_v16 = vadd.f32 %v16664_v3, %v21274_v53 }
 0x574   : > { %v16770_v7 = vpop.f32.mrf.mxu1  ;;  %v16737_v20 = vpop.f32.mrf.mxu0 }
 0x575   : > { %v16738_v60 = vadd.f32 %v16737_v20, %v16736_v31  ;;  %v7073_v58 = vadd.f32 %v16769_v46, %v7008_v24 }
 0x576   : > { %v16771_v37 = vpop.f32.mrf.mxu1  ;;  %v21270_v41 = vpop.f32.mrf.mxu0 }
 0x577   : > { %v7019_v48 = vadd.f32 %v16738_v60, %v6954_v43  ;;  %v16772_v11 = vadd.f32 %v16771_v37, %v16770_v7  ;;  %v6970_v7 = vadd.f32 %v16710_v55, %v6905_v50  ;;  %v18106_v50 = vld [vmem:[#allocation3 + $0x7f8] sm:$0xff]  }
 0x578   : > { %v16773_v47 = vpop.f32.mrf.mxu1  ;;  %v16740_v23 = vpop.f32.mrf.mxu0 }
 0x579   : > { %v7076_v33 = vadd.f32 %v16772_v11, %v7011_v42 }
 0x57a   : > { %v16774_v0 = vpop.f32.mrf.mxu1  ;;  %v21272_v18 = vpop.f32.mrf.mxu0 }
 0x57b   : > { %22234 = vst [vmem:[#allocation10_spill] sm:$0xff] %v21272_v18  ;;  %v16775_v61 = vadd.f32 %v16774_v0, %v16773_v47 }
 0x57c   : > { %v16776_v21 = vpop.f32.mrf.mxu1  ;;  %v21276_v26 = vpop.f32.mrf.mxu0 }
 0x57d   : > { %22235 = vst [vmem:[#allocation11_spill] sm:$0xff] %v21276_v26  ;;  %v7081_v9 = vadd.f32 %v16775_v61, %v7016_v56  ;;  %v6962_v61 = vadd.f32 %v16704_v63, %v6897_v16  ;;  %v22238_v56 = vld [vmem:[#allocation39_spill] sm:$0xff] }
 0x57e   : > { %v16777_v39 = vpop.f32.mrf.mxu1  ;;  %v16745_v22 = vpop.f32.mrf.mxu0  ;;  %v18110_v63 = vld [vmem:[#allocation3 + $0x878] sm:$0xff]  }
 0x57f   : > { %v16778_v5 = vadd.f32 %v16777_v39, %v16776_v21  ;;  %v16741_v39 = vadd.f32 %v16740_v23, %v21270_v41 }
 0x580   : > { %v16779_v18 = vpop.f32.mrf.mxu1  ;;  %v16746_v8 = vpop.f32.mrf.mxu0 }
 0x581   : > { %v16747_v28 = vadd.f32 %v16746_v8, %v16745_v22  ;;  %v7084_v22 = vadd.f32 %v16778_v5, %v7019_v48  ;;  %v7024_v8 = vadd.f32 %v16741_v39, %v6959_v54  ;;  %v18107_v39 = vld [vmem:[#allocation3 + $0x830] sm:$0xff]  }
 0x582   : > { %v16780_v26 = vpop.f32.mrf.mxu1  ;;  %v16748_v44 = vpop.f32.mrf.mxu0  ;;  %v22236_v29 = vld [vmem:[#allocation10_spill] sm:$0xff] }
 0x583   : > { %v7032_v20 = vadd.f32 %v16747_v28, %v6967_v15  ;;  %v16781_v37 = vadd.f32 %v16780_v26, %v16779_v18 }
 0x584   : > { %v16782_v45 = vpop.f32.mrf.mxu1  ;;  %v16749_v12 = vpop.f32.mrf.mxu0  ;;  %v22237_v40 = vld [vmem:[#allocation11_spill] sm:$0xff] }
 0x585   : > { %v16750_v10 = vadd.f32 %v16749_v12, %v16748_v44  ;;  %v16744_v6 = vadd.f32 %v22237_v40, %v22236_v29  ;;  %v7089_v34 = vadd.f32 %v16781_v37, %v7024_v8  ;;  %v22240_v37 = vld [vmem:[#allocation18_spill] sm:$0xff] }
 0x586   : > { %v16783_v14 = vpop.f32.mrf.mxu1  ;;  %v18114_v40 = vld [vmem:[#allocation3 + $0x870] sm:$0xff]  }
 0x587   : > { %v17671_v19 = vpop.f32.mrf.mxu0  ;;  %v7035_v49 = vadd.f32 %v16750_v10, %v6970_v7  ;;  %v16784_v44 = vadd.f32 %v16783_v14, %v16782_v45  ;;  %v7027_v12 = vadd.f32 %v16744_v6, %v6962_v61  ;;  %v18111_v7 = vld [vmem:[#allocation3 + $0x828] sm:$0xff]   ;;  %v18115_v6 = vld [vmem:[#allocation3 + $0x820] sm:$0xff]  }
 0x588   : > { %v16785_v17 = vpop.f32.mrf.mxu1  ;;  %v7146_v57 = vadd.f32 %v17671_v19, %v7081_v9  ;;  %v18117_v61 = vld [vmem:[#allocation3 + $0x7e0] sm:$0xff]  }
 0x589   : > { %v7137_v31 = vpop.f32.mrf.mxu0  ;;  %v7092_v24 = vadd.f32 %v16784_v44, %v7027_v12  ;;  %v18123_v12 = vld [vmem:[#allocation3 + $0x810] sm:$0xff]  }
 0x58a   : > { %v16786_v35 = vpop.f32.mrf.mxu1  ;;  %v7170_v47 = vmul.f32 0.01, %v7146_v57  ;;  %v7138_v27 = vadd.f32 %v7137_v31, %v7073_v58  ;;  %v22239_v58 = vld [vmem:[#allocation15_spill] sm:$0xff] }
 0x58b   : > { %v16787_v0 = vadd.f32 %v16786_v35, %v16785_v17  ;;  %v17672_v62 = vpop.f32.mrf.mxu0 }
 0x58c   : > { %v16788_v21 = vpop.f32.mrf.mxu1  ;;  %v21291_v38 = vmax.f32 %v7146_v57, %v7170_v47  ;;  %v7168_v1 = vmul.f32 0.01, %v7138_v27  ;;  %v7149_v41 = vadd.f32 %v17672_v62, %v7084_v22  ;;  %v18109_v47 = vld [vmem:[#allocation3 + $0x7f0] sm:$0xff]  }
 0x58d   : > { %v7097_v23 = vadd.f32 %v16787_v0, %v7032_v20  ;;  %v7140_v30 = vpop.f32.mrf.mxu0  ;;  %v18112_v62 = vld [vmem:[#allocation3 + $0x8b0] sm:$0xff]  }
 0x58e   : > { %v16789_v25 = vpop.f32.mrf.mxu1  ;;  %7258 = vst [vmem:[#allocation2 + $0x68] sm:$0xff] %v21291_v38  ;;  %v21297_v52 = vmax.f32 %v7138_v27, %v7168_v1  ;;  %v7171_v32 = vmul.f32 0.01, %v7149_v41  ;;  %v7141_v26 = vadd.f32 %v7140_v30, %v7076_v33  ;;  %v18116_v30 = vld [vmem:[#allocation3 + $0x8a8] sm:$0xff]  }
 0x58f   : > { %v16790_v18 = vadd.f32 %v16789_v25, %v16788_v21  ;;  %v17675_v51 = vpop.f32.mrf.mxu0 }
 0x590   : > { %7256 = vst [vmem:[#allocation2 + $0x28] sm:$0xff] %v21297_v52  ;;  %v21300_v53 = vmax.f32 %v7149_v41, %v7171_v32  ;;  %v7169_v13 = vmul.f32 0.01, %v7141_v26  ;;  %v7162_v60 = vadd.f32 %v17675_v51, %v7097_v23  ;;  %v7337_v46 = vpack.c.bf16 %v21297_v52, %v22238_v56  ;;  %v18113_v23 = vld [vmem:[#allocation3 + $0x7e8] sm:$0xff]  }
 0x591   : > { %v7100_v4 = vadd.f32 %v16790_v18, %v7035_v49  ;;  %v7153_v36 = vpop.f32.mrf.mxu0  ;;  %v21362_v49 = vld [vmem:[#allocation2 + $0x18] sm:$0xff]  ;;  %v18118_v51 = vld [vmem:[#allocation3 + $0x868] sm:$0xff]  }
 0x592   : > { %7259 = vst [vmem:[#allocation2 + $0x88] sm:$0xff] %v21300_v53  ;;  %v21305_v43 = vmax.f32 %v7141_v26, %v7169_v13  ;;  %v7174_v3 = vmul.f32 0.01, %v7162_v60  ;;  %v7154_v45 = vadd.f32 %v7153_v36, %v7089_v34  ;;  %7989 = vmatprep.mubr.bf16.mxu1 %v7337_v46  ;;  %v18119_v13 = vld [vmem:[#allocation3 + $0x818] sm:$0xff]   ;;  %v18122_v46 = vld [vmem:[#allocation3 + $0x860] sm:$0xff]  }
 0x593   : > { %v17676_v59 = vpop.f32.mrf.mxu0  ;;  %v18121_v36 = vld [vmem:[#allocation3 + $0x7d8] sm:$0xff]  }
 0x594   : > { %7257 = vst [vmem:[#allocation2 + $0x48] sm:$0xff] %v21305_v43  ;;  %v21308_v5 = vmax.f32 %v7162_v60, %v7174_v3  ;;  %v7172_v14 = vmul.f32 0.01, %v7154_v45  ;;  %v7165_v2 = vadd.f32 %v17676_v59, %v7100_v4  ;;  %v21329_v10 = vpack.c.bf16 %v21291_v38, %v21305_v43  ;;  %v18120_v60 = vld [vmem:[#allocation3 + $0x8a0] sm:$0xff]   ;;  %v18125_v59 = vld [vmem:[#allocation3 + $0x7d0] sm:$0xff]  }
 0x595   : > { %v7156_v28 = vpop.f32.mrf.mxu0  ;;  %v7290_v9 = vld [vmem:[#allocation2 + $0x67] sm:$0xff] }
 0x596   : > { %v21310_v54 = vld [vmem:[#allocation2 + $0x69] sm:$0xff]  ;;  %7262 = vst [vmem:[#allocation2 + $0xe8] sm:$0xff] %v21308_v5  ;;  %v21313_v55 = vmax.f32 %v7154_v45, %v7172_v14  ;;  %v7175_v48 = vmul.f32 0.01, %v7165_v2  ;;  %v7157_v11 = vadd.f32 %v7156_v28, %v7092_v24  ;;  %8638 = vst [vmem:[#allocation2 + $0x60] sm:$0xff] %v22238_v56  ;;  %v18124_v45 = vld [vmem:[#allocation3 + $0x898] sm:$0xff]  }
 0x597   : > { %13703 = vst [vmem:[#allocation2 + $0x70] sm:$0xff] %v22238_v56  ;;  %8639 = vst [vmem:[#allocation2 + $0x68] sm:$0xff] %v22238_v56  ;;  %v7265_v17 = vld [vmem:[#allocation2 + $0x27] sm:$0xff]  ;;  %v18126_v14 = vld [vmem:[#allocation3 + $0x858] sm:$0xff]  }
 0x598   : > { %v21318_v19 = vld [vmem:[#allocation2 + $0x29] sm:$0xff]  ;;  %7260 = vst [vmem:[#allocation2 + $0xa8] sm:$0xff] %v21313_v55  ;;  %v21321_v15 = vmax.f32 %v7165_v2, %v7175_v48  ;;  %v7173_v57 = vmul.f32 0.01, %v7157_v11  ;;  %8630 = vst [vmem:[#allocation2 + $0x20] sm:$0xff] %v22238_v56  ;;  %v7336_v42 = vpack.c.bf16 %v7265_v17, %v22239_v58  ;;  %v21369_v25 = vpack.c.bf16 %v21313_v55, %v21300_v53 }
 0x599   : > { %13695 = vst [vmem:[#allocation2 + $0x30] sm:$0xff] %v22238_v56  ;;  %8631 = vst [vmem:[#allocation2 + $0x28] sm:$0xff] %v22238_v56  ;;  %v21331_v35 = vld [vmem:[#allocation2 + $0x87] sm:$0xff]  ;;  %v7338_v21 = vpack.c.bf16 %v21318_v19, %v22240_v37  ;;  %v18128_v28 = vld [vmem:[#allocation3 + $0x890] sm:$0xff]  }
 0x59a   : > { %v21333_v31 = vld [vmem:[#allocation2 + $0x89] sm:$0xff]  ;;  %7263 = vst [vmem:[#allocation2 + $0x108] sm:$0xff] %v21321_v15  ;;  %v21336_v22 = vmax.f32 %v7157_v11, %v7173_v57  ;;  %7990 = vmatmul.mubr.bf16.vlgmr.msra.gmra.mxu1 %v7336_v42  ;;  %8642 = vst [vmem:[#allocation2 + $0x80] sm:$0xff] %v22238_v56  ;;  %v7348_v41 = vpack.c.bf16 %v21331_v35, %v7290_v9  ;;  %v18133_v42 = vld [vmem:[#allocation3 + $0x7c0] sm:$0xff]  }
 0x59b   : > { %13707 = vst [vmem:[#allocation2 + $0x90] sm:$0xff] %v22238_v56  ;;  %8643 = vst [vmem:[#allocation2 + $0x88] sm:$0xff] %v22238_v56  ;;  %16884 = vmatpush3.bf16.msra.mxu1 %v18106_v50  ;;  %7997 = vmatprep.mubr.bf16.mxu1 %v21329_v10  ;;  %v7289_v20 = vld [vmem:[#allocation2 + $0x47] sm:$0xff] }
 0x59c   : > { %v21342_v0 = vld [vmem:[#allocation2 + $0x49] sm:$0xff]  ;;  %7261 = vst [vmem:[#allocation2 + $0xc8] sm:$0xff] %v21336_v22  ;;  %v7339_v27 = vpack.c.bf16 %v7289_v20, %v7265_v17  ;;  %16885 = vmatprep.subr.bf16.mxu1 %v18107_v39  ;;  %8634 = vst [vmem:[#allocation2 + $0x40] sm:$0xff] %v22238_v56  ;;  %v21360_v29 = vpack.c.bf16 %v7290_v9, %v7289_v20  ;;  %v21395_v3 = vpack.c.bf16 %v21308_v5, %v21336_v22  ;;  %v18131_v50 = vld [vmem:[#allocation3 + $0x800] sm:$0xff]  }
 0x59d   : > { %13699 = vst [vmem:[#allocation2 + $0x50] sm:$0xff] %v22238_v56  ;;  %8635 = vst [vmem:[#allocation2 + $0x48] sm:$0xff] %v22238_v56  ;;  %v21350_v33 = vld [vmem:[#allocation2 + $0xe7] sm:$0xff]  ;;  %v21387_v34 = vpack.c.bf16 %v21310_v54, %v21342_v0  ;;  %v18130_v17 = vld [vmem:[#allocation3 + $0x850] sm:$0xff]   ;;  %v7341_v57 = vpack.c.bf16 %v21342_v0, %v21318_v19  ;;  %v7340_v19 = vpack.c.bf16 %v21305_v43, %v21297_v52 }
 0x59e   : > { %v21352_v1 = vld [vmem:[#allocation2 + $0xe9] sm:$0xff]  ;;  %8054 = vmatprep.mubr.bf16.mxu0 %v7339_v27  ;;  %13717 = vst [vmem:[#allocation2 + $0xe0] sm:$0xff] %v22238_v56  ;;  %v18135_v20 = vld [vmem:[#allocation3 + $0x880] sm:$0xff]   ;;  %v7349_v52 = vpack.c.bf16 %v21300_v53, %v21291_v38 }
 0x59f   : > { %13718 = vst [vmem:[#allocation2 + $0xe8] sm:$0xff] %v22238_v56  ;;  %13719 = vst [vmem:[#allocation2 + $0xf0] sm:$0xff] %v22238_v56  ;;  %8055 = vmatmul.mubr.bf16.vlgmr.msra.gmra.mxu0 %v7338_v21  ;;  %16886 = vmatpush3.bf16.msra.mxu1 %v18109_v47  ;;  %v7292_v16 = vld [vmem:[#allocation2 + $0xa7] sm:$0xff]  ;;  %v18136_v47 = vld [vmem:[#allocation3 + $0x8f8] sm:$0xff]   ;;  %v7370_v21 = vpack.c.bf16 %v21362_v49, %v21321_v15 }
 0x5a0   : > { %v21358_v8 = vld [vmem:[#allocation2 + $0xa9] sm:$0xff]  ;;  %8062 = vmatprep.mubr.bf16.mxu0 %v7348_v41  ;;  %16924 = vmatpush3.bf16.msra.mxu0 %v18110_v63  ;;  %8646 = vst [vmem:[#allocation2 + $0xa0] sm:$0xff] %v21362_v49  ;;  %v21391_v56 = vpack.c.bf16 %v7292_v16, %v21331_v35  ;;  %v18137_v0 = vld [vmem:[#allocation3 + $0x840] sm:$0xff]   ;;  %v7350_v63 = vpack.c.bf16 %v21333_v31, %v21310_v54  ;;  %v18141_v54 = vld [vmem:[#allocation3 + $0x8d8] sm:$0xff]  }
 0x5a1   : > { %13711 = vst [vmem:[#allocation2 + $0xb0] sm:$0xff] %v21362_v49  ;;  %8647 = vst [vmem:[#allocation2 + $0xa8] sm:$0xff] %v21362_v49  ;;  %16887 = vmatprep.subr.bf16.mxu1 %v18111_v7  ;;  %16925 = vmatprep.subr.bf16.mxu0 %v18112_v62  ;;  %v21371_v32 = vld [vmem:[#allocation2 + $0x107] sm:$0xff]  ;;  %v21401_v2 = vpack.c.bf16 %v21358_v8, %v21333_v31  ;;  %v18138_v27 = vld [vmem:[#allocation3 + $0x8f0] sm:$0xff]   ;;  %v7358_v31 = vpack.c.bf16 %v21336_v22, %v21313_v55 }
 0x5a2   : > { %v21373_v18 = vld [vmem:[#allocation2 + $0x109] sm:$0xff]  ;;  %7998 = vmatmul.mubr.bf16.gmra.mxu1 %v21360_v29  ;;  %13721 = vst [vmem:[#allocation2 + $0x100] sm:$0xff] %v21362_v49  ;;  %v7366_v9 = vpack.c.bf16 %v21371_v32, %v21350_v33  ;;  %v18140_v43 = vld [vmem:[#allocation3 + $0x8e0] sm:$0xff]   ;;  %v7367_v62 = vpack.c.bf16 %v21321_v15, %v21308_v5  ;;  %v18145_v5 = vld [vmem:[#allocation3 + $0x978] sm:$0xff]  }
 0x5a3   : > { %13722 = vst [vmem:[#allocation2 + $0x108] sm:$0xff] %v21362_v49  ;;  %13723 = vst [vmem:[#allocation2 + $0x110] sm:$0xff] %v21362_v49  ;;  %8005 = vmatprep.mubr.bf16.mxu1 %v21369_v25  ;;  %16888 = vmatpush3.bf16.msra.mxu1 %v18113_v23  ;;  %v7293_v26 = vld [vmem:[#allocation2 + $0xc7] sm:$0xff]  ;;  %v18142_v38 = vld [vmem:[#allocation3 + $0x8d0] sm:$0xff]   ;;  %v7368_v53 = vpack.c.bf16 %v21373_v18, %v21352_v1 }
 0x5a4   : > { %v21380_v44 = vld [vmem:[#allocation2 + $0xc9] sm:$0xff]  ;;  %16926 = vmatpush3.bf16.msra.mxu0 %v18114_v40  ;;  %16889 = vmatprep.subr.bf16.mxu1 %v18115_v6  ;;  %13713 = vst [vmem:[#allocation2 + $0xc0] sm:$0xff] %v21362_v49  ;;  %v7357_v4 = vpack.c.bf16 %v7293_v26, %v7292_v16  ;;  %v7363_v11 = vpack.c.bf16 %v21350_v33, %v7293_v26  ;;  %v18144_v55 = vld [vmem:[#allocation3 + $0x8c0] sm:$0xff]   ;;  %v18146_v15 = vld [vmem:[#allocation3 + $0x9f8] sm:$0xff]  }
 0x5a5   : > { %13714 = vst [vmem:[#allocation2 + $0xc8] sm:$0xff] %v21362_v49  ;;  %13715 = vst [vmem:[#allocation2 + $0xd0] sm:$0xff] %v21362_v49  ;;  %16927 = vmatprep.subr.bf16.mxu0 %v18116_v30  ;;  %v18127_v24 = vld [vmem:[#allocation3 + $0x808] sm:$0xff]   ;;  %v7365_v35 = vpack.c.bf16 %v21352_v1, %v21380_v44  ;;  %v18147_v23 = vld [vmem:[#allocation3 + $0x938] sm:$0xff]  }
 0x5a6   : > { %v18129_v48 = vld [vmem:[#allocation3 + $0x7c8] sm:$0xff]   ;;  %v18148_v16 = vld [vmem:[#allocation3 + $0x9b8] sm:$0xff]   ;;  %v18151_v40 = vld [vmem:[#allocation3 + $0x930] sm:$0xff]  }
 0x5a7   : > { %8063 = vmatmul.mubr.bf16.gmra.mxu0 %v21387_v34  ;;  %16890 = vmatpush3.bf16.msra.mxu1 %v18117_v61  ;;  %v18132_v58 = vld [vmem:[#allocation3 + $0x888] sm:$0xff]   ;;  %v18152_v6 = vld [vmem:[#allocation3 + $0x9b0] sm:$0xff]   ;;  %v18157_v61 = vld [vmem:[#allocation3 + $0x960] sm:$0xff]  }
 0x5a8   : > { %8070 = vmatprep.mubr.bf16.mxu0 %v7357_v4  ;;  %16928 = vmatpush3.bf16.msra.mxu0 %v18118_v51  ;;  %v18134_v39 = vld [vmem:[#allocation3 + $0x848] sm:$0xff]  }
 0x5a9   : > { %16891 = vmatprep.subr.bf16.mxu1 %v18119_v13  ;;  %16929 = vmatprep.subr.bf16.mxu0 %v18120_v60  ;;  %v18139_v7 = vld [vmem:[#allocation3 + $0x8e8] sm:$0xff]   ;;  %v18159_v13 = vld [vmem:[#allocation3 + $0x920] sm:$0xff]  }
 0x5aa   : > { %8006 = vmatmul.mubr.bf16.gmra.mxu1 %v21391_v56  ;;  %v18143_v37 = vld [vmem:[#allocation3 + $0x8c8] sm:$0xff]   ;;  %v18160_v60 = vld [vmem:[#allocation3 + $0x9a0] sm:$0xff]  }
 0x5ab   : > { %8013 = vmatprep.mubr.bf16.mxu1 %v21395_v3  ;;  %16892 = vmatpush3.bf16.msra.mxu1 %v18121_v36  ;;  %v22241_v22 = vld [vmem:[#allocation45_spill] sm:$0xff]  ;;  %v22242_v1 = vld [vmem:[#allocation40_spill] sm:$0xff]  ;;  %v18161_v36 = vld [vmem:[#allocation3 + $0x958] sm:$0xff]  }
 0x5ac   : > { %16930 = vmatpush3.bf16.msra.mxu0 %v18122_v46  ;;  %16893 = vmatprep.subr.bf16.mxu1 %v18123_v12  ;;  %v7369_v33 = vpack.c.bf16 %v22241_v22, %v21371_v32  ;;  %v7371_v41 = vpack.c.bf16 %v22242_v1, %v21373_v18  ;;  %v18154_v30 = vld [vmem:[#allocation3 + $0x9e8] sm:$0xff]  }
 0x5ad   : > { %16931 = vmatprep.subr.bf16.mxu0 %v18124_v45  ;;  %v18155_v18 = vld [vmem:[#allocation3 + $0x928] sm:$0xff]  }
 0x5ae   : > { %v18156_v26 = vld [vmem:[#allocation3 + $0x9a8] sm:$0xff]  }
 0x5af   : > { %8071 = vmatmul.mubr.bf16.gmra.mxu0 %v21401_v2  ;;  %16894 = vmatpush3.bf16.msra.mxu1 %v18125_v59  ;;  %v21446_v46 = vld [vmem:[#allocation2 + $0x7] sm:$0xf] }
 0x5b0   : > { %8078 = vmatprep.mubr.bf16.mxu0 %v7366_v9  ;;  %16932 = vmatpush3.bf16.msra.mxu0 %v18126_v14  ;;  %22243 = vst [vmem:[#allocation38_spill] sm:$0xff] %v21446_v46  ;;  %9715 = vst [vmem:[#allocation2] sm:$0xff] %v21362_v49  ;;  %v21453_v45 = vld [vmem:[#allocation2 + $0x9] sm:$0xf]  ;;  %v18165_v9 = vld [vmem:[#allocation3 + $0x950] sm:$0xff]  }
 0x5b1   : > { %16895 = vmatprep.subr.bf16.mxu1 %v18127_v24  ;;  %16933 = vmatprep.subr.bf16.mxu0 %v18128_v28  ;;  %22245 = vst [vmem:[#allocation41_spill] sm:$0xff] %v21453_v45  ;;  %v18164_v24 = vld [vmem:[#allocation3 + $0x998] sm:$0xff]  }
 0x5b2   : > { %8014 = vmatmul.mubr.bf16.gmra.mxu1 %v7363_v11 }
 0x5b3   : > { %16896 = vmatpush3.bf16.msra.mxu1 %v18129_v48  ;;  %8119 = vmatprep.mubr.bf16.mxu1 %v7341_v57  ;;  %v18166_v48 = vld [vmem:[#allocation3 + $0x9d0] sm:$0xff]  }
 0x5b4   : > { %16934 = vmatpush3.bf16.msra.mxu0 %v18130_v17  ;;  %16897 = vmatprep.subr.bf16.mxu1 %v18131_v50  ;;  %v18167_v57 = vld [vmem:[#allocation3 + $0x910] sm:$0xff]  }
 0x5b5   : > { %16935 = vmatprep.subr.bf16.mxu0 %v18132_v58  ;;  %v18168_v58 = vld [vmem:[#allocation3 + $0x990] sm:$0xff]  }
 0x5b7   : > { %8079 = vmatmul.mubr.bf16.gmra.mxu0 %v7365_v35  ;;  %16898 = vmatpush3.bf16.msra.mxu1 %v18133_v42 }
 0x5b8   : > { %16936 = vmatpush3.bf16.msra.mxu0 %v18134_v39  ;;  %8184 = vmatprep.mubr.bf16.mxu0 %v21329_v10  ;;  %v7359_v10 = vpack.c.bf16 %v21380_v44, %v21358_v8  ;;  %v18149_v8 = vld [vmem:[#allocation3 + $0x970] sm:$0xff]   ;;  %v18158_v44 = vld [vmem:[#allocation3 + $0x9e0] sm:$0xff]   ;;  %v18169_v39 = vld [vmem:[#allocation3 + $0x948] sm:$0xff]  }
 0x5b9   : > { %16937 = vmatprep.subr.bf16.mxu0 %v18135_v20  ;;  %17677 = vmatprep.subr.bf16.mxu1 %v18136_v47 }
 0x5ba   : > { %8120 = vmatmul.mubr.bf16.vlgmr.msra.gmra.mxu1 %v7340_v19 }
 0x5bb   : > { %8127 = vmatprep.mubr.bf16.mxu1 %v7350_v63  ;;  %17678 = vmatpush3.bf16.msra.mxu1 %v18136_v47 }
 0x5bc   : > { %16938 = vmatpush3.bf16.msra.mxu0 %v18137_v0  ;;  %17679 = vmatprep.subr.bf16.mxu1 %v18138_v27  ;;  %v18171_v0 = vld [vmem:[#allocation3 + $0x908] sm:$0xff]  }
 0x5bd   : > { %16975 = vmatprep.subr.bf16.mxu0 %v18145_v5 }
 0x5bf   : > { %8185 = vmatmul.mubr.bf16.vlgmr.msra.gmra.mxu0 %v21360_v29  ;;  %17680 = vmatpush3.bf16.msra.mxu1 %v18138_v27  ;;  %v18150_v29 = vld [vmem:[#allocation3 + $0x9f0] sm:$0xff]   ;;  %v18172_v27 = vld [vmem:[#allocation3 + $0x988] sm:$0xff]  }
 0x5c0   : > { %8192 = vmatprep.mubr.bf16.mxu0 %v21369_v25  ;;  %17681 = vmatprep.subr.bf16.mxu1 %v18139_v7  ;;  %v18153_v25 = vld [vmem:[#allocation3 + $0x968] sm:$0xff]  }
 0x5c1   : > { %16976 = vmatpush3.bf16.msra.mxu0 %v18147_v23  ;;  %v21492_v23 = vld [vmem:[#allocation2 + $0xa7] sm:$0xf] }
 0x5c2   : > { %8128 = vmatmul.mubr.bf16.gmra.mxu1 %v7349_v52  ;;  %16977 = vmatprep.subr.bf16.mxu0 %v18149_v8  ;;  %v18174_v52 = vld [vmem:[#allocation3 + $0x9c0] sm:$0xff]   ;;  %22247 = vst [vmem:[#allocation19_spill] sm:$0xff] %v21492_v23  ;;  %9735 = vst [vmem:[#allocation2 + $0xa0] sm:$0xff] %v21362_v49 }
 0x5c3   : > { %8135 = vmatprep.mubr.bf16.mxu1 %v7359_v10  ;;  %17682 = vmatpush3.bf16.msra.mxu1 %v18139_v7  ;;  %v18173_v7 = vld [vmem:[#allocation3 + $0x940] sm:$0xff]  }
 0x5c4   : > { %17683 = vmatprep.subr.bf16.mxu1 %v18140_v43 }
 0x5c5   : > { %16978 = vmatpush3.bf16.msra.mxu0 %v18151_v40 }
 0x5c6   : > { %16979 = vmatprep.subr.bf16.mxu0 %v18153_v25 }
 0x5c7   : > { %8193 = vmatmul.mubr.bf16.gmra.mxu0 %v21391_v56  ;;  %17684 = vmatpush3.bf16.msra.mxu1 %v18140_v43  ;;  %v18162_v56 = vld [vmem:[#allocation3 + $0x9d8] sm:$0xff]  }
 0x5c8   : > { %8200 = vmatprep.mubr.bf16.mxu0 %v21395_v3  ;;  %17685 = vmatprep.subr.bf16.mxu1 %v18141_v54  ;;  %v21450_v3 = vld [vmem:[#allocation2 + $0x8] sm:$0xf] }
 0x5c9   : > { %16980 = vmatpush3.bf16.msra.mxu0 %v18155_v18  ;;  %22244 = vst [vmem:[#allocation42_spill] sm:$0xff] %v21450_v3  ;;  %9716 = vst [vmem:[#allocation2 + $0x8] sm:$0xff] %v21362_v49 }
 0x5ca   : > { %8136 = vmatmul.mubr.bf16.gmra.mxu1 %v7358_v31  ;;  %16981 = vmatprep.subr.bf16.mxu0 %v18157_v61 }
 0x5cb   : > { %8143 = vmatprep.mubr.bf16.mxu1 %v7368_v53  ;;  %17686 = vmatpush3.bf16.msra.mxu1 %v18141_v54  ;;  %v18176_v53 = vld [vmem:[#allocation3 + $0x980] sm:$0xff]  }
 0x5cc   : > { %17687 = vmatprep.subr.bf16.mxu1 %v18142_v38 }
 0x5cd   : > { %16982 = vmatpush3.bf16.msra.mxu0 %v18159_v13 }
 0x5ce   : > { %16983 = vmatprep.subr.bf16.mxu0 %v18161_v36 }
 0x5cf   : > { %8201 = vmatmul.mubr.bf16.gmra.mxu0 %v7363_v11  ;;  %17688 = vmatpush3.bf16.msra.mxu1 %v18142_v38  ;;  %v18175_v38 = vld [vmem:[#allocation3 + $0x900] sm:$0xff]  }
 0x5d0   : > { %8208 = vmatprep.mubr.bf16.mxu0 %v7370_v21  ;;  %17689 = vmatprep.subr.bf16.mxu1 %v18143_v37  ;;  %v18177_v21 = vld [vmem:[#allocation3 + $0xa78] sm:$0xff]  }
 0x5d2   : > { %8144 = vmatmul.mubr.bf16.gmra.mxu1 %v7367_v62  ;;  %v18178_v62 = vld [vmem:[#allocation3 + $0xaf8] sm:$0xff]  }
 0x5d3   : > { %17690 = vmatpush3.bf16.msra.mxu1 %v18143_v37  ;;  %17693 = vmatprep.mubr.bf16.mxu1 %v21387_v34 }
 0x5d4   : > { %17691 = vmatprep.subr.bf16.mxu1 %v18144_v55 }
 0x5d7   : > { %8209 = vmatmul.mubr.bf16.gmra.mxu0 %v7369_v33  ;;  %17692 = vmatpush3.bf16.msra.mxu1 %v18144_v55 }
 0x5d8   : > { %16997 = vmatprep.subr.bf16.mxu1 %v18146_v15  ;;  %v21490_v15 = vld [vmem:[#allocation2 + $0xa8] sm:$0xf] }
 0x5d9   : > { %22246 = vst [vmem:[#allocation17_spill] sm:$0xff] %v21490_v15 }
 0x5da   : > { %17694 = vmatmul.mubr.bf16.vlgmr.msra.gmra.mxu1 %v21401_v2  ;;  %v18163_v2 = vld [vmem:[#allocation3 + $0x918] sm:$0xff]  }
 0x5db   : > { %17697 = vmatprep.mubr.bf16.mxu1 %v7365_v35  ;;  %16998 = vmatpush3.bf16.msra.mxu1 %v18148_v16  ;;  %v18170_v35 = vld [vmem:[#allocation3 + $0x9c8] sm:$0xff]  }
 0x5dc   : > { %16999 = vmatprep.subr.bf16.mxu1 %v18150_v29  ;;  %16984 = vmatpush3.bf16.msra.mxu0 %v18163_v2  ;;  %v21494_v16 = vld [vmem:[#allocation2 + $0xa9] sm:$0xf] }
 0x5dd   : > { %16985 = vmatprep.subr.bf16.mxu0 %v18165_v9  ;;  %22248 = vst [vmem:[#allocation43_spill] sm:$0xff] %v21494_v16  ;;  %9736 = vst [vmem:[#allocation2 + $0xa8] sm:$0xff] %v21362_v49 }
 0x5df   : > { %17000 = vmatpush3.bf16.msra.mxu1 %v18152_v6 }
 0x5e0   : > { %17001 = vmatprep.subr.bf16.mxu1 %v18154_v30  ;;  %16986 = vmatpush3.bf16.msra.mxu0 %v18167_v57 }
 0x5e1   : > { %16987 = vmatprep.subr.bf16.mxu0 %v18169_v39 }
 0x5e2   : > { %17698 = vmatmul.mubr.bf16.gmra.mxu1 %v7371_v41 }
 0x5e3   : > { %17002 = vmatpush3.bf16.msra.mxu1 %v18156_v26 }
 0x5e4   : > { %17003 = vmatprep.subr.bf16.mxu1 %v18158_v44  ;;  %16988 = vmatpush3.bf16.msra.mxu0 %v18171_v0 }
 0x5e5   : > { %16989 = vmatprep.subr.bf16.mxu0 %v18173_v7 }
 0x5e7   : > { %17004 = vmatpush3.bf16.msra.mxu1 %v18160_v60 }
 0x5e8   : > { %17005 = vmatprep.subr.bf16.mxu1 %v18162_v56  ;;  %16990 = vmatpush3.bf16.msra.mxu0 %v18175_v38 }
 0x5e9   : > { %17019 = vmatprep.subr.bf16.mxu0 %v18177_v21 }
 0x5eb   : > { %17006 = vmatpush3.bf16.msra.mxu1 %v18164_v24 }
 0x5ec   : > { %17007 = vmatprep.subr.bf16.mxu1 %v18166_v48 }
 0x5ef   : > { %17008 = vmatpush3.bf16.msra.mxu1 %v18168_v58 }
 0x5f0   : > { %17009 = vmatprep.subr.bf16.mxu1 %v18170_v35 }
 0x5f3   : > { %17010 = vmatpush3.bf16.msra.mxu1 %v18172_v27 }
 0x5f4   : > { %17011 = vmatprep.subr.bf16.mxu1 %v18174_v52 }
 0x5f7   : > { %17012 = vmatpush3.bf16.msra.mxu1 %v18176_v53 }
 0x5f8   : > { %17041 = vmatprep.subr.bf16.mxu1 %v18178_v62 }
 0x65a   : > { %v21438_v32 = vpop.f32.mrf.mxu1 }
 0x65c   : > { %v21440_v51 = vpop.f32.mrf.mxu1 }
 0x65d   : > { %v16821_v7 = vadd.f32 %v21440_v51, %v21438_v32 }
 0x65e   : > { %v21442_v34 = vpop.f32.mrf.mxu1 }
 0x65f   : > { %v21444_v4 = vpop.f32.mrf.mxu0 }
 0x660   : > { %v21448_v12 = vpop.f32.mrf.mxu1 }
 0x661   : > { %v21455_v59 = vpop.f32.mrf.mxu0  ;;  %v16824_v53 = vadd.f32 %v21448_v12, %v21442_v34 }
 0x662   : > { %v21458_v14 = vpop.f32.mrf.mxu1  ;;  %v16861_v21 = vadd.f32 %v21455_v59, %v21444_v4 }
 0x663   : > { %v21460_v28 = vpop.f32.mrf.mxu0 }
 0x664   : > { %v21462_v11 = vpop.f32.mrf.mxu1 }
 0x665   : > { %v21464_v17 = vpop.f32.mrf.mxu0 }
 0x666   : > { %v21466_v50 = vpop.f32.mrf.mxu1 }
 0x667   : > { %v21468_v42 = vpop.f32.mrf.mxu0 }
 0x668   : > { %v21470_v20 = vpop.f32.mrf.mxu1 }
 0x669   : > { %v21472_v47 = vpop.f32.mrf.mxu0 }
 0x66a   : > { %v16831_v19 = vpop.f32.mrf.mxu1  ;;  %v16867_v32 = vadd.f32 %v21472_v47, %v21468_v42 }
 0x66b   : > { %v21474_v63 = vpop.f32.mrf.mxu0 }
 0x66c   : > { %v16832_v43 = vpop.f32.mrf.mxu1 }
 0x66d   : > { %v21476_v10 = vadd.f32 %v16832_v43, %v16831_v19  ;;  %v21478_v54 = vpop.f32.mrf.mxu0  ;;  %v15129_v43 = vld [vmem:[#allocation5 + $0x3] ss:$0 sm:$0xff] }
 0x66e   : > { %v16834_v31 = vpop.f32.mrf.mxu1  ;;  %v7992_v16 = vadd.f32 %v16821_v7, %v15129_v43  ;;  %v16870_v34 = vadd.f32 %v21478_v54, %v21474_v63  ;;  %v7995_v59 = vadd.f32 %v16824_v53, %v15129_v43 }
 0x66f   : > { %v21480_v37 = vpop.f32.mrf.mxu0  ;;  %v8008_v3 = vadd.f32 %v21476_v10, %v15129_v43 }
 0x670   : > { %v16835_v55 = vpop.f32.mrf.mxu1  ;;  %v8057_v15 = vadd.f32 %v16861_v21, %v7992_v16 }
 0x671   : > { %v21482_v22 = vadd.f32 %v16835_v55, %v16834_v31  ;;  %v21484_v33 = vpop.f32.mrf.mxu0  ;;  %v16827_v31 = vadd.f32 %v21462_v11, %v21458_v14  ;;  %v16830_v55 = vadd.f32 %v21470_v20, %v21466_v50  ;;  %v16864_v14 = vadd.f32 %v21464_v17, %v21460_v28 }
 0x672   : > { %v21486_v1 = vpop.f32.mrf.mxu1  ;;  %v16873_v28 = vadd.f32 %v21484_v33, %v21480_v37 }
 0x673   : > { %v21488_v41 = vpop.f32.mrf.mxu0  ;;  %v8000_v23 = vadd.f32 %v16827_v31, %v15129_v43  ;;  %v8003_v20 = vadd.f32 %v16830_v55, %v15129_v43  ;;  %v8060_v7 = vadd.f32 %v16864_v14, %v7995_v59  ;;  %v8011_v53 = vadd.f32 %v21482_v22, %v15129_v43 }
 0x674   : > { %v16838_v5 = vpop.f32.mrf.mxu1 }
 0x675   : > { %v21496_v8 = vpop.f32.mrf.mxu0  ;;  %v8065_v45 = vadd.f32 %v16867_v32, %v8000_v23  ;;  %v16839_v17 = vadd.f32 %v16838_v5, %v21486_v1  ;;  %v8068_v54 = vadd.f32 %v16870_v34, %v8003_v20  ;;  %v22249_v20 = vld [vmem:[#allocation23_spill] sm:$0xff] }
 0x676   : > { %v16840_v29 = vpop.f32.mrf.mxu1  ;;  %v16876_v23 = vadd.f32 %v21496_v8, %v21488_v41 }
 0x677   : > { %v21500_v40 = vpop.f32.mrf.mxu0 }
 0x678   : > { %v16841_v6 = vpop.f32.mrf.mxu1 }
 0x679   : > { %v16878_v25 = vpop.f32.mrf.mxu0 }
 0x67a   : > { %v16899_v30 = vpop.f32.mrf.mxu1 }
 0x67b   : > { %v21502_v18 = vpop.f32.mrf.mxu0 }
 0x67c   : > { %v16900_v26 = vpop.f32.mrf.mxu1 }
 0x67d   : > { %v21504_v61 = vpop.f32.mrf.mxu0  ;;  %v16901_v42 = vadd.f32 %v16900_v26, %v16899_v30  ;;  %v16842_v30 = vadd.f32 %v16841_v6, %v16840_v29  ;;  %v21543_v6 = vadd.f32 %v16876_v23, %v8011_v53 }
 0x67e   : > { %v16902_v44 = vpop.f32.mrf.mxu1 }
 0x67f   : > { %v16939_v13 = vpop.f32.mrf.mxu0  ;;  %v8122_v37 = vadd.f32 %v16901_v42, %v8057_v15 }
 0x680   : > { %v16903_v60 = vpop.f32.mrf.mxu1 }
 0x681   : > { %v16940_v36 = vpop.f32.mrf.mxu0  ;;  %v16904_v26 = vadd.f32 %v16903_v60, %v16902_v44 }
 0x682   : > { %v16905_v56 = vpop.f32.mrf.mxu1 }
 0x683   : > { %v16942_v2 = vpop.f32.mrf.mxu0  ;;  %v8125_v15 = vadd.f32 %v16904_v26, %v8060_v7 }
 0x684   : > { %v16906_v24 = vpop.f32.mrf.mxu1 }
 0x685   : > { %v16943_v9 = vpop.f32.mrf.mxu0  ;;  %v16907_v4 = vadd.f32 %v16906_v24, %v16905_v56  ;;  %v16941_v56 = vadd.f32 %v16940_v36, %v16939_v13  ;;  %v8016_v13 = vadd.f32 %v16839_v17, %v15129_v43 }
 0x686   : > { %v16908_v48 = vpop.f32.mrf.mxu1  ;;  %v16944_v36 = vadd.f32 %v16943_v9, %v16942_v2 }
 0x687   : > { %v16945_v57 = vpop.f32.mrf.mxu0  ;;  %v8130_v24 = vadd.f32 %v16907_v4, %v8065_v45  ;;  %v16882_v45 = vadd.f32 %v21504_v61, %v21502_v18  ;;  %v8187_v29 = vadd.f32 %v16941_v56, %v8122_v37 }
 0x688   : > { %v16909_v58 = vpop.f32.mrf.mxu1  ;;  %v8190_v9 = vadd.f32 %v16944_v36, %v8125_v15 }
 0x689   : > { %v16946_v39 = vpop.f32.mrf.mxu0  ;;  %v16910_v31 = vadd.f32 %v16909_v58, %v16908_v48 }
 0x68a   : > { %v16911_v35 = vpop.f32.mrf.mxu1  ;;  %v16947_v47 = vadd.f32 %v16946_v39, %v16945_v57  ;;  %v16879_v57 = vadd.f32 %v16878_v25, %v21500_v40  ;;  %v8073_v39 = vadd.f32 %v16873_v28, %v8008_v3  ;;  %v8019_v40 = vadd.f32 %v16842_v30, %v15129_v43 }
 0x68b   : > { %v16948_v19 = vpop.f32.mrf.mxu0  ;;  %v8133_v48 = vadd.f32 %v16910_v31, %v8068_v54 }
 0x68c   : > { %v16912_v0 = vpop.f32.mrf.mxu1  ;;  %v8195_v5 = vadd.f32 %v16947_v47, %v8130_v24  ;;  %v8081_v60 = vadd.f32 %v16879_v57, %v8016_v13  ;;  %v8084_v21 = vadd.f32 %v16882_v45, %v8019_v40 }
 0x68d   : > { %v16949_v27 = vpop.f32.mrf.mxu0  ;;  %v16913_v58 = vadd.f32 %v16912_v0, %v16911_v35 }
 0x68e   : > { %v21508_v52 = vpop.f32.mrf.mxu1  ;;  %v16950_v33 = vadd.f32 %v16949_v27, %v16948_v19 }
 0x68f   : > { %v21512_v38 = vpop.f32.mrf.mxu0  ;;  %v21550_v35 = vadd.f32 %v16913_v58, %v8073_v39 }
 0x690   : > { %v21518_v62 = vpop.f32.mrf.mxu1  ;;  %v8198_v27 = vadd.f32 %v16950_v33, %v8133_v48 }
 0x691   : > { %v21524_v51 = vpop.f32.mrf.mxu0  ;;  %v21554_v14 = vadd.f32 %v21518_v62, %v21508_v52 }
 0x692   : > { %v16917_v11 = vpop.f32.mrf.mxu1 }
 0x693   : > { %v21530_v12 = vpop.f32.mrf.mxu0 }
 0x694   : > { %v16918_v50 = vpop.f32.mrf.mxu1 }
 0x695   : > { %v16955_v46 = vpop.f32.mrf.mxu0  ;;  %v16919_v25 = vadd.f32 %v16918_v50, %v16917_v11  ;;  %v21558_v11 = vadd.f32 %v21524_v51, %v21512_v38 }
 0x696   : > { %v16920_v63 = vpop.f32.mrf.mxu1  ;;  %v21561_v4 = vadd.f32 %v16955_v46, %v21530_v12 }
 0x697   : > { %v16957_v16 = vpop.f32.mrf.mxu0  ;;  %v8146_v34 = vadd.f32 %v16919_v25, %v8081_v60 }
 0x698   : > { %v16921_v10 = vpop.f32.mrf.mxu1 }
 0x699   : > { %v16958_v1 = vpop.f32.mrf.mxu0  ;;  %v16922_v18 = vadd.f32 %v16921_v10, %v16920_v63 }
 0x69a   : > { %v17695_v22 = vpop.f32.mrf.mxu1  ;;  %v16959_v61 = vadd.f32 %v16958_v1, %v16957_v16 }
 0x69b   : > { %v16960_v41 = vpop.f32.mrf.mxu0  ;;  %v8260_v8 = vadd.f32 %v17695_v22, %v8195_v5  ;;  %v21565_v28 = vadd.f32 %v16922_v18, %v8084_v21 }
 0x69c   : > { %v8251_v44 = vpop.f32.mrf.mxu1  ;;  %v8211_v17 = vadd.f32 %v16959_v61, %v8146_v34 }
 0x69d   : > { %v8284_v3 = vmul.f32 0.01, %v8260_v8  ;;  %v8252_v19 = vadd.f32 %v8251_v44, %v8187_v29  ;;  %v16961_v43 = vpop.f32.mrf.mxu0 }
 0x69e   : > { %v17696_v2 = vpop.f32.mrf.mxu1  ;;  %v21567_v52 = vadd.f32 %v16961_v43, %v16960_v41 }
 0x69f   : > { %v8292_v0 = vmax.f32 %v8260_v8, %v8284_v3  ;;  %v8282_v55 = vmul.f32 0.01, %v8252_v19  ;;  %v8263_v32 = vadd.f32 %v17696_v2, %v8198_v27 }
 0x6a0   : > { %v8254_v59 = vpop.f32.mrf.mxu1 }
 0x6a1   : > { %8300 = vst [vmem:[%s21548_s8 + $0x10] sm:$0xff] %v8292_v0  ;;  %v8348_v50 = vcombine.high %v8292_v0, %v8292_v0  ;;  %v8355_v42 = vrot.slane %v8292_v0, %v22249_v20  ;;  %v8290_v47 = vmax.f32 %v8252_v19, %v8282_v55  ;;  %v8285_v7 = vmul.f32 0.01, %v8263_v32 }
 0x6a2   : > { %v8255_v62 = vadd.f32 %v8254_v59, %v8190_v9  ;;  %v17699_v38 = vpop.f32.mrf.mxu1 }
 0x6a3   : > { %v8362_v51 = vrot.slane %v8348_v50, %v22249_v20  ;;  %v8363_v63 = vcombine.high %v8355_v42, %v8355_v42  ;;  %v15206_v46 = vrot.slane %v8355_v42, 9  ;;  %8298 = vst [vmem:[%s21548_s8] sm:$0xff] %v8290_v47  ;;  %v8314_v12 = vcombine.high %v8290_v47, %v8290_v47 }
 0x6a4   : > { %v8321_v54 = vrot.slane %v8290_v47, %v22249_v20  ;;  %v8293_v56 = vmax.f32 %v8263_v32, %v8285_v7  ;;  %v8283_v24 = vmul.f32 0.01, %v8255_v62  ;;  %v8276_v31 = vadd.f32 %v17699_v38, %v8211_v17  ;;  %v22250_v7 = vld [vmem:[#allocation47_spill] sm:$0xff]  ;;  %v8267_v17 = vpop.f32.mrf.mxu1 }
 0x6a5   : > { %v8364_v16 = vcombine.high %v8362_v51, %v8362_v51  ;;  %v15207_v53 = vrot.slane %v8363_v63, 9  ;;  %v15208_v23 = vrot.slane %v8362_v51, 9  ;;  %v8534_v30 = vmax.f32 %v8355_v42, %v15206_v46 }
 0x6a6   : > { %v8328_v26 = vrot.slane %v8314_v12, %v22249_v20  ;;  %v8329_v10 = vcombine.high %v8321_v54, %v8321_v54  ;;  %v15202_v57 = vrot.slane %v8321_v54, 9  ;;  %8301 = vst [vmem:[%s21548_s8 + $0x18] sm:$0xff] %v8293_v56  ;;  %v8365_v37 = vcombine.high %v8293_v56, %v8293_v56 }
 0x6a7   : > { %v15209_v33 = vrot.slane %v8364_v16, 9  ;;  %v8535_v1 = vmax.f32 %v8363_v63, %v15207_v53  ;;  %v8536_v5 = vmax.f32 %v8362_v51, %v15208_v23  ;;  %v8372_v39 = vrot.slane %v8293_v56, %v22249_v20 }
 0x6a8   : > { %v8330_v13 = vcombine.high %v8328_v26, %v8328_v26  ;;  %v15203_v45 = vrot.slane %v8329_v10, 9  ;;  %v15204_v36 = vrot.slane %v8328_v26, 9  ;;  %v8530_v22 = vmax.f32 %v8321_v54, %v15202_v57 }
 0x6a9   : > { %v8537_v48 = vmax.f32 %v8364_v16, %v15209_v33  ;;  %v8379_v58 = vrot.slane %v8365_v37, %v22249_v20  ;;  %v8380_v41 = vcombine.high %v8372_v39, %v8372_v39  ;;  %v15222_v8 = vrot.slane %v8372_v39, 9  ;;  %v17700_v37 = vpop.f32.mrf.mxu1 }
 0x6aa   : > { %v15205_v29 = vrot.slane %v8330_v13, 9  ;;  %v8531_v40 = vmax.f32 %v8329_v10, %v15203_v45  ;;  %v8532_v15 = vmax.f32 %v8328_v26, %v15204_v36  ;;  %v8291_v25 = vmax.f32 %v8255_v62, %v8283_v24 }
 0x6ab   : > { %v8381_v44 = vcombine.high %v8379_v58, %v8379_v58  ;;  %v15223_v60 = vrot.slane %v8380_v41, 9  ;;  %v15224_v3 = vrot.slane %v8379_v58, 9  ;;  %v8598_v19 = vmax.f32 %v8372_v39, %v15222_v8 }
 0x6ac   : > { %v8533_v27 = vmax.f32 %v8330_v13, %v15205_v29  ;;  %8299 = vst [vmem:[%s21548_s8 + $0x8] sm:$0xff] %v8291_v25  ;;  %v8331_v21 = vcombine.high %v8291_v25, %v8291_v25  ;;  %v8338_v18 = vrot.slane %v8291_v25, %v22249_v20  ;;  %v8288_v61 = vmul.f32 0.01, %v8276_v31 }
 0x6ad   : > { %v15225_v2 = vrot.slane %v8381_v44, 9  ;;  %v8599_v9 = vmax.f32 %v8380_v41, %v15223_v60  ;;  %v8600_v0 = vmax.f32 %v8379_v58, %v15224_v3  ;;  %v8614_v43 = vmax.f32 %v8534_v30, %v8598_v19 }
 0x6ae   : > { %v8345_v55 = vrot.slane %v8331_v21, %v22249_v20  ;;  %v8346_v32 = vcombine.high %v8338_v18, %v8338_v18  ;;  %v15218_v34 = vrot.slane %v8338_v18, 9  ;;  %v8296_v59 = vmax.f32 %v8276_v31, %v8288_v61 }
 0x6af   : > { %v8601_v50 = vmax.f32 %v8381_v44, %v15225_v2  ;;  %v8615_v42 = vmax.f32 %v8535_v1, %v8599_v9  ;;  %v8616_v47 = vmax.f32 %v8536_v5, %v8600_v0  ;;  %v8733_v62 = vrot.slane %v8614_v43, %v22250_v7 }
 0x6b0   : > { %v8347_v38 = vcombine.high %v8345_v55, %v8345_v55  ;;  %v15219_v51 = vrot.slane %v8346_v32, 9  ;;  %v15220_v63 = vrot.slane %v8345_v55, 9  ;;  %v8594_v46 = vmax.f32 %v8338_v18, %v15218_v34  ;;  %8304 = vst [vmem:[%s21548_s8 + $0x30] sm:$0xff] %v8296_v59 }
 0x6b1   : > { %v8617_v12 = vmax.f32 %v8537_v48, %v8601_v50  ;;  %v8737_v54 = vrot.slane %v8615_v42, %v22250_v7  ;;  %v8741_v56 = vrot.slane %v8616_v47, %v22250_v7  ;;  %v8416_v24 = vcombine.high %v8296_v59, %v8296_v59 }
 0x6b2   : > { %v15221_v16 = vrot.slane %v8347_v38, 9  ;;  %v8595_v53 = vmax.f32 %v8346_v32, %v15219_v51  ;;  %v8596_v31 = vmax.f32 %v8345_v55, %v15220_v63  ;;  %v8610_v23 = vmax.f32 %v8530_v22, %v8594_v46 }
 0x6b3   : > { %v8745_v30 = vrot.slane %v8617_v12, %v22250_v7  ;;  %v8781_v26 = vsel %vm6071_vm0, %v8737_v54, %v8733_v62  ;;  %v8423_v10 = vrot.slane %v8296_v59, %v22249_v20  ;;  %v8430_v57 = vrot.slane %v8416_v24, %v22249_v20 }
 0x6b4   : > { %v8782_v33 = vsel %vm6073_vm1, %v8741_v56, %v8781_v26  ;;  %v8597_v1 = vmax.f32 %v8347_v38, %v15221_v16  ;;  %v8611_v5 = vmax.f32 %v8531_v40, %v8595_v53  ;;  %v8612_v39 = vmax.f32 %v8532_v15, %v8596_v31 }
 0x6b5   : > { %v8141_v13 = vadd.f32 %v21554_v14, %v21543_v6  ;;  %v8783_v45 = vsel %vm6075_vm2, %v8745_v30, %v8782_v33  ;;  %v8203_v36 = vadd.f32 %v21558_v11, %v21550_v35  ;;  %v8214_v22 = vadd.f32 %v21567_v52, %v21565_v28  ;;  %v8270_v14 = vpop.f32.mrf.mxu1 }
 0x6b6   : > { %8795 = vst [vmem:[#allocation2 + $0x48] sm:$0xf] %v8783_v45  ;;  %v8613_v48 = vmax.f32 %v8533_v27, %v8597_v1  ;;  %v8717_v58 = vrot.slane %v8610_v23, %v22250_v7  ;;  %v8721_v41 = vrot.slane %v8611_v5, %v22250_v7  ;;  %v8725_v8 = vrot.slane %v8612_v39, %v22250_v7 }
 0x6b7   : > { %v8431_v29 = vcombine.high %v8423_v10, %v8423_v10  ;;  %v8268_v40 = vadd.f32 %v8267_v17, %v8203_v36  ;;  %v8206_v6 = vadd.f32 %v21561_v4, %v8141_v13  ;;  %v8432_v11 = vcombine.high %v8430_v57, %v8430_v57 }
 0x6b8   : > { %v8729_v15 = vrot.slane %v8613_v48, %v22250_v7  ;;  %v8778_v35 = vsel %vm6071_vm0, %v8721_v41, %v8717_v58  ;;  %v8279_v25 = vadd.f32 %v17700_v37, %v8214_v22  ;;  %v15214_v19 = vrot.slane %v8423_v10, 9 }
 0x6b9   : > { %v8779_v28 = vsel %vm6073_vm1, %v8725_v8, %v8778_v35  ;;  %v8286_v44 = vmul.f32 0.01, %v8268_v40  ;;  %v8271_v3 = vadd.f32 %v8270_v14, %v8206_v6  ;;  %v15215_v27 = vrot.slane %v8431_v29, 9 }
 0x6ba   : > { %v8780_v52 = vsel %vm6075_vm2, %v8729_v15, %v8779_v28  ;;  %v8289_v60 = vmul.f32 0.01, %v8279_v25  ;;  %v15216_v4 = vrot.slane %v8430_v57, 9  ;;  %v15217_v21 = vrot.slane %v8432_v11, 9 }
 0x6bb   : > { %8794 = vst [vmem:[#allocation2 + $0x28] sm:$0xf] %v8780_v52  ;;  %v8294_v18 = vmax.f32 %v8268_v40, %v8286_v44  ;;  %v8287_v2 = vmul.f32 0.01, %v8271_v3  ;;  %v8542_v62 = vmax.f32 %v8423_v10, %v15214_v19  ;;  %v8543_v17 = vmax.f32 %v8431_v29, %v15215_v27 }
 0x6bc   : > { %v8297_v61 = vmax.f32 %v8279_v25, %v8289_v60  ;;  %v8544_v38 = vmax.f32 %v8430_v57, %v15216_v4  ;;  %v8545_v53 = vmax.f32 %v8432_v11, %v15217_v21  ;;  %v21645_v11 = vld [vmem:[#allocation2 + $0x18] sm:$0xff] }
 0x6bd   : > { %v21603_v9 = vld [vmem:[#allocation2 + $0x48] sm:$0xf]  ;;  %8302 = vst [vmem:[%s21548_s8 + $0x20] sm:$0xff] %v8294_v18  ;;  %v8382_v55 = vcombine.high %v8294_v18, %v8294_v18  ;;  %v8389_v32 = vrot.slane %v8294_v18, %v22249_v20  ;;  %v8295_v51 = vmax.f32 %v8271_v3, %v8287_v2 }
 0x6be   : > { %v21605_v0 = vld [vmem:[#allocation2 + $0x47] sm:$0xf]  ;;  %8305 = vst [vmem:[%s21548_s8 + $0x38] sm:$0xff] %v8297_v61  ;;  %v8433_v34 = vcombine.high %v8297_v61, %v8297_v61  ;;  %v8440_v59 = vrot.slane %v8297_v61, %v22249_v20 }
 0x6bf   : > { %v21607_v43 = vld [vmem:[#allocation2 + $0x47] sm:$0xf]  ;;  %v8396_v54 = vrot.slane %v8382_v55, %v22249_v20  ;;  %v8397_v56 = vcombine.high %v8389_v32, %v8389_v32  ;;  %v15210_v24 = vrot.slane %v8389_v32, 9  ;;  %8303 = vst [vmem:[%s21548_s8 + $0x28] sm:$0xff] %v8295_v51  ;;  %v8399_v30 = vcombine.high %v8295_v51, %v8295_v51 }
 0x6c0   : > { %v21613_v50 = vld [vmem:[#allocation2 + $0x49] sm:$0xf]  ;;  %v8447_v16 = vrot.slane %v8433_v34, %v22249_v20  ;;  %v8448_v31 = vcombine.high %v8440_v59, %v8440_v59  ;;  %v15230_v23 = vrot.slane %v8440_v59, 9  ;;  %v8406_v37 = vrot.slane %v8295_v51, %v22249_v20 }
 0x6c1   : > { %v21615_v42 = vld [vmem:[#allocation2 + $0x49] sm:$0xf]  ;;  %v8398_v26 = vcombine.high %v8396_v54, %v8396_v54  ;;  %v15211_v10 = vrot.slane %v8397_v56, 9  ;;  %v15212_v57 = vrot.slane %v8396_v54, 9  ;;  %v8538_v58 = vmax.f32 %v8389_v32, %v15210_v24 }
 0x6c2   : > { %v21617_v47 = vld [vmem:[#allocation2 + $0x48] sm:$0xf]  ;;  %v8449_v5 = vcombine.high %v8447_v16, %v8447_v16  ;;  %v15231_v39 = vrot.slane %v8448_v31, 9  ;;  %v15232_v13 = vrot.slane %v8447_v16, 9  ;;  %v8606_v45 = vmax.f32 %v8440_v59, %v15230_v23 }
 0x6c3   : > { %v21619_v63 = vld [vmem:[#allocation2 + $0x48] sm:$0xf]  ;;  %v15213_v48 = vrot.slane %v8398_v26, 9  ;;  %v8539_v41 = vmax.f32 %v8397_v56, %v15211_v10  ;;  %v8413_v8 = vrot.slane %v8399_v30, %v22249_v20  ;;  %v8540_v25 = vmax.f32 %v8396_v54, %v15212_v57 }
 0x6c4   : > { %v21621_v46 = vld [vmem:[#allocation2 + $0x47] sm:$0xf]  ;;  %v15233_v6 = vrot.slane %v8449_v5, 9  ;;  %v8607_v14 = vmax.f32 %v8448_v31, %v15231_v39  ;;  %v8608_v15 = vmax.f32 %v8447_v16, %v15232_v13  ;;  %v8622_v35 = vmax.f32 %v8542_v62, %v8606_v45 }
 0x6c5   : > { %v21623_v12 = vld [vmem:[#allocation2 + $0x49] sm:$0xf]  ;;  %9723 = vst [vmem:[#allocation2 + $0x40] sm:$0xff] %v21362_v49  ;;  %v8414_v28 = vcombine.high %v8406_v37, %v8406_v37  ;;  %v8415_v52 = vcombine.high %v8413_v8, %v8413_v8  ;;  %v15226_v44 = vrot.slane %v8406_v37, 9  ;;  %v8541_v60 = vmax.f32 %v8398_v26, %v15213_v48 }
 0x6c6   : > { %9724 = vst [vmem:[#allocation2 + $0x48] sm:$0xff] %v21362_v49  ;;  %v21631_v33 = vld [vmem:[#allocation2 + $0x28] sm:$0xf]  ;;  %v8609_v3 = vmax.f32 %v8449_v5, %v15233_v6  ;;  %v8623_v19 = vmax.f32 %v8543_v17, %v8607_v14  ;;  %v15228_v4 = vrot.slane %v8413_v8, 9  ;;  %v8765_v2 = vrot.slane %v8622_v35, %v22250_v7 }
 0x6c7   : > { %v21633_v1 = vld [vmem:[#allocation2 + $0x27] sm:$0xf]  ;;  %v15227_v27 = vrot.slane %v8414_v28, 9  ;;  %v15229_v21 = vrot.slane %v8415_v52, 9  ;;  %v8602_v18 = vmax.f32 %v8406_v37, %v15226_v44 }
 0x6c8   : > { %v21635_v36 = vld [vmem:[#allocation2 + $0x27] sm:$0xf]  ;;  %v8625_v61 = vmax.f32 %v8545_v53, %v8609_v3  ;;  %v8769_v55 = vrot.slane %v8623_v19, %v22250_v7  ;;  %v8604_v59 = vmax.f32 %v8413_v8, %v15228_v4  ;;  %v22251_v8 = vld [vmem:[#allocation42_spill] sm:$0xff] }
 0x6c9   : > { %v21637_v22 = vld [vmem:[#allocation2 + $0x29] sm:$0xf]  ;;  %9719 = vst [vmem:[#allocation2 + $0x20] sm:$0xff] %v21362_v49  ;;  %v8624_v49 = vmax.f32 %v8544_v38, %v8608_v15  ;;  %v8603_v34 = vmax.f32 %v8414_v28, %v15227_v27  ;;  %v8605_v62 = vmax.f32 %v8415_v52, %v15229_v21  ;;  %v8618_v51 = vmax.f32 %v8538_v58, %v8602_v18  ;;  %v22252_v52 = vld [vmem:[#allocation38_spill] sm:$0xff] }
 0x6ca   : > { %v21641_v29 = vld [vmem:[#allocation2 + $0x29] sm:$0xf]  ;;  %v8777_v54 = vrot.slane %v8625_v61, %v22250_v7  ;;  %v8787_v17 = vsel %vm6071_vm0, %v8769_v55, %v8765_v2  ;;  %v8620_v24 = vmax.f32 %v8540_v25, %v8604_v59  ;;  %v8846_v6 = vcombine.low %v22251_v8, %v21631_v33  ;;  %v18179_v2 = vld [vmem:[#allocation3 + $0xa38] sm:$0xff]   ;;  %v18182_v59 = vld [vmem:[#allocation3 + $0xaf0] sm:$0xff]  }
 0x6cb   : > { %v21643_v40 = vld [vmem:[#allocation2 + $0x28] sm:$0xf]  ;;  %v8773_v32 = vrot.slane %v8624_v49, %v22250_v7  ;;  %v8619_v56 = vmax.f32 %v8539_v41, %v8603_v34  ;;  %v8621_v16 = vmax.f32 %v8541_v60, %v8605_v62  ;;  %v8749_v31 = vrot.slane %v8618_v51, %v22250_v7  ;;  %v18180_v55 = vld [vmem:[#allocation3 + $0xab8] sm:$0xff]   ;;  %v18181_v34 = vld [vmem:[#allocation3 + $0xa70] sm:$0xff]  }
 0x6cc   : > { %9720 = vst [vmem:[#allocation2 + $0x28] sm:$0xff] %v21645_v11  ;;  %v8757_v30 = vrot.slane %v8620_v24, %v22250_v7  ;;  %v8862_v15 = vcombine.low %v21633_v1, %v21605_v0  ;;  %v8838_v44 = vcombine.low %v22252_v52, %v21635_v36  ;;  %v22253_v27 = vld [vmem:[#allocation41_spill] sm:$0xff]  ;;  %v18189_v24 = vld [vmem:[#allocation3 + $0xa60] sm:$0xff]  }
 0x6cd   : > { %v8788_v38 = vsel %vm6073_vm1, %v8773_v32, %v8787_v17  ;;  %v8753_v23 = vrot.slane %v8619_v56, %v22250_v7  ;;  %v8761_v26 = vrot.slane %v8621_v16, %v22250_v7  ;;  %v8854_v4 = vcombine.low %v22253_v27, %v21637_v22  ;;  %v18184_v17 = vld [vmem:[#allocation3 + $0xab0] sm:$0xff]   ;;  %v18186_v56 = vld [vmem:[#allocation3 + $0xae8] sm:$0xff]   ;;  %v18190_v16 = vld [vmem:[#allocation3 + $0xae0] sm:$0xff]  }
 0x6ce   : > { %v8789_v53 = vsel %vm6075_vm2, %v8777_v54, %v8788_v38  ;;  %v18183_v54 = vld [vmem:[#allocation3 + $0xa30] sm:$0xff]   ;;  %v18185_v38 = vld [vmem:[#allocation3 + $0xa68] sm:$0xff]  }
 0x6cf   : > { %8797 = vst [vmem:[#allocation2 + $0x88] sm:$0xf] %v8789_v53  ;;  %v8784_v10 = vsel %vm6071_vm0, %v8753_v23, %v8749_v31  ;;  %v18191_v53 = vld [vmem:[#allocation3 + $0xa20] sm:$0xff]   ;;  %v18193_v23 = vld [vmem:[#allocation3 + $0xa58] sm:$0xff]   ;;  %v18203_v8 = vld [vmem:[#allocation3 + $0xa08] sm:$0xff]  }
 0x6d0   : > { %v8785_v57 = vsel %vm6073_vm1, %v8757_v30, %v8784_v10  ;;  %v18192_v31 = vld [vmem:[#allocation3 + $0xaa0] sm:$0xff]   ;;  %v18194_v30 = vld [vmem:[#allocation3 + $0xad8] sm:$0xff]  }
 0x6d1   : > { %v8786_v37 = vsel %vm6075_vm2, %v8761_v26, %v8785_v57  ;;  %v18195_v26 = vld [vmem:[#allocation3 + $0xa18] sm:$0xff]   ;;  %v18197_v57 = vld [vmem:[#allocation3 + $0xa50] sm:$0xff]  }
 0x6d2   : > { %8796 = vst [vmem:[#allocation2 + $0x68] sm:$0xf] %v8786_v37  ;;  %v18196_v10 = vld [vmem:[#allocation3 + $0xa98] sm:$0xff]   ;;  %v18198_v37 = vld [vmem:[#allocation3 + $0xad0] sm:$0xff]  }
 0x6d6   : > { %v8813_v5 = vld [vmem:[#allocation2 + $0x87] sm:$0xf] }
 0x6d7   : > { %v8821_v39 = vld [vmem:[#allocation2 + $0x89] sm:$0xf] }
 0x6d8   : > { %v8828_v13 = vld [vmem:[#allocation2 + $0x88] sm:$0xf] }
 0x6d9   : > { %v21662_v45 = vld [vmem:[#allocation2 + $0x88] sm:$0xf] }
 0x6da   : > { %v21664_v48 = vld [vmem:[#allocation2 + $0x87] sm:$0xf] }
 0x6db   : > { %v21666_v58 = vld [vmem:[#allocation2 + $0x89] sm:$0xf]  ;;  %9731 = vst [vmem:[#allocation2 + $0x80] sm:$0xff] %v21645_v11 }
 0x6dc   : > { %9732 = vst [vmem:[#allocation2 + $0x88] sm:$0xff] %v21645_v11  ;;  %v8805_v41 = vld [vmem:[#allocation2 + $0x68] sm:$0xf] }
 0x6dd   : > { %v8812_v14 = vld [vmem:[#allocation2 + $0x67] sm:$0xf]  ;;  %v8847_v25 = vcombine.low %v21603_v9, %v8805_v41 }
 0x6de   : > { %v8801_v35 = vld [vmem:[#allocation2 + $0x67] sm:$0xf]  ;;  %v8863_v28 = vcombine.low %v8812_v14, %v8813_v5  ;;  %v18199_v5 = vld [vmem:[#allocation3 + $0xa10] sm:$0xff]  }
 0x6df   : > { %v8839_v60 = vcombine.low %v21607_v43, %v8801_v35  ;;  %v8809_v3 = vld [vmem:[#allocation2 + $0x69] sm:$0xf]  ;;  %v8907_v36 = vpack.c.bf16 %v8847_v25, %v8846_v6  ;;  %v18205_v14 = vld [vmem:[#allocation3 + $0xa40] sm:$0xff]  }
 0x6e0   : > { %v8820_v19 = vld [vmem:[#allocation2 + $0x69] sm:$0xf]  ;;  %v8855_v33 = vcombine.low %v21613_v50, %v8809_v3  ;;  %v8909_v61 = vpack.c.bf16 %v8863_v28, %v8862_v15  ;;  %v8878_v50 = vcombine.low %v21641_v29, %v21615_v42  ;;  %v18206_v15 = vld [vmem:[#allocation3 + $0xac0] sm:$0xff]  }
 0x6e1   : > { %v8827_v49 = vld [vmem:[#allocation2 + $0x68] sm:$0xf]  ;;  %v8879_v21 = vcombine.low %v8820_v19, %v8821_v39  ;;  %v8906_v43 = vpack.c.bf16 %v8839_v60, %v8838_v44  ;;  %9532 = vmatprep.mubr.bf16.mxu0 %v8907_v36  ;;  %v18200_v39 = vld [vmem:[#allocation3 + $0xa90] sm:$0xff]   ;;  %v18207_v35 = vld [vmem:[#allocation3 + $0xa00] sm:$0xff]   ;;  %v8870_v44 = vcombine.low %v21643_v40, %v21619_v63 }
 0x6e2   : > { %v8894_v0 = vcombine.low %v21617_v47, %v8827_v49  ;;  %v21682_v1 = vld [vmem:[#allocation2 + $0x68] sm:$0xf]  ;;  %v8908_v22 = vpack.c.bf16 %v8855_v33, %v8854_v4  ;;  %9573 = vmatprep.mubr.bf16.mxu1 %v8909_v61  ;;  %v18208_v25 = vld [vmem:[#allocation3 + $0xa80] sm:$0xff]   ;;  %v18209_v19 = vld [vmem:[#allocation3 + $0xb38] sm:$0xff]  }
 0x6e3   : > { %v21684_v9 = vld [vmem:[#allocation2 + $0x67] sm:$0xf]  ;;  %9533 = vmatmul.mubr.bf16.vlgmr.msra.gmra.mxu0 %v8906_v43  ;;  %v8911_v62 = vpack.c.bf16 %v8879_v21, %v8878_v50  ;;  %v8871_v28 = vcombine.low %v21682_v1, %v21662_v45  ;;  %v22255_v60 = vld [vmem:[#allocation19_spill] sm:$0xff]  ;;  %v18210_v45 = vld [vmem:[#allocation3 + $0xb30] sm:$0xff]  }
 0x6e4   : > { %v21686_v18 = vld [vmem:[#allocation2 + $0x69] sm:$0xf]  ;;  %9727 = vst [vmem:[#allocation2 + $0x60] sm:$0xff] %v21645_v11  ;;  %9574 = vmatmul.mubr.bf16.vlgmr.msra.gmra.mxu1 %v8908_v22  ;;  %17020 = vmatpush3.bf16.msra.mxu0 %v18179_v2  ;;  %v8886_v52 = vcombine.low %v21621_v46, %v21684_v9  ;;  %v8887_v3 = vcombine.low %v21664_v48, %v22255_v60  ;;  %v18212_v46 = vld [vmem:[#allocation3 + $0xb20] sm:$0xff]   ;;  %v18213_v40 = vld [vmem:[#allocation3 + $0xb18] sm:$0xff]  }
 0x6e5   : > { %9728 = vst [vmem:[#allocation2 + $0x68] sm:$0xff] %v21645_v11  ;;  %v22254_v47 = vld [vmem:[#allocation17_spill] sm:$0xff]  ;;  %17042 = vmatpush3.bf16.msra.mxu1 %v18180_v55  ;;  %9614 = vmatprep.mubr.bf16.mxu0 %v8911_v62  ;;  %v8910_v49 = vpack.c.bf16 %v8871_v28, %v8870_v44  ;;  %v18216_v33 = vld [vmem:[#allocation3 + $0xb00] sm:$0xff]   ;;  %v8902_v21 = vcombine.low %v21623_v12, %v21686_v18  ;;  %v18217_v36 = vld [vmem:[#allocation3 + $0xbb8] sm:$0xff]  }
 0x6e6   : > { %v8895_v32 = vcombine.low %v8828_v13, %v22254_v47  ;;  %17021 = vmatprep.subr.bf16.mxu0 %v18181_v34  ;;  %17043 = vmatprep.subr.bf16.mxu1 %v18182_v59  ;;  %v18187_v42 = vld [vmem:[#allocation3 + $0xa28] sm:$0xff]   ;;  %v8912_v27 = vpack.c.bf16 %v8887_v3, %v8886_v52  ;;  %v18214_v48 = vld [vmem:[#allocation3 + $0xb10] sm:$0xff]   ;;  %v18218_v61 = vld [vmem:[#allocation3 + $0xb78] sm:$0xff]  }
 0x6e7   : > { %v18188_v29 = vld [vmem:[#allocation3 + $0xaa8] sm:$0xff]   ;;  %v18219_v43 = vld [vmem:[#allocation3 + $0xc38] sm:$0xff]   ;;  %v18221_v55 = vld [vmem:[#allocation3 + $0xbb0] sm:$0xff]  }
 0x6e8   : > { %v8913_v51 = vpack.c.bf16 %v8895_v32, %v8894_v0  ;;  %17022 = vmatpush3.bf16.msra.mxu0 %v18183_v54  ;;  %v18201_v13 = vld [vmem:[#allocation3 + $0xa48] sm:$0xff]   ;;  %v22256_v0 = vld [vmem:[#allocation43_spill] sm:$0xff]  ;;  %v18223_v22 = vld [vmem:[#allocation3 + $0xc30] sm:$0xff]  }
 0x6e9   : > { %17044 = vmatpush3.bf16.msra.mxu1 %v18184_v17  ;;  %17023 = vmatprep.subr.bf16.mxu0 %v18185_v38  ;;  %v18202_v41 = vld [vmem:[#allocation3 + $0xac8] sm:$0xff]   ;;  %v8903_v1 = vcombine.low %v21666_v58, %v22256_v0  ;;  %v18220_v2 = vld [vmem:[#allocation3 + $0xbf8] sm:$0xff]   ;;  %v18222_v50 = vld [vmem:[#allocation3 + $0xb70] sm:$0xff]  }
 0x6ea   : > { %9655 = vmatprep.mubr.bf16.mxu1 %v8913_v51  ;;  %17045 = vmatprep.subr.bf16.mxu1 %v18186_v56  ;;  %v18204_v6 = vld [vmem:[#allocation3 + $0xa88] sm:$0xff]   ;;  %v18224_v47 = vld [vmem:[#allocation3 + $0xbf0] sm:$0xff]   ;;  %v18229_v34 = vld [vmem:[#allocation3 + $0xba0] sm:$0xff]  }
 0x6eb   : > { %v18211_v63 = vld [vmem:[#allocation3 + $0xb28] sm:$0xff]   ;;  %v8914_v9 = vpack.c.bf16 %v8903_v1, %v8902_v21  ;;  %v18230_v59 = vld [vmem:[#allocation3 + $0xb60] sm:$0xff]   ;;  %v18233_v54 = vld [vmem:[#allocation3 + $0xb98] sm:$0xff]  }
 0x6ec   : > { %17024 = vmatpush3.bf16.msra.mxu0 %v18187_v42  ;;  %v18215_v4 = vld [vmem:[#allocation3 + $0xb08] sm:$0xff]   ;;  %v18231_v62 = vld [vmem:[#allocation3 + $0xc20] sm:$0xff]   ;;  %v18235_v17 = vld [vmem:[#allocation3 + $0xc18] sm:$0xff]  }
 0x6ed   : > { %17046 = vmatpush3.bf16.msra.mxu1 %v18188_v29  ;;  %17025 = vmatprep.subr.bf16.mxu0 %v18189_v24  ;;  %v18225_v12 = vld [vmem:[#allocation3 + $0xba8] sm:$0xff]   ;;  %v18232_v51 = vld [vmem:[#allocation3 + $0xbe0] sm:$0xff]   ;;  %v18234_v38 = vld [vmem:[#allocation3 + $0xb58] sm:$0xff]  }
 0x6ee   : > { %17047 = vmatprep.subr.bf16.mxu1 %v18190_v16  ;;  %v18226_v58 = vld [vmem:[#allocation3 + $0xb68] sm:$0xff]   ;;  %v18236_v56 = vld [vmem:[#allocation3 + $0xbd8] sm:$0xff]   ;;  %v18237_v42 = vld [vmem:[#allocation3 + $0xb90] sm:$0xff]  }
 0x6ef   : > { %v18227_v18 = vld [vmem:[#allocation3 + $0xc28] sm:$0xff]   ;;  %v18239_v29 = vld [vmem:[#allocation3 + $0xc10] sm:$0xff]  }
 0x6f0   : > { %17026 = vmatpush3.bf16.msra.mxu0 %v18191_v53  ;;  %v18228_v32 = vld [vmem:[#allocation3 + $0xbe8] sm:$0xff]   ;;  %v18238_v24 = vld [vmem:[#allocation3 + $0xb50] sm:$0xff]  }
 0x6f1   : > { %17048 = vmatpush3.bf16.msra.mxu1 %v18192_v31  ;;  %17027 = vmatprep.subr.bf16.mxu0 %v18193_v23  ;;  %v18240_v16 = vld [vmem:[#allocation3 + $0xbd0] sm:$0xff]   ;;  %v18241_v53 = vld [vmem:[#allocation3 + $0xb88] sm:$0xff]  }
 0x6f2   : > { %17049 = vmatprep.subr.bf16.mxu1 %v18194_v30  ;;  %v18243_v31 = vld [vmem:[#allocation3 + $0xc08] sm:$0xff]  }
 0x6f3   : > { %v18242_v23 = vld [vmem:[#allocation3 + $0xb48] sm:$0xff]  }
 0x6f4   : > { %17028 = vmatpush3.bf16.msra.mxu0 %v18195_v26  ;;  %v21715_v30 = vld [vmem:[#allocation2 + $0x7] sm:$0xf] }
 0x6f5   : > { %17050 = vmatpush3.bf16.msra.mxu1 %v18196_v10  ;;  %17029 = vmatprep.subr.bf16.mxu0 %v18197_v57  ;;  %v18244_v26 = vld [vmem:[#allocation3 + $0xbc8] sm:$0xff]   ;;  %v18245_v10 = vld [vmem:[#allocation3 + $0xb80] sm:$0xff]   ;;  %10788 = vst [vmem:[#allocation2] sm:$0xff] %v21645_v11 }
 0x6f6   : > { %17051 = vmatprep.subr.bf16.mxu1 %v18198_v37  ;;  %v18247_v57 = vld [vmem:[#allocation3 + $0xc00] sm:$0xff]   ;;  %v21718_v37 = vld [vmem:[#allocation2 + $0x8] sm:$0xf] }
 0x6f8   : > { %17030 = vmatpush3.bf16.msra.mxu0 %v18199_v5  ;;  %v21720_v5 = vld [vmem:[#allocation2 + $0x9] sm:$0xf] }
 0x6f9   : > { %17052 = vmatpush3.bf16.msra.mxu1 %v18200_v39  ;;  %17031 = vmatprep.subr.bf16.mxu0 %v18201_v13  ;;  %v18246_v39 = vld [vmem:[#allocation3 + $0xb40] sm:$0xff]   ;;  %10789 = vst [vmem:[#allocation2 + $0x8] sm:$0xff] %v21645_v11 }
 0x6fa   : > { %17053 = vmatprep.subr.bf16.mxu1 %v18202_v41  ;;  %v18248_v13 = vld [vmem:[#allocation3 + $0xbc0] sm:$0xff]   ;;  %v18249_v41 = vld [vmem:[#allocation3 + $0xcb8] sm:$0xff]  }
 0x6fc   : > { %17032 = vmatpush3.bf16.msra.mxu0 %v18203_v8  ;;  %v18251_v8 = vld [vmem:[#allocation3 + $0xd38] sm:$0xff]  }
 0x6fd   : > { %17054 = vmatpush3.bf16.msra.mxu1 %v18204_v6  ;;  %17033 = vmatprep.subr.bf16.mxu0 %v18205_v14  ;;  %v21723_v6 = vld [vmem:[#allocation2 + $0xa7] sm:$0xf] }
 0x6fe   : > { %17055 = vmatprep.subr.bf16.mxu1 %v18206_v15  ;;  %v21725_v14 = vld [vmem:[#allocation2 + $0xa8] sm:$0xf]  ;;  %13709 = vst [vmem:[#allocation2 + $0xa0] sm:$0xff] %v21645_v11 }
 0x6ff   : > { %v21728_v15 = vld [vmem:[#allocation2 + $0xa9] sm:$0xf] }
 0x700   : > { %17034 = vmatpush3.bf16.msra.mxu0 %v18207_v35  ;;  %13710 = vst [vmem:[#allocation2 + $0xa8] sm:$0xff] %v21645_v11 }
 0x701   : > { %17056 = vmatpush3.bf16.msra.mxu1 %v18208_v25  ;;  %17701 = vmatprep.subr.bf16.mxu0 %v21645_v11 }
 0x702   : > { %17072 = vmatprep.subr.bf16.mxu1 %v18217_v36 }
 0x703   : > { %9615 = vmatmul.mubr.bf16.vlgmr.msra.gmra.mxu0 %v8910_v49 }
 0x704   : > { %9656 = vmatmul.mubr.bf16.vlgmr.msra.gmra.mxu1 %v8912_v27  ;;  %17702 = vmatpush3.bf16.msra.mxu0 %v18209_v19 }
 0x705   : > { %17717 = vmatprep.mubr.msk.bf16.mxu0 %vm18681_vm7, %v21645_v11  ;;  %17703 = vmatprep.subr.bf16.mxu0 %v21645_v11 }
 0x706   : > { %17073 = vmatpush3.bf16.msra.mxu1 %v18218_v61 }
 0x707   : > { %17074 = vmatprep.subr.bf16.mxu1 %v18221_v55 }
 0x708   : > { %17704 = vmatpush3.bf16.msra.mxu0 %v18210_v45 }
 0x709   : > { %17705 = vmatprep.subr.bf16.mxu0 %v21645_v11 }
 0x70a   : > { %17075 = vmatpush3.bf16.msra.mxu1 %v18222_v50 }
 0x70b   : > { %17076 = vmatprep.subr.bf16.mxu1 %v18225_v12 }
 0x70c   : > { %17706 = vmatpush3.bf16.msra.mxu0 %v18211_v63  ;;  %v15234_v63 = vld [vmem:[#allocation5 + $0x4] ss:$0 sm:$0xff] }
 0x70d   : > { %17707 = vmatprep.subr.bf16.mxu0 %v21645_v11 }
 0x70e   : > { %17077 = vmatpush3.bf16.msra.mxu1 %v18226_v58 }
 0x70f   : > { %17078 = vmatprep.subr.bf16.mxu1 %v18229_v34 }
 0x710   : > { %17708 = vmatpush3.bf16.msra.mxu0 %v18212_v46 }
 0x711   : > { %17709 = vmatprep.subr.bf16.mxu0 %v21645_v11 }
 0x712   : > { %17079 = vmatpush3.bf16.msra.mxu1 %v18230_v59 }
 0x713   : > { %17080 = vmatprep.subr.bf16.mxu1 %v18233_v54 }
 0x714   : > { %17710 = vmatpush3.bf16.msra.mxu0 %v18213_v40 }
 0x715   : > { %17711 = vmatprep.subr.bf16.mxu0 %v21645_v11 }
 0x716   : > { %17081 = vmatpush3.bf16.msra.mxu1 %v18234_v38 }
 0x717   : > { %17082 = vmatprep.subr.bf16.mxu1 %v18237_v42 }
 0x718   : > { %17712 = vmatpush3.bf16.msra.mxu0 %v18214_v48 }
 0x719   : > { %17713 = vmatprep.subr.bf16.mxu0 %v21645_v11 }
 0x71a   : > { %17083 = vmatpush3.bf16.msra.mxu1 %v18238_v24 }
 0x71b   : > { %17084 = vmatprep.subr.bf16.mxu1 %v18241_v53 }
 0x71c   : > { %17714 = vmatpush3.bf16.msra.mxu0 %v18215_v4 }
 0x71d   : > { %17715 = vmatprep.subr.bf16.mxu0 %v21645_v11 }
 0x71e   : > { %17085 = vmatpush3.bf16.msra.mxu1 %v18242_v23 }
 0x71f   : > { %17086 = vmatprep.subr.bf16.mxu1 %v18245_v10 }
 0x720   : > { %17716 = vmatpush3.bf16.msra.mxu0 %v18216_v33 }
 0x721   : > { %17094 = vmatprep.subr.bf16.mxu0 %v18219_v43 }
 0x722   : > { %17087 = vmatpush3.bf16.msra.mxu1 %v18246_v39 }
 0x723   : > { %17718 = vmatmul.mubr.bf16.vlgmr.msra.gmra.mxu0 %v8914_v9  ;;  %17116 = vmatprep.subr.bf16.mxu1 %v18249_v41 }
 0x724   : > { %17095 = vmatpush3.bf16.msra.mxu0 %v18220_v2 }
 0x725   : > { %17096 = vmatprep.subr.bf16.mxu0 %v18223_v22 }
 0x728   : > { %17097 = vmatpush3.bf16.msra.mxu0 %v18224_v47 }
 0x729   : > { %17098 = vmatprep.subr.bf16.mxu0 %v18227_v18 }
 0x72c   : > { %17099 = vmatpush3.bf16.msra.mxu0 %v18228_v32 }
 0x72d   : > { %17100 = vmatprep.subr.bf16.mxu0 %v18231_v62 }
 0x730   : > { %17101 = vmatpush3.bf16.msra.mxu0 %v18232_v51 }
 0x731   : > { %17102 = vmatprep.subr.bf16.mxu0 %v18235_v17 }
 0x734   : > { %17103 = vmatpush3.bf16.msra.mxu0 %v18236_v56 }
 0x735   : > { %17104 = vmatprep.subr.bf16.mxu0 %v18239_v29 }
 0x738   : > { %17105 = vmatpush3.bf16.msra.mxu0 %v18240_v16 }
 0x739   : > { %17106 = vmatprep.subr.bf16.mxu0 %v18243_v31 }
 0x73c   : > { %17107 = vmatpush3.bf16.msra.mxu0 %v18244_v26 }
 0x73d   : > { %17108 = vmatprep.subr.bf16.mxu0 %v18247_v57 }
 0x740   : > { %17109 = vmatpush3.bf16.msra.mxu0 %v18248_v13 }
 0x741   : > { %17138 = vmatprep.subr.bf16.mxu0 %v18251_v8 }
 0x7a3   : > { %v16991_v35 = vpop.f32.mrf.mxu0 }
 0x7a4   : > { %v17013_v28 = vpop.f32.mrf.mxu1 }
 0x7a5   : > { %v16992_v25 = vpop.f32.mrf.mxu0 }
 0x7a6   : > { %v17014_v44 = vpop.f32.mrf.mxu1  ;;  %v16993_v45 = vadd.f32 %v16992_v25, %v16991_v35 }
 0x7a7   : > { %v16994_v52 = vpop.f32.mrf.mxu0  ;;  %v17015_v21 = vadd.f32 %v17014_v44, %v17013_v28 }
 0x7a8   : > { %v17016_v3 = vpop.f32.mrf.mxu1  ;;  %v9535_v48 = vadd.f32 %v16993_v45, %v15234_v63 }
 0x7a9   : > { %v16995_v60 = vpop.f32.mrf.mxu0 }
 0x7aa   : > { %v17017_v49 = vpop.f32.mrf.mxu1  ;;  %v16996_v4 = vadd.f32 %v16995_v60, %v16994_v52  ;;  %v9576_v9 = vadd.f32 %v17015_v21, %v9535_v48 }
 0x7ab   : > { %v17018_v43 = vadd.f32 %v17017_v49, %v17016_v3  ;;  %v18250_v49 = vld [vmem:[#allocation3 + $0xc78] sm:$0xff]  }
 0x7ac   : > { %v9538_v36 = vadd.f32 %v16996_v4, %v15234_v63 }
 0x7ae   : > { %v9579_v22 = vadd.f32 %v17018_v43, %v9538_v36 }
 0x7c3   : > { %v17035_v19 = vpop.f32.mrf.mxu0 }
 0x7c4   : > { %v17057_v46 = vpop.f32.mrf.mxu1 }
 0x7c5   : > { %v17036_v27 = vpop.f32.mrf.mxu0 }
 0x7c6   : > { %v17058_v33 = vpop.f32.mrf.mxu1  ;;  %v17037_v0 = vadd.f32 %v17036_v27, %v17035_v19 }
 0x7c7   : > { %v17038_v40 = vpop.f32.mrf.mxu0  ;;  %v17059_v50 = vadd.f32 %v17058_v33, %v17057_v46 }
 0x7c8   : > { %v17060_v61 = vpop.f32.mrf.mxu1  ;;  %v9617_v2 = vadd.f32 %v17037_v0, %v9576_v9 }
 0x7c9   : > { %v17039_v1 = vpop.f32.mrf.mxu0 }
 0x7ca   : > { %v17040_v55 = vadd.f32 %v17039_v1, %v17038_v40  ;;  %v17061_v47 = vpop.f32.mrf.mxu1  ;;  %v9658_v58 = vadd.f32 %v17059_v50, %v9617_v2 }
 0x7cb   : > { %v17062_v32 = vadd.f32 %v17061_v47, %v17060_v61  ;;  %v18252_v61 = vld [vmem:[#allocation3 + $0xcf8] sm:$0xff]  }
 0x7cc   : > { %v9620_v12 = vadd.f32 %v17040_v55, %v9579_v22 }
 0x7ce   : > { %v9661_v51 = vadd.f32 %v17062_v32, %v9620_v12 }
 0x7e3   : > { %v9698_v18 = vpop.f32.mrf.mxu0 }
 0x7e4   : > { %v9699_v34 = vadd.f32 %v9698_v18, %v9658_v58 }
 0x7e5   : > { %v17719_v59 = vpop.f32.mrf.mxu0 }
 0x7e6   : > { %v9705_v62 = vmul.f32 0.01, %v9699_v34 }
 0x7e7   : > { %v9701_v54 = vpop.f32.mrf.mxu0 }
 0x7e8   : > { %v9707_v17 = vmax.f32 %v9699_v34, %v9705_v62  ;;  %v9702_v38 = vadd.f32 %v9701_v54, %v9661_v51  ;;  %v18255_v51 = vld [vmem:[#allocation3 + $0xd30] sm:$0xff]  }
 0x7e9   : > { %v17720_v56 = vpop.f32.mrf.mxu0  ;;  %v18254_v54 = vld [vmem:[#allocation3 + $0xc70] sm:$0xff]  }
 0x7ea   : > { %v9711_v42 = vcombine.high %v9707_v17, %v9707_v17  ;;  %9787 = vst [vmem:[#allocation2 + $0x28] sm:$0xf] %v9707_v17  ;;  %v9706_v29 = vmul.f32 0.01, %v9702_v38  ;;  %v18256_v56 = vld [vmem:[#allocation3 + $0xcf0] sm:$0xff]  }
 0x7ec   : > { %9788 = vst [vmem:[#allocation2 + $0x48] sm:$0xf] %v9711_v42  ;;  %v9708_v24 = vmax.f32 %v9702_v38, %v9706_v29  ;;  %v18257_v38 = vld [vmem:[#allocation3 + $0xca8] sm:$0xff]  }
 0x7ed   : > { %v18259_v42 = vld [vmem:[#allocation3 + $0xd28] sm:$0xff]  }
 0x7ee   : > { %v9712_v16 = vcombine.high %v9708_v24, %v9708_v24  ;;  %9789 = vst [vmem:[#allocation2 + $0x68] sm:$0xf] %v9708_v24  ;;  %v18258_v29 = vld [vmem:[#allocation3 + $0xc68] sm:$0xff]   ;;  %v18261_v24 = vld [vmem:[#allocation3 + $0xca0] sm:$0xff]  }
 0x7f0   : > { %9790 = vst [vmem:[#allocation2 + $0x88] sm:$0xf] %v9712_v16  ;;  %v18260_v16 = vld [vmem:[#allocation3 + $0xce8] sm:$0xff]  }
 0x7f1   : > { %v9796_v53 = vld [vmem:[#allocation2 + $0x28] sm:$0xf] }
 0x7f2   : > { %v9792_v31 = vld [vmem:[#allocation2 + $0x27] sm:$0xf]  ;;  %v9839_v44 = vcombine.low %v21718_v37, %v9796_v53  ;;  %v18253_v37 = vld [vmem:[#allocation3 + $0xcb0] sm:$0xff]  }
 0x7f3   : > { %v9803_v23 = vld [vmem:[#allocation2 + $0x27] sm:$0xf]  ;;  %v9831_v3 = vcombine.low %v21715_v30, %v9792_v31 }
 0x7f4   : > { %10792 = vst [vmem:[#allocation2 + $0x20] sm:$0xff] %v21645_v11  ;;  %v9811_v26 = vld [vmem:[#allocation2 + $0x29] sm:$0xf]  ;;  %v18263_v53 = vld [vmem:[#allocation3 + $0xd20] sm:$0xff]  }
 0x7f5   : > { %v9800_v10 = vld [vmem:[#allocation2 + $0x29] sm:$0xf]  ;;  %v18262_v31 = vld [vmem:[#allocation3 + $0xc60] sm:$0xff]  }
 0x7f6   : > { %v21732_v57 = vld [vmem:[#allocation2 + $0x28] sm:$0xf]  ;;  %v9847_v22 = vcombine.low %v21720_v5, %v9800_v10  ;;  %v18267_v10 = vld [vmem:[#allocation3 + $0xd18] sm:$0xff]  }
 0x7f7   : > { %v9797_v39 = vld [vmem:[#allocation2 + $0x48] sm:$0xf]  ;;  %10793 = vst [vmem:[#allocation2 + $0x28] sm:$0xff] %v21645_v11 }
 0x7f8   : > { %v9793_v13 = vld [vmem:[#allocation2 + $0x47] sm:$0xf] }
 0x7f9   : > { %v9804_v41 = vld [vmem:[#allocation2 + $0x47] sm:$0xf] }
 0x7fa   : > { %v9812_v8 = vld [vmem:[#allocation2 + $0x49] sm:$0xf]  ;;  %v9855_v40 = vcombine.low %v9803_v23, %v9804_v41  ;;  %v18265_v23 = vld [vmem:[#allocation3 + $0xc98] sm:$0xff]  }
 0x7fb   : > { %v9801_v35 = vld [vmem:[#allocation2 + $0x49] sm:$0xf]  ;;  %v9871_v4 = vcombine.low %v9811_v26, %v9812_v8  ;;  %v18264_v26 = vld [vmem:[#allocation3 + $0xce0] sm:$0xff]   ;;  %v18268_v41 = vld [vmem:[#allocation3 + $0xcd8] sm:$0xff]  }
 0x7fc   : > { %v9798_v25 = vld [vmem:[#allocation2 + $0x68] sm:$0xf]  ;;  %v18271_v8 = vld [vmem:[#allocation3 + $0xd10] sm:$0xff]  }
 0x7fd   : > { %v9794_v28 = vld [vmem:[#allocation2 + $0x67] sm:$0xf]  ;;  %v9840_v60 = vcombine.low %v9797_v39, %v9798_v25  ;;  %v18266_v39 = vld [vmem:[#allocation3 + $0xc58] sm:$0xff]  }
 0x7fe   : > { %v9805_v52 = vld [vmem:[#allocation2 + $0x67] sm:$0xf]  ;;  %v9832_v19 = vcombine.low %v9793_v13, %v9794_v28  ;;  %v18269_v13 = vld [vmem:[#allocation3 + $0xc90] sm:$0xff]  }
 0x7ff   : > { %v9813_v27 = vld [vmem:[#allocation2 + $0x69] sm:$0xf]  ;;  %v9900_v0 = vpack.c.bf16 %v9840_v60, %v9839_v44  ;;  %v18272_v28 = vld [vmem:[#allocation3 + $0xcd0] sm:$0xff]   ;;  %v18277_v60 = vld [vmem:[#allocation3 + $0xc80] sm:$0xff]  }
 0x800   : > { %v9802_v45 = vld [vmem:[#allocation2 + $0x69] sm:$0xf]  ;;  %v9899_v1 = vpack.c.bf16 %v9832_v19, %v9831_v3  ;;  %v18279_v19 = vld [vmem:[#allocation3 + $0xd00] sm:$0xff]  }
 0x801   : > { %v9820_v63 = vld [vmem:[#allocation2 + $0x68] sm:$0xf]  ;;  %v9848_v33 = vcombine.low %v9801_v35, %v9802_v45  ;;  %10525 = vmatprep.mubr.bf16.mxu1 %v9900_v0  ;;  %v18270_v35 = vld [vmem:[#allocation3 + $0xc50] sm:$0xff]   ;;  %v18280_v45 = vld [vmem:[#allocation3 + $0xcc0] sm:$0xff]  }
 0x802   : > { %v9806_v46 = vld [vmem:[#allocation2 + $0x87] sm:$0xf]  ;;  %10526 = vmatmul.mubr.bf16.vlgmr.msra.gmra.mxu1 %v9899_v1  ;;  %v18285_v0 = vld [vmem:[#allocation3 + $0xd58] sm:$0xff]   ;;  %v18286_v1 = vld [vmem:[#allocation3 + $0xd50] sm:$0xff]  }
 0x803   : > { %v9814_v48 = vld [vmem:[#allocation2 + $0x89] sm:$0xf]  ;;  %v9856_v9 = vcombine.low %v9805_v52, %v9806_v46  ;;  %v9901_v59 = vpack.c.bf16 %v9848_v33, %v9847_v22  ;;  %17117 = vmatpush3.bf16.msra.mxu1 %v18250_v49  ;;  %v18278_v49 = vld [vmem:[#allocation3 + $0xc40] sm:$0xff]   ;;  %v18292_v22 = vld [vmem:[#allocation3 + $0xe78] sm:$0xff]  }
 0x804   : > { %v9821_v21 = vld [vmem:[#allocation2 + $0x88] sm:$0xf]  ;;  %v9872_v36 = vcombine.low %v9813_v27, %v9814_v48  ;;  %17118 = vmatprep.subr.bf16.mxu1 %v18253_v37 }
 0x805   : > { %v9819_v43 = vld [vmem:[#allocation2 + $0x48] sm:$0xf]  ;;  %v9888_v50 = vcombine.low %v9821_v21, %v21725_v14  ;;  %v9902_v18 = vpack.c.bf16 %v9856_v9, %v9855_v40  ;;  %v18281_v40 = vld [vmem:[#allocation3 + $0xd78] sm:$0xff]   ;;  %v18282_v21 = vld [vmem:[#allocation3 + $0xd70] sm:$0xff]  }
 0x806   : > { %v21737_v2 = vld [vmem:[#allocation2 + $0x48] sm:$0xf]  ;;  %v9904_v32 = vpack.c.bf16 %v9872_v36, %v9871_v4  ;;  %v9887_v62 = vcombine.low %v9819_v43, %v9820_v63  ;;  %v18288_v36 = vld [vmem:[#allocation3 + $0xd40] sm:$0xff]  }
 0x807   : > { %v21739_v30 = vld [vmem:[#allocation2 + $0x68] sm:$0xf]  ;;  %10566 = vmatprep.mubr.bf16.mxu0 %v9902_v18  ;;  %17119 = vmatpush3.bf16.msra.mxu1 %v18254_v54  ;;  %v9863_v63 = vcombine.low %v21732_v57, %v21737_v2  ;;  %v18284_v57 = vld [vmem:[#allocation3 + $0xd60] sm:$0xff]   ;;  %v18289_v2 = vld [vmem:[#allocation3 + $0xdf8] sm:$0xff]  }
 0x808   : > { %v21741_v55 = vld [vmem:[#allocation2 + $0x88] sm:$0xf]  ;;  %10607 = vmatprep.mubr.bf16.mxu1 %v9904_v32  ;;  %10567 = vmatmul.mubr.bf16.vlgmr.msra.gmra.mxu0 %v9901_v59  ;;  %v9906_v17 = vpack.c.bf16 %v9888_v50, %v9887_v62  ;;  %v18294_v50 = vld [vmem:[#allocation3 + $0xe38] sm:$0xff]   ;;  %v18301_v59 = vld [vmem:[#allocation3 + $0xda0] sm:$0xff]  }
 0x809   : > { %v21745_v47 = vld [vmem:[#allocation2 + $0x47] sm:$0xf]  ;;  %17139 = vmatpush3.bf16.msra.mxu0 %v18252_v61  ;;  %17120 = vmatprep.subr.bf16.mxu1 %v18257_v38  ;;  %v9864_v27 = vcombine.low %v21739_v30, %v21741_v55  ;;  %v18290_v30 = vld [vmem:[#allocation3 + $0xdb8] sm:$0xff]   ;;  %v18291_v55 = vld [vmem:[#allocation3 + $0xdf0] sm:$0xff]  }
 0x80a   : > { %v21747_v12 = vld [vmem:[#allocation2 + $0x67] sm:$0xf]  ;;  %10796 = vst [vmem:[#allocation2 + $0x40] sm:$0xff] %v21645_v11  ;;  %10648 = vmatprep.mubr.bf16.mxu0 %v9906_v17  ;;  %17140 = vmatprep.subr.bf16.mxu0 %v18255_v51  ;;  %v18303_v51 = vld [vmem:[#allocation3 + $0xdd8] sm:$0xff]  }
 0x80b   : > { %v21749_v58 = vld [vmem:[#allocation2 + $0x87] sm:$0xf]  ;;  %10800 = vst [vmem:[#allocation2 + $0x60] sm:$0xff] %v21645_v11  ;;  %17121 = vmatpush3.bf16.msra.mxu1 %v18258_v29  ;;  %v9903_v48 = vpack.c.bf16 %v9864_v27, %v9863_v63  ;;  %v9879_v4 = vcombine.low %v21745_v47, %v21747_v12  ;;  %v18296_v47 = vld [vmem:[#allocation3 + $0xe70] sm:$0xff]   ;;  %v18308_v17 = vld [vmem:[#allocation3 + $0xe58] sm:$0xff]  }
 0x80c   : > { %13705 = vst [vmem:[#allocation2 + $0x80] sm:$0xff] %v21645_v11  ;;  %v21754_v34 = vld [vmem:[#allocation2 + $0x49] sm:$0xf]  ;;  %17122 = vmatprep.subr.bf16.mxu1 %v18261_v24  ;;  %v9880_v46 = vcombine.low %v21749_v58, %v21723_v6  ;;  %v18293_v12 = vld [vmem:[#allocation3 + $0xdb0] sm:$0xff]   ;;  %v21785_v62 = vld [vmem:[#allocation2 + $0x7] sm:$0x3] }
 0x80d   : > { %v21756_v5 = vld [vmem:[#allocation2 + $0x69] sm:$0xf]  ;;  %10797 = vst [vmem:[#allocation2 + $0x48] sm:$0xff] %v21645_v11  ;;  %17141 = vmatpush3.bf16.msra.mxu0 %v18256_v56  ;;  %v18306_v54 = vld [vmem:[#allocation3 + $0xe20] sm:$0xff]   ;;  %11810 = vst [vmem:[#allocation2] sm:$0xff] %v21645_v11 }
 0x80e   : > { %v21758_v14 = vld [vmem:[#allocation2 + $0x89] sm:$0xf]  ;;  %10801 = vst [vmem:[#allocation2 + $0x68] sm:$0xff] %v21645_v11  ;;  %17142 = vmatprep.subr.bf16.mxu0 %v18259_v42  ;;  %v9905_v33 = vpack.c.bf16 %v9880_v46, %v9879_v4  ;;  %v9895_v37 = vcombine.low %v21754_v34, %v21756_v5  ;;  %v18299_v34 = vld [vmem:[#allocation3 + $0xde0] sm:$0xff]   ;;  %v18305_v42 = vld [vmem:[#allocation3 + $0xd98] sm:$0xff]  }
 0x80f   : > { %13706 = vst [vmem:[#allocation2 + $0x88] sm:$0xff] %v21645_v11  ;;  %17123 = vmatpush3.bf16.msra.mxu1 %v18262_v31  ;;  %v18273_v25 = vld [vmem:[#allocation3 + $0xc88] sm:$0xff]   ;;  %v9896_v61 = vcombine.low %v21758_v14, %v21728_v15  ;;  %v18298_v15 = vld [vmem:[#allocation3 + $0xe30] sm:$0xff]   ;;  %v18304_v14 = vld [vmem:[#allocation3 + $0xe60] sm:$0xff]  }
 0x810   : > { %17124 = vmatprep.subr.bf16.mxu1 %v18265_v23  ;;  %v18275_v52 = vld [vmem:[#allocation3 + $0xd08] sm:$0xff]   ;;  %v18307_v29 = vld [vmem:[#allocation3 + $0xdd0] sm:$0xff]   ;;  %v18310_v24 = vld [vmem:[#allocation3 + $0xe18] sm:$0xff]  }
 0x811   : > { %17143 = vmatpush3.bf16.msra.mxu0 %v18260_v16  ;;  %v18274_v44 = vld [vmem:[#allocation3 + $0xc48] sm:$0xff]   ;;  %v9907_v43 = vpack.c.bf16 %v9896_v61, %v9895_v37  ;;  %v18312_v16 = vld [vmem:[#allocation3 + $0xe50] sm:$0xff]  }
 0x812   : > { %17144 = vmatprep.subr.bf16.mxu0 %v18263_v53  ;;  %v18276_v3 = vld [vmem:[#allocation3 + $0xcc8] sm:$0xff]   ;;  %v18309_v53 = vld [vmem:[#allocation3 + $0xd90] sm:$0xff]  }
 0x813   : > { %17125 = vmatpush3.bf16.msra.mxu1 %v18266_v39  ;;  %v18283_v6 = vld [vmem:[#allocation3 + $0xd68] sm:$0xff]   ;;  %v18314_v23 = vld [vmem:[#allocation3 + $0xe10] sm:$0xff]   ;;  %v18315_v39 = vld [vmem:[#allocation3 + $0xdc0] sm:$0xff]  }
 0x814   : > { %17126 = vmatprep.subr.bf16.mxu1 %v18269_v13  ;;  %v18287_v9 = vld [vmem:[#allocation3 + $0xd48] sm:$0xff]   ;;  %v18319_v13 = vld [vmem:[#allocation3 + $0xe40] sm:$0xff]  }
 0x815   : > { %17145 = vmatpush3.bf16.msra.mxu0 %v18264_v26  ;;  %v18295_v58 = vld [vmem:[#allocation3 + $0xde8] sm:$0xff]  }
 0x816   : > { %17146 = vmatprep.subr.bf16.mxu0 %v18267_v10  ;;  %v18300_v18 = vld [vmem:[#allocation3 + $0xe68] sm:$0xff]  }
 0x817   : > { %17127 = vmatpush3.bf16.msra.mxu1 %v18270_v35  ;;  %v18297_v32 = vld [vmem:[#allocation3 + $0xda8] sm:$0xff]   ;;  %v18321_v35 = vld [vmem:[#allocation3 + $0xe00] sm:$0xff]  }
 0x818   : > { %17128 = vmatprep.subr.bf16.mxu1 %v18273_v25  ;;  %v18302_v5 = vld [vmem:[#allocation3 + $0xe28] sm:$0xff]   ;;  %v18324_v25 = vld [vmem:[#allocation3 + $0xf78] sm:$0xff]  }
 0x819   : > { %17147 = vmatpush3.bf16.msra.mxu0 %v18268_v41  ;;  %v21788_v38 = vld [vmem:[#allocation2 + $0x8] sm:$0x3]  ;;  %v18317_v41 = vld [vmem:[#allocation3 + $0xd80] sm:$0xff]  }
 0x81a   : > { %17148 = vmatprep.subr.bf16.mxu0 %v18271_v8  ;;  %v21790_v56 = vld [vmem:[#allocation2 + $0x9] sm:$0x3]  ;;  %v18320_v8 = vld [vmem:[#allocation3 + $0xef8] sm:$0xff]  }
 0x81b   : > { %17129 = vmatpush3.bf16.msra.mxu1 %v18274_v44  ;;  %11811 = vst [vmem:[#allocation2 + $0x8] sm:$0xff] %v21645_v11  ;;  %v18311_v31 = vld [vmem:[#allocation3 + $0xdc8] sm:$0xff]   ;;  %v21797_v44 = vld [vmem:[#allocation2 + $0x18] sm:$0xff] }
 0x81c   : > { %17130 = vmatprep.subr.bf16.mxu1 %v18277_v60  ;;  %v18316_v26 = vld [vmem:[#allocation3 + $0xe48] sm:$0xff]  }
 0x81d   : > { %17149 = vmatpush3.bf16.msra.mxu0 %v18272_v28  ;;  %v18313_v10 = vld [vmem:[#allocation3 + $0xd88] sm:$0xff]  }
 0x81e   : > { %17150 = vmatprep.subr.bf16.mxu0 %v18275_v52  ;;  %v21793_v28 = vld [vmem:[#allocation2 + $0x67] sm:$0x3]  ;;  %v21800_v60 = vld [vmem:[#allocation2 + $0x69] sm:$0x3] }
 0x81f   : > { %17131 = vmatpush3.bf16.msra.mxu1 %v18278_v49  ;;  %v21795_v52 = vld [vmem:[#allocation2 + $0x68] sm:$0x3]  ;;  %11822 = vst [vmem:[#allocation2 + $0x60] sm:$0xff] %v21797_v44 }
 0x820   : > { %17721 = vmatprep.subr.bf16.mxu1 %v21645_v11  ;;  %11823 = vst [vmem:[#allocation2 + $0x68] sm:$0xff] %v21797_v44 }
 0x821   : > { %17151 = vmatpush3.bf16.msra.mxu0 %v18276_v3 }
 0x822   : > { %17152 = vmatprep.subr.bf16.mxu0 %v18279_v19  ;;  %10608 = vmatmul.mubr.bf16.vlgmr.msra.gmra.mxu1 %v9903_v48 }
 0x823   : > { %17722 = vmatpush3.bf16.msra.mxu1 %v18281_v40  ;;  %17737 = vmatprep.mubr.msk.bf16.mxu1 %vm18681_vm7, %v21645_v11 }
 0x824   : > { %17723 = vmatprep.subr.bf16.mxu1 %v21645_v11 }
 0x825   : > { %17153 = vmatpush3.bf16.msra.mxu0 %v18280_v45 }
 0x826   : > { %17169 = vmatprep.subr.bf16.mxu0 %v18289_v2 }
 0x827   : > { %17724 = vmatpush3.bf16.msra.mxu1 %v18282_v21 }
 0x828   : > { %10649 = vmatmul.mubr.bf16.vlgmr.msra.gmra.mxu0 %v9905_v33  ;;  %17725 = vmatprep.subr.bf16.mxu1 %v21645_v11 }
 0x829   : > { %17170 = vmatpush3.bf16.msra.mxu0 %v18290_v30 }
 0x82a   : > { %17171 = vmatprep.subr.bf16.mxu0 %v18291_v55 }
 0x82b   : > { %17726 = vmatpush3.bf16.msra.mxu1 %v18283_v6  ;;  %v15307_v6 = vld [vmem:[#allocation5 + $0x5] ss:$0 sm:$0xff] }
 0x82c   : > { %17727 = vmatprep.subr.bf16.mxu1 %v21645_v11 }
 0x82d   : > { %17172 = vmatpush3.bf16.msra.mxu0 %v18293_v12 }
 0x82e   : > { %17173 = vmatprep.subr.bf16.mxu0 %v18295_v58 }
 0x82f   : > { %17728 = vmatpush3.bf16.msra.mxu1 %v18284_v57 }
 0x830   : > { %17729 = vmatprep.subr.bf16.mxu1 %v21645_v11 }
 0x831   : > { %17174 = vmatpush3.bf16.msra.mxu0 %v18297_v32 }
 0x832   : > { %17175 = vmatprep.subr.bf16.mxu0 %v18299_v34 }
 0x833   : > { %17730 = vmatpush3.bf16.msra.mxu1 %v18285_v0 }
 0x834   : > { %17731 = vmatprep.subr.bf16.mxu1 %v21645_v11 }
 0x835   : > { %17176 = vmatpush3.bf16.msra.mxu0 %v18301_v59 }
 0x836   : > { %17177 = vmatprep.subr.bf16.mxu0 %v18303_v51 }
 0x837   : > { %17732 = vmatpush3.bf16.msra.mxu1 %v18286_v1 }
 0x838   : > { %17733 = vmatprep.subr.bf16.mxu1 %v21645_v11 }
 0x839   : > { %17178 = vmatpush3.bf16.msra.mxu0 %v18305_v42 }
 0x83a   : > { %17179 = vmatprep.subr.bf16.mxu0 %v18307_v29 }
 0x83b   : > { %17734 = vmatpush3.bf16.msra.mxu1 %v18287_v9 }
 0x83c   : > { %17735 = vmatprep.subr.bf16.mxu1 %v21645_v11  ;;  %v18318_v11 = vld [vmem:[#allocation3 + $0xe08] sm:$0xff]  }
 0x83d   : > { %17180 = vmatpush3.bf16.msra.mxu0 %v18309_v53 }
 0x83e   : > { %17181 = vmatprep.subr.bf16.mxu0 %v18311_v31 }
 0x83f   : > { %17736 = vmatpush3.bf16.msra.mxu1 %v18288_v36 }
 0x840   : > { %17191 = vmatprep.subr.bf16.mxu1 %v18292_v22 }
 0x841   : > { %17182 = vmatpush3.bf16.msra.mxu0 %v18313_v10 }
 0x842   : > { %17738 = vmatmul.mubr.bf16.vlgmr.msra.gmra.mxu1 %v9907_v43  ;;  %17183 = vmatprep.subr.bf16.mxu0 %v18315_v39 }
 0x843   : > { %17192 = vmatpush3.bf16.msra.mxu1 %v18294_v50 }
 0x844   : > { %17193 = vmatprep.subr.bf16.mxu1 %v18296_v47 }
 0x845   : > { %17184 = vmatpush3.bf16.msra.mxu0 %v18317_v41 }
 0x846   : > { %17213 = vmatprep.subr.bf16.mxu0 %v18320_v8 }
 0x847   : > { %17194 = vmatpush3.bf16.msra.mxu1 %v18298_v15 }
 0x848   : > { %17195 = vmatprep.subr.bf16.mxu1 %v18300_v18 }
 0x84b   : > { %17196 = vmatpush3.bf16.msra.mxu1 %v18302_v5 }
 0x84c   : > { %17197 = vmatprep.subr.bf16.mxu1 %v18304_v14 }
 0x84f   : > { %17198 = vmatpush3.bf16.msra.mxu1 %v18306_v54 }
 0x850   : > { %17199 = vmatprep.subr.bf16.mxu1 %v18308_v17 }
 0x853   : > { %17200 = vmatpush3.bf16.msra.mxu1 %v18310_v24 }
 0x854   : > { %17201 = vmatprep.subr.bf16.mxu1 %v18312_v16 }
 0x857   : > { %17202 = vmatpush3.bf16.msra.mxu1 %v18314_v23 }
 0x858   : > { %17203 = vmatprep.subr.bf16.mxu1 %v18316_v26 }
 0x85b   : > { %17204 = vmatpush3.bf16.msra.mxu1 %v18318_v11 }
 0x85c   : > { %17205 = vmatprep.subr.bf16.mxu1 %v18319_v13 }
 0x85f   : > { %17206 = vmatpush3.bf16.msra.mxu1 %v18321_v35 }
 0x860   : > { %17235 = vmatprep.subr.bf16.mxu1 %v18324_v25 }
 0x8c2   : > { %v17088_v3 = vpop.f32.mrf.mxu1 }
 0x8c4   : > { %v17089_v19 = vpop.f32.mrf.mxu1 }
 0x8c5   : > { %v17090_v21 = vadd.f32 %v17089_v19, %v17088_v3 }
 0x8c6   : > { %v17091_v27 = vpop.f32.mrf.mxu1 }
 0x8c7   : > { %v10528_v1 = vadd.f32 %v17090_v21, %v15307_v6 }
 0x8c8   : > { %v17110_v49 = vpop.f32.mrf.mxu0  ;;  %v17092_v63 = vpop.f32.mrf.mxu1 }
 0x8c9   : > { %v17093_v36 = vadd.f32 %v17092_v63, %v17091_v27 }
 0x8ca   : > { %v17111_v45 = vpop.f32.mrf.mxu0 }
 0x8cb   : > { %v17112_v9 = vadd.f32 %v17111_v45, %v17110_v49  ;;  %v10531_v30 = vadd.f32 %v17093_v36, %v15307_v6 }
 0x8cc   : > { %v17113_v46 = vpop.f32.mrf.mxu0 }
 0x8cd   : > { %v10569_v2 = vadd.f32 %v17112_v9, %v10528_v1 }
 0x8ce   : > { %v17114_v48 = vpop.f32.mrf.mxu0 }
 0x8cf   : > { %v17115_v55 = vadd.f32 %v17114_v48, %v17113_v46 }
 0x8d1   : > { %v10572_v58 = vadd.f32 %v17115_v55, %v10531_v30 }
 0x8e2   : > { %v17132_v40 = vpop.f32.mrf.mxu1 }
 0x8e4   : > { %v17133_v4 = vpop.f32.mrf.mxu1 }
 0x8e5   : > { %v17134_v61 = vadd.f32 %v17133_v4, %v17132_v40 }
 0x8e6   : > { %v17135_v57 = vpop.f32.mrf.mxu1 }
 0x8e7   : > { %v10610_v22 = vadd.f32 %v17134_v61, %v10569_v2 }
 0x8e8   : > { %v17154_v33 = vpop.f32.mrf.mxu0  ;;  %v17136_v37 = vpop.f32.mrf.mxu1 }
 0x8e9   : > { %v17137_v47 = vadd.f32 %v17136_v37, %v17135_v57 }
 0x8ea   : > { %v17155_v0 = vpop.f32.mrf.mxu0 }
 0x8eb   : > { %v17156_v50 = vadd.f32 %v17155_v0, %v17154_v33  ;;  %v10613_v15 = vadd.f32 %v17137_v47, %v10572_v58 }
 0x8ec   : > { %v17157_v43 = vpop.f32.mrf.mxu0 }
 0x8ed   : > { %v10651_v32 = vadd.f32 %v17156_v50, %v10610_v22 }
 0x8ee   : > { %v17158_v12 = vpop.f32.mrf.mxu0 }
 0x8ef   : > { %v17159_v18 = vadd.f32 %v17158_v12, %v17157_v43 }
 0x8f1   : > { %v10654_v51 = vadd.f32 %v17159_v18, %v10613_v15 }
 0x902   : > { %v10691_v34 = vpop.f32.mrf.mxu1 }
 0x903   : > { %v10692_v5 = vadd.f32 %v10691_v34, %v10651_v32 }
 0x904   : > { %v17739_v14 = vpop.f32.mrf.mxu1 }
 0x905   : > { %v10698_v59 = vmul.f32 0.01, %v10692_v5  ;;  %v18322_v14 = vld [vmem:[#allocation3 + $0xeb8] sm:$0xff]  }
 0x906   : > { %v10694_v54 = vpop.f32.mrf.mxu1 }
 0x907   : > { %v10700_v17 = vmax.f32 %v10692_v5, %v10698_v59  ;;  %v10695_v42 = vadd.f32 %v10694_v54, %v10654_v51  ;;  %v18323_v59 = vld [vmem:[#allocation3 + $0xef0] sm:$0xff]  }
 0x908   : > { %v17740_v29 = vpop.f32.mrf.mxu1 }
 0x909   : > { %v10704_v24 = vcombine.high %v10700_v17, %v10700_v17  ;;  %10708 = vst [vmem:[%s345_s12] sm:$0xf] %v10700_v17  ;;  %v10718_v16 = vrot.slane %v10700_v17, %v22249_v20  ;;  %v10699_v53 = vmul.f32 0.01, %v10695_v42 }
 0x90b   : > { %10709 = vst [vmem:[%s345_s12 + $0x4] sm:$0xf] %v10704_v24  ;;  %v10725_v31 = vrot.slane %v10704_v24, %v22249_v20  ;;  %v10726_v23 = vcombine.high %v10718_v16, %v10718_v16  ;;  %v15380_v26 = vrot.slane %v10718_v16, 9  ;;  %v10701_v10 = vmax.f32 %v10695_v42, %v10699_v53 }
 0x90d   : > { %v10727_v39 = vcombine.high %v10725_v31, %v10725_v31  ;;  %v15381_v11 = vrot.slane %v10726_v23, 9  ;;  %v15384_v13 = vrot.slane %v10725_v31, 9  ;;  %10710 = vst [vmem:[%s345_s12 + $0x8] sm:$0xf] %v10701_v10  ;;  %v10705_v41 = vcombine.high %v10701_v10, %v10701_v10 }
 0x90e   : > { %v10734_v8 = vrot.slane %v10701_v10, %v22249_v20  ;;  %v10764_v35 = vmax.f32 %v10718_v16, %v15380_v26  ;;  %v18325_v10 = vld [vmem:[#allocation3 + $0xeb0] sm:$0xff]  }
 0x90f   : > { %v15385_v25 = vrot.slane %v10727_v39, 9  ;;  %v10780_v3 = vmax.f32 %v10725_v31, %v15384_v13  ;;  %10711 = vst [vmem:[%s345_s12 + $0xc] sm:$0xf] %v10705_v41  ;;  %v10741_v19 = vrot.slane %v10705_v41, %v22249_v20  ;;  %v10765_v45 = vmax.f32 %v10726_v23, %v15381_v11  ;;  %v18326_v13 = vld [vmem:[#allocation3 + $0xf38] sm:$0xff]  }
 0x910   : > { %v10742_v49 = vcombine.high %v10734_v8, %v10734_v8  ;;  %v15382_v27 = vrot.slane %v10734_v8, 9 }
 0x911   : > { %v10781_v63 = vmax.f32 %v10727_v39, %v15385_v25  ;;  %v10784_v46 = vmax.f32 %v10764_v35, %v10780_v3  ;;  %v10743_v40 = vcombine.high %v10741_v19, %v10741_v19  ;;  %v15386_v4 = vrot.slane %v10741_v19, 9  ;;  %v18328_v35 = vld [vmem:[#allocation3 + $0xf70] sm:$0xff]   ;;  %v18329_v3 = vld [vmem:[#allocation3 + $0xea8] sm:$0xff]  }
 0x912   : > { %v15383_v48 = vrot.slane %v10742_v49, 9  ;;  %v10766_v21 = vmax.f32 %v10734_v8, %v15382_v27  ;;  %v18327_v8 = vld [vmem:[#allocation3 + $0xee8] sm:$0xff]  }
 0x913   : > { %v10785_v33 = vmax.f32 %v10765_v45, %v10781_v63  ;;  %v15387_v6 = vrot.slane %v10743_v40, 9  ;;  %v10782_v57 = vmax.f32 %v10741_v19, %v15386_v4  ;;  %v10867_v0 = vrot.slane %v10784_v46, %v22250_v7  ;;  %v18330_v19 = vld [vmem:[#allocation3 + $0xf30] sm:$0xff]   ;;  %v18332_v27 = vld [vmem:[#allocation3 + $0xf68] sm:$0xff]   ;;  %v18333_v45 = vld [vmem:[#allocation3 + $0xea0] sm:$0xff]  }
 0x914   : > { %v10767_v9 = vmax.f32 %v10742_v49, %v15383_v48  ;;  %v18331_v49 = vld [vmem:[#allocation3 + $0xee0] sm:$0xff]   ;;  %v18334_v63 = vld [vmem:[#allocation3 + $0xf28] sm:$0xff]   ;;  %v18335_v46 = vld [vmem:[#allocation3 + $0xed8] sm:$0xff]  }
 0x915   : > { %v10871_v1 = vrot.slane %v10785_v33, %v22250_v7  ;;  %v10783_v36 = vmax.f32 %v10743_v40, %v15387_v6  ;;  %v10786_v61 = vmax.f32 %v10766_v21, %v10782_v57  ;;  %v18336_v40 = vld [vmem:[#allocation3 + $0xf60] sm:$0xff]   ;;  %v18337_v48 = vld [vmem:[#allocation3 + $0xe98] sm:$0xff]   ;;  %v18339_v33 = vld [vmem:[#allocation3 + $0xed0] sm:$0xff]  }
 0x916   : > { %v18338_v4 = vld [vmem:[#allocation3 + $0xf20] sm:$0xff]   ;;  %v18340_v21 = vld [vmem:[#allocation3 + $0xf58] sm:$0xff]   ;;  %v18341_v6 = vld [vmem:[#allocation3 + $0xe90] sm:$0xff]  }
 0x917   : > { %v10880_v37 = vsel %vm6071_vm0, %v10871_v1, %v10867_v0  ;;  %v10787_v43 = vmax.f32 %v10767_v9, %v10783_v36  ;;  %v10875_v2 = vrot.slane %v10786_v61, %v22250_v7  ;;  %v18342_v57 = vld [vmem:[#allocation3 + $0xf18] sm:$0xff]   ;;  %v18343_v0 = vld [vmem:[#allocation3 + $0xec8] sm:$0xff]   ;;  %v18344_v1 = vld [vmem:[#allocation3 + $0xf50] sm:$0xff]  }
 0x918   : > { %10884 = vst [vmem:[#allocation2 + $0x28] sm:$0x3] %v10880_v37  ;;  %v18345_v9 = vld [vmem:[#allocation3 + $0xe88] sm:$0xff]   ;;  %v18346_v36 = vld [vmem:[#allocation3 + $0xf10] sm:$0xff]   ;;  %v18347_v61 = vld [vmem:[#allocation3 + $0xec0] sm:$0xff]  }
 0x919   : > { %v10879_v30 = vrot.slane %v10787_v43, %v22250_v7  ;;  %v18348_v43 = vld [vmem:[#allocation3 + $0xf48] sm:$0xff]  }
 0x91b   : > { %v10881_v55 = vsel %vm6071_vm0, %v10879_v30, %v10875_v2  ;;  %v18349_v2 = vld [vmem:[#allocation3 + $0xe80] sm:$0xff]   ;;  %v18350_v30 = vld [vmem:[#allocation3 + $0xf08] sm:$0xff]  }
 0x91c   : > { %10885 = vst [vmem:[#allocation2 + $0x48] sm:$0x3] %v10881_v55 }
 0x91f   : > { %v10889_v22 = vld [vmem:[#allocation2 + $0x28] sm:$0x3] }
 0x920   : > { %v10887_v50 = vld [vmem:[#allocation2 + $0x27] sm:$0x3]  ;;  %v10917_v12 = vcombine.low %v21788_v38, %v10889_v22  ;;  %v10896_v15 = vld [vmem:[#allocation2 + $0x29] sm:$0x3] }
 0x921   : > { %v10892_v47 = vld [vmem:[#allocation2 + $0x27] sm:$0x3]  ;;  %v10906_v58 = vcombine.low %v21785_v62, %v10887_v50  ;;  %v10891_v18 = vld [vmem:[#allocation2 + $0x29] sm:$0x3] }
 0x922   : > { %11814 = vst [vmem:[#allocation2 + $0x20] sm:$0xff] %v21797_v44  ;;  %v21820_v32 = vld [vmem:[#allocation2 + $0x28] sm:$0x3]  ;;  %v10924_v7 = vrot.slane %v10917_v12, %v22249_v20  ;;  %v10928_v5 = vcombine.low %v21790_v56, %v10891_v18  ;;  %v18351_v22 = vld [vmem:[#allocation3 + $0xf40] sm:$0xff]   ;;  %v18354_v18 = vld [vmem:[#allocation3 + $0xfb0] sm:$0xff]  }
 0x923   : > { %11815 = vst [vmem:[#allocation2 + $0x28] sm:$0xff] %v21797_v44  ;;  %v10913_v34 = vrot.slane %v10906_v58, %v22249_v20  ;;  %v10893_v54 = vld [vmem:[#allocation2 + $0x47] sm:$0x3]  ;;  %v10897_v62 = vld [vmem:[#allocation2 + $0x49] sm:$0x3] }
 0x924   : > { %v11004_v51 = vpack.c.bf16 %v10924_v7, %v10924_v7  ;;  %v10900_v17 = vld [vmem:[#allocation2 + $0x48] sm:$0x3]  ;;  %v10939_v42 = vcombine.low %v10892_v47, %v10893_v54  ;;  %v10961_v29 = vcombine.low %v10896_v15, %v10897_v62  ;;  %v10935_v56 = vrot.slane %v10928_v5, %v22249_v20  ;;  %v18353_v47 = vld [vmem:[#allocation3 + $0xfb8] sm:$0xff]   ;;  %v18352_v58 = vld [vmem:[#allocation3 + $0xf00] sm:$0xff]  }
 0x925   : > { %v11003_v38 = vpack.c.bf16 %v10913_v34, %v10913_v34  ;;  %v10983_v24 = vcombine.low %v10900_v17, %v21795_v52  ;;  %v21827_v16 = vld [vmem:[#allocation2 + $0x48] sm:$0x3]  ;;  %v18356_v7 = vld [vmem:[#allocation3 + $0xfa0] sm:$0xff]   ;;  %v18357_v34 = vld [vmem:[#allocation3 + $0xf98] sm:$0xff]  }
 0x926   : > { %v21829_v53 = vld [vmem:[#allocation2 + $0x47] sm:$0x3]  ;;  %v21831_v31 = vld [vmem:[#allocation2 + $0x49] sm:$0x3]  ;;  %11629 = vmatprep.mubr.bf16.mxu0 %v11004_v51  ;;  %v10946_v23 = vrot.slane %v10939_v42, %v22249_v20  ;;  %v10968_v26 = vrot.slane %v10961_v29, %v22249_v20  ;;  %v11005_v41 = vpack.c.bf16 %v10935_v56, %v10935_v56  ;;  %v10950_v37 = vcombine.low %v21820_v32, %v21827_v16  ;;  %v18358_v5 = vld [vmem:[#allocation3 + $0xf90] sm:$0xff]  }
 0x927   : > { %11818 = vst [vmem:[#allocation2 + $0x40] sm:$0xff] %v21797_v44  ;;  %11819 = vst [vmem:[#allocation2 + $0x48] sm:$0xff] %v21797_v44  ;;  %11630 = vmatmul.mubr.bf16.vlgmr.msra.gmra.mxu0 %v11003_v38  ;;  %v10990_v52 = vrot.slane %v10983_v24, %v22249_v20  ;;  %v10972_v50 = vcombine.low %v21829_v53, %v21793_v28  ;;  %v18355_v32 = vld [vmem:[#allocation3 + $0xfa8] sm:$0xff]   ;;  %v18360_v51 = vld [vmem:[#allocation3 + $0xf80] sm:$0xff]  }
 0x928   : > { %17214 = vmatpush3.bf16.msra.mxu0 %v18322_v14  ;;  %v11006_v39 = vpack.c.bf16 %v10946_v23, %v10946_v23  ;;  %v11008_v11 = vpack.c.bf16 %v10968_v26, %v10968_v26  ;;  %v10957_v55 = vrot.slane %v10950_v37, %v22249_v20  ;;  %v18359_v14 = vld [vmem:[#allocation3 + $0xf88] sm:$0xff]   ;;  %v18361_v62 = vld [vmem:[#allocation3 + $0x1038] sm:$0xff]   ;;  %v18363_v42 = vld [vmem:[#allocation3 + $0x1030] sm:$0xff]  }
 0x929   : > { %17215 = vmatprep.subr.bf16.mxu0 %v18323_v59  ;;  %v11010_v25 = vpack.c.bf16 %v10990_v52, %v10990_v52  ;;  %v10979_v15 = vrot.slane %v10972_v50, %v22249_v20  ;;  %v10994_v59 = vcombine.low %v21831_v31, %v21800_v60  ;;  %v18362_v17 = vld [vmem:[#allocation3 + $0xff8] sm:$0xff]   ;;  %v18368_v16 = vld [vmem:[#allocation3 + $0x10b0] sm:$0xff]   ;;  %v18367_v60 = vld [vmem:[#allocation3 + $0x1028] sm:$0xff]  }
 0x92a   : > { %11669 = vmatprep.mubr.bf16.mxu1 %v11006_v39  ;;  %11709 = vmatprep.mubr.bf16.mxu0 %v11008_v11  ;;  %v11007_v12 = vpack.c.bf16 %v10957_v55, %v10957_v55  ;;  %v18364_v29 = vld [vmem:[#allocation3 + $0x10b8] sm:$0xff]   ;;  %v18365_v53 = vld [vmem:[#allocation3 + $0xff0] sm:$0xff]   ;;  %v18369_v56 = vld [vmem:[#allocation3 + $0xfe8] sm:$0xff]  }
 0x92b   : > { %11670 = vmatmul.mubr.bf16.vlgmr.msra.gmra.mxu1 %v11005_v41  ;;  %v11009_v28 = vpack.c.bf16 %v10979_v15, %v10979_v15  ;;  %v11001_v38 = vrot.slane %v10994_v59, %v22249_v20  ;;  %v18366_v24 = vld [vmem:[#allocation3 + $0x1078] sm:$0xff]   ;;  %v18370_v31 = vld [vmem:[#allocation3 + $0x1070] sm:$0xff]   ;;  %v18371_v23 = vld [vmem:[#allocation3 + $0x1020] sm:$0xff]  }
 0x92c   : > { %17216 = vmatpush3.bf16.msra.mxu0 %v18325_v10  ;;  %17236 = vmatpush3.bf16.msra.mxu1 %v18326_v13  ;;  %v18372_v26 = vld [vmem:[#allocation3 + $0x10a8] sm:$0xff]   ;;  %v18373_v52 = vld [vmem:[#allocation3 + $0xfe0] sm:$0xff]   ;;  %v18375_v39 = vld [vmem:[#allocation3 + $0x1018] sm:$0xff]  }
 0x92d   : > { %11749 = vmatprep.mubr.bf16.mxu1 %v11010_v25  ;;  %17217 = vmatprep.subr.bf16.mxu0 %v18327_v8  ;;  %v11011_v54 = vpack.c.bf16 %v11001_v38, %v11001_v38  ;;  %v18374_v10 = vld [vmem:[#allocation3 + $0x1068] sm:$0xff]   ;;  %v18376_v11 = vld [vmem:[#allocation3 + $0x10a0] sm:$0xff]   ;;  %v18377_v13 = vld [vmem:[#allocation3 + $0xfd8] sm:$0xff]  }
 0x92e   : > { %17237 = vmatprep.subr.bf16.mxu1 %v18328_v35  ;;  %v18378_v41 = vld [vmem:[#allocation3 + $0x1060] sm:$0xff]   ;;  %v18379_v8 = vld [vmem:[#allocation3 + $0x1010] sm:$0xff]   ;;  %v18380_v35 = vld [vmem:[#allocation3 + $0x1098] sm:$0xff]  }
 0x92f   : > { %v18381_v25 = vld [vmem:[#allocation3 + $0xfd0] sm:$0xff]  }
 0x930   : > { %17218 = vmatpush3.bf16.msra.mxu0 %v18329_v3  ;;  %17238 = vmatpush3.bf16.msra.mxu1 %v18330_v19  ;;  %v18382_v3 = vld [vmem:[#allocation3 + $0x1058] sm:$0xff]   ;;  %v18383_v19 = vld [vmem:[#allocation3 + $0x1008] sm:$0xff]  }
 0x931   : > { %17219 = vmatprep.subr.bf16.mxu0 %v18331_v49  ;;  %17239 = vmatprep.subr.bf16.mxu1 %v18332_v27  ;;  %v18384_v49 = vld [vmem:[#allocation3 + $0x1090] sm:$0xff]   ;;  %v21858_v27 = vld [vmem:[#allocation2 + $0x7] sm:$0x3] }
 0x932   : > { %12817 = vst [vmem:[#allocation2] sm:$0xff] %v21797_v44 }
 0x934   : > { %17220 = vmatpush3.bf16.msra.mxu0 %v18333_v45  ;;  %17240 = vmatpush3.bf16.msra.mxu1 %v18334_v63  ;;  %v18385_v45 = vld [vmem:[#allocation3 + $0xfc8] sm:$0xff]   ;;  %v18386_v63 = vld [vmem:[#allocation3 + $0x1050] sm:$0xff]  }
 0x935   : > { %17221 = vmatprep.subr.bf16.mxu0 %v18335_v46  ;;  %17241 = vmatprep.subr.bf16.mxu1 %v18336_v40  ;;  %v18387_v46 = vld [vmem:[#allocation3 + $0x1000] sm:$0xff]   ;;  %v18388_v40 = vld [vmem:[#allocation3 + $0x1088] sm:$0xff]  }
 0x938   : > { %17222 = vmatpush3.bf16.msra.mxu0 %v18337_v48  ;;  %17242 = vmatpush3.bf16.msra.mxu1 %v18338_v4  ;;  %v21861_v48 = vld [vmem:[#allocation2 + $0x8] sm:$0x3] }
 0x939   : > { %17223 = vmatprep.subr.bf16.mxu0 %v18339_v33  ;;  %17243 = vmatprep.subr.bf16.mxu1 %v18340_v21  ;;  %v21863_v4 = vld [vmem:[#allocation2 + $0x9] sm:$0x3]  ;;  %v18389_v33 = vld [vmem:[#allocation3 + $0xfc0] sm:$0xff]  }
 0x93a   : > { %v18390_v21 = vld [vmem:[#allocation3 + $0x1048] sm:$0xff]   ;;  %12818 = vst [vmem:[#allocation2 + $0x8] sm:$0xff] %v21797_v44 }
 0x93c   : > { %17224 = vmatpush3.bf16.msra.mxu0 %v18341_v6  ;;  %17244 = vmatpush3.bf16.msra.mxu1 %v18342_v57  ;;  %v18391_v6 = vld [vmem:[#allocation3 + $0x1080] sm:$0xff]   ;;  %v18392_v57 = vld [vmem:[#allocation3 + $0x1138] sm:$0xff]  }
 0x93d   : > { %17225 = vmatprep.subr.bf16.mxu0 %v18343_v0  ;;  %17245 = vmatprep.subr.bf16.mxu1 %v18344_v1  ;;  %v18393_v0 = vld [vmem:[#allocation3 + $0x1040] sm:$0xff]   ;;  %v18396_v1 = vld [vmem:[#allocation3 + $0x11b8] sm:$0xff]  }
 0x940   : > { %17226 = vmatpush3.bf16.msra.mxu0 %v18345_v9  ;;  %17246 = vmatpush3.bf16.msra.mxu1 %v18346_v36  ;;  %v21866_v9 = vld [vmem:[#allocation2 + $0x67] sm:$0x3] }
 0x941   : > { %17227 = vmatprep.subr.bf16.mxu0 %v18347_v61  ;;  %17247 = vmatprep.subr.bf16.mxu1 %v18348_v43  ;;  %v21868_v36 = vld [vmem:[#allocation2 + $0x68] sm:$0x3]  ;;  %13701 = vst [vmem:[#allocation2 + $0x60] sm:$0xff] %v21797_v44 }
 0x942   : > { %v21871_v61 = vld [vmem:[#allocation2 + $0x69] sm:$0x3] }
 0x943   : > { %13702 = vst [vmem:[#allocation2 + $0x68] sm:$0xff] %v21797_v44 }
 0x944   : > { %17228 = vmatpush3.bf16.msra.mxu0 %v18349_v2  ;;  %17248 = vmatpush3.bf16.msra.mxu1 %v18350_v30 }
 0x945   : > { %17741 = vmatprep.subr.bf16.mxu0 %v21797_v44  ;;  %17249 = vmatprep.subr.bf16.mxu1 %v18351_v22 }
 0x947   : > { %11710 = vmatmul.mubr.bf16.vlgmr.msra.gmra.mxu0 %v11007_v12 }
 0x948   : > { %17742 = vmatpush3.bf16.msra.mxu0 %v18353_v47  ;;  %17757 = vmatprep.mubr.msk.bf16.mxu0 %vm18681_vm7, %v21797_v44 }
 0x949   : > { %17250 = vmatpush3.bf16.msra.mxu1 %v18352_v58  ;;  %17743 = vmatprep.subr.bf16.mxu0 %v21797_v44 }
 0x94a   : > { %17266 = vmatprep.subr.bf16.mxu1 %v18361_v62 }
 0x94c   : > { %11750 = vmatmul.mubr.bf16.vlgmr.msra.gmra.mxu1 %v11009_v28  ;;  %17744 = vmatpush3.bf16.msra.mxu0 %v18354_v18 }
 0x94d   : > { %17745 = vmatprep.subr.bf16.mxu0 %v21797_v44  ;;  %17267 = vmatpush3.bf16.msra.mxu1 %v18362_v17 }
 0x94e   : > { %17268 = vmatprep.subr.bf16.mxu1 %v18363_v42 }
 0x950   : > { %17746 = vmatpush3.bf16.msra.mxu0 %v18355_v32 }
 0x951   : > { %17747 = vmatprep.subr.bf16.mxu0 %v21797_v44  ;;  %17269 = vmatpush3.bf16.msra.mxu1 %v18365_v53 }
 0x952   : > { %17270 = vmatprep.subr.bf16.mxu1 %v18367_v60 }
 0x954   : > { %17748 = vmatpush3.bf16.msra.mxu0 %v18356_v7 }
 0x955   : > { %17749 = vmatprep.subr.bf16.mxu0 %v21797_v44  ;;  %17271 = vmatpush3.bf16.msra.mxu1 %v18369_v56 }
 0x956   : > { %17272 = vmatprep.subr.bf16.mxu1 %v18371_v23 }
 0x958   : > { %17750 = vmatpush3.bf16.msra.mxu0 %v18357_v34 }
 0x959   : > { %17751 = vmatprep.subr.bf16.mxu0 %v21797_v44  ;;  %17273 = vmatpush3.bf16.msra.mxu1 %v18373_v52 }
 0x95a   : > { %17274 = vmatprep.subr.bf16.mxu1 %v18375_v39 }
 0x95c   : > { %17752 = vmatpush3.bf16.msra.mxu0 %v18358_v5 }
 0x95d   : > { %17753 = vmatprep.subr.bf16.mxu0 %v21797_v44  ;;  %17275 = vmatpush3.bf16.msra.mxu1 %v18377_v13 }
 0x95e   : > { %17276 = vmatprep.subr.bf16.mxu1 %v18379_v8 }
 0x960   : > { %17754 = vmatpush3.bf16.msra.mxu0 %v18359_v14  ;;  %v15388_v14 = vld [vmem:[#allocation5 + $0x6] ss:$0 sm:$0xff] }
 0x961   : > { %17755 = vmatprep.subr.bf16.mxu0 %v21797_v44  ;;  %17277 = vmatpush3.bf16.msra.mxu1 %v18381_v25 }
 0x962   : > { %17278 = vmatprep.subr.bf16.mxu1 %v18383_v19 }
 0x964   : > { %17756 = vmatpush3.bf16.msra.mxu0 %v18360_v51 }
 0x965   : > { %17288 = vmatprep.subr.bf16.mxu0 %v18364_v29  ;;  %17279 = vmatpush3.bf16.msra.mxu1 %v18385_v45 }
 0x966   : > { %17280 = vmatprep.subr.bf16.mxu1 %v18387_v46 }
 0x967   : > { %17758 = vmatmul.mubr.bf16.vlgmr.msra.gmra.mxu0 %v11011_v54 }
 0x968   : > { %17289 = vmatpush3.bf16.msra.mxu0 %v18366_v24 }
 0x969   : > { %17290 = vmatprep.subr.bf16.mxu0 %v18368_v16  ;;  %17281 = vmatpush3.bf16.msra.mxu1 %v18389_v33 }
 0x96a   : > { %17310 = vmatprep.subr.bf16.mxu1 %v18392_v57 }
 0x96c   : > { %17291 = vmatpush3.bf16.msra.mxu0 %v18370_v31 }
 0x96d   : > { %17292 = vmatprep.subr.bf16.mxu0 %v18372_v26 }
 0x970   : > { %17293 = vmatpush3.bf16.msra.mxu0 %v18374_v10 }
 0x971   : > { %17294 = vmatprep.subr.bf16.mxu0 %v18376_v11 }
 0x974   : > { %17295 = vmatpush3.bf16.msra.mxu0 %v18378_v41 }
 0x975   : > { %17296 = vmatprep.subr.bf16.mxu0 %v18380_v35 }
 0x978   : > { %17297 = vmatpush3.bf16.msra.mxu0 %v18382_v3 }
 0x979   : > { %17298 = vmatprep.subr.bf16.mxu0 %v18384_v49  ;;  %v18394_v49 = vld [vmem:[#allocation3 + $0x10f8] sm:$0xff]  }
 0x97c   : > { %17299 = vmatpush3.bf16.msra.mxu0 %v18386_v63 }
 0x97d   : > { %17300 = vmatprep.subr.bf16.mxu0 %v18388_v40 }
 0x980   : > { %17301 = vmatpush3.bf16.msra.mxu0 %v18390_v21 }
 0x981   : > { %17302 = vmatprep.subr.bf16.mxu0 %v18391_v6 }
 0x984   : > { %17303 = vmatpush3.bf16.msra.mxu0 %v18393_v0 }
 0x985   : > { %17332 = vmatprep.subr.bf16.mxu0 %v18396_v1 }
 0x9e7   : > { %v17185_v37 = vpop.f32.mrf.mxu0 }
 0x9e9   : > { %v17186_v43 = vpop.f32.mrf.mxu0 }
 0x9ea   : > { %v17187_v5 = vadd.f32 %v17186_v43, %v17185_v37 }
 0x9eb   : > { %v17188_v2 = vpop.f32.mrf.mxu0  ;;  %v17207_v30 = vpop.f32.mrf.mxu1 }
 0x9ec   : > { %v11632_v51 = vadd.f32 %v17187_v5, %v15388_v14  ;;  %v18407_v5 = vld [vmem:[#allocation3 + $0x1118] sm:$0xff]   ;;  %v18408_v14 = vld [vmem:[#allocation3 + $0x11a0] sm:$0xff]  }
 0x9ed   : > { %v17189_v55 = vpop.f32.mrf.mxu0  ;;  %v17208_v22 = vpop.f32.mrf.mxu1 }
 0x9ee   : > { %v17209_v59 = vadd.f32 %v17208_v22, %v17207_v30  ;;  %v18397_v22 = vld [vmem:[#allocation3 + $0x10f0] sm:$0xff]  }
 0x9ef   : > { %v17210_v50 = vpop.f32.mrf.mxu1 }
 0x9f0   : > { %v11672_v54 = vadd.f32 %v17209_v59, %v11632_v51  ;;  %v18398_v50 = vld [vmem:[#allocation3 + $0x1178] sm:$0xff]   ;;  %v18410_v51 = vld [vmem:[#allocation3 + $0x1160] sm:$0xff]  }
 0x9f1   : > { %v17211_v47 = vpop.f32.mrf.mxu1  ;;  %v18409_v59 = vld [vmem:[#allocation3 + $0x10d8] sm:$0xff]  }
 0xa07   : > { %v17229_v12 = vpop.f32.mrf.mxu0 }
 0xa09   : > { %v17230_v58 = vpop.f32.mrf.mxu0 }
 0xa0a   : > { %v17231_v38 = vadd.f32 %v17230_v58, %v17229_v12  ;;  %v18400_v12 = vld [vmem:[#allocation3 + $0x11b0] sm:$0xff]  }
 0xa0b   : > { %v17232_v15 = vpop.f32.mrf.mxu0 }
 0xa0c   : > { %v17251_v18 = vpop.f32.mrf.mxu1  ;;  %v11712_v17 = vadd.f32 %v17231_v38, %v11672_v54  ;;  %v18401_v15 = vld [vmem:[#allocation3 + $0x10e8] sm:$0xff]   ;;  %v18411_v38 = vld [vmem:[#allocation3 + $0x1110] sm:$0xff]   ;;  %v18412_v54 = vld [vmem:[#allocation3 + $0x1198] sm:$0xff]  }
 0xa0d   : > { %v17233_v28 = vpop.f32.mrf.mxu0 }
 0xa0e   : > { %v17252_v32 = vpop.f32.mrf.mxu1  ;;  %v18403_v28 = vld [vmem:[#allocation3 + $0x1120] sm:$0xff]  }
 0xa0f   : > { %v17253_v62 = vadd.f32 %v17252_v32, %v17251_v18  ;;  %v18402_v18 = vld [vmem:[#allocation3 + $0x1170] sm:$0xff]   ;;  %v18404_v32 = vld [vmem:[#allocation3 + $0x11a8] sm:$0xff]  }
 0xa10   : > { %v17254_v7 = vpop.f32.mrf.mxu1 }
 0xa11   : > { %v11752_v42 = vadd.f32 %v17253_v62, %v11712_v17  ;;  %v18405_v7 = vld [vmem:[#allocation3 + $0x10e0] sm:$0xff]   ;;  %v18413_v62 = vld [vmem:[#allocation3 + $0x10d0] sm:$0xff]   ;;  %v18414_v17 = vld [vmem:[#allocation3 + $0x1158] sm:$0xff]  }
 0xa12   : > { %v17255_v34 = vpop.f32.mrf.mxu1 }
 0xa13   : > { %v18406_v34 = vld [vmem:[#allocation3 + $0x1168] sm:$0xff]  }
 0xa27   : > { %v11791_v29 = vpop.f32.mrf.mxu0 }
 0xa28   : > { %v11792_v24 = vadd.f32 %v11791_v29, %v11752_v42  ;;  %v18415_v42 = vld [vmem:[#allocation3 + $0x1108] sm:$0xff]   ;;  %v18416_v29 = vld [vmem:[#allocation3 + $0x1190] sm:$0xff]  }
 0xa29   : > { %v17759_v16 = vpop.f32.mrf.mxu0 }
 0xa2a   : > { %v11797_v53 = vmul.f32 0.01, %v11792_v24  ;;  %v18418_v16 = vld [vmem:[#allocation3 + $0x1150] sm:$0xff]  }
 0xa2b   : > { %v11794_v60 = vpop.f32.mrf.mxu0 }
 0xa2c   : > { %v11798_v31 = vmax.f32 %v11792_v24, %v11797_v53  ;;  %v18417_v24 = vld [vmem:[#allocation3 + $0x10c8] sm:$0xff]   ;;  %v18419_v53 = vld [vmem:[#allocation3 + $0x1100] sm:$0xff]  }
 0xa2d   : > { %v17760_v56 = vpop.f32.mrf.mxu0  ;;  %v18420_v60 = vld [vmem:[#allocation3 + $0x1188] sm:$0xff]  }
 0xa2e   : > { %v11806_v23 = vrot.slane %v11798_v31, %v22249_v20  ;;  %15461 = vst.sshfl [vmem:[#allocation2 + $0x28] sm:$0x3 pattern:$0x76325410] %v11798_v31  ;;  %v18421_v56 = vld [vmem:[#allocation3 + $0x10c0] sm:$0xff]  }
 0xa30   : > { %v11807_v26 = vcombine.high %v11806_v23, %v11806_v23  ;;  %v18422_v23 = vld [vmem:[#allocation3 + $0x1148] sm:$0xff]  }
 0xa32   : > { %11883 = vst [vmem:[#allocation2 + $0x48] sm:$0x3] %v11807_v26 }
 0xa35   : > { %v11887_v52 = vld [vmem:[#allocation2 + $0x28] sm:$0x3] }
 0xa36   : > { %v11885_v10 = vld [vmem:[#allocation2 + $0x27] sm:$0x3]  ;;  %v11915_v11 = vcombine.low %v21861_v48, %v11887_v52  ;;  %v11894_v41 = vld [vmem:[#allocation2 + $0x29] sm:$0x3] }
 0xa37   : > { %v11890_v39 = vld [vmem:[#allocation2 + $0x27] sm:$0x3]  ;;  %v11904_v13 = vcombine.low %v21858_v27, %v11885_v10  ;;  %v11889_v8 = vld [vmem:[#allocation2 + $0x29] sm:$0x3] }
 0xa38   : > { %12821 = vst [vmem:[#allocation2 + $0x20] sm:$0xff] %v21797_v44  ;;  %v21878_v35 = vld [vmem:[#allocation2 + $0x28] sm:$0x3]  ;;  %v11926_v25 = vcombine.low %v21863_v4, %v11889_v8  ;;  %v11922_v3 = vrot.slane %v11915_v11, %v22249_v20  ;;  %v18395_v4 = vld [vmem:[#allocation3 + $0x1130] sm:$0xff]   ;;  %v18423_v52 = vld [vmem:[#allocation3 + $0x1180] sm:$0xff]  }
 0xa39   : > { %12822 = vst [vmem:[#allocation2 + $0x28] sm:$0xff] %v21797_v44  ;;  %v11911_v19 = vrot.slane %v11904_v13, %v22249_v20  ;;  %v11891_v45 = vld [vmem:[#allocation2 + $0x47] sm:$0x3]  ;;  %v11895_v63 = vld [vmem:[#allocation2 + $0x49] sm:$0x3]  ;;  %v18425_v11 = vld [vmem:[#allocation3 + $0x11f8] sm:$0xff]  }
 0xa3a   : > { %v11898_v46 = vld [vmem:[#allocation2 + $0x48] sm:$0x3]  ;;  %v12002_v40 = vpack.c.bf16 %v11922_v3, %v11922_v3  ;;  %v11937_v48 = vcombine.low %v11890_v39, %v11891_v45  ;;  %v11959_v33 = vcombine.low %v11894_v41, %v11895_v63  ;;  %v11933_v0 = vrot.slane %v11926_v25, %v22249_v20  ;;  %v18424_v39 = vld [vmem:[#allocation3 + $0x1140] sm:$0xff]   ;;  %v18426_v8 = vld [vmem:[#allocation3 + $0x11f0] sm:$0xff]  }
 0xa3b   : > { %v12001_v27 = vpack.c.bf16 %v11911_v19, %v11911_v19  ;;  %v21884_v21 = vld [vmem:[#allocation2 + $0x48] sm:$0x3]  ;;  %v11981_v1 = vcombine.low %v11898_v46, %v21868_v36  ;;  %v18428_v25 = vld [vmem:[#allocation3 + $0x11e0] sm:$0xff]   ;;  %v18429_v3 = vld [vmem:[#allocation3 + $0x11d8] sm:$0xff]  }
 0xa3c   : > { %v21886_v6 = vld [vmem:[#allocation2 + $0x47] sm:$0x3]  ;;  %v21888_v57 = vld [vmem:[#allocation2 + $0x49] sm:$0x3]  ;;  %12627 = vmatprep.mubr.bf16.mxu1 %v12002_v40  ;;  %v11944_v37 = vrot.slane %v11937_v48, %v22249_v20  ;;  %v11966_v43 = vrot.slane %v11959_v33, %v22249_v20  ;;  %v12003_v47 = vpack.c.bf16 %v11933_v0, %v11933_v0  ;;  %v11948_v31 = vcombine.low %v21878_v35, %v21884_v21  ;;  %v18430_v19 = vld [vmem:[#allocation3 + $0x11d0] sm:$0xff]  }
 0xa3d   : > { %12825 = vst [vmem:[#allocation2 + $0x40] sm:$0xff] %v21797_v44  ;;  %12826 = vst [vmem:[#allocation2 + $0x48] sm:$0xff] %v21797_v44  ;;  %12628 = vmatmul.mubr.bf16.vlgmr.msra.gmra.mxu1 %v12001_v27  ;;  %v11988_v2 = vrot.slane %v11981_v1, %v22249_v20  ;;  %v18399_v36 = vld [vmem:[#allocation3 + $0x1128] sm:$0xff]   ;;  %v11970_v10 = vcombine.low %v21886_v6, %v21866_v9  ;;  %v11992_v45 = vcombine.low %v21888_v57, %v21871_v61  ;;  %v18432_v63 = vld [vmem:[#allocation3 + $0x11c0] sm:$0xff]  }
 0xa3e   : > { %17311 = vmatpush3.bf16.msra.mxu1 %v18394_v49  ;;  %v12004_v30 = vpack.c.bf16 %v11944_v37, %v11944_v37  ;;  %v12006_v55 = vpack.c.bf16 %v11966_v43, %v11966_v43  ;;  %v11955_v26 = vrot.slane %v11948_v31, %v22249_v20  ;;  %v18427_v9 = vld [vmem:[#allocation3 + $0x11e8] sm:$0xff]   ;;  %v18433_v27 = vld [vmem:[#allocation3 + $0x1278] sm:$0xff]   ;;  %v18435_v33 = vld [vmem:[#allocation3 + $0x1270] sm:$0xff]  }
 0xa3f   : > { %17312 = vmatprep.subr.bf16.mxu1 %v18395_v4  ;;  %v12008_v58 = vpack.c.bf16 %v11988_v2, %v11988_v2  ;;  %v11977_v41 = vrot.slane %v11970_v10, %v22249_v20  ;;  %v18431_v49 = vld [vmem:[#allocation3 + $0x11c8] sm:$0xff]   ;;  %v11999_v46 = vrot.slane %v11992_v45, %v22249_v20  ;;  %v18434_v48 = vld [vmem:[#allocation3 + $0x1238] sm:$0xff]   ;;  %v18441_v4 = vld [vmem:[#allocation3 + $0x12f0] sm:$0xff]  }
 0xa40   : > { %12667 = vmatprep.mubr.bf16.mxu0 %v12004_v30  ;;  %12707 = vmatprep.mubr.bf16.mxu1 %v12006_v55  ;;  %v12005_v13 = vpack.c.bf16 %v11955_v26, %v11955_v26  ;;  %v18437_v21 = vld [vmem:[#allocation3 + $0x12f8] sm:$0xff]   ;;  %v18436_v0 = vld [vmem:[#allocation3 + $0x1230] sm:$0xff]   ;;  %v18439_v61 = vld [vmem:[#allocation3 + $0x1268] sm:$0xff]  }
 0xa41   : > { %12668 = vmatmul.mubr.bf16.vlgmr.msra.gmra.mxu0 %v12003_v47  ;;  %v12007_v35 = vpack.c.bf16 %v11977_v41, %v11977_v41  ;;  %v12009_v40 = vpack.c.bf16 %v11999_v46, %v11999_v46  ;;  %v18438_v6 = vld [vmem:[#allocation3 + $0x12b8] sm:$0xff]   ;;  %v18442_v57 = vld [vmem:[#allocation3 + $0x12b0] sm:$0xff]   ;;  %v18443_v1 = vld [vmem:[#allocation3 + $0x1260] sm:$0xff]  }
 0xa42   : > { %17313 = vmatpush3.bf16.msra.mxu1 %v18397_v22  ;;  %17333 = vmatpush3.bf16.msra.mxu0 %v18398_v50  ;;  %v18444_v37 = vld [vmem:[#allocation3 + $0x1220] sm:$0xff]   ;;  %v18445_v43 = vld [vmem:[#allocation3 + $0x12e8] sm:$0xff]   ;;  %v18447_v30 = vld [vmem:[#allocation3 + $0x1258] sm:$0xff]  }
 0xa43   : > { %12747 = vmatprep.mubr.bf16.mxu0 %v12008_v58  ;;  %17314 = vmatprep.subr.bf16.mxu1 %v18399_v36  ;;  %v18446_v2 = vld [vmem:[#allocation3 + $0x12a8] sm:$0xff]   ;;  %v18448_v55 = vld [vmem:[#allocation3 + $0x1218] sm:$0xff]   ;;  %v18449_v22 = vld [vmem:[#allocation3 + $0x12e0] sm:$0xff]  }
 0xa44   : > { %17334 = vmatprep.subr.bf16.mxu0 %v18400_v12  ;;  %v18450_v50 = vld [vmem:[#allocation3 + $0x12a0] sm:$0xff]   ;;  %v18451_v47 = vld [vmem:[#allocation3 + $0x1250] sm:$0xff]   ;;  %v18453_v12 = vld [vmem:[#allocation3 + $0x12d8] sm:$0xff]  }
 0xa45   : > { %v18452_v36 = vld [vmem:[#allocation3 + $0x1210] sm:$0xff]   ;;  %v18455_v58 = vld [vmem:[#allocation3 + $0x1248] sm:$0xff]   ;;  %v18464_v31 = vld [vmem:[#allocation3 + $0x1280] sm:$0xff]  }
 0xa46   : > { %17315 = vmatpush3.bf16.msra.mxu1 %v18401_v15  ;;  %17335 = vmatpush3.bf16.msra.mxu0 %v18402_v18  ;;  %v18454_v15 = vld [vmem:[#allocation3 + $0x1298] sm:$0xff]   ;;  %v18456_v18 = vld [vmem:[#allocation3 + $0x1208] sm:$0xff]   ;;  %v18471_v10 = vld [vmem:[#allocation3 + $0x13f0] sm:$0xff]  }
 0xa47   : > { %17316 = vmatprep.subr.bf16.mxu1 %v18403_v28  ;;  %17336 = vmatprep.subr.bf16.mxu0 %v18404_v32  ;;  %v18457_v28 = vld [vmem:[#allocation3 + $0x12d0] sm:$0xff]   ;;  %v18459_v32 = vld [vmem:[#allocation3 + $0x1240] sm:$0xff]   ;;  %v18475_v41 = vld [vmem:[#allocation3 + $0x13e8] sm:$0xff]  }
 0xa48   : > { %v18483_v45 = vld [vmem:[#allocation3 + $0x13d8] sm:$0xff]   ;;  %v12895_v46 = vld [vmem:[#allocation2 + $0x29] sm:$0x1] }
 0xa4a   : > { %17317 = vmatpush3.bf16.msra.mxu1 %v18405_v7  ;;  %17337 = vmatpush3.bf16.msra.mxu0 %v18406_v34  ;;  %v12891_v7 = vld [vmem:[#allocation2 + $0x8] sm:$0x1]  ;;  %v12890_v34 = vld [vmem:[#allocation2 + $0x7] sm:$0x1] }
 0xa4b   : > { %17318 = vmatprep.subr.bf16.mxu1 %v18407_v5  ;;  %17338 = vmatprep.subr.bf16.mxu0 %v18408_v14  ;;  %v12900_v5 = vpack.c.bf16 %v12891_v7, %v12891_v7  ;;  %v21916_v14 = vld [vmem:[#allocation2 + $0x18] sm:$0xff]  ;;  %v18508_v7 = vld [vmem:[#allocation3 + $0x1470] sm:$0xff]  }
 0xa4c   : > { %13689 = vst [vmem:[#allocation2] sm:$0xff] %v21916_v14 }
 0xa4e   : > { %17319 = vmatpush3.bf16.msra.mxu1 %v18409_v59  ;;  %17339 = vmatpush3.bf16.msra.mxu0 %v18410_v51  ;;  %v12893_v59 = vld [vmem:[#allocation2 + $0x27] sm:$0x1]  ;;  %v12892_v51 = vld [vmem:[#allocation2 + $0x9] sm:$0x1] }
 0xa4f   : > { %17320 = vmatprep.subr.bf16.mxu1 %v18411_v38  ;;  %17340 = vmatprep.subr.bf16.mxu0 %v18412_v54  ;;  %v18458_v38 = vld [vmem:[#allocation3 + $0x1290] sm:$0xff]   ;;  %v18460_v54 = vld [vmem:[#allocation3 + $0x1200] sm:$0xff]   ;;  %13693 = vst [vmem:[#allocation2 + $0x20] sm:$0xff] %v21916_v14  ;;  %13690 = vst [vmem:[#allocation2 + $0x8] sm:$0xff] %v21916_v14  ;;  %v12901_v26 = vpack.c.bf16 %v12892_v51, %v12892_v51 }
 0xa50   : > { %v18512_v51 = vld [vmem:[#allocation3 + $0x1468] sm:$0xff]  }
 0xa52   : > { %17321 = vmatpush3.bf16.msra.mxu1 %v18413_v62  ;;  %17341 = vmatpush3.bf16.msra.mxu0 %v18414_v17  ;;  %v12902_v62 = vpack.c.bf16 %v12893_v59, %v12893_v59  ;;  %v18461_v17 = vld [vmem:[#allocation3 + $0x12c8] sm:$0xff]  }
 0xa53   : > { %17322 = vmatprep.subr.bf16.mxu1 %v18415_v42  ;;  %17342 = vmatprep.subr.bf16.mxu0 %v18416_v29  ;;  %v18465_v42 = vld [vmem:[#allocation3 + $0x1378] sm:$0xff]   ;;  %v12899_v29 = vpack.c.bf16 %v12890_v34, %v12890_v34 }
 0xa56   : > { %17323 = vmatpush3.bf16.msra.mxu1 %v18417_v24  ;;  %17343 = vmatpush3.bf16.msra.mxu0 %v18418_v16  ;;  %v18462_v24 = vld [vmem:[#allocation3 + $0x1288] sm:$0xff]   ;;  %v18466_v16 = vld [vmem:[#allocation3 + $0x1338] sm:$0xff]  }
 0xa57   : > { %17324 = vmatprep.subr.bf16.mxu1 %v18419_v53  ;;  %17344 = vmatprep.subr.bf16.mxu0 %v18420_v60  ;;  %v18463_v53 = vld [vmem:[#allocation3 + $0x12c0] sm:$0xff]   ;;  %v18468_v60 = vld [vmem:[#allocation3 + $0x1370] sm:$0xff]  }
 0xa5a   : > { %17325 = vmatpush3.bf16.msra.mxu1 %v18421_v56  ;;  %17345 = vmatpush3.bf16.msra.mxu0 %v18422_v23  ;;  %v18470_v56 = vld [vmem:[#allocation3 + $0x1330] sm:$0xff]   ;;  %v18467_v23 = vld [vmem:[#allocation3 + $0x13f8] sm:$0xff]  }
 0xa5b   : > { %17346 = vmatprep.subr.bf16.mxu0 %v18423_v52  ;;  %17761 = vmatprep.subr.bf16.mxu1 %v21797_v44  ;;  %v18469_v52 = vld [vmem:[#allocation3 + $0x13b8] sm:$0xff]  }
 0xa5d   : > { %12708 = vmatmul.mubr.bf16.vlgmr.msra.gmra.mxu1 %v12005_v13  ;;  %v18474_v13 = vld [vmem:[#allocation3 + $0x1328] sm:$0xff]  }
 0xa5e   : > { %17347 = vmatpush3.bf16.msra.mxu0 %v18424_v39  ;;  %17762 = vmatpush3.bf16.msra.mxu1 %v18425_v11  ;;  %v18472_v39 = vld [vmem:[#allocation3 + $0x1368] sm:$0xff]   ;;  %v18473_v11 = vld [vmem:[#allocation3 + $0x13b0] sm:$0xff]  }
 0xa5f   : > { %17763 = vmatprep.subr.bf16.mxu1 %v21797_v44  ;;  %17777 = vmatprep.mubr.msk.bf16.mxu1 %vm18681_vm7, %v21797_v44 }
 0xa60   : > { %17363 = vmatprep.subr.bf16.mxu0 %v18433_v27  ;;  %v18485_v27 = vld [vmem:[#allocation3 + $0x1398] sm:$0xff]  }
 0xa61   : > { %12748 = vmatmul.mubr.bf16.vlgmr.msra.gmra.mxu0 %v12007_v35  ;;  %v18477_v35 = vld [vmem:[#allocation3 + $0x13a8] sm:$0xff]  }
 0xa62   : > { %17764 = vmatpush3.bf16.msra.mxu1 %v18426_v8  ;;  %17364 = vmatpush3.bf16.msra.mxu0 %v18434_v48  ;;  %v18476_v8 = vld [vmem:[#allocation3 + $0x1360] sm:$0xff]   ;;  %v18486_v48 = vld [vmem:[#allocation3 + $0x1310] sm:$0xff]  }
 0xa63   : > { %17765 = vmatprep.subr.bf16.mxu1 %v21797_v44  ;;  %17365 = vmatprep.subr.bf16.mxu0 %v18435_v33  ;;  %v18487_v33 = vld [vmem:[#allocation3 + $0x13d0] sm:$0xff]  }
 0xa64   : > { %13519 = vmatprep.mubr.bf16.mxu0 %v12900_v5  ;;  %v18511_v5 = vld [vmem:[#allocation3 + $0x14a8] sm:$0xff]  }
 0xa66   : > { %17766 = vmatpush3.bf16.msra.mxu1 %v18427_v9  ;;  %17366 = vmatpush3.bf16.msra.mxu0 %v18436_v0  ;;  %v18478_v9 = vld [vmem:[#allocation3 + $0x1320] sm:$0xff]  }
 0xa67   : > { %17767 = vmatprep.subr.bf16.mxu1 %v21797_v44  ;;  %17367 = vmatprep.subr.bf16.mxu0 %v18439_v61  ;;  %v18489_v61 = vld [vmem:[#allocation3 + $0x1390] sm:$0xff]  }
 0xa6a   : > { %17768 = vmatpush3.bf16.msra.mxu1 %v18428_v25  ;;  %v18479_v25 = vld [vmem:[#allocation3 + $0x13e0] sm:$0xff]  }
 0xa6b   : > { %17769 = vmatprep.subr.bf16.mxu1 %v21797_v44 }
 0xa6e   : > { %17770 = vmatpush3.bf16.msra.mxu1 %v18429_v3  ;;  %v18480_v3 = vld [vmem:[#allocation3 + $0x1358] sm:$0xff]  }
 0xa6f   : > { %17771 = vmatprep.subr.bf16.mxu1 %v21797_v44 }
 0xa72   : > { %17772 = vmatpush3.bf16.msra.mxu1 %v18430_v19  ;;  %v18481_v19 = vld [vmem:[#allocation3 + $0x13a0] sm:$0xff]  }
 0xa73   : > { %17773 = vmatprep.subr.bf16.mxu1 %v21797_v44 }
 0xa76   : > { %17774 = vmatpush3.bf16.msra.mxu1 %v18431_v49  ;;  %v18482_v49 = vld [vmem:[#allocation3 + $0x1318] sm:$0xff]  }
 0xa77   : > { %17775 = vmatprep.subr.bf16.mxu1 %v21797_v44  ;;  %v18440_v44 = vld [vmem:[#allocation3 + $0x1228] sm:$0xff]  }
 0xa78   : > { %17368 = vmatpush3.bf16.msra.mxu0 %v18440_v44  ;;  %v18491_v44 = vld [vmem:[#allocation3 + $0x13c8] sm:$0xff]  }
 0xa79   : > { %17369 = vmatprep.subr.bf16.mxu0 %v18443_v1  ;;  %v18492_v1 = vld [vmem:[#allocation3 + $0x1340] sm:$0xff]  }
 0xa7a   : > { %17776 = vmatpush3.bf16.msra.mxu1 %v18432_v63  ;;  %v18484_v63 = vld [vmem:[#allocation3 + $0x1350] sm:$0xff]  }
 0xa7b   : > { %17385 = vmatprep.subr.bf16.mxu1 %v18437_v21  ;;  %v12897_v21 = vld [vmem:[#allocation2 + $0x48] sm:$0x1] }
 0xa7c   : > { %17370 = vmatpush3.bf16.msra.mxu0 %v18444_v37  ;;  %v12906_v0 = vpack.c.bf16 %v12897_v21, %v12897_v21  ;;  %v18493_v37 = vld [vmem:[#allocation3 + $0x1388] sm:$0xff]  }
 0xa7d   : > { %17778 = vmatmul.mubr.bf16.vlgmr.msra.gmra.mxu1 %v12009_v40  ;;  %17371 = vmatprep.subr.bf16.mxu0 %v18447_v30  ;;  %v12904_v40 = vpack.c.bf16 %v12895_v46, %v12895_v46  ;;  %v18496_v30 = vld [vmem:[#allocation3 + $0x1380] sm:$0xff]  }
 0xa7e   : > { %17386 = vmatpush3.bf16.msra.mxu1 %v18438_v6  ;;  %13559 = vmatprep.mubr.bf16.mxu1 %v12902_v62  ;;  %v12896_v6 = vld [vmem:[#allocation2 + $0x47] sm:$0x1]  ;;  %v18519_v62 = vld [vmem:[#allocation3 + $0x1498] sm:$0xff]  }
 0xa7f   : > { %17387 = vmatprep.subr.bf16.mxu1 %v18441_v4  ;;  %v18488_v4 = vld [vmem:[#allocation3 + $0x1348] sm:$0xff]   ;;  %13697 = vst [vmem:[#allocation2 + $0x40] sm:$0xff] %v21916_v14 }
 0xa80   : > { %17372 = vmatpush3.bf16.msra.mxu0 %v18448_v55  ;;  %v12905_v55 = vpack.c.bf16 %v12896_v6, %v12896_v6 }
 0xa81   : > { %17373 = vmatprep.subr.bf16.mxu0 %v18451_v47 }
 0xa82   : > { %17388 = vmatpush3.bf16.msra.mxu1 %v18442_v57  ;;  %v18490_v57 = vld [vmem:[#allocation3 + $0x1308] sm:$0xff]  }
 0xa83   : > { %17389 = vmatprep.subr.bf16.mxu1 %v18445_v43  ;;  %v18494_v43 = vld [vmem:[#allocation3 + $0x1300] sm:$0xff]  }
 0xa84   : > { %17374 = vmatpush3.bf16.msra.mxu0 %v18452_v36 }
 0xa85   : > { %17375 = vmatprep.subr.bf16.mxu0 %v18455_v58  ;;  %v18505_v58 = vld [vmem:[#allocation3 + $0x14b8] sm:$0xff]  }
 0xa86   : > { %17390 = vmatpush3.bf16.msra.mxu1 %v18446_v2  ;;  %v18495_v2 = vld [vmem:[#allocation3 + $0x13c0] sm:$0xff]  }
 0xa87   : > { %17391 = vmatprep.subr.bf16.mxu1 %v18449_v22  ;;  %v21923_v22 = vld [vmem:[#allocation2 + $0x49] sm:$0x1] }
 0xa88   : > { %17376 = vmatpush3.bf16.msra.mxu0 %v18456_v18  ;;  %13698 = vst [vmem:[#allocation2 + $0x48] sm:$0xff] %v21916_v14  ;;  %v18507_v18 = vld [vmem:[#allocation3 + $0x14b0] sm:$0xff]  }
 0xa89   : > { %17377 = vmatprep.subr.bf16.mxu0 %v18459_v32 }
 0xa8a   : > { %17392 = vmatpush3.bf16.msra.mxu1 %v18450_v50 }
 0xa8b   : > { %17393 = vmatprep.subr.bf16.mxu1 %v18453_v12 }
 0xa8c   : > { %17378 = vmatpush3.bf16.msra.mxu0 %v18460_v54  ;;  %v18516_v54 = vld [vmem:[#allocation3 + $0x1460] sm:$0xff]  }
 0xa8d   : > { %17407 = vmatprep.subr.bf16.mxu0 %v18465_v42  ;;  %v18523_v42 = vld [vmem:[#allocation3 + $0x1490] sm:$0xff]  }
 0xa8e   : > { %17394 = vmatpush3.bf16.msra.mxu1 %v18454_v15  ;;  %v18506_v15 = vld [vmem:[#allocation3 + $0x1478] sm:$0xff]  }
 0xa8f   : > { %17395 = vmatprep.subr.bf16.mxu1 %v18457_v28  ;;  %13520 = vmatmul.mubr.bf16.vlgmr.msra.gmra.mxu0 %v12899_v29 }
 0xa90   : > { %17408 = vmatpush3.bf16.msra.mxu0 %v18466_v16  ;;  %13599 = vmatprep.mubr.bf16.mxu0 %v12904_v40 }
 0xa91   : > { %17409 = vmatprep.subr.bf16.mxu0 %v18468_v60 }
 0xa92   : > { %17396 = vmatpush3.bf16.msra.mxu1 %v18458_v38  ;;  %v18515_v38 = vld [vmem:[#allocation3 + $0x14a0] sm:$0xff]  }
 0xa93   : > { %17397 = vmatprep.subr.bf16.mxu1 %v18461_v17  ;;  %v18520_v17 = vld [vmem:[#allocation3 + $0x1458] sm:$0xff]  }
 0xa94   : > { %17410 = vmatpush3.bf16.msra.mxu0 %v18470_v56 }
 0xa95   : > { %17411 = vmatprep.subr.bf16.mxu0 %v18472_v39 }
 0xa96   : > { %17398 = vmatpush3.bf16.msra.mxu1 %v18462_v24 }
 0xa97   : > { %17399 = vmatprep.subr.bf16.mxu1 %v18463_v53 }
 0xa98   : > { %17412 = vmatpush3.bf16.msra.mxu0 %v18474_v13 }
 0xa99   : > { %17413 = vmatprep.subr.bf16.mxu0 %v18476_v8 }
 0xa9a   : > { %17400 = vmatpush3.bf16.msra.mxu1 %v18464_v31 }
 0xa9b   : > { %17429 = vmatprep.subr.bf16.mxu1 %v18467_v23 }
 0xa9c   : > { %17414 = vmatpush3.bf16.msra.mxu0 %v18478_v9 }
 0xa9d   : > { %13560 = vmatmul.mubr.bf16.vlgmr.msra.gmra.mxu1 %v12901_v26  ;;  %17415 = vmatprep.subr.bf16.mxu0 %v18480_v3 }
 0xa9e   : > { %17430 = vmatpush3.bf16.msra.mxu1 %v18469_v52  ;;  %13639 = vmatprep.mubr.bf16.mxu1 %v12906_v0  ;;  %v15462_v52 = vld [vmem:[#allocation5 + $0x7] ss:$0 sm:$0xff] }
 0xa9f   : > { %17431 = vmatprep.subr.bf16.mxu1 %v18471_v10 }
 0xaa0   : > { %17416 = vmatpush3.bf16.msra.mxu0 %v18482_v49 }
 0xaa1   : > { %17417 = vmatprep.subr.bf16.mxu0 %v18484_v63 }
 0xaa2   : > { %17432 = vmatpush3.bf16.msra.mxu1 %v18473_v11 }
 0xaa3   : > { %17433 = vmatprep.subr.bf16.mxu1 %v18475_v41 }
 0xaa4   : > { %17418 = vmatpush3.bf16.msra.mxu0 %v18486_v48 }
 0xaa5   : > { %17419 = vmatprep.subr.bf16.mxu0 %v18488_v4  ;;  %v18497_v4 = vld [vmem:[#allocation3 + $0x1438] sm:$0xff]  }
 0xaa6   : > { %17434 = vmatpush3.bf16.msra.mxu1 %v18477_v35 }
 0xaa7   : > { %17435 = vmatprep.subr.bf16.mxu1 %v18479_v25 }
 0xaa8   : > { %17420 = vmatpush3.bf16.msra.mxu0 %v18490_v57  ;;  %v18500_v57 = vld [vmem:[#allocation3 + $0x1420] sm:$0xff]  }
 0xaa9   : > { %17421 = vmatprep.subr.bf16.mxu0 %v18492_v1  ;;  %v18502_v1 = vld [vmem:[#allocation3 + $0x1410] sm:$0xff]  }
 0xaaa   : > { %17436 = vmatpush3.bf16.msra.mxu1 %v18481_v19 }
 0xaab   : > { %17437 = vmatprep.subr.bf16.mxu1 %v18483_v45 }
 0xaac   : > { %17422 = vmatpush3.bf16.msra.mxu0 %v18494_v43  ;;  %v18504_v43 = vld [vmem:[#allocation3 + $0x1400] sm:$0xff]  }
 0xaad   : > { %17781 = vmatprep.subr.bf16.mxu0 %v21916_v14 }
 0xaae   : > { %17438 = vmatpush3.bf16.msra.mxu1 %v18485_v27 }
 0xaaf   : > { %17439 = vmatprep.subr.bf16.mxu1 %v18487_v33 }
 0xab2   : > { %17440 = vmatpush3.bf16.msra.mxu1 %v18489_v61  ;;  %v18498_v61 = vld [vmem:[#allocation3 + $0x1430] sm:$0xff]  }
 0xab3   : > { %17441 = vmatprep.subr.bf16.mxu1 %v18491_v44  ;;  %v18501_v44 = vld [vmem:[#allocation3 + $0x1418] sm:$0xff]  }
 0xab6   : > { %17442 = vmatpush3.bf16.msra.mxu1 %v18493_v37  ;;  %v18503_v37 = vld [vmem:[#allocation3 + $0x1408] sm:$0xff]  }
 0xab7   : > { %17443 = vmatprep.subr.bf16.mxu1 %v18495_v2  ;;  %v18509_v2 = vld [vmem:[#allocation3 + $0x1538] sm:$0xff]  }
 0xaba   : > { %17444 = vmatpush3.bf16.msra.mxu1 %v18496_v30  ;;  %v12907_v30 = vpack.c.bf16 %v21923_v22, %v21923_v22  ;;  %v18521_v22 = vld [vmem:[#allocation3 + $0x1520] sm:$0xff]  }
 0xabb   : > { %17460 = vmatprep.subr.bf16.mxu1 %v18505_v58  ;;  %v18514_v58 = vld [vmem:[#allocation3 + $0x14f0] sm:$0xff]  }
 0xabd   : > { %13640 = vmatmul.mubr.bf16.vlgmr.msra.gmra.mxu1 %v12905_v55  ;;  %v18510_v55 = vld [vmem:[#allocation3 + $0x14f8] sm:$0xff]  }
 0xabe   : > { %17461 = vmatpush3.bf16.msra.mxu1 %v18506_v15 }
 0xabf   : > { %17462 = vmatprep.subr.bf16.mxu1 %v18507_v18  ;;  %v18517_v18 = vld [vmem:[#allocation3 + $0x1528] sm:$0xff]  }
 0xac2   : > { %17463 = vmatpush3.bf16.msra.mxu1 %v18508_v7  ;;  %v18518_v7 = vld [vmem:[#allocation3 + $0x14e8] sm:$0xff]  }
 0xac3   : > { %17464 = vmatprep.subr.bf16.mxu1 %v18511_v5 }
 0xac6   : > { %17465 = vmatpush3.bf16.msra.mxu1 %v18512_v51 }
 0xac7   : > { %17466 = vmatprep.subr.bf16.mxu1 %v18515_v38  ;;  %v18522_v38 = vld [vmem:[#allocation3 + $0x14e0] sm:$0xff]  }
 0xaca   : > { %17467 = vmatpush3.bf16.msra.mxu1 %v18516_v54 }
 0xacb   : > { %17468 = vmatprep.subr.bf16.mxu1 %v18519_v62 }
 0xace   : > { %17469 = vmatpush3.bf16.msra.mxu1 %v18520_v17 }
 0xacf   : > { %17470 = vmatprep.subr.bf16.mxu1 %v18523_v42  ;;  %v18524_v42 = vld [vmem:[#allocation3 + $0x1450] sm:$0xff]  }
 0xad2   : > { %17471 = vmatpush3.bf16.msra.mxu1 %v18524_v42  ;;  %v13768_v42 = vld [vmem:[#allocation2 + $0x47] sm:$0x1] }
 0xafd   : > { %v17282_v50 = vpop.f32.mrf.mxu1 }
 0xaff   : > { %v17283_v47 = vpop.f32.mrf.mxu1 }
 0xb00   : > { %v17284_v26 = vadd.f32 %v17283_v47, %v17282_v50  ;;  %v18513_v47 = vld [vmem:[#allocation3 + $0x1530] sm:$0xff]  }
 0xb01   : > { %v17285_v36 = vpop.f32.mrf.mxu1  ;;  %v17304_v12 = vpop.f32.mrf.mxu0 }
 0xb02   : > { %v12630_v39 = vadd.f32 %v17284_v26, %v15462_v52  ;;  %v18532_v26 = vld [vmem:[#allocation3 + $0x1440] sm:$0xff]   ;;  %v18533_v52 = vld [vmem:[#allocation3 + $0x1508] sm:$0xff]  }
 0xb03   : > { %v17286_v28 = vpop.f32.mrf.mxu1  ;;  %v17305_v32 = vpop.f32.mrf.mxu0 }
 0xb04   : > { %v17306_v10 = vadd.f32 %v17305_v32, %v17304_v12  ;;  %v13054_v28 = vld [vmem:[#allocation5 + $0x8] sm:$0x1] }
 0xb05   : > { %v17307_v34 = vpop.f32.mrf.mxu0 }
 0xb06   : > { %v12670_v13 = vadd.f32 %v17306_v10, %v12630_v39  ;;  %v13762_v39 = vld [vmem:[#allocation2 + $0x7] sm:$0x1] }
 0xb07   : > { %v17308_v59 = vpop.f32.mrf.mxu0 }
 0xb1d   : > { %v17326_v29 = vpop.f32.mrf.mxu1 }
 0xb1f   : > { %v17327_v24 = vpop.f32.mrf.mxu1 }
 0xb20   : > { %v17328_v11 = vadd.f32 %v17327_v24, %v17326_v29  ;;  %v18525_v29 = vld [vmem:[#allocation3 + $0x1518] sm:$0xff]  }
 0xb21   : > { %v17329_v16 = vpop.f32.mrf.mxu1  ;;  %v17348_v53 = vpop.f32.mrf.mxu0  ;;  %v18526_v24 = vld [vmem:[#allocation3 + $0x14d8] sm:$0xff]  }
 0xb22   : > { %v12710_v8 = vadd.f32 %v17328_v11, %v12670_v13  ;;  %v18527_v16 = vld [vmem:[#allocation3 + $0x1488] sm:$0xff]   ;;  %v18537_v11 = vld [vmem:[#allocation3 + $0x15b8] sm:$0xff]   ;;  %v13765_v13 = vld [vmem:[#allocation2 + $0x27] sm:$0x1] }
 0xb23   : > { %v17330_v60 = vpop.f32.mrf.mxu1  ;;  %v17349_v31 = vpop.f32.mrf.mxu0  ;;  %17472 = vmatprep.subr.bf16.mxu1 %v18527_v16 }
 0xb24   : > { %v17350_v41 = vadd.f32 %v17349_v31, %v17348_v53  ;;  %v18528_v53 = vld [vmem:[#allocation3 + $0x1448] sm:$0xff]   ;;  %v18529_v60 = vld [vmem:[#allocation3 + $0x1510] sm:$0xff]   ;;  %v18531_v31 = vld [vmem:[#allocation3 + $0x1480] sm:$0xff]  }
 0xb25   : > { %v17351_v56 = vpop.f32.mrf.mxu0  ;;  %17473 = vmatpush3.bf16.msra.mxu1 %v18528_v53 }
 0xb26   : > { %v12750_v35 = vadd.f32 %v17350_v41, %v12710_v8  ;;  %v18530_v56 = vld [vmem:[#allocation3 + $0x14d0] sm:$0xff]   ;;  %17474 = vmatprep.subr.bf16.mxu1 %v18531_v31  ;;  %v13774_v41 = vpack.c.bf16 %v13765_v13, %v13765_v13  ;;  %v18534_v8 = vld [vmem:[#allocation3 + $0x14c8] sm:$0xff]  }
 0xb27   : > { %v17352_v23 = vpop.f32.mrf.mxu0 }
 0xb28   : > { %v13763_v23 = vld [vmem:[#allocation2 + $0x8] sm:$0x1] }
 0xb29   : > { %v13772_v10 = vpack.c.bf16 %v13763_v23, %v13763_v23  ;;  %17475 = vmatpush3.bf16.msra.mxu1 %v18532_v26 }
 0xb2a   : > { %17504 = vmatprep.subr.bf16.mxu1 %v18537_v11 }
 0xb2b   : > { %14391 = vmatprep.mubr.bf16.mxu1 %v13772_v10 }
 0xb3d   : > { %v12789_v9 = vpop.f32.mrf.mxu1 }
 0xb3e   : > { %v12790_v25 = vadd.f32 %v12789_v9, %v12750_v35  ;;  %v13771_v35 = vpack.c.bf16 %v13762_v39, %v13762_v39  ;;  %v18535_v9 = vld [vmem:[#allocation3 + $0x1500] sm:$0xff]  }
 0xb3f   : > { %v17779_v3 = vpop.f32.mrf.mxu1 }
 0xb40   : > { %v12795_v19 = vmul.f32 0.01, %v12790_v25  ;;  %v18540_v3 = vld [vmem:[#allocation3 + $0x15b0] sm:$0xff]   ;;  %14392 = vmatmul.mubr.bf16.vlgmr.msra.gmra.mxu1 %v13771_v35  ;;  %v18569_v35 = vld [vmem:[#allocation3 + $0x1678] sm:$0xff]  }
 0xb41   : > { %v12792_v49 = vpop.f32.mrf.mxu1 }
 0xb42   : > { %v12796_v45 = vmax.f32 %v12790_v25, %v12795_v19  ;;  %v18538_v25 = vld [vmem:[#allocation3 + $0x1578] sm:$0xff]   ;;  %v18536_v19 = vld [vmem:[#allocation3 + $0x14c0] sm:$0xff]   ;;  %v13764_v49 = vld [vmem:[#allocation2 + $0x9] sm:$0x1] }
 0xb43   : > { %v17780_v63 = vpop.f32.mrf.mxu1  ;;  %17505 = vmatpush3.bf16.msra.mxu1 %v18538_v25  ;;  %v18570_v25 = vld [vmem:[#allocation3 + $0x1670] sm:$0xff]  }
 0xb44   : > { %v12804_v46 = vrot.slane %v12796_v45, %v22249_v20  ;;  %15535 = vst.sshfl [vmem:[%s350_s16] sm:$0x3 pattern:$0x76325410] %v12796_v45  ;;  %v12810_v40 = vrot.slane %v12796_v45, 1  ;;  %v18499_v20 = vld [vmem:[#allocation3 + $0x1428] sm:$0xff]   ;;  %v18542_v63 = vld [vmem:[#allocation3 + $0x1570] sm:$0xff]   ;;  %17506 = vmatprep.subr.bf16.mxu1 %v18540_v3 }
 0xb45   : > { %v18572_v3 = vld [vmem:[#allocation3 + $0x1660] sm:$0xff]  }
 0xb46   : > { %v12805_v27 = vcombine.high %v12804_v46, %v12804_v46  ;;  %v12812_v48 = vmax.f32 %v12796_v45, %v12810_v40  ;;  %v18539_v45 = vld [vmem:[#allocation3 + $0x1638] sm:$0xff]   ;;  %v18544_v46 = vld [vmem:[#allocation3 + $0x15a8] sm:$0xff]   ;;  %v13773_v40 = vpack.c.bf16 %v13764_v49, %v13764_v49  ;;  %v18574_v49 = vld [vmem:[#allocation3 + $0x1650] sm:$0xff]  }
 0xb47   : > { %17507 = vmatpush3.bf16.msra.mxu1 %v18542_v63  ;;  %v18576_v63 = vld [vmem:[#allocation3 + $0x1640] sm:$0xff]  }
 0xb48   : > { %12809 = vst [vmem:[%s350_s16 + $0x2] sm:$0x3] %v12805_v27  ;;  %v12814_v33 = vrot.slane %v12812_v48, 2  ;;  %17508 = vmatprep.subr.bf16.mxu1 %v18544_v46  ;;  %v13770_v46 = vld [vmem:[#allocation2 + $0x49] sm:$0x1] }
 0xb4a   : > { %v12816_v21 = vmax.f32 %v12812_v48, %v12814_v33  ;;  %v18541_v48 = vld [vmem:[#allocation3 + $0x15f8] sm:$0xff]   ;;  %v18543_v33 = vld [vmem:[#allocation3 + $0x1630] sm:$0xff]  }
 0xb4c   : > { %12889 = vst [vmem:[#allocation2 + $0x28] sm:$0x1] %v12816_v21  ;;  %v18546_v21 = vld [vmem:[#allocation3 + $0x1568] sm:$0xff]  }
 0xb4d   : > { %17509 = vmatpush3.bf16.msra.mxu1 %v18546_v21 }
 0xb4f   : > { %v17379_v50 = vpop.f32.mrf.mxu0 }
 0xb51   : > { %v17380_v36 = vpop.f32.mrf.mxu0 }
 0xb52   : > { %v17381_v12 = vadd.f32 %v17380_v36, %v17379_v50  ;;  %v18555_v50 = vld [vmem:[#allocation3 + $0x1618] sm:$0xff]  }
 0xb53   : > { %v12894_v6 = vld [vmem:[#allocation2 + $0x28] sm:$0x1]  ;;  %v17382_v15 = vpop.f32.mrf.mxu0  ;;  %v18557_v36 = vld [vmem:[#allocation3 + $0x15d8] sm:$0xff]  }
 0xb54   : > { %v12903_v0 = vpack.c.bf16 %v12894_v6, %v12894_v6  ;;  %13694 = vst [vmem:[#allocation2 + $0x28] sm:$0xff] %v21916_v14  ;;  %v13522_v5 = vadd.f32 %v17381_v12, %v13054_v28  ;;  %v18558_v12 = vld [vmem:[#allocation3 + $0x1550] sm:$0xff]   ;;  %v18560_v15 = vld [vmem:[#allocation3 + $0x1588] sm:$0xff]  }
 0xb55   : > { %v17383_v32 = vpop.f32.mrf.mxu0  ;;  %v18561_v28 = vld [vmem:[#allocation3 + $0x15d0] sm:$0xff]  }
 0xb56   : > { %13600 = vmatmul.mubr.bf16.vlgmr.msra.gmra.mxu0 %v12903_v0 }
 0xb57   : > { %17782 = vmatpush3.bf16.msra.mxu0 %v18497_v4  ;;  %17797 = vmatprep.mubr.msk.bf16.mxu0 %vm18681_vm7, %v21916_v14  ;;  %v18548_v4 = vld [vmem:[#allocation3 + $0x15a0] sm:$0xff]  }
 0xb58   : > { %17783 = vmatprep.subr.bf16.mxu0 %v21916_v14  ;;  %17510 = vmatprep.subr.bf16.mxu1 %v18548_v4 }
 0xb5b   : > { %17784 = vmatpush3.bf16.msra.mxu0 %v18498_v61  ;;  %v18545_v61 = vld [vmem:[#allocation3 + $0x15f0] sm:$0xff]  }
 0xb5c   : > { %17785 = vmatprep.subr.bf16.mxu0 %v21916_v14 }
 0xb5d   : > { %v17401_v34 = vpop.f32.mrf.mxu1 }
 0xb5f   : > { %17786 = vmatpush3.bf16.msra.mxu0 %v18499_v20  ;;  %v17402_v59 = vpop.f32.mrf.mxu1 }
 0xb60   : > { %17787 = vmatprep.subr.bf16.mxu0 %v21916_v14  ;;  %v17403_v51 = vadd.f32 %v17402_v59, %v17401_v34  ;;  %v18563_v34 = vld [vmem:[#allocation3 + $0x1608] sm:$0xff]   ;;  %v18566_v59 = vld [vmem:[#allocation3 + $0x1540] sm:$0xff]  }
 0xb61   : > { %v17404_v54 = vpop.f32.mrf.mxu1 }
 0xb62   : > { %v21943_v62 = vadd.f32 %v17403_v51, %v13522_v5  ;;  %v18565_v5 = vld [vmem:[#allocation3 + $0x15c8] sm:$0xff]   ;;  %v18567_v51 = vld [vmem:[#allocation3 + $0x1600] sm:$0xff]  }
 0xb63   : > { %17788 = vmatpush3.bf16.msra.mxu0 %v18500_v57  ;;  %v17405_v17 = vpop.f32.mrf.mxu1  ;;  %v18547_v57 = vld [vmem:[#allocation3 + $0x1628] sm:$0xff]  }
 0xb64   : > { %17789 = vmatprep.subr.bf16.mxu0 %v21916_v14  ;;  %v18568_v17 = vld [vmem:[#allocation3 + $0x15c0] sm:$0xff]  }
 0xb67   : > { %17790 = vmatpush3.bf16.msra.mxu0 %v18501_v44  ;;  %v18550_v44 = vld [vmem:[#allocation3 + $0x1560] sm:$0xff]  }
 0xb68   : > { %17791 = vmatprep.subr.bf16.mxu0 %v21916_v14  ;;  %17511 = vmatpush3.bf16.msra.mxu1 %v18550_v44 }
 0xb6b   : > { %17792 = vmatpush3.bf16.msra.mxu0 %v18502_v1 }
 0xb6c   : > { %17793 = vmatprep.subr.bf16.mxu0 %v21916_v14 }
 0xb6f   : > { %17794 = vmatpush3.bf16.msra.mxu0 %v18503_v37  ;;  %v18549_v37 = vld [vmem:[#allocation3 + $0x15e8] sm:$0xff]  }
 0xb70   : > { %17795 = vmatprep.subr.bf16.mxu0 %v21916_v14 }
 0xb73   : > { %17796 = vmatpush3.bf16.msra.mxu0 %v18504_v43  ;;  %v18551_v43 = vld [vmem:[#allocation3 + $0x1620] sm:$0xff]  }
 0xb74   : > { %17482 = vmatprep.subr.bf16.mxu0 %v18509_v2  ;;  %v18552_v2 = vld [vmem:[#allocation3 + $0x1598] sm:$0xff]  }
 0xb75   : > { %17512 = vmatprep.subr.bf16.mxu1 %v18552_v2 }
 0xb76   : > { %17798 = vmatmul.mubr.bf16.vlgmr.msra.gmra.mxu0 %v12907_v30  ;;  %v18553_v30 = vld [vmem:[#allocation3 + $0x15e0] sm:$0xff]  }
 0xb77   : > { %17483 = vmatpush3.bf16.msra.mxu0 %v18510_v55  ;;  %14431 = vmatprep.mubr.bf16.mxu0 %v13774_v41  ;;  %v18554_v55 = vld [vmem:[#allocation3 + $0x1558] sm:$0xff]  }
 0xb78   : > { %17484 = vmatprep.subr.bf16.mxu0 %v18513_v47  ;;  %v18556_v47 = vld [vmem:[#allocation3 + $0x1590] sm:$0xff]   ;;  %17513 = vmatpush3.bf16.msra.mxu1 %v18554_v55 }
 0xb79   : > { %17514 = vmatprep.subr.bf16.mxu1 %v18556_v47 }
 0xb7b   : > { %17485 = vmatpush3.bf16.msra.mxu0 %v18514_v58  ;;  %v18559_v58 = vld [vmem:[#allocation3 + $0x1610] sm:$0xff]  }
 0xb7c   : > { %17486 = vmatprep.subr.bf16.mxu0 %v18517_v18  ;;  %v13767_v18 = vld [vmem:[#allocation2 + $0x29] sm:$0x1]  ;;  %17515 = vmatpush3.bf16.msra.mxu1 %v18558_v12 }
 0xb7d   : > { %v17445_v27 = vpop.f32.mrf.mxu1  ;;  %v13776_v32 = vpack.c.bf16 %v13767_v18, %v13767_v18  ;;  %17516 = vmatprep.subr.bf16.mxu1 %v18560_v15 }
 0xb7f   : > { %17487 = vmatpush3.bf16.msra.mxu0 %v18518_v7  ;;  %v17446_v6 = vpop.f32.mrf.mxu1  ;;  %v18562_v7 = vld [vmem:[#allocation3 + $0x1548] sm:$0xff]   ;;  %14471 = vmatprep.mubr.bf16.mxu1 %v13776_v32 }
 0xb80   : > { %17488 = vmatprep.subr.bf16.mxu0 %v18521_v22  ;;  %v21945_v0 = vadd.f32 %v17446_v6, %v17445_v27  ;;  %v18564_v22 = vld [vmem:[#allocation3 + $0x1580] sm:$0xff]   ;;  %17517 = vmatpush3.bf16.msra.mxu1 %v18562_v7  ;;  %v13926_v6 = vld [vmem:[#allocation5 + $0x9] sm:$0x1] }
 0xb81   : > { %v17448_v20 = vpop.f32.mrf.mxu1  ;;  %17518 = vmatprep.subr.bf16.mxu1 %v18564_v22 }
 0xb83   : > { %17489 = vmatpush3.bf16.msra.mxu0 %v18522_v38  ;;  %v17449_v1 = vpop.f32.mrf.mxu1  ;;  %v13769_v38 = vld [vmem:[#allocation2 + $0x48] sm:$0x1] }
 0xb84   : > { %17490 = vmatprep.subr.bf16.mxu0 %v18525_v29  ;;  %v13778_v54 = vpack.c.bf16 %v13769_v38, %v13769_v38  ;;  %17519 = vmatpush3.bf16.msra.mxu1 %v18566_v59  ;;  %v13777_v29 = vpack.c.bf16 %v13768_v42, %v13768_v42 }
 0xb85   : > { %17801 = vmatprep.subr.bf16.mxu1 %v21916_v14 }
 0xb87   : > { %17491 = vmatpush3.bf16.msra.mxu0 %v18526_v24 }
 0xb88   : > { %17492 = vmatprep.subr.bf16.mxu0 %v18529_v60 }
 0xb8b   : > { %17493 = vmatpush3.bf16.msra.mxu0 %v18530_v56 }
 0xb8c   : > { %17494 = vmatprep.subr.bf16.mxu0 %v18533_v52 }
 0xb8f   : > { %17495 = vmatpush3.bf16.msra.mxu0 %v18534_v8 }
 0xb90   : > { %17496 = vmatprep.subr.bf16.mxu0 %v18535_v9 }
 0xb93   : > { %17497 = vmatpush3.bf16.msra.mxu0 %v18536_v19  ;;  %v18573_v19 = vld [vmem:[#allocation3 + $0x1658] sm:$0xff]  }
 0xb94   : > { %17526 = vmatprep.subr.bf16.mxu0 %v18539_v45  ;;  %v18575_v45 = vld [vmem:[#allocation3 + $0x1648] sm:$0xff]  }
 0xb96   : > { %14432 = vmatmul.mubr.bf16.vlgmr.msra.gmra.mxu0 %v13773_v40  ;;  %v13779_v40 = vpack.c.bf16 %v13770_v46, %v13770_v46 }
 0xb97   : > { %17527 = vmatpush3.bf16.msra.mxu0 %v18541_v48  ;;  %14511 = vmatprep.mubr.bf16.mxu0 %v13778_v54 }
 0xb98   : > { %17528 = vmatprep.subr.bf16.mxu0 %v18543_v33 }
 0xb9b   : > { %17529 = vmatpush3.bf16.msra.mxu0 %v18545_v61 }
 0xb9c   : > { %17530 = vmatprep.subr.bf16.mxu0 %v18547_v57 }
 0xb9f   : > { %17531 = vmatpush3.bf16.msra.mxu0 %v18549_v37 }
 0xba0   : > { %17532 = vmatprep.subr.bf16.mxu0 %v18551_v43 }
 0xba3   : > { %17533 = vmatpush3.bf16.msra.mxu0 %v18553_v30 }
 0xba4   : > { %17534 = vmatprep.subr.bf16.mxu0 %v18555_v50 }
 0xba7   : > { %17535 = vmatpush3.bf16.msra.mxu0 %v18557_v36 }
 0xba8   : > { %17536 = vmatprep.subr.bf16.mxu0 %v18559_v58 }
 0xbab   : > { %17537 = vmatpush3.bf16.msra.mxu0 %v18561_v28 }
 0xbac   : > { %17538 = vmatprep.subr.bf16.mxu0 %v18563_v34 }
 0xbaf   : > { %17539 = vmatpush3.bf16.msra.mxu0 %v18565_v5 }
 0xbb0   : > { %17540 = vmatprep.subr.bf16.mxu0 %v18567_v51 }
 0xbb3   : > { %17541 = vmatpush3.bf16.msra.mxu0 %v18568_v17 }
 0xbb6   : > { %14512 = vmatmul.mubr.bf16.vlgmr.msra.gmra.mxu0 %v13777_v29 }
 0xc00   : > { %v17476_v27 = vpop.f32.mrf.mxu1 }
 0xc02   : > { %v17477_v48 = vpop.f32.mrf.mxu1 }
 0xc03   : > { %v17478_v33 = vadd.f32 %v17477_v48, %v17476_v27 }
 0xc04   : > { %v17479_v21 = vpop.f32.mrf.mxu1 }
 0xc05   : > { %v14394_v61 = vadd.f32 %v17478_v33, %v13926_v6 }
 0xc06   : > { %v17480_v4 = vpop.f32.mrf.mxu1 }
 0xc16   : > { %v17423_v24 = vpop.f32.mrf.mxu0 }
 0xc18   : > { %v17424_v16 = vpop.f32.mrf.mxu0 }
 0xc19   : > { %v17425_v53 = vadd.f32 %v17424_v16, %v17423_v24 }
 0xc1a   : > { %v17426_v60 = vpop.f32.mrf.mxu0 }
 0xc1b   : > { %v13602_v31 = vadd.f32 %v17425_v53, %v21943_v62  ;;  %v18571_v62 = vld [vmem:[#allocation3 + $0x1668] sm:$0xff]  }
 0xc1c   : > { %v17427_v56 = vpop.f32.mrf.mxu0 }
 0xc1d   : > { %v13642_v23 = vadd.f32 %v21945_v0, %v13602_v31 }
 0xc36   : > { %v13681_v26 = vpop.f32.mrf.mxu0 }
 0xc37   : > { %v13682_v52 = vadd.f32 %v13681_v26, %v13642_v23 }
 0xc38   : > { %v17799_v10 = vpop.f32.mrf.mxu0 }
 0xc39   : > { %v13687_v39 = vmul.f32 0.01, %v13682_v52 }
 0xc3a   : > { %v13684_v11 = vpop.f32.mrf.mxu0 }
 0xc3b   : > { %v13688_v13 = vmax.f32 %v13682_v52, %v13687_v39 }
 0xc3c   : > { %v17800_v41 = vpop.f32.mrf.mxu0 }
 0xc3d   : > { %13761 = vst [vmem:[#allocation2 + $0x28] sm:$0x1] %v13688_v13 }
 0xc44   : > { %v13766_v8 = vld [vmem:[#allocation2 + $0x28] sm:$0x1] }
 0xc45   : > { %v13775_v9 = vpack.c.bf16 %v13766_v8, %v13766_v8 }
 0xc47   : > { %14472 = vmatmul.mubr.bf16.vlgmr.msra.gmra.mxu1 %v13775_v9 }
 0xc48   : > { %17802 = vmatpush3.bf16.msra.mxu1 %v18569_v35  ;;  %17817 = vmatprep.mubr.msk.bf16.mxu1 %vm18681_vm7, %v21916_v14 }
 0xc49   : > { %17803 = vmatprep.subr.bf16.mxu1 %v21916_v14 }
 0xc4c   : > { %17804 = vmatpush3.bf16.msra.mxu1 %v18570_v25 }
 0xc4d   : > { %17805 = vmatprep.subr.bf16.mxu1 %v21916_v14 }
 0xc50   : > { %17806 = vmatpush3.bf16.msra.mxu1 %v18571_v62 }
 0xc51   : > { %17807 = vmatprep.subr.bf16.mxu1 %v21916_v14 }
 0xc54   : > { %17808 = vmatpush3.bf16.msra.mxu1 %v18572_v3 }
 0xc55   : > { %17809 = vmatprep.subr.bf16.mxu1 %v21916_v14 }
 0xc56   : > { %v17498_v0 = vpop.f32.mrf.mxu0 }
 0xc58   : > { %17810 = vmatpush3.bf16.msra.mxu1 %v18573_v19  ;;  %v17499_v20 = vpop.f32.mrf.mxu0 }
 0xc59   : > { %17811 = vmatprep.subr.bf16.mxu1 %v21916_v14  ;;  %v17500_v57 = vadd.f32 %v17499_v20, %v17498_v0 }
 0xc5a   : > { %v17501_v44 = vpop.f32.mrf.mxu0 }
 0xc5b   : > { %v14434_v1 = vadd.f32 %v17500_v57, %v14394_v61 }
 0xc5c   : > { %17812 = vmatpush3.bf16.msra.mxu1 %v18574_v49  ;;  %v17502_v37 = vpop.f32.mrf.mxu0 }
 0xc5d   : > { %17813 = vmatprep.subr.bf16.mxu1 %v21916_v14 }
 0xc60   : > { %17814 = vmatpush3.bf16.msra.mxu1 %v18575_v45 }
 0xc61   : > { %17815 = vmatprep.subr.bf16.mxu1 %v21916_v14 }
 0xc64   : > { %17816 = vmatpush3.bf16.msra.mxu1 %v18576_v63 }
 0xc67   : > { %17818 = vmatmul.mubr.bf16.vlgmr.msra.gmra.mxu1 %v13779_v40 }
 0xc76   : > { %v17542_v43 = vpop.f32.mrf.mxu0 }
 0xc78   : > { %v17543_v2 = vpop.f32.mrf.mxu0 }
 0xc79   : > { %v17544_v14 = vadd.f32 %v17543_v2, %v17542_v43 }
 0xc7a   : > { %v17545_v30 = vpop.f32.mrf.mxu0 }
 0xc7c   : > { %v17546_v55 = vpop.f32.mrf.mxu0 }
 0xd07   : > { %v17520_v50 = vpop.f32.mrf.mxu1 }
 0xd09   : > { %v17521_v47 = vpop.f32.mrf.mxu1 }
 0xd0a   : > { %v17522_v36 = vadd.f32 %v17521_v47, %v17520_v50 }
 0xd0b   : > { %v17523_v12 = vpop.f32.mrf.mxu1 }
 0xd0c   : > { %v14474_v58 = vadd.f32 %v17522_v36, %v14434_v1 }
 0xd0d   : > { %v17524_v15 = vpop.f32.mrf.mxu1 }
 0xd0e   : > { %v14514_v18 = vadd.f32 %v17544_v14, %v14474_v58 }
 0xd27   : > { %v14553_v28 = vpop.f32.mrf.mxu1 }
 0xd28   : > { %v14554_v32 = vadd.f32 %v14553_v28, %v14514_v18 }
 0xd29   : > { %v17819_v7 = vpop.f32.mrf.mxu1 }
 0xd2a   : > { %v14559_v34 = vmul.f32 0.01, %v14554_v32 }
 0xd2b   : > { %v14556_v22 = vpop.f32.mrf.mxu1 }
 0xd2c   : > { %v14560_v5 = vmax.f32 %v14554_v32, %v14559_v34 }
 0xd2d   : > { %v17820_v59 = vpop.f32.mrf.mxu1 }
 0xd2e   : > { %14561 = vst [vmem:[%s353_s19] sm:$0x1] %v14560_v5 }
 0xd2f PF: > { %s20_s24 = sadd.s32 1, %s18670_s24  }
 0xd30   : > { %p17_p3 = scmp.ge.s32.totalorder %s20_s24, 4  }
 0xd32   :  { %19 = sbr.rel (!%p17_p3) target bundleno = 2 (0x2), region = 139 }
 0xd37   :  { %14643 = vsyncpa [#allocation4], 1 }
 0xd38   :  { %14645 = vsyncpa [#allocation4 + $0x1], 1 }
 0xd39   :  { %14646 = vsyncpa [#allocation6], 1 }

</bundles_post_ra>
